<compile_context>
chip_gen: v7x
topology: tpu7x:2x2x1
jax: 0.10.0
libtpu: 0.0.40
codegen_flags: <defaults>
</compile_context>

<pallas_src>
import jax
import jax.numpy as jnp
from jax import lax
from jax.experimental import pallas as pl
from jax.experimental.pallas import tpu as pltpu

TM_MAX = 2048     # max rays per grid tile (lane axis; multiple of 512)
S = 16            # samples per ray (blocked along sublanes)
HID = 32          # MLP hidden width
FEAT = 16         # geometry feature width (feature 0 -> density logit)
DIM_A = 8         # appearance embedding dim (hparams.dim_a)
VOCAB = 10        # hparams.vocab_size
NEAR = 0.05
FAR = 2.0
DT = (FAR - NEAR) / S


def _round_up(x, m):
    return ((x + m - 1) // m) * m


def _pick_tile(n_rays):
    """Rays per tile: as large as possible (<= TM_MAX) while keeping >=2 grid steps."""
    n512 = _round_up(max(n_rays, 1), 512)
    if n512 <= 512:
        return 512
    return min(TM_MAX, max(512, (n512 // 2) // 512 * 512))


# --------------------------------------------------------------------------
# Fused kernel: ray generation + per-sample MLP field + volume rendering
# --------------------------------------------------------------------------
def render_kernel(cam_ref,            # SMEM f32[16]: [W, m00..m22, pad]
                  w1p3_ref,           # (S*HID, 3)      bf16  kron(t_s, w1^T)
                  c1_ref,             # (S*HID, 1)      f32   w1^T @ o + b1 (tiled)
                  w2_ref, b2_ref,     # (S*FEAT, S*HID) bf16, (S*FEAT, 1) f32 (feature-major)
                  w3g_ref,            # (S*HID, S*FEAT) bf16  (cols feature-major)
                  w3dn_ref,           # (S*HID, 3)      bf16  direction columns
                  b3e_ref,            # (S*HID, 1)      f32   appearance-folded bias
                  w4_ref, b4_ref,     # (3S, S*HID) bf16, (3S, 1) f32 (channel-major)
                  out_ref):           # (8, TM) f32: rgb0..2, depth, opacity, pad
    tm = out_ref.shape[1]
    wf = cam_ref[0]                   # image width (f32)

    # ---- ray generation (fused get_ray_directions + get_rays) -------------
    base = (pl.program_id(0) * tm).astype(jnp.float32)
    idx = lax.broadcasted_iota(jnp.int32, (1, tm), 1).astype(jnp.float32) + base
    v = jnp.floor(idx / wf)                         # pixel row
    u = idx - v * wf                                # pixel col
    # exactness correction for the float division near row boundaries
    lo = u < 0.0
    v = jnp.where(lo, v - 1.0, v)
    u = jnp.where(lo, u + wf, u)
    hi = u >= wf
    v = jnp.where(hi, v + 1.0, v)
    u = jnp.where(hi, u - wf, u)

    # rays_d^T = (R @ K_adj) @ [u; v; 1]  -- 9 scalar*vector VPU FMAs, no MXU
    dx = cam_ref[1] * u + cam_ref[2] * v + cam_ref[3]
    dy = cam_ref[4] * u + cam_ref[5] * v + cam_ref[6]
    dz = cam_ref[7] * u + cam_ref[8] * v + cam_ref[9]
    inv_n = lax.rsqrt(dx * dx + dy * dy + dz * dz + 1e-12)
    dn = jnp.concatenate([dx, dy, dz], axis=0) * inv_n          # unit dirs (3, tm)
    dn_b = dn.astype(jnp.bfloat16)

    # ---- density MLP (all S samples in one matmul per layer) --------------
    # layer 1: positions never materialized; translation + b1 folded into c1
    h1b = jnp.maximum(
        jnp.dot(w1p3_ref[...], dn_b, preferred_element_type=jnp.float32)
        + c1_ref[...], 0.0).astype(jnp.bfloat16)                # (S*HID, tm)

    # layer 2: geometry features, feature-major rows (f*S + s)
    geo = jnp.dot(w2_ref[...], h1b,
                  preferred_element_type=jnp.float32) + b2_ref[...]   # (S*FEAT, tm)
    sig_pre = geo[0:S, :]                                       # density logits (S, tm)
    geo_b = geo.astype(jnp.bfloat16)

    # ---- rgb MLP (geo part + bf16 direction part + f32 appearance bias) ---
    h2b = jnp.maximum(
        jnp.dot(w3g_ref[...], geo_b, preferred_element_type=jnp.float32)
        + jnp.dot(w3dn_ref[...], dn_b, preferred_element_type=jnp.float32)
        + b3e_ref[...], 0.0).astype(jnp.bfloat16)               # (S*HID, tm)
    col = jax.nn.sigmoid(
        jnp.dot(w4_ref[...], h2b,
                preferred_element_type=jnp.float32) + b4_ref[...])    # (3S, tm)

    # ---- volume rendering (samples on sublanes, rays lane-dense) ----------
    # trunc_exp forward is exp; clamp only to avoid overflow with random weights
    sigma = jnp.exp(jnp.minimum(sig_pre, 80.0))                 # (S, tm)
    sdt = sigma * DT
    # inclusive prefix sum over S sublanes via log-step shifted adds (no MXU)
    inc = sdt
    for k in (1, 2, 4, 8):
        shifted = jnp.concatenate(
            [jnp.zeros((k, tm), jnp.float32), inc[:S - k, :]], axis=0)
        inc = inc + shifted
    cum_excl = inc - sdt                                        # exclusive prefix sum
    trans = jnp.exp(-cum_excl)
    alpha = 1.0 - jnp.exp(-sdt)
    w = trans * alpha                                           # (S, tm)

    opa = jnp.sum(w, axis=0, keepdims=True)                     # (1, tm)
    s_idx = lax.broadcasted_iota(jnp.int32, (S, 1), 0).astype(jnp.float32)
    t_col = NEAR + DT * (s_idx + 0.5)                           # (S, 1) sample depths
    depth = jnp.sum(w * t_col, axis=0, keepdims=True)           # (1, tm)

    white = 1.0 - opa                                           # white background
    rgb0 = jnp.sum(w * col[0 * S:1 * S, :], axis=0, keepdims=True) + white
    rgb1 = jnp.sum(w * col[1 * S:2 * S, :], axis=0, keepdims=True) + white
    rgb2 = jnp.sum(w * col[2 * S:3 * S, :], axis=0, keepdims=True) + white

    # single packed, lane-dense (8, tm) store
    out_ref[...] = jnp.concatenate(
        [rgb0, rgb1, rgb2, depth, opa, jnp.zeros((3, tm), jnp.float32)], axis=0)


def render_pallas(cam, c1, b3e, consts, n_rays):
    tm = _pick_tile(n_rays)
    n_pad = _round_up(n_rays, tm)
    grid = (n_pad // tm,)
    cspec = lambda shape: pl.BlockSpec(shape, lambda i: (0, 0))
    out = pl.pallas_call(
        render_kernel,
        out_shape=jax.ShapeDtypeStruct((8, n_pad), jnp.float32),
        grid=grid,
        in_specs=[pl.BlockSpec(memory_space=pltpu.MemorySpace.SMEM),  # cam scalars
                  cspec((S * HID, 3)),                                # w1p3
                  cspec((S * HID, 1)),                                # c1
                  cspec((S * FEAT, S * HID)),                         # w2_fm
                  cspec((S * FEAT, 1)),                               # b2_fm
                  cspec((S * HID, S * FEAT)),                         # w3g_fm
                  cspec((S * HID, 3)),                                # w3dn
                  cspec((S * HID, 1)),                                # b3e
                  cspec((3 * S, S * HID)),                            # w4_cm
                  cspec((3 * S, 1))],                                 # b4_cm
        out_specs=pl.BlockSpec((8, tm), lambda i: (0, i)),
        compiler_params=pltpu.CompilerParams(
            dimension_semantics=("parallel",),
            vmem_limit_bytes=48 * 1024 * 1024),
    )(cam, consts['w1p3'], c1,
      consts['w2_fm'], consts['b2_fm'],
      consts['w3g_fm'], consts['w3dn'], b3e,
      consts['w4_cm'], consts['b4_cm'])
    return out


# --------------------------------------------------------------------------
# Parameter init (deterministic, synthetic weights — no checkpoint load)
# --------------------------------------------------------------------------
def init_params(key):
    ks = jax.random.split(key, 6)
    return {
        'w1': jax.random.normal(ks[0], (3, HID), jnp.float32) * 0.5,
        'b1': jnp.zeros((1, HID), jnp.float32),
        'w2': jax.random.normal(ks[1], (HID, FEAT), jnp.float32) / jnp.sqrt(HID),
        'b2': jnp.zeros((1, FEAT), jnp.float32),
        'w3': jax.random.normal(ks[2], (FEAT + 3 + DIM_A, HID), jnp.float32) * 0.3,
        'b3': jnp.zeros((1, HID), jnp.float32),
        'w4': jax.random.normal(ks[3], (HID, 3), jnp.float32) / jnp.sqrt(HID),
        'b4': jnp.zeros((1, 3), jnp.float32),
        'embed_a': jax.random.normal(ks[4], (VOCAB, DIM_A), jnp.float32) * 0.1,
    }


def build_static_render_consts(p):
    """Block-diagonal per-sample weights, permuted for feature/channel-major outputs."""
    eye_s = jnp.eye(S, dtype=jnp.float32)
    tvals = (NEAR + DT * (jnp.arange(S, dtype=jnp.float32) + 0.5)).reshape(S, 1)
    # perm_geo[f*S + s] = s*FEAT + f   (feature-major geometry rows)
    perm_geo = jnp.arange(S * FEAT).reshape(S, FEAT).T.reshape(-1)
    # perm_col[c*S + s] = s*3 + c      (channel-major rgb rows)
    perm_col = jnp.arange(S * 3).reshape(S, 3).T.reshape(-1)

    c = {}
    # layer 1: pos = o + t_s*dn  ->  w1^T @ pos = (t_s * w1^T) @ dn + const
    c['w1p3'] = jnp.kron(tvals, p['w1'].T).astype(jnp.bfloat16)           # (S*HID, 3)
    w2_blk = jnp.kron(eye_s, p['w2'].T)                                   # (S*FEAT, S*HID)
    c['w2_fm'] = w2_blk[perm_geo].astype(jnp.bfloat16)
    c['b2_fm'] = jnp.tile(p['b2'].T, (S, 1))[perm_geo]
    w3g_blk = jnp.kron(eye_s, p['w3'][:FEAT, :].T)                        # (S*HID, S*FEAT)
    c['w3g_fm'] = w3g_blk[:, perm_geo].astype(jnp.bfloat16)
    c['w3dn'] = jnp.tile(p['w3'][FEAT:FEAT + 3, :].T, (S, 1)).astype(jnp.bfloat16)
    w4_blk = jnp.kron(eye_s, p['w4'].T)                                   # (3S, S*HID)
    c['w4_cm'] = w4_blk[perm_col].astype(jnp.bfloat16)
    c['b4_cm'] = jnp.tile(p['b4'].T, (S, 1))[perm_col]
    return c


class NeRFSystemPallas:
    """Simplified NeRFSystem for rendering from custom camera poses."""

    def __init__(self, hparams, key):
        self.hparams = hparams
        self.params = init_params(key)
        self.img_wh = None
        self.intrinsics = None
        self._static = build_static_render_consts(self.params)

    def setup_intrinsics(self, w, h, fx, fy, cx, cy):
        self.img_wh = (w, h)
        self.intrinsics = (float(fx), float(fy), float(cx), float(cy))

    def forward(self, batch, split='test'):
        if split == 'train':
            raise ValueError('Rendering from custom poses should be done in test mode')
        pose = batch['pose'].astype(jnp.float32)            # (3, 4) c2w
        ts = batch['ts']                                     # (1,) int
        w, h = self.img_wh
        fx, fy, cx, cy = self.intrinsics
        n_rays = w * h
        p = self.params

        # glue: fold intrinsics + rotation into one 3x3  (rays_d^T = M @ [u;v;1])
        A = jnp.array([[1.0 / fx, 0.0, (0.5 - cx) / fx],
                       [0.0, 1.0 / fy, (0.5 - cy) / fy],
                       [0.0, 0.0, 1.0]], jnp.float32)
        m_rd = pose[:, :3] @ A                               # (3, 3)
        cam = jnp.concatenate([jnp.array([float(w)], jnp.float32),
                               m_rd.reshape(-1),
                               jnp.zeros((6,), jnp.float32)])          # f32[16]

        # pose translation + b1 folded into an f32 bias column for layer 1
        o = pose[:, 3:4]                                     # (3, 1)
        c1 = jnp.tile(p['w1'].T @ o + p['b1'].T, (S, 1))     # (S*HID, 1)

        # appearance embedding folded into an effective f32 rgb-net bias
        a_vec = p['embed_a'][ts[0]][:, None]                 # (DIM_A, 1)
        b3e = jnp.tile(p['w3'][FEAT + 3:, :].T @ a_vec + p['b3'].T, (S, 1))

        out = render_pallas(cam, c1, b3e, self._static, n_rays)   # (8, n_pad)
        return {'rgb': out[0:3, :n_rays].T,                  # (n_rays, 3)
                'depth': out[3, :n_rays],                    # (n_rays,)
                'opacity': out[4, :n_rays]}                  # (n_rays,)


if __name__ == "__main__":
    key = jax.random.PRNGKey(0)

    # small image: 32x32 -> 1024 rays (2 grid steps of 512 rays)
    W_IMG, H_IMG = 32, 32
    fx = fy = 40.0
    cx, cy = W_IMG / 2.0, H_IMG / 2.0

    hparams = dict(scale=0.5, vocab_size=VOCAB, dim_a=DIM_A, dim_g=16,
                   use_exposure=False, random_bg=False,
                   distortion_loss_w=0.0, eval_lpips=False)

    system = NeRFSystemPallas(hparams, key)
    system.setup_intrinsics(W_IMG, H_IMG, fx, fy, cx, cy)

    # deterministic custom camera pose (3x4 c2w) and appearance timestep
    pose = jnp.array([[1.0, 0.0, 0.0, 0.1],
                      [0.0, 1.0, 0.0, 0.2],
                      [0.0, 0.0, 1.0, -1.0]], jnp.float32)
    batch = {'pose': pose, 'ts': jnp.array([3], jnp.int32)}

    out = system.forward(batch, split='test')
    jax.block_until_ready(out)

    assert out['rgb'].shape == (W_IMG * H_IMG, 3)
    assert out['depth'].shape == (W_IMG * H_IMG,)
    assert out['opacity'].shape == (W_IMG * H_IMG,)
    assert bool(jnp.isfinite(out['rgb']).all())
    assert bool(jnp.isfinite(out['depth']).all())
    assert bool(jnp.isfinite(out['opacity']).all())
    print("KERNEL_OK")
</pallas_src>

<mosaic_0001>
module attributes {stable_mosaic.version = 11 : i64} {
  func.func @render_kernel(%arg0: i32, %arg1: memref<16xf32, #tpu.memory_space<smem>>, %arg2: memref<512x3xbf16, #tpu.memory_space<vmem>>, %arg3: memref<512x1xf32, #tpu.memory_space<vmem>>, %arg4: memref<256x512xbf16, #tpu.memory_space<vmem>>, %arg5: memref<256x1xf32, #tpu.memory_space<vmem>>, %arg6: memref<512x256xbf16, #tpu.memory_space<vmem>>, %arg7: memref<512x3xbf16, #tpu.memory_space<vmem>>, %arg8: memref<512x1xf32, #tpu.memory_space<vmem>>, %arg9: memref<48x512xbf16, #tpu.memory_space<vmem>>, %arg10: memref<48x1xf32, #tpu.memory_space<vmem>>, %arg11: memref<8x512xf32, #tpu.memory_space<vmem>>) attributes {dimension_semantics = [#tpu.dimension_semantics<parallel>], iteration_bounds = array<i64: 2>, scalar_prefetch = 0 : i64, scratch_operands = 0 : i64, tpu.core_type = #tpu.core_type<tc>, window_params = [{transform_indices = @transform_0, window_bounds = array<i64: 16>}, {pipeline_mode = #tpu.pipeline_mode<synchronous>, transform_indices = @transform_1, window_bounds = array<i64: 512, 3>}, {pipeline_mode = #tpu.pipeline_mode<synchronous>, transform_indices = @transform_2, window_bounds = array<i64: 512, 1>}, {pipeline_mode = #tpu.pipeline_mode<synchronous>, transform_indices = @transform_3, window_bounds = array<i64: 256, 512>}, {pipeline_mode = #tpu.pipeline_mode<synchronous>, transform_indices = @transform_4, window_bounds = array<i64: 256, 1>}, {pipeline_mode = #tpu.pipeline_mode<synchronous>, transform_indices = @transform_5, window_bounds = array<i64: 512, 256>}, {pipeline_mode = #tpu.pipeline_mode<synchronous>, transform_indices = @transform_6, window_bounds = array<i64: 512, 3>}, {pipeline_mode = #tpu.pipeline_mode<synchronous>, transform_indices = @transform_7, window_bounds = array<i64: 512, 1>}, {pipeline_mode = #tpu.pipeline_mode<synchronous>, transform_indices = @transform_8, window_bounds = array<i64: 48, 512>}, {pipeline_mode = #tpu.pipeline_mode<synchronous>, transform_indices = @transform_9, window_bounds = array<i64: 48, 1>}, {transform_indices = @transform_10, window_bounds = array<i64: 8, 512>}]} {
    %c0 = arith.constant 0 : index
    %0 = memref.load %arg1[%c0] : memref<16xf32, #tpu.memory_space<smem>>
    %c512_i32 = arith.constant 512 : i32
    %1 = arith.muli %arg0, %c512_i32 : i32
    %2 = arith.sitofp %1 : i32 to f32
    %3 = tpu.iota {dimensions = array<i32: 1>} : vector<1x512xi32>
    %4 = arith.sitofp %3 : vector<1x512xi32> to vector<1x512xf32>
    %5 = vector.broadcast %2 : f32 to vector<1x512xf32>
    %6 = arith.addf %4, %5 : vector<1x512xf32>
    %7 = vector.broadcast %0 : f32 to vector<1x512xf32>
    %8 = arith.divf %6, %7 : vector<1x512xf32>
    %9 = math.floor %8 : vector<1x512xf32>
    %10 = vector.broadcast %0 : f32 to vector<1x512xf32>
    %11 = arith.mulf %9, %10 : vector<1x512xf32>
    %12 = arith.subf %6, %11 : vector<1x512xf32>
    %cst = arith.constant 0.000000e+00 : f32
    %13 = vector.broadcast %cst : f32 to vector<1x512xf32>
    %14 = arith.cmpf olt, %12, %13 : vector<1x512xf32>
    %cst_0 = arith.constant 1.000000e+00 : f32
    %15 = vector.broadcast %cst_0 : f32 to vector<1x512xf32>
    %16 = arith.subf %9, %15 : vector<1x512xf32>
    %17 = arith.select %14, %16, %9 : vector<1x512xi1>, vector<1x512xf32>
    %18 = vector.broadcast %0 : f32 to vector<1x512xf32>
    %19 = arith.addf %12, %18 : vector<1x512xf32>
    %20 = arith.select %14, %19, %12 : vector<1x512xi1>, vector<1x512xf32>
    %21 = vector.broadcast %0 : f32 to vector<1x512xf32>
    %22 = arith.cmpf oge, %20, %21 : vector<1x512xf32>
    %cst_1 = arith.constant 1.000000e+00 : f32
    %23 = vector.broadcast %cst_1 : f32 to vector<1x512xf32>
    %24 = arith.addf %17, %23 : vector<1x512xf32>
    %25 = arith.select %22, %24, %17 : vector<1x512xi1>, vector<1x512xf32>
    %26 = vector.broadcast %0 : f32 to vector<1x512xf32>
    %27 = arith.subf %20, %26 : vector<1x512xf32>
    %28 = arith.select %22, %27, %20 : vector<1x512xi1>, vector<1x512xf32>
    %c1 = arith.constant 1 : index
    %29 = memref.load %arg1[%c1] : memref<16xf32, #tpu.memory_space<smem>>
    %30 = vector.broadcast %29 : f32 to vector<1x512xf32>
    %31 = arith.mulf %30, %28 : vector<1x512xf32>
    %c2 = arith.constant 2 : index
    %32 = memref.load %arg1[%c2] : memref<16xf32, #tpu.memory_space<smem>>
    %33 = vector.broadcast %32 : f32 to vector<1x512xf32>
    %34 = arith.mulf %33, %25 : vector<1x512xf32>
    %35 = arith.addf %31, %34 : vector<1x512xf32>
    %c3 = arith.constant 3 : index
    %36 = memref.load %arg1[%c3] : memref<16xf32, #tpu.memory_space<smem>>
    %37 = vector.broadcast %36 : f32 to vector<1x512xf32>
    %38 = arith.addf %35, %37 : vector<1x512xf32>
    %c4 = arith.constant 4 : index
    %39 = memref.load %arg1[%c4] : memref<16xf32, #tpu.memory_space<smem>>
    %40 = vector.broadcast %39 : f32 to vector<1x512xf32>
    %41 = arith.mulf %40, %28 : vector<1x512xf32>
    %c5 = arith.constant 5 : index
    %42 = memref.load %arg1[%c5] : memref<16xf32, #tpu.memory_space<smem>>
    %43 = vector.broadcast %42 : f32 to vector<1x512xf32>
    %44 = arith.mulf %43, %25 : vector<1x512xf32>
    %45 = arith.addf %41, %44 : vector<1x512xf32>
    %c6 = arith.constant 6 : index
    %46 = memref.load %arg1[%c6] : memref<16xf32, #tpu.memory_space<smem>>
    %47 = vector.broadcast %46 : f32 to vector<1x512xf32>
    %48 = arith.addf %45, %47 : vector<1x512xf32>
    %c7 = arith.constant 7 : index
    %49 = memref.load %arg1[%c7] : memref<16xf32, #tpu.memory_space<smem>>
    %50 = vector.broadcast %49 : f32 to vector<1x512xf32>
    %51 = arith.mulf %50, %28 : vector<1x512xf32>
    %c8 = arith.constant 8 : index
    %52 = memref.load %arg1[%c8] : memref<16xf32, #tpu.memory_space<smem>>
    %53 = vector.broadcast %52 : f32 to vector<1x512xf32>
    %54 = arith.mulf %53, %25 : vector<1x512xf32>
    %55 = arith.addf %51, %54 : vector<1x512xf32>
    %c9 = arith.constant 9 : index
    %56 = memref.load %arg1[%c9] : memref<16xf32, #tpu.memory_space<smem>>
    %57 = vector.broadcast %56 : f32 to vector<1x512xf32>
    %58 = arith.addf %55, %57 : vector<1x512xf32>
    %59 = arith.mulf %38, %38 : vector<1x512xf32>
    %60 = arith.mulf %48, %48 : vector<1x512xf32>
    %61 = arith.addf %59, %60 : vector<1x512xf32>
    %62 = arith.mulf %58, %58 : vector<1x512xf32>
    %63 = arith.addf %61, %62 : vector<1x512xf32>
    %cst_2 = arith.constant 9.99999996E-13 : f32
    %64 = vector.broadcast %cst_2 : f32 to vector<1x512xf32>
    %65 = arith.addf %63, %64 : vector<1x512xf32>
    %66 = math.rsqrt %65 : vector<1x512xf32>
    %67 = tpu.concatenate %38, %48, %58 in 0 : vector<1x512xf32>, vector<1x512xf32>, vector<1x512xf32> -> vector<3x512xf32>
    %68 = vector.broadcast %66 : vector<1x512xf32> to vector<3x512xf32>
    %69 = arith.mulf %67, %68 : vector<3x512xf32>
    %70 = arith.truncf %69 : vector<3x512xf32> to vector<3x512xbf16>
    %c0_3 = arith.constant 0 : index
    %c0_4 = arith.constant 0 : index
    %71 = vector.load %arg2[%c0_3, %c0_4] : memref<512x3xbf16, #tpu.memory_space<vmem>>, vector<512x3xbf16>
    %cst_5 = arith.constant dense<0.000000e+00> : vector<512x512xf32>
    %72 = tpu.matmul %71, %70, %cst_5 {dimension_numbers = #tpu.dot_dimension_numbers<[1], [0], [0], [1], [0, 0, 1, 1], [], []>} : vector<512x3xbf16>, vector<3x512xbf16>, vector<512x512xf32> -> vector<512x512xf32>
    %c0_6 = arith.constant 0 : index
    %c0_7 = arith.constant 0 : index
    %73 = vector.load %arg3[%c0_6, %c0_7] : memref<512x1xf32, #tpu.memory_space<vmem>>, vector<512x1xf32>
    %74 = vector.broadcast %73 : vector<512x1xf32> to vector<512x512xf32>
    %75 = arith.addf %72, %74 : vector<512x512xf32>
    %cst_8 = arith.constant 0.000000e+00 : f32
    %76 = vector.broadcast %cst_8 : f32 to vector<512x512xf32>
    %77 = arith.maximumf %75, %76 : vector<512x512xf32>
    %78 = arith.truncf %77 : vector<512x512xf32> to vector<512x512xbf16>
    %c0_9 = arith.constant 0 : index
    %c0_10 = arith.constant 0 : index
    %79 = vector.load %arg4[%c0_9, %c0_10] : memref<256x512xbf16, #tpu.memory_space<vmem>>, vector<256x512xbf16>
    %cst_11 = arith.constant dense<0.000000e+00> : vector<256x512xf32>
    %80 = tpu.matmul %79, %78, %cst_11 {dimension_numbers = #tpu.dot_dimension_numbers<[1], [0], [0], [1], [0, 0, 1, 1], [], []>} : vector<256x512xbf16>, vector<512x512xbf16>, vector<256x512xf32> -> vector<256x512xf32>
    %c0_12 = arith.constant 0 : index
    %c0_13 = arith.constant 0 : index
    %81 = vector.load %arg5[%c0_12, %c0_13] : memref<256x1xf32, #tpu.memory_space<vmem>>, vector<256x1xf32>
    %82 = vector.broadcast %81 : vector<256x1xf32> to vector<256x512xf32>
    %83 = arith.addf %80, %82 : vector<256x512xf32>
    %84 = vector.extract_strided_slice %83 {offsets = [0, 0], sizes = [16, 512], strides = [1, 1]} : vector<256x512xf32> to vector<16x512xf32>
    %85 = arith.truncf %83 : vector<256x512xf32> to vector<256x512xbf16>
    %c0_14 = arith.constant 0 : index
    %c0_15 = arith.constant 0 : index
    %86 = vector.load %arg6[%c0_14, %c0_15] : memref<512x256xbf16, #tpu.memory_space<vmem>>, vector<512x256xbf16>
    %cst_16 = arith.constant dense<0.000000e+00> : vector<512x512xf32>
    %87 = tpu.matmul %86, %85, %cst_16 {dimension_numbers = #tpu.dot_dimension_numbers<[1], [0], [0], [1], [0, 0, 1, 1], [], []>} : vector<512x256xbf16>, vector<256x512xbf16>, vector<512x512xf32> -> vector<512x512xf32>
    %c0_17 = arith.constant 0 : index
    %c0_18 = arith.constant 0 : index
    %88 = vector.load %arg7[%c0_17, %c0_18] : memref<512x3xbf16, #tpu.memory_space<vmem>>, vector<512x3xbf16>
    %cst_19 = arith.constant dense<0.000000e+00> : vector<512x512xf32>
    %89 = tpu.matmul %88, %70, %cst_19 {dimension_numbers = #tpu.dot_dimension_numbers<[1], [0], [0], [1], [0, 0, 1, 1], [], []>} : vector<512x3xbf16>, vector<3x512xbf16>, vector<512x512xf32> -> vector<512x512xf32>
    %90 = arith.addf %87, %89 : vector<512x512xf32>
    %c0_20 = arith.constant 0 : index
    %c0_21 = arith.constant 0 : index
    %91 = vector.load %arg8[%c0_20, %c0_21] : memref<512x1xf32, #tpu.memory_space<vmem>>, vector<512x1xf32>
    %92 = vector.broadcast %91 : vector<512x1xf32> to vector<512x512xf32>
    %93 = arith.addf %90, %92 : vector<512x512xf32>
    %cst_22 = arith.constant 0.000000e+00 : f32
    %94 = vector.broadcast %cst_22 : f32 to vector<512x512xf32>
    %95 = arith.maximumf %93, %94 : vector<512x512xf32>
    %96 = arith.truncf %95 : vector<512x512xf32> to vector<512x512xbf16>
    %c0_23 = arith.constant 0 : index
    %c0_24 = arith.constant 0 : index
    %97 = vector.load %arg9[%c0_23, %c0_24] : memref<48x512xbf16, #tpu.memory_space<vmem>>, vector<48x512xbf16>
    %cst_25 = arith.constant dense<0.000000e+00> : vector<48x512xf32>
    %98 = tpu.matmul %97, %96, %cst_25 {dimension_numbers = #tpu.dot_dimension_numbers<[1], [0], [0], [1], [0, 0, 1, 1], [], []>} : vector<48x512xbf16>, vector<512x512xbf16>, vector<48x512xf32> -> vector<48x512xf32>
    %c0_26 = arith.constant 0 : index
    %c0_27 = arith.constant 0 : index
    %99 = vector.load %arg10[%c0_26, %c0_27] : memref<48x1xf32, #tpu.memory_space<vmem>>, vector<48x1xf32>
    %100 = vector.broadcast %99 : vector<48x1xf32> to vector<48x512xf32>
    %101 = arith.addf %98, %100 : vector<48x512xf32>
    %102 = arith.negf %101 : vector<48x512xf32>
    %103 = math.exp %102 : vector<48x512xf32>
    %cst_28 = arith.constant 1.000000e+00 : f32
    %104 = vector.broadcast %cst_28 : f32 to vector<48x512xf32>
    %105 = arith.addf %104, %103 : vector<48x512xf32>
    %106 = arith.divf %104, %105 : vector<48x512xf32>
    %cst_29 = arith.constant 8.000000e+01 : f32
    %107 = vector.broadcast %cst_29 : f32 to vector<16x512xf32>
    %108 = arith.minimumf %84, %107 : vector<16x512xf32>
    %109 = math.exp %108 : vector<16x512xf32>
    %cst_30 = arith.constant 1.218750e-01 : f32
    %110 = vector.broadcast %cst_30 : f32 to vector<16x512xf32>
    %111 = arith.mulf %109, %110 : vector<16x512xf32>
    %cst_31 = arith.constant 0.000000e+00 : f32
    %112 = vector.broadcast %cst_31 : f32 to vector<1x512xf32>
    %113 = vector.extract_strided_slice %111 {offsets = [0, 0], sizes = [15, 512], strides = [1, 1]} : vector<16x512xf32> to vector<15x512xf32>
    %114 = tpu.concatenate %112, %113 in 0 : vector<1x512xf32>, vector<15x512xf32> -> vector<16x512xf32>
    %115 = arith.addf %111, %114 : vector<16x512xf32>
    %cst_32 = arith.constant 0.000000e+00 : f32
    %116 = vector.broadcast %cst_32 : f32 to vector<2x512xf32>
    %117 = vector.extract_strided_slice %115 {offsets = [0, 0], sizes = [14, 512], strides = [1, 1]} : vector<16x512xf32> to vector<14x512xf32>
    %118 = tpu.concatenate %116, %117 in 0 : vector<2x512xf32>, vector<14x512xf32> -> vector<16x512xf32>
    %119 = arith.addf %115, %118 : vector<16x512xf32>
    %cst_33 = arith.constant 0.000000e+00 : f32
    %120 = vector.broadcast %cst_33 : f32 to vector<4x512xf32>
    %121 = vector.extract_strided_slice %119 {offsets = [0, 0], sizes = [12, 512], strides = [1, 1]} : vector<16x512xf32> to vector<12x512xf32>
    %122 = tpu.concatenate %120, %121 in 0 : vector<4x512xf32>, vector<12x512xf32> -> vector<16x512xf32>
    %123 = arith.addf %119, %122 : vector<16x512xf32>
    %cst_34 = arith.constant 0.000000e+00 : f32
    %124 = vector.broadcast %cst_34 : f32 to vector<8x512xf32>
    %125 = vector.extract_strided_slice %123 {offsets = [0, 0], sizes = [8, 512], strides = [1, 1]} : vector<16x512xf32> to vector<8x512xf32>
    %126 = tpu.concatenate %124, %125 in 0 : vector<8x512xf32>, vector<8x512xf32> -> vector<16x512xf32>
    %127 = arith.addf %123, %126 : vector<16x512xf32>
    %128 = arith.subf %127, %111 : vector<16x512xf32>
    %cst_35 = arith.constant 0.000000e+00 : f32
    %129 = vector.broadcast %cst_35 : f32 to vector<16x512xf32>
    %130 = arith.subf %129, %128 : vector<16x512xf32>
    %131 = math.exp %130 : vector<16x512xf32>
    %cst_36 = arith.constant 0.000000e+00 : f32
    %132 = vector.broadcast %cst_36 : f32 to vector<16x512xf32>
    %133 = arith.subf %132, %111 : vector<16x512xf32>
    %134 = math.exp %133 : vector<16x512xf32>
    %cst_37 = arith.constant 1.000000e+00 : f32
    %135 = vector.broadcast %cst_37 : f32 to vector<16x512xf32>
    %136 = arith.subf %135, %134 : vector<16x512xf32>
    %137 = arith.mulf %131, %136 : vector<16x512xf32>
    %cst_38 = arith.constant dense<0.000000e+00> : vector<512xf32>
    %138 = vector.multi_reduction <add>, %137, %cst_38 [0] : vector<16x512xf32> to vector<512xf32>
    %139 = vector.shape_cast %138 : vector<512xf32> to vector<1x512xf32>
    %140 = tpu.iota {dimensions = array<i32: 0>} : vector<16x1xi32>
    %141 = arith.sitofp %140 : vector<16x1xi32> to vector<16x1xf32>
    %cst_39 = arith.constant 5.000000e-01 : f32
    %142 = vector.broadcast %cst_39 : f32 to vector<16x1xf32>
    %143 = arith.addf %141, %142 : vector<16x1xf32>
    %cst_40 = arith.constant 1.218750e-01 : f32
    %144 = vector.broadcast %cst_40 : f32 to vector<16x1xf32>
    %145 = arith.mulf %144, %143 : vector<16x1xf32>
    %cst_41 = arith.constant 5.000000e-02 : f32
    %146 = vector.broadcast %cst_41 : f32 to vector<16x1xf32>
    %147 = arith.addf %146, %145 : vector<16x1xf32>
    %148 = vector.broadcast %147 : vector<16x1xf32> to vector<16x512xf32>
    %149 = arith.mulf %137, %148 : vector<16x512xf32>
    %cst_42 = arith.constant dense<0.000000e+00> : vector<512xf32>
    %150 = vector.multi_reduction <add>, %149, %cst_42 [0] : vector<16x512xf32> to vector<512xf32>
    %151 = vector.shape_cast %150 : vector<512xf32> to vector<1x512xf32>
    %cst_43 = arith.constant 1.000000e+00 : f32
    %152 = vector.broadcast %cst_43 : f32 to vector<1x512xf32>
    %153 = arith.subf %152, %139 : vector<1x512xf32>
    %154 = vector.extract_strided_slice %106 {offsets = [0, 0], sizes = [16, 512], strides = [1, 1]} : vector<48x512xf32> to vector<16x512xf32>
    %155 = arith.mulf %137, %154 : vector<16x512xf32>
    %cst_44 = arith.constant dense<0.000000e+00> : vector<512xf32>
    %156 = vector.multi_reduction <add>, %155, %cst_44 [0] : vector<16x512xf32> to vector<512xf32>
    %157 = vector.shape_cast %156 : vector<512xf32> to vector<1x512xf32>
    %158 = arith.addf %157, %153 : vector<1x512xf32>
    %159 = vector.extract_strided_slice %106 {offsets = [16, 0], sizes = [16, 512], strides = [1, 1]} : vector<48x512xf32> to vector<16x512xf32>
    %160 = arith.mulf %137, %159 : vector<16x512xf32>
    %cst_45 = arith.constant dense<0.000000e+00> : vector<512xf32>
    %161 = vector.multi_reduction <add>, %160, %cst_45 [0] : vector<16x512xf32> to vector<512xf32>
    %162 = vector.shape_cast %161 : vector<512xf32> to vector<1x512xf32>
    %163 = arith.addf %162, %153 : vector<1x512xf32>
    %164 = vector.extract_strided_slice %106 {offsets = [32, 0], sizes = [16, 512], strides = [1, 1]} : vector<48x512xf32> to vector<16x512xf32>
    %165 = arith.mulf %137, %164 : vector<16x512xf32>
    %cst_46 = arith.constant dense<0.000000e+00> : vector<512xf32>
    %166 = vector.multi_reduction <add>, %165, %cst_46 [0] : vector<16x512xf32> to vector<512xf32>
    %167 = vector.shape_cast %166 : vector<512xf32> to vector<1x512xf32>
    %168 = arith.addf %167, %153 : vector<1x512xf32>
    %cst_47 = arith.constant 0.000000e+00 : f32
    %169 = vector.broadcast %cst_47 : f32 to vector<3x512xf32>
    %170 = tpu.concatenate %158, %163, %168, %151, %139, %169 in 0 : vector<1x512xf32>, vector<1x512xf32>, vector<1x512xf32>, vector<1x512xf32>, vector<1x512xf32>, vector<3x512xf32> -> vector<8x512xf32>
    %c0_48 = arith.constant 0 : index
    %c0_49 = arith.constant 0 : index
    %171 = vector.load %arg11[%c0_48, %c0_49] : memref<8x512xf32, #tpu.memory_space<vmem>>, vector<8x512xf32>
    tpu.vector_store %arg11[%c0_48, %c0_49], %170 {strides = array<i32>} : memref<8x512xf32, #tpu.memory_space<vmem>>, vector<8x512xf32>,
    return
  }
  func.func @transform_0(%arg0: i32) -> i32 {
    %c0_i32 = arith.constant 0 : i32
    %c0_i32_0 = arith.constant 0 : i32
    return %c0_i32 : i32
  }
  func.func @transform_1(%arg0: i32) -> (i32, i32) {
    %c0_i32 = arith.constant 0 : i32
    %c0_i32_0 = arith.constant 0 : i32
    %c0_i32_1 = arith.constant 0 : i32
    return %c0_i32, %c0_i32_0 : i32, i32
  }
  func.func @transform_2(%arg0: i32) -> (i32, i32) {
    %c0_i32 = arith.constant 0 : i32
    %c0_i32_0 = arith.constant 0 : i32
    %c0_i32_1 = arith.constant 0 : i32
    return %c0_i32, %c0_i32_0 : i32, i32
  }
  func.func @transform_3(%arg0: i32) -> (i32, i32) {
    %c0_i32 = arith.constant 0 : i32
    %c0_i32_0 = arith.constant 0 : i32
    %c0_i32_1 = arith.constant 0 : i32
    return %c0_i32, %c0_i32_0 : i32, i32
  }
  func.func @transform_4(%arg0: i32) -> (i32, i32) {
    %c0_i32 = arith.constant 0 : i32
    %c0_i32_0 = arith.constant 0 : i32
    %c0_i32_1 = arith.constant 0 : i32
    return %c0_i32, %c0_i32_0 : i32, i32
  }
  func.func @transform_5(%arg0: i32) -> (i32, i32) {
    %c0_i32 = arith.constant 0 : i32
    %c0_i32_0 = arith.constant 0 : i32
    %c0_i32_1 = arith.constant 0 : i32
    return %c0_i32, %c0_i32_0 : i32, i32
  }
  func.func @transform_6(%arg0: i32) -> (i32, i32) {
    %c0_i32 = arith.constant 0 : i32
    %c0_i32_0 = arith.constant 0 : i32
    %c0_i32_1 = arith.constant 0 : i32
    return %c0_i32, %c0_i32_0 : i32, i32
  }
  func.func @transform_7(%arg0: i32) -> (i32, i32) {
    %c0_i32 = arith.constant 0 : i32
    %c0_i32_0 = arith.constant 0 : i32
    %c0_i32_1 = arith.constant 0 : i32
    return %c0_i32, %c0_i32_0 : i32, i32
  }
  func.func @transform_8(%arg0: i32) -> (i32, i32) {
    %c0_i32 = arith.constant 0 : i32
    %c0_i32_0 = arith.constant 0 : i32
    %c0_i32_1 = arith.constant 0 : i32
    return %c0_i32, %c0_i32_0 : i32, i32
  }
  func.func @transform_9(%arg0: i32) -> (i32, i32) {
    %c0_i32 = arith.constant 0 : i32
    %c0_i32_0 = arith.constant 0 : i32
    %c0_i32_1 = arith.constant 0 : i32
    return %c0_i32, %c0_i32_0 : i32, i32
  }
  func.func @transform_10(%arg0: i32) -> (i32, i32) {
    %c0_i32 = arith.constant 0 : i32
    %c0_i32_0 = arith.constant 0 : i32
    return %c0_i32, %arg0 : i32, i32
  }
}

</mosaic_0001>

<bundles_post_ra>
// kernel: tpu_custom_call.1
= control target key start
LH: loop header
LB: loop body
LE: loop exit
PB: predicated region body
PF: predicated region fallthrough
CT: control target
= control target key end

     0   :  { %s12248_s0 = inlined_call_operand.vmem [shape: f32[16], index: 0, kind: input, shape index: {}]   ;;  %s12249_s1 = inlined_call_operand.vmem [shape: bf16[512,3], index: 1, kind: input, shape index: {}]   ;;  %s12250_s2 = inlined_call_operand.vmem [shape: f32[512,1], index: 2, kind: input, shape index: {}]   ;;  %s12251_s3 = inlined_call_operand.vmem [shape: bf16[256,512], index: 3, kind: input, shape index: {}]   ;;  %s12252_s4 = inlined_call_operand.vmem [shape: f32[256,1], index: 4, kind: input, shape index: {}]   ;;  %s12253_s5 = inlined_call_operand.vmem [shape: bf16[512,256], index: 5, kind: input, shape index: {}]   ;;  %s12254_s6 = inlined_call_operand.vmem [shape: bf16[512,3], index: 6, kind: input, shape index: {}]   ;;  %s12255_s7 = inlined_call_operand.vmem [shape: f32[512,1], index: 7, kind: input, shape index: {}]   ;;  %s12256_s8 = inlined_call_operand.vmem [shape: bf16[48,512], index: 8, kind: input, shape index: {}]   ;;  %s12257_s9 = inlined_call_operand.vmem [shape: f32[48,1], index: 9, kind: input, shape index: {}]   ;;  %s12258_s10 = inlined_call_operand.hbm [shape: f32[8,1024], index: 10, kind: output, shape index: {}]  }
   0x1   :  { %12300 = sst [smem:[#allocation33_spill]] %s12248_s0 }
   0x2   :  { %15 = vsyncpa [#allocation4], 0 }
   0x3   :  { %16 = vsyncpa [#allocation3], 0 }
   0x4   :  { %18 = vsyncpa [#allocation3 + $0x1], 0  ;;  %s9504_s13 = smov 0   ;;  %s9506_s14 = smov 0  }
   0x5   :  { %s9508_s15 = smov 0   ;;  %s9510_s16 = smov 0  }
   0x6 LB: > { %s9525_s17 = sadd.s32 4294967295, %s9443_s16   ;;  %s7938_s18 = sadd.s32 4294967294, %s9443_s16   ;;  %s9443_s16 = sphi %s9510_s16, %s12407_s16   ;;  %s9439_s15 = sphi %s9508_s15, %s12406_s15   ;;  %s9435_s14 = sphi %s9506_s14, %s12405_s14   ;;  %s9431_s13 = sphi %s9504_s13, %s12404_s13  }
   0x7   : > { %s9529_s19 = sadd.s32 1, %s9443_s16   ;;  %s241_s20 = sadd.s32 1, %s9439_s15 }
   0x8   : > { %s238_s21 = ssub.s32 %s9443_s16, %s9529_s19  ;;  %p251_p0 = scmp.ne.s32.totalorder %s9439_s15, %s9435_s14 }
   0x9   : > { %p239_p1 = scmp.eq.s32.totalorder %s238_s21, 0  ;;  %p252_p2 = scmp.eq.s32.totalorder %s9525_s17, 1 }
   0xa   : > { %p257_p3 = scmp.ne.s32.totalorder %s9435_s14, %s9431_s13  ;;  %p258_p4 = scmp.eq.s32.totalorder %s7938_s18, 1 }
   0xb   : > { %s9540_s22 = scalar_select %p239_p1, %s9439_s15, %s241_s20  }
   0xc   : > { %p9542_p5 = por %p252_p2, %p251_p0  ;;  %p9546_p6 = por %p258_p4, %p257_p3 }
   0xd   : > { %12301 = sst [smem:[#allocation8_spill]] %s9540_s22  ;;  %p7939_p7 = scmp.ge.s32.totalorder %s9443_s16, 1 }
   0xe   : > { %p265_p8 = scmp.lt.s32.totalorder %s9443_s16, 3  ;;  %p8894_p9 = scmp.eq.s32.totalorder %s9525_s17, 0 }
   0xf   : > { %s12305_s0 = sld [smem:[#allocation33_spill]] }
  0x10   : > { %p9553_p10 = pnand %p7939_p7, %p265_p8 }
  0x12   : > { %p8886_p11 = pneg %p9553_p10 }
  0x14   : > { %p8887_p12 = pnand %p8894_p9, %p8886_p11 }
  0x15   : > { %s278_s28 = sshll.u32 %s12305_s0, 4  ;;  %s279_s28 = int_to_ptr.vmem [resolvable:$true] %s278_s28 }
  0x16   : > { %s9362_s29 = scalar_lea.vmem %s279_s28, 16  ;;  %p9364_p0 = pneg %p8887_p12 }
  0x17   : > { %p9363_p13 = scmp.ne.s32.totalorder %s279_s28, %s9362_s29  ;;  %p9370_p3 = scmp.lt.s32.totalorder %s279_s28, %s279_s28 }
  0x18   : > { %p9371_p4 = scmp.lt.s32.totalorder %s9362_s29, %s9362_s29 }
  0x19   : > { %p9365_p1 = pnand %p9364_p0, %p9363_p13 }
  0x1a   : > { %p9372_p7 = por %p9371_p4, %p9370_p3 }
  0x1b   : > { %p9366_p2 = pneg %p9365_p1 }
  0x1d   : > { %p9373_p8 = pnand %p9372_p7, %p9366_p2 }
  0x1f   : > { %9376 = shalt.err (!%p9373_p8)
}
  0x20   : > { %s9445_s30 = smov [#allocation2]   ;;  %318 = sbr.rel (%p9553_p10) target bundleno = 1773 (0x6ed), region = 60 }
  0x21   : > { %8889 = dma.vmem_to_smem (!%p8887_p12), %s279_s28, 16, %s9445_s30, [#allocation4]  }
  0x27   : > { %9422 = dma.done.wait (%p8894_p9), [#allocation4], 16  }
  0x28   : > { %9424 = vsyncadd (%p8894_p9), [#allocation4], 4294967280 }
  0x29   : > { %324 = sfence }
  0x2a   : > { %v607_v0 = vld [vmem:[%s12250_s2 + $0x10] sm:$0xff]  ;;  %v605_v1 = vld [vmem:[%s12250_s2] sm:$0xff]  ;;  %s354_s21 = sld [smem:[#allocation2]]  ;;  %v12260_v2 = vlaneseq  ;;  %v12266_v3 = vmov 0   ;;  %v608_v5 = vld [vmem:[%s12250_s2 + $0x18] sm:$0xff]  ;;  %s12259_s29 = sshll.u32 %s9525_s17, 9 }
  0x2b   : > { %8933 = vset.pattern.permute.xlu1 %v12266_v3  ;;  %8932 = vset.pattern.permute.xlu0 %v12266_v3  ;;  %v606_v6 = vld [vmem:[%s12250_s2 + $0x8] sm:$0xff]  ;;  %v609_v10 = vld [vmem:[%s12250_s2 + $0x20] sm:$0xff]  ;;  %s356_s20 = scvt.s32.f32 %s12259_s29  ;;  %v612_v11 = vld [vmem:[%s12250_s2 + $0x38] sm:$0xff]  ;;  %s7949_s28 = sld [smem:[#allocation2 + $0x1]]  ;;  %vm523_vm6 = vcmask 1040384   ;;  %vm528_vm8 = vcmask 1041408  }
  0x2c   : > { %681 = vperm.xlu1 %8933, %v607_v0   ;;  %671 = vperm.xlu0 %8932, %v605_v1   ;;  %v358_v4 = vand.u32 127, %v12260_v2  ;;  %v610_v9 = vld [vmem:[%s12250_s2 + $0x28] sm:$0xff]  ;;  %v611_v16 = vld [vmem:[%s12250_s2 + $0x30] sm:$0xff]  ;;  %s7950_s30 = sld [smem:[#allocation2 + $0x2]]  ;;  %s7951_s11 = sld [smem:[#allocation2 + $0x3]]  ;;  %v613_v24 = vld [vmem:[%s12250_s2 + $0x40] sm:$0xff] }
  0x2d   : > { %1292 = vmatprep.mubr.bf16.mxu0 %v12266_v3  ;;  %1645 = vmatprep.mubr.bf16.mxu1 %v12266_v3  ;;  %v366_v17 = vstv %s356_s20  ;;  %s9605_s12 = sld [smem:[#allocation2 + $0x4]]  ;;  %s9607_s18 = sld [smem:[#allocation2 + $0x5]]  ;;  %v614_v23 = vld [vmem:[%s12250_s2 + $0x48] sm:$0xff]  ;;  %v616_v30 = vld [vmem:[%s12250_s2 + $0x58] sm:$0xff]  ;;  %v615_v31 = vld [vmem:[%s12250_s2 + $0x50] sm:$0xff]  ;;  %vm1149_vm10 = vcmask 23552  }
  0x2e   : > { %v359_v7 = vadd.s32 128, %v358_v4  ;;  %v361_v13 = vadd.s32 384, %v358_v4  ;;  %v362_v14 = vcvt.s32.f32 %v358_v4  ;;  %v360_v15 = vadd.s32 256, %v358_v4  ;;  %s9615_s27 = sld [smem:[#allocation2 + $0x6]]  ;;  %s9617_s29 = sld [smem:[#allocation2 + $0x7]]  ;;  %v618_v40 = vld [vmem:[%s12250_s2 + $0x68] sm:$0xff] }
  0x2f   : > { %s9619_s0 = sld [smem:[#allocation2 + $0x8]]  ;;  %v617_v41 = vld [vmem:[%s12250_s2 + $0x60] sm:$0xff]  ;;  %v620_v60 = vld [vmem:[%s12250_s2 + $0x78] sm:$0xff]  ;;  %v619_v61 = vld [vmem:[%s12250_s2 + $0x70] sm:$0xff]  ;;  %vm7526_vm11 = vcmask 1043456   ;;  %s349_s25 = sand.u32 1, %s9435_s14  }
  0x30   : > { %686 = vperm.xlu1 %8933, %v608_v5   ;;  %676 = vperm.xlu0 %8932, %v606_v6   ;;  %v9588_v8 = vstv %s354_s21  ;;  %v363_v12 = vcvt.s32.f32 %v359_v7  ;;  %v365_v18 = vcvt.s32.f32 %v361_v13  ;;  %v364_v19 = vcvt.s32.f32 %v360_v15  ;;  %v621_v15 = vld [vmem:[%s12250_s2 + $0x80] sm:$0xff]  ;;  %s7943_s26 = sshll.u32 %s349_s25, 5 }
  0x31   : > { %9208 = vrcp.f32 %v9588_v8  ;;  %v367_v22 = vadd.f32 %v366_v17, %v362_v14  ;;  %v9627_v36 = vstv %s7949_s28  ;;  %s9648_s28 = sld [smem:[#allocation2 + $0x9]]  ;;  %v622_v14 = vld [vmem:[%s12250_s2 + $0x88] sm:$0xff]  ;;  %vm7846_vm12 = vcmask 1042432  }
  0x32   : > { %v368_v20 = vadd.f32 %v366_v17, %v363_v12  ;;  %v370_v21 = vadd.f32 %v366_v17, %v365_v18  ;;  %v369_v25 = vadd.f32 %v366_v17, %v364_v19  ;;  %v9629_v37 = vstv %s7950_s30 }
  0x33   : > { %v9631_v38 = vstv %s7951_s11  ;;  %v9643_v43 = vstv %s9605_s12  ;;  %v9646_v44 = vstv %s9607_s18  ;;  %vm7855_vm13 = vcmask 1044480   ;;  %s12402_s11 = sshll.u32 %s9525_s17, 9  ;;  %s7865_s18 = scalar_lea.sflag [#allocation3], %s349_s25 }
  0x34   : > { %696 = vperm.xlu1 %8933, %v610_v9   ;;  %691 = vperm.xlu0 %8932, %v609_v10   ;;  %v9655_v51 = vstv %s9615_s27  ;;  %v9658_v52 = vstv %s9617_s29  ;;  %s9448_s17 = smov [#allocation5]  }
  0x35   : > { %v9661_v54 = vstv %s9619_s0  ;;  %s12203_s0 = scalar_lea.hbm %s12258_s10, %s12402_s11  ;;  %s9381_s21 = sshll.u32 %s9448_s17, 4  ;;  %s9382_s21 = int_to_ptr.vmem [resolvable:$false] %s9381_s21 }
  0x36   : > { %s9383_s22 = scalar_lea.vmem %s9382_s21, 1024 }
  0x38   : > { %706 = vperm.xlu1 %8933, %v612_v11   ;;  %701 = vperm.xlu0 %8932, %v611_v16   ;;  %v9679_v11 = vstv %s9648_s28  ;;  %s351_s28 = scalar_lea.vmem [#allocation5], %s7943_s26 }
  0x39   : > { %s7879_s30 = sshll.u32 %s351_s28, 4  ;;  %s12205_s30 = int_to_ptr.vmem [resolvable:$true] %s7879_s30 }
  0x3a   : > { %s9377_s27 = scalar_lea.vmem %s12205_s30, 512  ;;  %p9384_p12 = scmp.lt.s32.totalorder %s12205_s30, %s9382_s21 }
  0x3b   : > { %v9209_v26 = vpop.eup %9208  ;;  %p9378_p9 = scmp.ne.s32.totalorder %s12205_s30, %s9377_s27  ;;  %p9385_p13 = scmp.lt.s32.totalorder %s9383_s22, %s9377_s27 }
  0x3c   : > { %716 = vperm.xlu1 %8933, %v614_v23   ;;  %711 = vperm.xlu0 %8932, %v613_v24   ;;  %v374_v27 = vmul.f32 %v9209_v26, %v368_v20  ;;  %v376_v28 = vmul.f32 %v9209_v26, %v370_v21  ;;  %v373_v29 = vmul.f32 %v9209_v26, %v367_v22 }
  0x3d   : > { %v375_v32 = vmul.f32 %v9209_v26, %v369_v25  ;;  %p9379_p10 = pnand %p9378_p9, %p9542_p5  ;;  %p9386_p0 = por %p9385_p13, %p9384_p12 }
  0x3e   : > { %v378_v33 = vfloor.f32 %v374_v27  ;;  %v380_v34 = vfloor.f32 %v376_v28  ;;  %v377_v35 = vfloor.f32 %v373_v29  ;;  %v624_v28 = vld [vmem:[%s12250_s2 + $0x98] sm:$0xff] }
  0x3f   : > { %v9633_v39 = vfloor.f32 %v375_v32  ;;  %p9380_p11 = pneg %p9379_p10 }
  0x40   : > { %726 = vperm.xlu1 %8933, %v616_v30   ;;  %721 = vperm.xlu0 %8932, %v615_v31   ;;  %v382_v42 = vmul.f32 %v378_v33, %v9588_v8  ;;  %v384_v45 = vmul.f32 %v380_v34, %v9588_v8  ;;  %v7946_v46 = vadd.f32 -1.0, %v378_v33  ;;  %v7948_v47 = vadd.f32 -1.0, %v380_v34 }
  0x41   : > { %v381_v48 = vmul.f32 %v377_v35, %v9588_v8  ;;  %v383_v49 = vmul.f32 %v9633_v39, %v9588_v8  ;;  %v7945_v56 = vadd.f32 -1.0, %v377_v35  ;;  %p9387_p1 = pnand %p9386_p0, %p9380_p11 }
  0x42   : > { %v386_v50 = vsub.f32 %v368_v20, %v382_v42  ;;  %v388_v53 = vsub.f32 %v370_v21, %v384_v45 }
  0x43   : > { %v385_v55 = vsub.f32 %v367_v22, %v381_v48  ;;  %v9663_v57 = vsub.f32 %v369_v25, %v383_v49 }
  0x44   : > { %736 = vperm.xlu1 %8933, %v618_v40   ;;  %731 = vperm.xlu0 %8932, %v617_v41   ;;  %vm390_vm0 = vcmp.lt.f32.partialorder %v386_v50, 0.0  ;;  %v402_v58 = vadd.f32 %v386_v50, %v9588_v8  ;;  %vm392_vm1 = vcmp.lt.f32.partialorder %v388_v53, 0.0  ;;  %v404_v59 = vadd.f32 %v388_v53, %v9588_v8 }
  0x45   : > { %v398_v62 = vsel %vm390_vm0, %v7946_v46, %v378_v33  ;;  %v400_v63 = vsel %vm392_vm1, %v7948_v47, %v380_v34  ;;  %vm389_vm2 = vcmp.lt.f32.partialorder %v385_v55, 0.0  ;;  %v401_v0 = vadd.f32 %v385_v55, %v9588_v8  ;;  %v623_v33 = vld [vmem:[%s12250_s2 + $0x90] sm:$0xff] }
  0x46   : > { %v406_v1 = vsel %vm390_vm0, %v402_v58, %v386_v50  ;;  %v414_v4 = vadd.f32 1.0, %v398_v62  ;;  %v408_v5 = vsel %vm392_vm1, %v404_v59, %v388_v53  ;;  %v416_v6 = vadd.f32 1.0, %v400_v63 }
  0x47   : > { %vm410_vm3 = vcmp.ge.f32.partialorder %v406_v1, %v9588_v8  ;;  %v422_v7 = vsub.f32 %v406_v1, %v9588_v8  ;;  %vm412_vm4 = vcmp.ge.f32.partialorder %v408_v5, %v9588_v8  ;;  %v424_v9 = vsub.f32 %v408_v5, %v9588_v8 }
  0x48   : > { %746 = vperm.xlu1 %8933, %v620_v60   ;;  %741 = vperm.xlu0 %8932, %v619_v61   ;;  %v418_v10 = vsel %vm410_vm3, %v414_v4, %v398_v62  ;;  %v420_v12 = vsel %vm412_vm4, %v416_v6, %v400_v63  ;;  %v397_v13 = vsel %vm389_vm2, %v7945_v56, %v377_v35  ;;  %v7947_v59 = vadd.f32 -1.0, %v9633_v39  ;;  %v625_v60 = vld [vmem:[%s12250_s2 + $0xa0] sm:$0xff]  ;;  %v628_v4 = vld [vmem:[%s12250_s2 + $0xb8] sm:$0xff] }
  0x49   : > { %v426_v16 = vsel %vm410_vm3, %v422_v7, %v406_v1  ;;  %v438_v17 = vmul.f32 %v9629_v37, %v418_v10  ;;  %v460_v18 = vmul.f32 %v9646_v44, %v418_v10  ;;  %v482_v19 = vmul.f32 %v9661_v54, %v418_v10 }
  0x4a   : > { %v432_v20 = vmul.f32 %v9627_v36, %v426_v16  ;;  %v454_v21 = vmul.f32 %v9643_v43, %v426_v16  ;;  %v476_v22 = vmul.f32 %v9658_v52, %v426_v16  ;;  %v428_v23 = vsel %vm412_vm4, %v424_v9, %v408_v5  ;;  %v627_v5 = vld [vmem:[%s12250_s2 + $0xb0] sm:$0xff] }
  0x4b   : > { %v434_v24 = vmul.f32 %v9627_v36, %v428_v23  ;;  %v440_v25 = vmul.f32 %v9629_v37, %v420_v12  ;;  %v456_v26 = vmul.f32 %v9643_v43, %v428_v23  ;;  %v462_v27 = vmul.f32 %v9646_v44, %v420_v12 }
  0x4c   : > { %756 = vperm.xlu1 %8933, %v622_v14   ;;  %751 = vperm.xlu0 %8932, %v621_v15   ;;  %v442_v29 = vadd.f32 %v438_v17, %v432_v20  ;;  %v464_v30 = vadd.f32 %v460_v18, %v454_v21  ;;  %v486_v31 = vadd.f32 %v482_v19, %v476_v22  ;;  %v413_v32 = vadd.f32 1.0, %v397_v13 }
  0x4d   : > { %v444_v34 = vadd.f32 %v440_v25, %v434_v24  ;;  %v466_v35 = vadd.f32 %v462_v27, %v456_v26  ;;  %v478_v40 = vmul.f32 %v9658_v52, %v428_v23  ;;  %v484_v41 = vmul.f32 %v9661_v54, %v420_v12 }
  0x4e   : > { %v448_v42 = vadd.f32 %v9631_v38, %v442_v29  ;;  %v470_v45 = vadd.f32 %v9655_v51, %v464_v30  ;;  %v9713_v46 = vadd.f32 %v9679_v11, %v486_v31  ;;  %v405_v47 = vsel %vm389_vm2, %v401_v0, %v385_v55  ;;  %v626_v55 = vld [vmem:[%s12250_s2 + $0xa8] sm:$0xff] }
  0x4f   : > { %v9717_v48 = vadd.f32 %v9631_v38, %v444_v34  ;;  %v9720_v49 = vadd.f32 %v9655_v51, %v466_v35  ;;  %v488_v50 = vadd.f32 %v484_v41, %v478_v40  ;;  %vm409_vm5 = vcmp.ge.f32.partialorder %v405_v47, %v9588_v8  ;;  %v631_v34 = vld [vmem:[%s12250_s2 + $0xd0] sm:$0xff] }
  0x50   : > { %766 = vperm.xlu1 %8933, %v624_v28   ;;  %761 = vperm.xlu0 %8932, %v623_v33   ;;  %v496_v53 = vmul.f32 %v448_v42, %v448_v42  ;;  %v500_v56 = vmul.f32 %v470_v45, %v470_v45  ;;  %v508_v58 = vmul.f32 %v9713_v46, %v9713_v46  ;;  %vm391_vm7 = vcmp.lt.f32.partialorder %v9663_v57, 0.0  ;;  %v629_v28 = vld [vmem:[%s12250_s2 + $0xc0] sm:$0xff]  ;;  %v632_v33 = vld [vmem:[%s12250_s2 + $0xd8] sm:$0xff] }
  0x51   : > { %v9733_v61 = vadd.f32 %v9679_v11, %v488_v50  ;;  %v498_v62 = vmul.f32 %v9717_v48, %v9717_v48  ;;  %v502_v63 = vmul.f32 %v9720_v49, %v9720_v49  ;;  %v417_v1 = vsel %vm409_vm5, %v413_v32, %v397_v13 }
  0x52   : > { %v504_v0 = vadd.f32 %v500_v56, %v496_v53  ;;  %v421_v9 = vsub.f32 %v405_v47, %v9588_v8  ;;  %v437_v12 = vmul.f32 %v9629_v37, %v417_v1  ;;  %v459_v13 = vmul.f32 %v9646_v44, %v417_v1 }
  0x53   : > { %v506_v6 = vadd.f32 %v502_v63, %v498_v62  ;;  %v510_v7 = vmul.f32 %v9733_v61, %v9733_v61  ;;  %v481_v16 = vmul.f32 %v9661_v54, %v417_v1  ;;  %v399_v17 = vsel %vm391_vm7, %v7947_v59, %v9633_v39  ;;  %v630_v39 = vld [vmem:[%s12250_s2 + $0xc8] sm:$0xff] }
  0x54   : > { %776 = vperm.xlu1 %8933, %v626_v55   ;;  %771 = vperm.xlu0 %8932, %v625_v60   ;;  %v512_v10 = vadd.f32 %v508_v58, %v504_v0  ;;  %v425_v15 = vsel %vm409_vm5, %v421_v9, %v405_v47  ;;  %v403_v23 = vadd.f32 %v9663_v57, %v9588_v8  ;;  %v415_v24 = vadd.f32 1.0, %v399_v17 }
  0x55   : > { %v514_v14 = vadd.f32 %v510_v7, %v506_v6  ;;  %v431_v19 = vmul.f32 %v9627_v36, %v425_v15  ;;  %v453_v20 = vmul.f32 %v9643_v43, %v425_v15  ;;  %v475_v21 = vmul.f32 %v9658_v52, %v425_v15  ;;  %v636_v6 = vld [vmem:[%s12250_s2 + $0xf8] sm:$0xff]  ;;  %v635_v7 = vld [vmem:[%s12250_s2 + $0xf0] sm:$0xff] }
  0x56   : > { %v516_v18 = vadd.f32 1e-12, %v512_v10  ;;  %v407_v29 = vsel %vm391_vm7, %v403_v23, %v9663_v57  ;;  %v525_v35 = vsel %vm523_vm6, %v448_v42, %v470_v45  ;;  %v527_v59 = vsel %vm523_vm6, %v9717_v48, %v9720_v49  ;;  %v640_v23 = vld [vmem:[%s12250_s2 + $0x118] sm:$0xff] }
  0x57   : > { %v518_v22 = vadd.f32 1e-12, %v514_v14  ;;  %v441_v25 = vadd.f32 %v437_v12, %v431_v19  ;;  %v463_v26 = vadd.f32 %v459_v13, %v453_v20  ;;  %v485_v27 = vadd.f32 %v481_v16, %v475_v21  ;;  %v638_v20 = vld [vmem:[%s12250_s2 + $0x108] sm:$0xff]  ;;  %v637_v21 = vld [vmem:[%s12250_s2 + $0x100] sm:$0xff] }
  0x58   : > { %786 = vperm.xlu1 %8933, %v628_v4   ;;  %781 = vperm.xlu0 %8932, %v627_v5   ;;  %9210 = vrsqrt.f32 %v516_v18  ;;  %vm411_vm9 = vcmp.ge.f32.partialorder %v407_v29, %v9588_v8  ;;  %v423_v40 = vsub.f32 %v407_v29, %v9588_v8  ;;  %v530_v55 = vsel %vm528_vm8, %v525_v35, %v9713_v46  ;;  %v643_v35 = vld [vmem:[%s12250_s2 + $0x130] sm:$0xff] }
  0x59   : > { %9212 = vrsqrt.f32 %v518_v22  ;;  %v447_v30 = vadd.f32 %v9631_v38, %v441_v25  ;;  %v469_v31 = vadd.f32 %v9655_v51, %v463_v26  ;;  %v9776_v32 = vadd.f32 %v9679_v11, %v485_v27 }
  0x5a   : > { %v419_v57 = vsel %vm411_vm9, %v415_v24, %v399_v17  ;;  %v427_v53 = vsel %vm411_vm9, %v423_v40, %v407_v29  ;;  %v639_v24 = vld [vmem:[%s12250_s2 + $0x110] sm:$0xff]  ;;  %v642_v29 = vld [vmem:[%s12250_s2 + $0x128] sm:$0xff] }
  0x5b   : > { %v495_v41 = vmul.f32 %v447_v30, %v447_v30  ;;  %v499_v47 = vmul.f32 %v469_v31, %v469_v31  ;;  %v507_v50 = vmul.f32 %v9776_v32, %v9776_v32  ;;  %v439_v56 = vmul.f32 %v9629_v37, %v419_v57 }
  0x5c   : > { %796 = vperm.xlu1 %8933, %v630_v39   ;;  %791 = vperm.xlu0 %8932, %v629_v28   ;;  %v461_v58 = vmul.f32 %v9646_v44, %v419_v57  ;;  %v433_v45 = vmul.f32 %v9627_v36, %v427_v53  ;;  %v455_v8 = vmul.f32 %v9643_v43, %v427_v53  ;;  %v9447_v37 = vmov 65535   ;;  %v634_v36 = vld [vmem:[%s12250_s2 + $0xe8] sm:$0xff]  ;;  %v633_v43 = vld [vmem:[%s12250_s2 + $0xe0] sm:$0xff] }
  0x5d   : > { %v503_v42 = vadd.f32 %v499_v47, %v495_v41  ;;  %v477_v60 = vmul.f32 %v9658_v52, %v427_v53  ;;  %v483_v62 = vmul.f32 %v9661_v54, %v419_v57  ;;  %v1246_v44 = vsel %vm523_vm6, 4294967295, %v9447_v37  ;;  %v646_v47 = vld [vmem:[%s12250_s2 + $0x148] sm:$0xff]  ;;  %v653_v37 = vld [vmem:[%s12250_s2 + $0x180] sm:$0xff] }
  0x5e   : > { %v443_v0 = vadd.f32 %v439_v56, %v433_v45  ;;  %v465_v48 = vadd.f32 %v461_v58, %v455_v8  ;;  %v532_v52 = vsel %vm528_vm8, %v527_v59, %v9733_v61  ;;  %v1247_v10 = vsel %vm528_vm8, %v1246_v44, 0  ;;  %v8935_v53 = vld [vmem:[%s12249_s1 + $0x8] sm:$0xff]   ;;  %v648_v58 = vld [vmem:[%s12250_s2 + $0x158] sm:$0xff]  ;;  %v647_v59 = vld [vmem:[%s12250_s2 + $0x150] sm:$0xff] }
  0x5f   : > { %v511_v63 = vadd.f32 %v507_v50, %v503_v42  ;;  %v487_v54 = vadd.f32 %v483_v62, %v477_v60  ;;  %v645_v50 = vld [vmem:[%s12250_s2 + $0x140] sm:$0xff]  ;;  %v650_v42 = vld [vmem:[%s12250_s2 + $0x168] sm:$0xff]  ;;  %v8936_v8 = vld [vmem:[%s12249_s1 + $0x10] sm:$0xff]  }
  0x60   : > { %806 = vperm.xlu1 %8933, %v632_v33   ;;  %801 = vperm.xlu0 %8932, %v631_v34   ;;  %v449_v1 = vadd.f32 %v9631_v38, %v443_v0  ;;  %v471_v4 = vadd.f32 %v9655_v51, %v465_v48  ;;  %v644_v33 = vld [vmem:[%s12250_s2 + $0x138] sm:$0xff]  ;;  %v649_v45 = vld [vmem:[%s12250_s2 + $0x160] sm:$0xff]  ;;  %v651_v60 = vld [vmem:[%s12250_s2 + $0x170] sm:$0xff] }
  0x61   : > { %v515_v49 = vadd.f32 1e-12, %v511_v63  ;;  %v493_v61 = vadd.f32 %v9679_v11, %v487_v54  ;;  %v524_v11 = vsel %vm523_vm6, %v447_v30, %v469_v31  ;;  %v641_v30 = vld [vmem:[%s12250_s2 + $0x120] sm:$0xff]  ;;  %v654_v62 = vld [vmem:[%s12250_s2 + $0x188] sm:$0xff]  ;;  %v8937_v44 = vld [vmem:[%s12249_s1 + $0x18] sm:$0xff]  }
  0x62   : > { %v9211_v46 = vpop.eup %9210  ;;  %v497_v38 = vmul.f32 %v449_v1, %v449_v1  ;;  %v501_v51 = vmul.f32 %v471_v4, %v471_v4  ;;  %v529_v25 = vsel %vm528_vm8, %v524_v11, %v9776_v32  ;;  %v526_v28 = vsel %vm523_vm6, %v449_v1, %v471_v4  ;;  %v8934_v31 = vld [vmem:[%s12249_s1] sm:$0xff]   ;;  %v656_v63 = vld [vmem:[%s12250_s2 + $0x198] sm:$0xff]  ;;  %v655_v0 = vld [vmem:[%s12250_s2 + $0x190] sm:$0xff] }
  0x63   : > { %v9213_v5 = vpop.eup %9212  ;;  %v534_v9 = vmul.f32 %v9211_v46, %v530_v55  ;;  %9214 = vrsqrt.f32 %v515_v49  ;;  %v509_v14 = vmul.f32 %v493_v61, %v493_v61  ;;  %v531_v34 = vsel %vm528_vm8, %v526_v28, %v493_v61  ;;  %v652_v55 = vld [vmem:[%s12250_s2 + $0x178] sm:$0xff]  ;;  %v658_v48 = vld [vmem:[%s12250_s2 + $0x1a8] sm:$0xff]  ;;  %v659_v54 = vld [vmem:[%s12250_s2 + $0x1b0] sm:$0xff] }
  0x64   : > { %816 = vperm.xlu1 %8933, %v634_v36   ;;  %811 = vperm.xlu0 %8932, %v633_v43   ;;  %v536_v12 = vmul.f32 %v9213_v5, %v532_v52  ;;  %v505_v16 = vadd.f32 %v501_v51, %v497_v38  ;;  %v657_v36 = vld [vmem:[%s12250_s2 + $0x1a0] sm:$0xff]  ;;  %v660_v52 = vld [vmem:[%s12250_s2 + $0x1b8] sm:$0xff]  ;;  %v662_v46 = vld [vmem:[%s12250_s2 + $0x1c8] sm:$0xff] }
  0x65   : > { %v538_v13 = vpack.c.bf16 %v534_v9, %v534_v9  ;;  %v8938_v43 = vld [vmem:[%s12249_s1 + $0x20] sm:$0xff]   ;;  %v8939_v1 = vld [vmem:[%s12249_s1 + $0x28] sm:$0xff]   ;;  %v664_v4 = vld [vmem:[%s12250_s2 + $0x1d8] sm:$0xff] }
  0x66   : > { %v540_v15 = vpack.c.bf16 %v536_v12, %v536_v12  ;;  %v513_v19 = vadd.f32 %v509_v14, %v505_v16  ;;  %v661_v49 = vld [vmem:[%s12250_s2 + $0x1c0] sm:$0xff]  ;;  %v663_v5 = vld [vmem:[%s12250_s2 + $0x1d0] sm:$0xff]  ;;  %v2415_v12 = vld [vmem:[%s12252_s4 + $0x8] sm:$0xff] }
  0x67   : > { %v9819_v17 = vand.u32 %v1247_v10, %v538_v13  ;;  %v8940_v9 = vld [vmem:[%s12249_s1 + $0x30] sm:$0xff]   ;;  %v2414_v38 = vld [vmem:[%s12252_s4] sm:$0xff]  ;;  %v8941_v51 = vld [vmem:[%s12249_s1 + $0x38] sm:$0xff]  }
  0x68   : > { %826 = vperm.xlu1 %8933, %v636_v6   ;;  %821 = vperm.xlu0 %8932, %v635_v7   ;;  %v9821_v18 = vand.u32 %v1247_v10, %v540_v15  ;;  %v517_v22 = vadd.f32 1e-12, %v513_v19  ;;  %v666_v6 = vld [vmem:[%s12250_s2 + $0x1e8] sm:$0xff]  ;;  %v665_v7 = vld [vmem:[%s12250_s2 + $0x1e0] sm:$0xff]  ;;  %v667_v61 = vld [vmem:[%s12250_s2 + $0x1f0] sm:$0xff] }
  0x69   : > { %12306 = vst [vmem:[#allocation9_spill] sm:$0xff] %v9819_v17  ;;  %1260 = vmatprep.subr.bf16.mxu0 %v9819_v17  ;;  %v2417_v15 = vld [vmem:[%s12252_s4 + $0x18] sm:$0xff]  ;;  %v2416_v16 = vld [vmem:[%s12252_s4 + $0x10] sm:$0xff]  ;;  %v2422_v28 = vld [vmem:[%s12252_s4 + $0x40] sm:$0xff] }
  0x6a   : > { %12307 = vst [vmem:[#allocation10_spill] sm:$0xff] %v9821_v18  ;;  %1613 = vmatprep.subr.bf16.mxu1 %v9821_v18  ;;  %9216 = vrsqrt.f32 %v517_v22  ;;  %v8942_v22 = vld [vmem:[%s12249_s1 + $0x40] sm:$0xff]   ;;  %v5927_v18 = vld [vmem:[%s12255_s7 + $0x188] sm:$0xff] }
  0x6c   : > { %836 = vperm.xlu1 %8933, %v638_v20   ;;  %831 = vperm.xlu0 %8932, %v637_v21   ;;  %v2419_v20 = vld [vmem:[%s12252_s4 + $0x28] sm:$0xff]  ;;  %v2418_v21 = vld [vmem:[%s12252_s4 + $0x20] sm:$0xff] }
  0x6d   : > { %v9215_v26 = vpop.eup %9214 }
  0x6e   : > { %v533_v27 = vmul.f32 %v9215_v26, %v529_v25  ;;  %v2421_v25 = vld [vmem:[%s12252_s4 + $0x38] sm:$0xff]  ;;  %v2420_v26 = vld [vmem:[%s12252_s4 + $0x30] sm:$0xff] }
  0x70   : > { %846 = vperm.xlu1 %8933, %v640_v23   ;;  %841 = vperm.xlu0 %8932, %v639_v24   ;;  %v537_v39 = vpack.c.bf16 %v533_v27, %v533_v27 }
  0x72   : > { %v9850_v32 = vand.u32 %v1247_v10, %v537_v39  ;;  %v2423_v39 = vld [vmem:[%s12252_s4 + $0x48] sm:$0xff] }
  0x74   : > { %12308 = vst [vmem:[#allocation11_spill] sm:$0xff] %v9850_v32  ;;  %856 = vperm.xlu1 %8933, %v642_v29   ;;  %851 = vperm.xlu0 %8932, %v641_v30   ;;  %v9217_v57 = vpop.eup %9216  ;;  %v8943_v29 = vld [vmem:[%s12249_s1 + $0x48] sm:$0xff]  }
  0x75   : > { %1261 = vmatpush1.bf16.msra.mxu0 %v9850_v32  ;;  %v535_v40 = vmul.f32 %v9217_v57, %v531_v34  ;;  %v2427_v57 = vld [vmem:[%s12252_s4 + $0x68] sm:$0xff]  ;;  %v5926_v32 = vld [vmem:[%s12255_s7 + $0x180] sm:$0xff] }
  0x77   : > { %v539_v41 = vpack.c.bf16 %v535_v40, %v535_v40  ;;  %v2426_v40 = vld [vmem:[%s12252_s4 + $0x60] sm:$0xff] }
  0x78   : > { %7990 = vmatmul.mubr.msk.bf16.vlgmr.msra.gmra.mrb[0].mxu0 %vm1149_vm10, %v8934_v31  ;;  %866 = vperm.xlu1 %8933, %v644_v33   ;;  %v2424_v33 = vld [vmem:[%s12252_s4 + $0x50] sm:$0xff] }
  0x79   : > { %1302 = vmatprep.mubr.bf16.mxu0 %v12266_v3  ;;  %861 = vperm.xlu0 %8932, %v643_v35   ;;  %v9871_v56 = vand.u32 %v1247_v10, %v539_v41  ;;  %v668_v10 = vld [vmem:[%s12250_s2 + $0x1f8] sm:$0xff]  ;;  %v8944_v41 = vld [vmem:[%s12249_s1 + $0x50] sm:$0xff]  }
  0x7b   : > { %12309 = vst [vmem:[#allocation12_spill] sm:$0xff] %v9871_v56  ;;  %1614 = vmatpush1.bf16.msra.mxu1 %v9871_v56 }
  0x7c   : > { %876 = vperm.xlu1 %8933, %v646_v47  }
  0x7d   : > { %871 = vperm.xlu0 %8932, %v645_v50   ;;  %v2429_v50 = vld [vmem:[%s12252_s4 + $0x78] sm:$0xff] }
  0x7e   : > { %8022 = vmatmul.mubr.msk.bf16.vlgmr.msra.gmra.mrb[0].mxu1 %vm1149_vm10, %v8934_v31  ;;  %v2425_v31 = vld [vmem:[%s12252_s4 + $0x58] sm:$0xff] }
  0x7f   : > { %1655 = vmatprep.mubr.bf16.mxu1 %v12266_v3 }
  0x80   : > { %7991 = vmatmul.mubr.msk.bf16.gmra.mrb[4].mxu0 %vm1149_vm10, %v8935_v53  ;;  %886 = vperm.xlu1 %8933, %v648_v58  }
  0x81   : > { %1312 = vmatprep.mubr.bf16.mxu0 %v12266_v3  ;;  %881 = vperm.xlu0 %8932, %v647_v59   ;;  %v2431_v59 = vld [vmem:[%s12252_s4 + $0x88] sm:$0xff] }
  0x84   : > { %896 = vperm.xlu1 %8933, %v650_v42   ;;  %v2430_v42 = vld [vmem:[%s12252_s4 + $0x80] sm:$0xff] }
  0x85   : > { %891 = vperm.xlu0 %8932, %v649_v45   ;;  %v8945_v45 = vld [vmem:[%s12249_s1 + $0x58] sm:$0xff]  }
  0x86   : > { %8023 = vmatmul.mubr.msk.bf16.gmra.mrb[4].mxu1 %vm1149_vm10, %v8935_v53  ;;  %v2428_v53 = vld [vmem:[%s12252_s4 + $0x70] sm:$0xff] }
  0x87   : > { %1665 = vmatprep.mubr.bf16.mxu1 %v12266_v3 }
  0x88   : > { %7992 = vmatmul.mubr.msk.bf16.gmra.mrb[8].mxu0 %vm1149_vm10, %v8936_v8  ;;  %906 = vperm.xlu1 %8933, %v652_v55  }
  0x89   : > { %1322 = vmatprep.mubr.bf16.mxu0 %v12266_v3  ;;  %901 = vperm.xlu0 %8932, %v651_v60   ;;  %v2433_v60 = vld [vmem:[%s12252_s4 + $0x98] sm:$0xff] }
  0x8c   : > { %916 = vperm.xlu1 %8933, %v654_v62   ;;  %v2432_v62 = vld [vmem:[%s12252_s4 + $0x90] sm:$0xff] }
  0x8d   : > { %911 = vperm.xlu0 %8932, %v653_v37  }
  0x8e   : > { %8024 = vmatmul.mubr.msk.bf16.gmra.mrb[8].mxu1 %vm1149_vm10, %v8936_v8 }
  0x8f   : > { %1675 = vmatprep.mubr.bf16.mxu1 %v12266_v3 }
  0x90   : > { %7993 = vmatmul.mubr.msk.bf16.gmra.mrb[12].mxu0 %vm1149_vm10, %v8937_v44  ;;  %926 = vperm.xlu1 %8933, %v656_v63   ;;  %v2434_v63 = vld [vmem:[%s12252_s4 + $0xa0] sm:$0xff] }
  0x91   : > { %1332 = vmatprep.mubr.bf16.mxu0 %v12266_v3  ;;  %921 = vperm.xlu0 %8932, %v655_v0  }
  0x94   : > { %936 = vperm.xlu1 %8933, %v658_v48   ;;  %v8946_v48 = vld [vmem:[%s12249_s1 + $0x60] sm:$0xff]  }
  0x95   : > { %931 = vperm.xlu0 %8932, %v657_v36   ;;  %v2437_v36 = vld [vmem:[%s12252_s4 + $0xb8] sm:$0xff] }
  0x96   : > { %8025 = vmatmul.mubr.msk.bf16.gmra.mrb[12].mxu1 %vm1149_vm10, %v8937_v44  ;;  %v2435_v44 = vld [vmem:[%s12252_s4 + $0xa8] sm:$0xff] }
  0x97   : > { %1685 = vmatprep.mubr.bf16.mxu1 %v12266_v3 }
  0x98   : > { %7994 = vmatmul.mubr.msk.bf16.gmra.mrb[16].mxu0 %vm1149_vm10, %v8938_v43  ;;  %946 = vperm.xlu1 %8933, %v660_v52  }
  0x99   : > { %1342 = vmatprep.mubr.bf16.mxu0 %v12266_v3  ;;  %941 = vperm.xlu0 %8932, %v659_v54  }
  0x9c   : > { %956 = vperm.xlu1 %8933, %v662_v46   ;;  %v2439_v46 = vld [vmem:[%s12252_s4 + $0xc8] sm:$0xff] }
  0x9d   : > { %951 = vperm.xlu0 %8932, %v661_v49   ;;  %v2438_v49 = vld [vmem:[%s12252_s4 + $0xc0] sm:$0xff] }
  0x9e   : > { %8026 = vmatmul.mubr.msk.bf16.gmra.mrb[16].mxu1 %vm1149_vm10, %v8938_v43  ;;  %v2436_v43 = vld [vmem:[%s12252_s4 + $0xb0] sm:$0xff] }
  0x9f   : > { %1695 = vmatprep.mubr.bf16.mxu1 %v12266_v3 }
  0xa0   : > { %7995 = vmatmul.mubr.msk.bf16.gmra.mrb[20].mxu0 %vm1149_vm10, %v8939_v1  ;;  %966 = vperm.xlu1 %8933, %v664_v4  }
  0xa1   : > { %1352 = vmatprep.mubr.bf16.mxu0 %v12266_v3  ;;  %961 = vperm.xlu0 %8932, %v663_v5   ;;  %v2441_v5 = vld [vmem:[%s12252_s4 + $0xd8] sm:$0xff] }
  0xa4   : > { %976 = vperm.xlu1 %8933, %v666_v6   ;;  %v2440_v6 = vld [vmem:[%s12252_s4 + $0xd0] sm:$0xff] }
  0xa5   : > { %971 = vperm.xlu0 %8932, %v665_v7  }
  0xa6   : > { %8027 = vmatmul.mubr.msk.bf16.gmra.mrb[20].mxu1 %vm1149_vm10, %v8939_v1  ;;  %v8947_v1 = vld [vmem:[%s12249_s1 + $0x68] sm:$0xff]  }
  0xa7   : > { %1705 = vmatprep.mubr.bf16.mxu1 %v12266_v3 }
  0xa8   : > { %7996 = vmatmul.mubr.msk.bf16.gmra.mrb[24].mxu0 %vm1149_vm10, %v8940_v9  ;;  %986 = vperm.xlu1 %8933, %v668_v10   ;;  %v2442_v10 = vld [vmem:[%s12252_s4 + $0xe0] sm:$0xff] }
  0xa9   : > { %1362 = vmatprep.mubr.bf16.mxu0 %v12266_v3  ;;  %981 = vperm.xlu0 %8932, %v667_v61   ;;  %v8948_v61 = vld [vmem:[%s12249_s1 + $0x70] sm:$0xff]  }
  0xab   : > { %v9988_v13 = vpop.permute.xlu1 %681  ;;  %v9990_v14 = vpop.permute.xlu0 %671 }
  0xac   : > { %2453 = vperm.xlu1 %8933, %v2415_v12  }
  0xad   : > { %2448 = vperm.xlu0 %8932, %v2414_v38  }
  0xae   : > { %8028 = vmatmul.mubr.msk.bf16.gmra.mrb[24].mxu1 %vm1149_vm10, %v8940_v9  ;;  %v2443_v9 = vld [vmem:[%s12252_s4 + $0xe8] sm:$0xff] }
  0xaf   : > { %v9998_v19 = vpop.permute.xlu1 %686  ;;  %v10002_v11 = vpop.permute.xlu0 %676  ;;  %1715 = vmatprep.mubr.bf16.mxu1 %v12266_v3 }
  0xb0   : > { %7997 = vmatmul.mubr.msk.bf16.gmra.mrb[28].mxu0 %vm1149_vm10, %v8941_v51  ;;  %2463 = vperm.xlu1 %8933, %v2417_v15   ;;  %v2444_v15 = vld [vmem:[%s12252_s4 + $0xf0] sm:$0xff] }
  0xb1   : > { %1372 = vmatprep.mubr.bf16.mxu0 %v12266_v3  ;;  %2458 = vperm.xlu0 %8932, %v2416_v16  }
  0xb3   : > { %v10015_v23 = vpop.permute.xlu1 %696  ;;  %v10017_v24 = vpop.permute.xlu0 %691 }
  0xb4   : > { %2473 = vperm.xlu1 %8933, %v2419_v20   ;;  %v5879_v20 = vld [vmem:[%s12255_s7 + $0x8] sm:$0xff] }
  0xb5   : > { %2468 = vperm.xlu0 %8932, %v2418_v21   ;;  %v5878_v21 = vld [vmem:[%s12255_s7] sm:$0xff] }
  0xb6   : > { %8029 = vmatmul.mubr.msk.bf16.gmra.mrb[28].mxu1 %vm1149_vm10, %v8941_v51  ;;  %v2445_v51 = vld [vmem:[%s12252_s4 + $0xf8] sm:$0xff] }
  0xb7   : > { %1725 = vmatprep.mubr.bf16.mxu1 %v12266_v3  ;;  %v10029_v27 = vpop.permute.xlu1 %706  ;;  %v10040_v30 = vpop.permute.xlu0 %701 }
  0xb8   : > { %7998 = vmatmul.mubr.msk.bf16.gmra.mrb[32].mxu0 %vm1149_vm10, %v8942_v22  ;;  %2483 = vperm.xlu1 %8933, %v2421_v25   ;;  %v8949_v25 = vld [vmem:[%s12249_s1 + $0x78] sm:$0xff]  }
  0xb9   : > { %1382 = vmatprep.mubr.bf16.mxu0 %v12266_v3  ;;  %2478 = vperm.xlu0 %8932, %v2420_v26   ;;  %v5881_v26 = vld [vmem:[%s12255_s7 + $0x18] sm:$0xff] }
  0xbb   : > { %v10051_v34 = vpop.permute.xlu1 %716  ;;  %v10054_v35 = vpop.permute.xlu0 %711 }
  0xbc   : > { %2493 = vperm.xlu1 %8933, %v2423_v39   ;;  %v5880_v39 = vld [vmem:[%s12255_s7 + $0x10] sm:$0xff] }
  0xbd   : > { %2488 = vperm.xlu0 %8932, %v2422_v28  }
  0xbe   : > { %8030 = vmatmul.mubr.msk.bf16.gmra.mrb[32].mxu1 %vm1149_vm10, %v8942_v22 }
  0xbf   : > { %1735 = vmatprep.mubr.bf16.mxu1 %v12266_v3  ;;  %v10065_v47 = vpop.permute.xlu1 %726  ;;  %v10075_v58 = vpop.permute.xlu0 %721 }
  0xc0   : > { %7999 = vmatmul.mubr.msk.bf16.gmra.mrb[36].mxu0 %vm1149_vm10, %v8943_v29  ;;  %2503 = vperm.xlu1 %8933, %v2425_v31   ;;  %v5883_v31 = vld [vmem:[%s12255_s7 + $0x28] sm:$0xff] }
  0xc1   : > { %1392 = vmatprep.mubr.bf16.mxu0 %v12266_v3  ;;  %2498 = vperm.xlu0 %8932, %v2424_v33   ;;  %v5882_v33 = vld [vmem:[%s12255_s7 + $0x20] sm:$0xff] }
  0xc3   : > { %v10088_v8 = vpop.permute.xlu1 %736  ;;  %v10090_v55 = vpop.permute.xlu0 %731 }
  0xc4   : > { %2513 = vperm.xlu1 %8933, %v2427_v57   ;;  %v8950_v57 = vld [vmem:[%s12249_s1 + $0x80] sm:$0xff]  }
  0xc5   : > { %2508 = vperm.xlu0 %8932, %v2426_v40  }
  0xc6   : > { %8031 = vmatmul.mubr.msk.bf16.gmra.mrb[36].mxu1 %vm1149_vm10, %v8943_v29 }
  0xc7   : > { %1745 = vmatprep.mubr.bf16.mxu1 %v12266_v3  ;;  %v10102_v37 = vpop.permute.xlu1 %746  ;;  %v10110_v0 = vpop.permute.xlu0 %741 }
  0xc8   : > { %8000 = vmatmul.mubr.msk.bf16.gmra.mrb[40].mxu0 %vm1149_vm10, %v8944_v41  ;;  %2523 = vperm.xlu1 %8933, %v2429_v50   ;;  %v5884_v50 = vld [vmem:[%s12255_s7 + $0x30] sm:$0xff] }
  0xc9   : > { %1402 = vmatprep.mubr.bf16.mxu0 %v12266_v3  ;;  %2518 = vperm.xlu0 %8932, %v2428_v53  }
  0xcb   : > { %v10123_v52 = vpop.permute.xlu1 %756  ;;  %v10127_v54 = vpop.permute.xlu0 %751 }
  0xcc   : > { %2533 = vperm.xlu1 %8933, %v2431_v59   ;;  %v5887_v59 = vld [vmem:[%s12255_s7 + $0x48] sm:$0xff] }
  0xcd   : > { %2528 = vperm.xlu0 %8932, %v2430_v42   ;;  %v5886_v42 = vld [vmem:[%s12255_s7 + $0x40] sm:$0xff] }
  0xce   : > { %8032 = vmatmul.mubr.msk.bf16.gmra.mrb[40].mxu1 %vm1149_vm10, %v8944_v41  ;;  %v5885_v41 = vld [vmem:[%s12255_s7 + $0x38] sm:$0xff] }
  0xcf   : > { %1755 = vmatprep.mubr.bf16.mxu1 %v12266_v3  ;;  %v10138_v4 = vpop.permute.xlu1 %766  ;;  %v10147_v7 = vpop.permute.xlu0 %761 }
  0xd0   : > { %8001 = vmatmul.mubr.msk.bf16.gmra.mrb[44].mxu0 %vm1149_vm10, %v8945_v45  ;;  %2543 = vperm.xlu1 %8933, %v2433_v60  }
  0xd1   : > { %1412 = vmatprep.mubr.bf16.mxu0 %v12266_v3  ;;  %2538 = vperm.xlu0 %8932, %v2432_v62  }
  0xd3   : > { %v10161_v12 = vpop.permute.xlu1 %776  ;;  %v10163_v38 = vpop.permute.xlu0 %771 }
  0xd4   : > { %2553 = vperm.xlu1 %8933, %v2435_v44   ;;  %v5889_v44 = vld [vmem:[%s12255_s7 + $0x58] sm:$0xff] }
  0xd5   : > { %2548 = vperm.xlu0 %8932, %v2434_v63   ;;  %v5888_v63 = vld [vmem:[%s12255_s7 + $0x50] sm:$0xff] }
  0xd6   : > { %8033 = vmatmul.mubr.msk.bf16.gmra.mrb[44].mxu1 %vm1149_vm10, %v8945_v45  ;;  %v8951_v45 = vld [vmem:[%s12249_s1 + $0x88] sm:$0xff]  }
  0xd7   : > { %1765 = vmatprep.mubr.bf16.mxu1 %v12266_v3  ;;  %v10175_v16 = vpop.permute.xlu1 %786  ;;  %v10183_v22 = vpop.permute.xlu0 %781 }
  0xd8   : > { %8002 = vmatmul.mubr.msk.bf16.gmra.mrb[48].mxu0 %vm1149_vm10, %v8946_v48  ;;  %2563 = vperm.xlu1 %8933, %v2437_v36   ;;  %v5891_v36 = vld [vmem:[%s12255_s7 + $0x68] sm:$0xff] }
  0xd9   : > { %1422 = vmatprep.mubr.bf16.mxu0 %v12266_v3  ;;  %2558 = vperm.xlu0 %8932, %v2436_v43   ;;  %v5890_v43 = vld [vmem:[%s12255_s7 + $0x60] sm:$0xff] }
  0xdb   : > { %v10196_v28 = vpop.permute.xlu1 %796  ;;  %v10200_v29 = vpop.permute.xlu0 %791 }
  0xdc   : > { %2573 = vperm.xlu1 %8933, %v2439_v46  }
  0xdd   : > { %2568 = vperm.xlu0 %8932, %v2438_v49   ;;  %v8952_v49 = vld [vmem:[%s12249_s1 + $0x90] sm:$0xff]  }
  0xde   : > { %8034 = vmatmul.mubr.msk.bf16.gmra.mrb[48].mxu1 %vm1149_vm10, %v8946_v48 }
  0xdf   : > { %1775 = vmatprep.mubr.bf16.mxu1 %v12266_v3  ;;  %v10211_v40 = vpop.permute.xlu1 %806  ;;  %v10219_v53 = vpop.permute.xlu0 %801 }
  0xe0   : > { %8003 = vmatmul.mubr.msk.bf16.gmra.mrb[52].mxu0 %vm1149_vm10, %v8947_v1  ;;  %2583 = vperm.xlu1 %8933, %v2441_v5   ;;  %v5892_v5 = vld [vmem:[%s12255_s7 + $0x70] sm:$0xff] }
  0xe1   : > { %1432 = vmatprep.mubr.bf16.mxu0 %v12266_v3  ;;  %2578 = vperm.xlu0 %8932, %v2440_v6  }
  0xe3   : > { %v10234_v60 = vpop.permute.xlu1 %816  ;;  %v10236_v62 = vpop.permute.xlu0 %811 }
  0xe4   : > { %2593 = vperm.xlu1 %8933, %v2443_v9  }
  0xe5   : > { %2588 = vperm.xlu0 %8932, %v2442_v10   ;;  %v5895_v10 = vld [vmem:[%s12255_s7 + $0x88] sm:$0xff] }
  0xe6   : > { %8035 = vmatmul.mubr.msk.bf16.gmra.mrb[52].mxu1 %vm1149_vm10, %v8947_v1  ;;  %v5893_v1 = vld [vmem:[%s12255_s7 + $0x78] sm:$0xff] }
  0xe7   : > { %1785 = vmatprep.mubr.bf16.mxu1 %v12266_v3  ;;  %v10248_v48 = vpop.permute.xlu1 %826  ;;  %v10256_v46 = vpop.permute.xlu0 %821 }
  0xe8   : > { %8004 = vmatmul.mubr.msk.bf16.gmra.mrb[56].mxu0 %vm1149_vm10, %v8948_v61  ;;  %2603 = vperm.xlu1 %8933, %v2445_v51   ;;  %v8953_v51 = vld [vmem:[%s12249_s1 + $0x98] sm:$0xff]  }
  0xe9   : > { %1442 = vmatprep.mubr.bf16.mxu0 %v12266_v3  ;;  %2598 = vperm.xlu0 %8932, %v2444_v15  }
  0xeb   : > { %v10269_v6 = vpop.permute.xlu1 %836  ;;  %v10273_v9 = vpop.permute.xlu0 %831 }
  0xec   : > { %5949 = vperm.xlu1 %8933, %v5879_v20   ;;  %v5897_v20 = vld [vmem:[%s12255_s7 + $0x98] sm:$0xff] }
  0xed   : > { %5944 = vperm.xlu0 %8932, %v5878_v21   ;;  %v5896_v21 = vld [vmem:[%s12255_s7 + $0x90] sm:$0xff] }
  0xee   : > { %8036 = vmatmul.mubr.msk.bf16.gmra.mrb[56].mxu1 %vm1149_vm10, %v8948_v61  ;;  %v5894_v61 = vld [vmem:[%s12255_s7 + $0x80] sm:$0xff] }
  0xef   : > { %1795 = vmatprep.mubr.bf16.mxu1 %v12266_v3  ;;  %v10284_v15 = vpop.permute.xlu1 %846 }
  0xf0   : > { %8005 = vmatmul.mubr.msk.bf16.gmra.mrb[60].mxu0 %vm1149_vm10, %v8949_v25  ;;  %5959 = vperm.xlu1 %8933, %v5881_v26   ;;  %v5899_v26 = vld [vmem:[%s12255_s7 + $0xa8] sm:$0xff] }
  0xf1   : > { %1452 = vmatprep.mubr.bf16.mxu0 %v12266_v3  ;;  %5954 = vperm.xlu0 %8932, %v5880_v39   ;;  %v5898_v39 = vld [vmem:[%s12255_s7 + $0xa0] sm:$0xff] }
  0xf4   : > { %5969 = vperm.xlu1 %8933, %v5883_v31   ;;  %v8954_v31 = vld [vmem:[%s12249_s1 + $0xa0] sm:$0xff]  }
  0xf5   : > { %5964 = vperm.xlu0 %8932, %v5882_v33   ;;  %v10307_v33 = vpop.permute.xlu1 %856 }
  0xf6   : > { %8037 = vmatmul.mubr.msk.bf16.gmra.mrb[60].mxu1 %vm1149_vm10, %v8949_v25  ;;  %v10292_v25 = vpop.permute.xlu0 %841 }
  0xf7   : > { %1805 = vmatprep.mubr.bf16.mxu1 %v12266_v3 }
  0xf8   : > { %8006 = vmatmul.mubr.msk.bf16.gmra.mrb[64].mxu0 %vm1149_vm10, %v8950_v57  ;;  %5979 = vperm.xlu1 %8933, %v5885_v41   ;;  %v5901_v41 = vld [vmem:[%s12255_s7 + $0xb8] sm:$0xff] }
  0xf9   : > { %1462 = vmatprep.mubr.bf16.mxu0 %v12266_v3  ;;  %5974 = vperm.xlu0 %8932, %v5884_v50   ;;  %v5900_v50 = vld [vmem:[%s12255_s7 + $0xb0] sm:$0xff] }
  0xfc   : > { %5989 = vperm.xlu1 %8933, %v5887_v59   ;;  %v10321_v59 = vpop.permute.xlu1 %866 }
  0xfd   : > { %5984 = vperm.xlu0 %8932, %v5886_v42   ;;  %v5903_v42 = vld [vmem:[%s12255_s7 + $0xc8] sm:$0xff] }
  0xfe   : > { %8038 = vmatmul.mubr.msk.bf16.gmra.mrb[64].mxu1 %vm1149_vm10, %v8950_v57  ;;  %v10309_v57 = vpop.permute.xlu0 %851 }
  0xff   : > { %1815 = vmatprep.mubr.bf16.mxu1 %v12266_v3 }
 0x100   : > { %8007 = vmatmul.mubr.msk.bf16.gmra.mrb[68].mxu0 %vm1149_vm10, %v8951_v45  ;;  %5999 = vperm.xlu1 %8933, %v5889_v44  }
 0x101   : > { %1472 = vmatprep.mubr.bf16.mxu0 %v12266_v3  ;;  %5994 = vperm.xlu0 %8932, %v5888_v63   ;;  %v8955_v63 = vld [vmem:[%s12249_s1 + $0xa8] sm:$0xff]  }
 0x102   : > { %v10329_v44 = vpop.permute.xlu0 %861 }
 0x104   : > { %6009 = vperm.xlu1 %8933, %v5891_v36   ;;  %v5905_v36 = vld [vmem:[%s12255_s7 + $0xd8] sm:$0xff] }
 0x105   : > { %6004 = vperm.xlu0 %8932, %v5890_v43   ;;  %v5904_v43 = vld [vmem:[%s12255_s7 + $0xd0] sm:$0xff] }
 0x106   : > { %8039 = vmatmul.mubr.msk.bf16.gmra.mrb[68].mxu1 %vm1149_vm10, %v8951_v45  ;;  %v5902_v45 = vld [vmem:[%s12255_s7 + $0xc0] sm:$0xff] }
 0x107   : > { %1825 = vmatprep.mubr.bf16.mxu1 %v12266_v3 }
 0x108   : > { %8008 = vmatmul.mubr.msk.bf16.gmra.mrb[72].mxu0 %vm1149_vm10, %v8952_v49  ;;  %6019 = vperm.xlu1 %8933, %v5893_v1   ;;  %v10346_v1 = vpop.permute.xlu0 %871 }
 0x109   : > { %1482 = vmatprep.mubr.bf16.mxu0 %v12266_v3  ;;  %6014 = vperm.xlu0 %8932, %v5892_v5   ;;  %12311 = vst [vmem:[#allocation14_spill] sm:$0xff] %v10346_v1  ;;  %v5907_v5 = vld [vmem:[%s12255_s7 + $0xe8] sm:$0xff] }
 0x10c   : > { %6029 = vperm.xlu1 %8933, %v5895_v10   ;;  %v5906_v10 = vld [vmem:[%s12255_s7 + $0xe0] sm:$0xff] }
 0x10d   : > { %6024 = vperm.xlu0 %8932, %v5894_v61   ;;  %v8956_v61 = vld [vmem:[%s12249_s1 + $0xb0] sm:$0xff]  }
 0x10e   : > { %8040 = vmatmul.mubr.msk.bf16.gmra.mrb[72].mxu1 %vm1149_vm10, %v8952_v49  ;;  %v10342_v49 = vpop.permute.xlu1 %876 }
 0x10f   : > { %1835 = vmatprep.mubr.bf16.mxu1 %v12266_v3  ;;  %12310 = vst [vmem:[#allocation13_spill] sm:$0xff] %v10342_v49 }
 0x110   : > { %8009 = vmatmul.mubr.msk.bf16.gmra.mrb[76].mxu0 %vm1149_vm10, %v8953_v51  ;;  %6039 = vperm.xlu1 %8933, %v5897_v20   ;;  %v5909_v20 = vld [vmem:[%s12255_s7 + $0xf8] sm:$0xff] }
 0x111   : > { %1492 = vmatprep.mubr.bf16.mxu0 %v12266_v3  ;;  %6034 = vperm.xlu0 %8932, %v5896_v21   ;;  %v5908_v21 = vld [vmem:[%s12255_s7 + $0xf0] sm:$0xff] }
 0x114   : > { %6049 = vperm.xlu1 %8933, %v5899_v26   ;;  %v10365_v26 = vpop.permute.xlu0 %881 }
 0x115   : > { %6044 = vperm.xlu0 %8932, %v5898_v39   ;;  %12313 = vst [vmem:[#allocation16_spill] sm:$0xff] %v10365_v26  ;;  %v5911_v39 = vld [vmem:[%s12255_s7 + $0x108] sm:$0xff] }
 0x116   : > { %8041 = vmatmul.mubr.msk.bf16.gmra.mrb[76].mxu1 %vm1149_vm10, %v8953_v51  ;;  %v10357_v51 = vpop.permute.xlu1 %886 }
 0x117   : > { %1845 = vmatprep.mubr.bf16.mxu1 %v12266_v3  ;;  %12312 = vst [vmem:[#allocation15_spill] sm:$0xff] %v10357_v51 }
 0x118   : > { %8010 = vmatmul.mubr.msk.bf16.gmra.mrb[80].mxu0 %vm1149_vm10, %v8954_v31  ;;  %6059 = vperm.xlu1 %8933, %v5901_v41   ;;  %v8957_v41 = vld [vmem:[%s12249_s1 + $0xb8] sm:$0xff]  }
 0x119   : > { %1502 = vmatprep.mubr.bf16.mxu0 %v12266_v3  ;;  %6054 = vperm.xlu0 %8932, %v5900_v50  }
 0x11a   : > { %v10380_v50 = vpop.permute.xlu1 %896 }
 0x11b   : > { %12314 = vst [vmem:[#allocation17_spill] sm:$0xff] %v10380_v50 }
 0x11c   : > { %6069 = vperm.xlu1 %8933, %v5903_v42   ;;  %v10382_v42 = vpop.permute.xlu0 %891 }
 0x11d   : > { %6064 = vperm.xlu0 %8932, %v5902_v45   ;;  %12315 = vst [vmem:[#allocation18_spill] sm:$0xff] %v10382_v42  ;;  %v5913_v45 = vld [vmem:[%s12255_s7 + $0x118] sm:$0xff] }
 0x11e   : > { %8042 = vmatmul.mubr.msk.bf16.gmra.mrb[80].mxu1 %vm1149_vm10, %v8954_v31  ;;  %v5910_v31 = vld [vmem:[%s12255_s7 + $0x100] sm:$0xff] }
 0x11f   : > { %1855 = vmatprep.mubr.bf16.mxu1 %v12266_v3 }
 0x120   : > { %8011 = vmatmul.mubr.msk.bf16.gmra.mrb[84].mxu0 %vm1149_vm10, %v8955_v63  ;;  %6079 = vperm.xlu1 %8933, %v5905_v36   ;;  %v10394_v36 = vpop.permute.xlu1 %906 }
 0x121   : > { %1512 = vmatprep.mubr.bf16.mxu0 %v12266_v3  ;;  %6074 = vperm.xlu0 %8932, %v5904_v43   ;;  %12316 = vst [vmem:[#allocation19_spill] sm:$0xff] %v10394_v36  ;;  %v5915_v43 = vld [vmem:[%s12255_s7 + $0x128] sm:$0xff] }
 0x124   : > { %6089 = vperm.xlu1 %8933, %v5907_v5   ;;  %v5914_v5 = vld [vmem:[%s12255_s7 + $0x120] sm:$0xff] }
 0x125   : > { %6084 = vperm.xlu0 %8932, %v5906_v10   ;;  %v10402_v10 = vpop.permute.xlu0 %901 }
 0x126   : > { %8043 = vmatmul.mubr.msk.bf16.gmra.mrb[84].mxu1 %vm1149_vm10, %v8955_v63  ;;  %v5912_v63 = vld [vmem:[%s12255_s7 + $0x110] sm:$0xff]  ;;  %12317 = vst [vmem:[#allocation20_spill] sm:$0xff] %v10402_v10 }
 0x127   : > { %1865 = vmatprep.mubr.bf16.mxu1 %v12266_v3 }
 0x128   : > { %8012 = vmatmul.mubr.msk.bf16.gmra.mrb[88].mxu0 %vm1149_vm10, %v8956_v61  ;;  %6099 = vperm.xlu1 %8933, %v5909_v20   ;;  %v5917_v20 = vld [vmem:[%s12255_s7 + $0x138] sm:$0xff] }
 0x129   : > { %1522 = vmatprep.mubr.bf16.mxu0 %v12266_v3  ;;  %6094 = vperm.xlu0 %8932, %v5908_v21   ;;  %v5916_v21 = vld [vmem:[%s12255_s7 + $0x130] sm:$0xff] }
 0x12c   : > { %6109 = vperm.xlu1 %8933, %v5911_v39   ;;  %v10415_v39 = vpop.permute.xlu1 %916 }
 0x12d   : > { %6104 = vperm.xlu0 %8932, %v5910_v31   ;;  %12318 = vst [vmem:[#allocation21_spill] sm:$0xff] %v10415_v39  ;;  %v10419_v31 = vpop.permute.xlu0 %911 }
 0x12e   : > { %8044 = vmatmul.mubr.msk.bf16.gmra.mrb[88].mxu1 %vm1149_vm10, %v8956_v61  ;;  %v8958_v61 = vld [vmem:[%s12249_s1 + $0xc0] sm:$0xff]   ;;  %12319 = vst [vmem:[#allocation22_spill] sm:$0xff] %v10419_v31 }
 0x12f   : > { %1875 = vmatprep.mubr.bf16.mxu1 %v12266_v3 }
 0x130   : > { %8013 = vmatmul.mubr.msk.bf16.gmra.mrb[92].mxu0 %vm1149_vm10, %v8957_v41  ;;  %6119 = vperm.xlu1 %8933, %v5913_v45   ;;  %v5919_v45 = vld [vmem:[%s12255_s7 + $0x148] sm:$0xff] }
 0x131   : > { %1532 = vmatprep.mubr.bf16.mxu0 %v12266_v3  ;;  %6114 = vperm.xlu0 %8932, %v5912_v63   ;;  %v8959_v63 = vld [vmem:[%s12249_s1 + $0xc8] sm:$0xff]  }
 0x134   : > { %6129 = vperm.xlu1 %8933, %v5915_v43   ;;  %v10430_v43 = vpop.permute.xlu1 %926 }
 0x135   : > { %6124 = vperm.xlu0 %8932, %v5914_v5   ;;  %12320 = vst [vmem:[#allocation23_spill] sm:$0xff] %v10430_v43  ;;  %v5921_v5 = vld [vmem:[%s12255_s7 + $0x158] sm:$0xff] }
 0x136   : > { %8045 = vmatmul.mubr.msk.bf16.gmra.mrb[92].mxu1 %vm1149_vm10, %v8957_v41  ;;  %v5918_v41 = vld [vmem:[%s12255_s7 + $0x140] sm:$0xff] }
 0x137   : > { %1885 = vmatprep.mubr.bf16.mxu1 %v12266_v3 }
 0x138   : > { %8014 = vmatmul.mubr.msk.bf16.gmra.mrb[96].mxu0 %vm1149_vm10, %v8958_v61  ;;  %6139 = vperm.xlu1 %8933, %v5917_v20   ;;  %v5920_v20 = vld [vmem:[%s12255_s7 + $0x150] sm:$0xff]  ;;  %v10453_v2 = vpop.permute.xlu1 %936 }
 0x139   : > { %1542 = vmatprep.mubr.bf16.mxu0 %v12266_v3  ;;  %6134 = vperm.xlu0 %8932, %v5916_v21   ;;  %v10438_v21 = vpop.permute.xlu0 %921  ;;  %12322 = vst [vmem:[#allocation25_spill] sm:$0xff] %v10453_v2 }
 0x13a   : > { %12321 = vst [vmem:[#allocation24_spill] sm:$0xff] %v10438_v21 }
 0x13c   : > { %6149 = vperm.xlu1 %8933, %v5919_v45   ;;  %v5923_v45 = vld [vmem:[%s12255_s7 + $0x168] sm:$0xff] }
 0x13d   : > { %6144 = vperm.xlu0 %8932, %v5918_v41   ;;  %v5922_v41 = vld [vmem:[%s12255_s7 + $0x160] sm:$0xff]  ;;  %v10455_v56 = vpop.permute.xlu0 %931 }
 0x13e   : > { %8046 = vmatmul.mubr.msk.bf16.gmra.mrb[96].mxu1 %vm1149_vm10, %v8958_v61  ;;  %v8960_v61 = vld [vmem:[%s12249_s1 + $0xd0] sm:$0xff]   ;;  %12323 = vst [vmem:[#allocation26_spill] sm:$0xff] %v10455_v56 }
 0x13f   : > { %1895 = vmatprep.mubr.bf16.mxu1 %v12266_v3 }
 0x140   : > { %8015 = vmatmul.mubr.msk.bf16.gmra.mrb[100].mxu0 %vm1149_vm10, %v8959_v63  ;;  %6159 = vperm.xlu1 %8933, %v5921_v5   ;;  %v5925_v5 = vld [vmem:[%s12255_s7 + $0x178] sm:$0xff] }
 0x141   : > { %1552 = vmatprep.mubr.bf16.mxu0 %v12266_v3  ;;  %6154 = vperm.xlu0 %8932, %v5920_v20   ;;  %v5924_v20 = vld [vmem:[%s12255_s7 + $0x170] sm:$0xff] }
 0x144   : > { %6169 = vperm.xlu1 %8933, %v5923_v45   ;;  %v10467_v45 = vpop.permute.xlu1 %946 }
 0x145   : > { %6164 = vperm.xlu0 %8932, %v5922_v41   ;;  %12324 = vst [vmem:[#allocation27_spill] sm:$0xff] %v10467_v45 }
 0x146   : > { %8047 = vmatmul.mubr.msk.bf16.gmra.mrb[100].mxu1 %vm1149_vm10, %v8959_v63  ;;  %v10475_v63 = vpop.permute.xlu0 %941 }
 0x147   : > { %1905 = vmatprep.mubr.bf16.mxu1 %v12266_v3  ;;  %12325 = vst [vmem:[#allocation28_spill] sm:$0xff] %v10475_v63  ;;  %v5929_v63 = vld [vmem:[%s12255_s7 + $0x198] sm:$0xff] }
 0x148   : > { %8016 = vmatmul.mubr.msk.bf16.gmra.mrb[104].mxu0 %vm1149_vm10, %v8960_v61  ;;  %6179 = vperm.xlu1 %8933, %v5925_v5   ;;  %v8961_v5 = vld [vmem:[%s12249_s1 + $0xd8] sm:$0xff]  }
 0x149   : > { %1562 = vmatprep.mubr.bf16.mxu0 %v12266_v3  ;;  %6174 = vperm.xlu0 %8932, %v5924_v20  }
 0x14a   : > { %v10496_v39 = vpop.permute.xlu0 %951 }
 0x14b   : > { %v1294_v41 = vpop.f32.mrb[0].mxu0  ;;  %12328 = vst [vmem:[#allocation30_spill] sm:$0xff] %v10496_v39 }
 0x14c   : > { %v1295_v17 = vadd.f32 %v1294_v41, %v9990_v14  ;;  %v1296_v2 = vpop.f32.mrb[1].mxu0  ;;  %6189 = vperm.xlu1 %8933, %v5927_v18   ;;  %v5928_v41 = vld [vmem:[%s12255_s7 + $0x190] sm:$0xff] }
 0x14d   : > { %v1297_v20 = vadd.f32 %v1296_v2, %v9990_v14  ;;  %v1298_v3 = vpop.f32.mrb[2].mxu0  ;;  %6184 = vperm.xlu0 %8932, %v5926_v32  }
 0x14e   : > { %v1299_v45 = vadd.f32 %v1298_v3, %v10002_v11  ;;  %v1300_v56 = vpop.f32.mrb[3].mxu0  ;;  %8048 = vmatmul.mubr.msk.bf16.gmra.mrb[104].mxu1 %vm1149_vm10, %v8960_v61  ;;  %v1966_v21 = vmax.f32 %v1295_v17, 0.0  ;;  %v12326_v3 = vmov 0   ;;  %v5931_v17 = vld [vmem:[%s12255_s7 + $0x1a8] sm:$0xff] }
 0x14f   : > { %v1301_v43 = vadd.f32 %v1300_v56, %v10002_v11  ;;  %1915 = vmatprep.mubr.bf16.mxu1 %v12326_v3  ;;  %v1967_v18 = vmax.f32 %v1297_v20, 0.0  ;;  %v10494_v56 = vpop.permute.xlu1 %956 }
 0x150   : > { %v1970_v2 = vmax.f32 %v1299_v45, 0.0  ;;  %8017 = vmatmul.mubr.msk.bf16.gmra.mrb[108].mxu0 %vm1149_vm10, %v8961_v5  ;;  %12327 = vst [vmem:[#allocation29_spill] sm:$0xff] %v10494_v56  ;;  %6199 = vperm.xlu1 %8933, %v5929_v63   ;;  %v10506_v56 = vld [vmem:[%s12249_s1 + $0xe0] sm:$0xff]  }
 0x151   : > { %v1971_v32 = vmax.f32 %v1301_v43, 0.0  ;;  %1572 = vmatprep.mubr.bf16.mxu0 %v12326_v3  ;;  %6194 = vperm.xlu0 %8932, %v5928_v41   ;;  %v1647_v36 = vpop.f32.mrb[0].mxu1 }
 0x152   : > { %v2222_v31 = vpack.c.bf16 %v1970_v2, %v1966_v21  ;;  %v1648_v45 = vadd.f32 %v1647_v36, %v9990_v14  ;;  %v1649_v20 = vpop.f32.mrb[1].mxu1  ;;  %v5930_v21 = vld [vmem:[%s12255_s7 + $0x1a0] sm:$0xff] }
 0x153   : > { %v2223_v10 = vpack.c.bf16 %v1971_v32, %v1967_v18  ;;  %v1304_v61 = vpop.f32.mrb[4].mxu0  ;;  %v1650_v63 = vadd.f32 %v1649_v20, %v9990_v14  ;;  %v1651_v41 = vpop.f32.mrb[2].mxu1  ;;  %v5933_v14 = vld [vmem:[%s12255_s7 + $0x1b8] sm:$0xff] }
 0x154   : > { %v1305_v43 = vadd.f32 %v1304_v61, %v9988_v13  ;;  %v1306_v50 = vpop.f32.mrb[5].mxu0  ;;  %v1652_v18 = vadd.f32 %v1651_v41, %v10002_v11  ;;  %v1653_v32 = vpop.f32.mrb[3].mxu1  ;;  %6209 = vperm.xlu1 %8933, %v5931_v17  }
 0x155   : > { %2926 = vmatprep.subr.bf16.mxu0 %v2223_v10  ;;  %v1307_v2 = vadd.f32 %v1306_v50, %v9988_v13  ;;  %v1308_v36 = vpop.f32.mrb[6].mxu0  ;;  %v1654_v42 = vadd.f32 %v1653_v32, %v10002_v11  ;;  %6204 = vperm.xlu0 %8932, %v5930_v21   ;;  %v1968_v10 = vmax.f32 %v1648_v45, 0.0  ;;  %v5932_v11 = vld [vmem:[%s12255_s7 + $0x1b0] sm:$0xff]  ;;  %v10528_v21 = vpop.permute.xlu1 %966 }
 0x156   : > { %2927 = vmatpush1.bf16.msra.mxu0 %v2222_v31  ;;  %v1309_v61 = vadd.f32 %v1308_v36, %v9998_v19  ;;  %v1310_v39 = vpop.f32.mrb[7].mxu0  ;;  %v1972_v50 = vmax.f32 %v1652_v18, 0.0  ;;  %8049 = vmatmul.mubr.msk.bf16.gmra.mrb[108].mxu1 %vm1149_vm10, %v8961_v5  ;;  %v1974_v20 = vmax.f32 %v1305_v43, 0.0  ;;  %v1969_v31 = vmax.f32 %v1650_v63, 0.0  ;;  %v10530_v5 = vpop.permute.xlu0 %961 }
 0x157   : > { %v1311_v51 = vadd.f32 %v1310_v39, %v9998_v19  ;;  %v1973_v39 = vmax.f32 %v1654_v42, 0.0  ;;  %1925 = vmatprep.mubr.bf16.mxu1 %v12326_v3  ;;  %v1975_v17 = vmax.f32 %v1307_v2, 0.0  ;;  %v5935_v2 = vld [vmem:[%s12255_s7 + $0x1c8] sm:$0xff] }
 0x158   : > { %v1978_v41 = vmax.f32 %v1309_v61, 0.0  ;;  %8018 = vmatmul.mubr.msk.bf16.gmra.mrb[112].mxu0 %vm1149_vm10, %v10506_v56  ;;  %v2224_v43 = vpack.c.bf16 %v1972_v50, %v1968_v10  ;;  %6219 = vperm.xlu1 %8933, %v5933_v14   ;;  %v5934_v14 = vld [vmem:[%s12255_s7 + $0x1c0] sm:$0xff] }
 0x159   : > { %1582 = vmatprep.mubr.bf16.mxu0 %v12326_v3  ;;  %v1979_v45 = vmax.f32 %v1311_v51, 0.0  ;;  %v2225_v18 = vpack.c.bf16 %v1973_v39, %v1969_v31  ;;  %v1657_v32 = vpop.f32.mrb[4].mxu1  ;;  %6214 = vperm.xlu0 %8932, %v5932_v11   ;;  %v10537_v51 = vld [vmem:[%s12249_s1 + $0xe8] sm:$0xff]  }
 0x15a   : > { %v2226_v36 = vpack.c.bf16 %v1978_v41, %v1974_v20  ;;  %v1658_v42 = vadd.f32 %v1657_v32, %v9988_v13  ;;  %v1659_v63 = vpop.f32.mrb[5].mxu1 }
 0x15b   : > { %v1314_v61 = vpop.f32.mrb[8].mxu0  ;;  %v2227_v26 = vpack.c.bf16 %v1979_v45, %v1975_v17  ;;  %3312 = vmatprep.subr.bf16.mxu1 %v2225_v18  ;;  %v1660_v10 = vadd.f32 %v1659_v63, %v9988_v13  ;;  %v1661_v50 = vpop.f32.mrb[6].mxu1 }
 0x15c   : > { %v1315_v49 = vadd.f32 %v1314_v61, %v10017_v24  ;;  %v1316_v1 = vpop.f32.mrb[9].mxu0  ;;  %3313 = vmatpush1.bf16.msra.mxu1 %v2224_v43  ;;  %v1662_v11 = vadd.f32 %v1661_v50, %v9998_v19  ;;  %v1663_v31 = vpop.f32.mrb[7].mxu1  ;;  %6229 = vperm.xlu1 %8933, %v5935_v2   ;;  %v1976_v13 = vmax.f32 %v1658_v42, 0.0  ;;  %v5937_v43 = vld [vmem:[%s12255_s7 + $0x1d8] sm:$0xff] }
 0x15d   : > { %v1317_v20 = vadd.f32 %v1316_v1, %v10017_v24  ;;  %v1318_v41 = vpop.f32.mrb[10].mxu0  ;;  %2928 = vmatprep.subr.bf16.mxu0 %v2227_v26  ;;  %v1664_v45 = vadd.f32 %v1663_v31, %v9998_v19  ;;  %6224 = vperm.xlu0 %8932, %v5934_v14   ;;  %v5936_v19 = vld [vmem:[%s12255_s7 + $0x1d0] sm:$0xff] }
 0x15e   : > { %v1319_v39 = vadd.f32 %v1318_v41, %v10015_v23  ;;  %v1320_v17 = vpop.f32.mrb[11].mxu0  ;;  %2929 = vmatpush1.bf16.msra.mxu0 %v2226_v36  ;;  %v1980_v18 = vmax.f32 %v1662_v11, 0.0  ;;  %8050 = vmatmul.mubr.msk.bf16.gmra.mrb[112].mxu1 %vm1149_vm10, %v10506_v56  ;;  %v1982_v1 = vmax.f32 %v1315_v49, 0.0  ;;  %v1977_v36 = vmax.f32 %v1660_v10, 0.0  ;;  %v10563_v49 = vpop.permute.xlu1 %976 }
 0x15f   : > { %v1321_v32 = vadd.f32 %v1320_v17, %v10015_v23  ;;  %1935 = vmatprep.mubr.bf16.mxu1 %v12326_v3  ;;  %v1981_v61 = vmax.f32 %v1664_v45, 0.0  ;;  %v1983_v42 = vmax.f32 %v1317_v20, 0.0  ;;  %v10565_v56 = vpop.permute.xlu0 %971  ;;  %v10572_v45 = vld [vmem:[%s12249_s1 + $0xf0] sm:$0xff]  }
 0x160   : > { %v1986_v26 = vmax.f32 %v1319_v39, 0.0  ;;  %8019 = vmatmul.mubr.msk.bf16.gmra.mrb[116].mxu0 %vm1149_vm10, %v10537_v51  ;;  %v2228_v2 = vpack.c.bf16 %v1980_v18, %v1976_v13  ;;  %6239 = vperm.xlu1 %8933, %v5937_v43   ;;  %v5938_v13 = vld [vmem:[%s12255_s7 + $0x1e0] sm:$0xff] }
 0x161   : > { %v1987_v63 = vmax.f32 %v1321_v32, 0.0  ;;  %1592 = vmatprep.mubr.bf16.mxu0 %v12326_v3  ;;  %v1667_v50 = vpop.f32.mrb[8].mxu1  ;;  %v2229_v41 = vpack.c.bf16 %v1981_v61, %v1977_v36  ;;  %6234 = vperm.xlu0 %8932, %v5936_v19   ;;  %v5939_v32 = vld [vmem:[%s12255_s7 + $0x1e8] sm:$0xff] }
 0x162   : > { %v2230_v14 = vpack.c.bf16 %v1986_v26, %v1982_v1  ;;  %v1668_v39 = vadd.f32 %v1667_v50, %v10017_v24  ;;  %v1669_v10 = vpop.f32.mrb[9].mxu1 }
 0x163   : > { %v1324_v11 = vpop.f32.mrb[12].mxu0  ;;  %v2231_v31 = vpack.c.bf16 %v1987_v63, %v1983_v42  ;;  %v1670_v18 = vadd.f32 %v1669_v10, %v10017_v24  ;;  %v1671_v1 = vpop.f32.mrb[10].mxu1  ;;  %3314 = vmatprep.subr.bf16.mxu1 %v2229_v41 }
 0x164   : > { %v1325_v20 = vadd.f32 %v1324_v11, %v10040_v30  ;;  %v1326_v17 = vpop.f32.mrb[13].mxu0  ;;  %v1672_v43 = vadd.f32 %v1671_v1, %v10015_v23  ;;  %v1673_v19 = vpop.f32.mrb[11].mxu1  ;;  %3315 = vmatpush1.bf16.msra.mxu1 %v2228_v2  ;;  %v1984_v42 = vmax.f32 %v1668_v39, 0.0  ;;  %6249 = vperm.xlu1 %8933, %v5939_v32   ;;  %v5941_v2 = vld [vmem:[%s12255_s7 + $0x1f8] sm:$0xff] }
 0x165   : > { %v1328_v26 = vpop.f32.mrb[14].mxu0  ;;  %2930 = vmatprep.subr.bf16.mxu0 %v2231_v31  ;;  %v1327_v36 = vadd.f32 %v1326_v17, %v10040_v30  ;;  %v1674_v63 = vadd.f32 %v1673_v19, %v10015_v23  ;;  %6244 = vperm.xlu0 %8932, %v5938_v13   ;;  %v5940_v23 = vld [vmem:[%s12255_s7 + $0x1f0] sm:$0xff]  ;;  %v10600_v13 = vpop.permute.xlu0 %981 }
 0x166   : > { %v1329_v61 = vadd.f32 %v1328_v26, %v10029_v27  ;;  %2931 = vmatpush1.bf16.msra.mxu0 %v2230_v14  ;;  %v1330_v50 = vpop.f32.mrb[15].mxu0  ;;  %v1988_v24 = vmax.f32 %v1672_v43, 0.0  ;;  %8051 = vmatmul.mubr.msk.bf16.gmra.mrb[116].mxu1 %vm1149_vm10, %v10537_v51  ;;  %v1990_v41 = vmax.f32 %v1325_v20, 0.0  ;;  %v1985_v14 = vmax.f32 %v1670_v18, 0.0  ;;  %v10598_v51 = vpop.permute.xlu1 %986 }
 0x167   : > { %v1331_v31 = vadd.f32 %v1330_v50, %v10029_v27  ;;  %v1989_v39 = vmax.f32 %v1674_v63, 0.0  ;;  %1945 = vmatprep.mubr.bf16.mxu1 %v12326_v3  ;;  %v1991_v20 = vmax.f32 %v1327_v36, 0.0  ;;  %v10606_v63 = vld [vmem:[%s12249_s1 + $0xf8] sm:$0xff]   ;;  %v6915_v36 = vld [vmem:[%s12257_s9 + $0x8] sm:$0xff] }
 0x168   : > { %v1994_v11 = vmax.f32 %v1329_v61, 0.0  ;;  %8020 = vmatmul.mubr.msk.bf16.gmra.mrb[120].mxu0 %vm1149_vm10, %v10572_v45  ;;  %v2232_v10 = vpack.c.bf16 %v1988_v24, %v1984_v42  ;;  %6259 = vperm.xlu1 %8933, %v5941_v2  }
 0x169   : > { %1602 = vmatprep.mubr.bf16.mxu0 %v12326_v3  ;;  %v1995_v17 = vmax.f32 %v1331_v31, 0.0  ;;  %v1677_v1 = vpop.f32.mrb[12].mxu1  ;;  %v2233_v26 = vpack.c.bf16 %v1989_v39, %v1985_v14  ;;  %6254 = vperm.xlu0 %8932, %v5940_v23   ;;  %v6914_v23 = vld [vmem:[%s12257_s9] sm:$0xff] }
 0x16a   : > { %v2234_v32 = vpack.c.bf16 %v1994_v11, %v1990_v41  ;;  %v1678_v43 = vadd.f32 %v1677_v1, %v10040_v30  ;;  %v1679_v18 = vpop.f32.mrb[13].mxu1  ;;  %v8968_v14 = vld [vmem:[%s12251_s3 + $0x4] ss:$16 sps:$4 sm:$0xff]  }
 0x16b   : > { %v1334_v19 = vpop.f32.mrb[16].mxu0  ;;  %v2235_v61 = vpack.c.bf16 %v1995_v17, %v1991_v20  ;;  %v1680_v42 = vadd.f32 %v1679_v18, %v10040_v30  ;;  %v1681_v50 = vpop.f32.mrb[14].mxu1  ;;  %3316 = vmatprep.subr.bf16.mxu1 %v2233_v26 }
 0x16c   : > { %v1335_v24 = vadd.f32 %v1334_v19, %v10054_v35  ;;  %v1336_v41 = vpop.f32.mrb[17].mxu0  ;;  %v1682_v11 = vadd.f32 %v1681_v50, %v10029_v27  ;;  %v1683_v31 = vpop.f32.mrb[15].mxu1  ;;  %3317 = vmatpush1.bf16.msra.mxu1 %v2232_v10  ;;  %6927 = vperm.xlu1 %8933, %v6915_v36   ;;  %v1992_v17 = vmax.f32 %v1678_v43, 0.0  ;;  %v6916_v36 = vld [vmem:[%s12257_s9 + $0x10] sm:$0xff] }
 0x16d   : > { %v1338_v2 = vpop.f32.mrb[18].mxu0  ;;  %2932 = vmatprep.subr.bf16.mxu0 %v2235_v61  ;;  %v1684_v30 = vadd.f32 %v1683_v31, %v10029_v27  ;;  %v1337_v39 = vadd.f32 %v1336_v41, %v10054_v35  ;;  %v6917_v27 = vld [vmem:[%s12257_s9 + $0x18] sm:$0xff]  ;;  %v10630_v18 = vpop.permute.xlu1 %2453  ;;  %v1993_v61 = vmax.f32 %v1680_v42, 0.0  ;;  %6922 = vperm.xlu0 %8932, %v6914_v23   ;;  %v6919_v23 = vld [vmem:[%s12257_s9 + $0x28] sm:$0xff] }
 0x16e   : > { %v1339_v20 = vadd.f32 %v1338_v2, %v10051_v34  ;;  %2933 = vmatpush1.bf16.msra.mxu0 %v2234_v32  ;;  %v1996_v10 = vmax.f32 %v1682_v11, 0.0  ;;  %8052 = vmatmul.mubr.msk.bf16.gmra.mrb[120].mxu1 %vm1149_vm10, %v10572_v45  ;;  %v1998_v1 = vmax.f32 %v1335_v24, 0.0  ;;  %v1340_v26 = vpop.f32.mrb[19].mxu0  ;;  %v10637_v50 = vpop.permute.xlu0 %2448 }
 0x16f   : > { %v1997_v32 = vmax.f32 %v1684_v30, 0.0  ;;  %v1341_v43 = vadd.f32 %v1340_v26, %v10051_v34  ;;  %1955 = vmatprep.mubr.bf16.mxu1 %v12326_v3  ;;  %v1999_v11 = vmax.f32 %v1337_v39, 0.0 }
 0x170   : > { %8021 = vmatmul.mubr.msk.bf16.gmra.mrb[124].mxu0 %vm1149_vm10, %v10606_v63  ;;  %v2002_v19 = vmax.f32 %v1339_v20, 0.0  ;;  %v2236_v45 = vpack.c.bf16 %v1996_v10, %v1992_v17  ;;  %6937 = vperm.xlu1 %8933, %v6917_v27  }
 0x171   : > { %2958 = vmatprep.mubr.bf16.mxu0 %v8968_v14  ;;  %v1687_v24 = vpop.f32.mrb[16].mxu1  ;;  %v2237_v41 = vpack.c.bf16 %v1997_v32, %v1993_v61  ;;  %v2003_v31 = vmax.f32 %v1341_v43, 0.0  ;;  %6932 = vperm.xlu0 %8932, %v6916_v36   ;;  %v10649_v32 = vpop.permute.xlu1 %2463 }
 0x172   : > { %v2238_v2 = vpack.c.bf16 %v2002_v19, %v1998_v1  ;;  %v1688_v42 = vadd.f32 %v1687_v24, %v10054_v35  ;;  %v1689_v30 = vpop.f32.mrb[17].mxu1  ;;  %v6918_v19 = vld [vmem:[%s12257_s9 + $0x20] sm:$0xff]  ;;  %12329 = vst [vmem:[#allocation31_spill] sm:$0xff] %v10649_v32 }
 0x173   : > { %v1690_v20 = vadd.f32 %v1689_v30, %v10054_v35  ;;  %v1691_v17 = vpop.f32.mrb[18].mxu1  ;;  %3318 = vmatprep.subr.bf16.mxu1 %v2237_v41  ;;  %v1344_v10 = vpop.f32.mrb[20].mxu0  ;;  %v2239_v26 = vpack.c.bf16 %v2003_v31, %v1999_v11 }
 0x174   : > { %v1692_v61 = vadd.f32 %v1691_v17, %v10051_v34  ;;  %v1693_v39 = vpop.f32.mrb[19].mxu1  ;;  %3319 = vmatpush1.bf16.msra.mxu1 %v2236_v45  ;;  %v1345_v1 = vadd.f32 %v1344_v10, %v10075_v58  ;;  %v1346_v27 = vpop.f32.mrb[21].mxu0  ;;  %6947 = vperm.xlu1 %8933, %v6919_v23   ;;  %v2000_v36 = vmax.f32 %v1688_v42, 0.0 }
 0x175   : > { %v1694_v35 = vadd.f32 %v1693_v39, %v10051_v34  ;;  %v1347_v43 = vadd.f32 %v1346_v27, %v10075_v58  ;;  %v1348_v24 = vpop.f32.mrb[22].mxu0  ;;  %2934 = vmatprep.subr.bf16.mxu0 %v2239_v26  ;;  %v10656_v31 = vpop.permute.xlu0 %2458  ;;  %v2001_v30 = vmax.f32 %v1690_v20, 0.0  ;;  %6942 = vperm.xlu0 %8932, %v6918_v19  }
 0x176   : > { %v2004_v41 = vmax.f32 %v1692_v61, 0.0  ;;  %8053 = vmatmul.mubr.msk.bf16.gmra.mrb[124].mxu1 %vm1149_vm10, %v10606_v63  ;;  %v1349_v45 = vadd.f32 %v1348_v24, %v10065_v47  ;;  %v1350_v11 = vpop.f32.mrb[23].mxu0  ;;  %2935 = vmatpush1.bf16.msra.mxu0 %v2238_v2  ;;  %12330 = vst [vmem:[#allocation32_spill] sm:$0xff] %v10656_v31  ;;  %v2006_v10 = vmax.f32 %v1345_v1, 0.0 }
 0x177   : > { %v2005_v17 = vmax.f32 %v1694_v35, 0.0  ;;  %v1351_v34 = vadd.f32 %v1350_v11, %v10065_v47  ;;  %3344 = vmatprep.mubr.bf16.mxu1 %v8968_v14  ;;  %v2007_v39 = vmax.f32 %v1347_v43, 0.0 }
 0x178   : > { %v2010_v26 = vmax.f32 %v1349_v45, 0.0  ;;  %v2240_v23 = vpack.c.bf16 %v2004_v41, %v2000_v36 }
 0x179   : > { %v1697_v42 = vpop.f32.mrb[20].mxu1  ;;  %v2241_v61 = vpack.c.bf16 %v2005_v17, %v2001_v30  ;;  %v2011_v27 = vmax.f32 %v1351_v34, 0.0 }
 0x17a   : > { %v1698_v63 = vadd.f32 %v1697_v42, %v10075_v58  ;;  %v1699_v24 = vpop.f32.mrb[21].mxu1  ;;  %v2242_v32 = vpack.c.bf16 %v2010_v26, %v2006_v10 }
 0x17b   : > { %v1700_v2 = vadd.f32 %v1699_v24, %v10075_v58  ;;  %v1701_v31 = vpop.f32.mrb[22].mxu1  ;;  %3320 = vmatprep.subr.bf16.mxu1 %v2241_v61  ;;  %v1354_v20 = vpop.f32.mrb[24].mxu0  ;;  %v2243_v35 = vpack.c.bf16 %v2011_v27, %v2007_v39 }
 0x17c   : > { %v1702_v19 = vadd.f32 %v1701_v31, %v10065_v47  ;;  %v1703_v14 = vpop.f32.mrb[23].mxu1  ;;  %3321 = vmatpush1.bf16.msra.mxu1 %v2240_v23  ;;  %v1355_v1 = vadd.f32 %v1354_v20, %v10090_v55  ;;  %v1356_v36 = vpop.f32.mrb[25].mxu0  ;;  %v2008_v11 = vmax.f32 %v1698_v63, 0.0 }
 0x17d   : > { %v1704_v43 = vadd.f32 %v1703_v14, %v10065_v47  ;;  %v1357_v41 = vadd.f32 %v1356_v36, %v10090_v55  ;;  %v1358_v45 = vpop.f32.mrb[26].mxu0  ;;  %2936 = vmatprep.subr.bf16.mxu0 %v2243_v35  ;;  %v2009_v34 = vmax.f32 %v1700_v2, 0.0 }
 0x17e   : > { %v2012_v30 = vmax.f32 %v1702_v19, 0.0  ;;  %v1359_v58 = vadd.f32 %v1358_v45, %v10088_v8  ;;  %v1360_v17 = vpop.f32.mrb[27].mxu0  ;;  %2937 = vmatpush1.bf16.msra.mxu0 %v2242_v32  ;;  %v2014_v26 = vmax.f32 %v1355_v1, 0.0 }
 0x17f   : > { %v2013_v10 = vmax.f32 %v1704_v43, 0.0  ;;  %v1361_v31 = vadd.f32 %v1360_v17, %v10088_v8  ;;  %v2015_v47 = vmax.f32 %v1357_v41, 0.0 }
 0x180   : > { %v2018_v23 = vmax.f32 %v1359_v58, 0.0  ;;  %v2244_v42 = vpack.c.bf16 %v2012_v30, %v2008_v11 }
 0x181   : > { %v1707_v61 = vpop.f32.mrb[24].mxu1  ;;  %v2245_v39 = vpack.c.bf16 %v2013_v10, %v2009_v34  ;;  %v2019_v27 = vmax.f32 %v1361_v31, 0.0 }
 0x182   : > { %v1708_v24 = vadd.f32 %v1707_v61, %v10090_v55  ;;  %v1709_v20 = vpop.f32.mrb[25].mxu1  ;;  %v2246_v63 = vpack.c.bf16 %v2018_v23, %v2014_v26 }
 0x183   : > { %v1710_v35 = vadd.f32 %v1709_v20, %v10090_v55  ;;  %v1711_v19 = vpop.f32.mrb[26].mxu1  ;;  %3322 = vmatprep.subr.bf16.mxu1 %v2245_v39  ;;  %v1364_v32 = vpop.f32.mrb[28].mxu0  ;;  %v2247_v2 = vpack.c.bf16 %v2019_v27, %v2015_v47 }
 0x184   : > { %v1712_v14 = vadd.f32 %v1711_v19, %v10088_v8  ;;  %v1713_v36 = vpop.f32.mrb[27].mxu1  ;;  %3323 = vmatpush1.bf16.msra.mxu1 %v2244_v42  ;;  %v1365_v1 = vadd.f32 %v1364_v32, %v10110_v0  ;;  %v1366_v43 = vpop.f32.mrb[29].mxu0  ;;  %v2016_v30 = vmax.f32 %v1708_v24, 0.0 }
 0x185   : > { %v1714_v41 = vadd.f32 %v1713_v36, %v10088_v8  ;;  %v1367_v45 = vadd.f32 %v1366_v43, %v10110_v0  ;;  %v1368_v11 = vpop.f32.mrb[30].mxu0  ;;  %2938 = vmatprep.subr.bf16.mxu0 %v2247_v2  ;;  %v2017_v34 = vmax.f32 %v1710_v35, 0.0 }
 0x186   : > { %v2020_v58 = vmax.f32 %v1712_v14, 0.0  ;;  %v1369_v55 = vadd.f32 %v1368_v11, %v10102_v37  ;;  %v1370_v17 = vpop.f32.mrb[31].mxu0  ;;  %2939 = vmatpush1.bf16.msra.mxu0 %v2246_v63  ;;  %v2022_v26 = vmax.f32 %v1365_v1, 0.0 }
 0x187   : > { %v2021_v10 = vmax.f32 %v1714_v41, 0.0  ;;  %v1371_v31 = vadd.f32 %v1370_v17, %v10102_v37  ;;  %v2023_v8 = vmax.f32 %v1367_v45, 0.0 }
 0x188   : > { %v2026_v23 = vmax.f32 %v1369_v55, 0.0  ;;  %v2248_v42 = vpack.c.bf16 %v2020_v58, %v2016_v30 }
 0x189   : > { %v1717_v61 = vpop.f32.mrb[28].mxu1  ;;  %v2249_v39 = vpack.c.bf16 %v2021_v10, %v2017_v34  ;;  %v2027_v47 = vmax.f32 %v1371_v31, 0.0 }
 0x18a   : > { %v1718_v27 = vadd.f32 %v1717_v61, %v10110_v0  ;;  %v1719_v20 = vpop.f32.mrb[29].mxu1  ;;  %v2250_v24 = vpack.c.bf16 %v2026_v23, %v2022_v26 }
 0x18b   : > { %v1720_v19 = vadd.f32 %v1719_v20, %v10110_v0  ;;  %v1721_v32 = vpop.f32.mrb[30].mxu1  ;;  %3324 = vmatprep.subr.bf16.mxu1 %v2249_v39  ;;  %v1374_v63 = vpop.f32.mrb[32].mxu0  ;;  %v2251_v35 = vpack.c.bf16 %v2027_v47, %v2023_v8 }
 0x18c   : > { %v1722_v2 = vadd.f32 %v1721_v32, %v10102_v37  ;;  %v1723_v14 = vpop.f32.mrb[31].mxu1  ;;  %3325 = vmatpush1.bf16.msra.mxu1 %v2248_v42  ;;  %v1375_v36 = vadd.f32 %v1374_v63, %v10127_v54  ;;  %v1376_v1 = vpop.f32.mrb[33].mxu0  ;;  %v2024_v11 = vmax.f32 %v1718_v27, 0.0 }
 0x18d   : > { %v1724_v43 = vadd.f32 %v1723_v14, %v10102_v37  ;;  %v1377_v41 = vadd.f32 %v1376_v1, %v10127_v54  ;;  %v1378_v45 = vpop.f32.mrb[34].mxu0  ;;  %2940 = vmatprep.subr.bf16.mxu0 %v2251_v35  ;;  %v2025_v55 = vmax.f32 %v1720_v19, 0.0 }
 0x18e   : > { %v2028_v30 = vmax.f32 %v1722_v2, 0.0  ;;  %v1379_v0 = vadd.f32 %v1378_v45, %v10123_v52  ;;  %v1380_v58 = vpop.f32.mrb[35].mxu0  ;;  %2941 = vmatpush1.bf16.msra.mxu0 %v2250_v24  ;;  %v2030_v10 = vmax.f32 %v1375_v36, 0.0 }
 0x18f   : > { %v2029_v17 = vmax.f32 %v1724_v43, 0.0  ;;  %v1381_v34 = vadd.f32 %v1380_v58, %v10123_v52  ;;  %v2031_v37 = vmax.f32 %v1377_v41, 0.0 }
 0x190   : > { %v2034_v31 = vmax.f32 %v1379_v0, 0.0  ;;  %v2252_v26 = vpack.c.bf16 %v2028_v30, %v2024_v11 }
 0x191   : > { %v1727_v23 = vpop.f32.mrb[32].mxu1  ;;  %v2253_v42 = vpack.c.bf16 %v2029_v17, %v2025_v55  ;;  %v2035_v61 = vmax.f32 %v1381_v34, 0.0 }
 0x192   : > { %v1728_v39 = vadd.f32 %v1727_v23, %v10127_v54  ;;  %v1729_v8 = vpop.f32.mrb[33].mxu1  ;;  %v2254_v47 = vpack.c.bf16 %v2034_v31, %v2030_v10 }
 0x193   : > { %v1730_v27 = vadd.f32 %v1729_v8, %v10127_v54  ;;  %v1731_v20 = vpop.f32.mrb[34].mxu1  ;;  %3326 = vmatprep.subr.bf16.mxu1 %v2253_v42  ;;  %v1384_v24 = vpop.f32.mrb[36].mxu0  ;;  %v2255_v19 = vpack.c.bf16 %v2035_v61, %v2031_v37 }
 0x194   : > { %v1732_v32 = vadd.f32 %v1731_v20, %v10123_v52  ;;  %v1733_v63 = vpop.f32.mrb[35].mxu1  ;;  %3327 = vmatpush1.bf16.msra.mxu1 %v2252_v26  ;;  %v1385_v35 = vadd.f32 %v1384_v24, %v10147_v7  ;;  %v1386_v2 = vpop.f32.mrb[37].mxu0  ;;  %v2032_v43 = vmax.f32 %v1728_v39, 0.0 }
 0x195   : > { %v1734_v14 = vadd.f32 %v1733_v63, %v10123_v52  ;;  %v1387_v36 = vadd.f32 %v1386_v2, %v10147_v7  ;;  %v1388_v1 = vpop.f32.mrb[38].mxu0  ;;  %2942 = vmatprep.subr.bf16.mxu0 %v2255_v19  ;;  %v2033_v11 = vmax.f32 %v1730_v27, 0.0 }
 0x196   : > { %v2036_v41 = vmax.f32 %v1732_v32, 0.0  ;;  %v1389_v54 = vadd.f32 %v1388_v1, %v10138_v4  ;;  %v1390_v45 = vpop.f32.mrb[39].mxu0  ;;  %2943 = vmatpush1.bf16.msra.mxu0 %v2254_v47  ;;  %v2038_v58 = vmax.f32 %v1385_v35, 0.0 }
 0x197   : > { %v2037_v30 = vmax.f32 %v1734_v14, 0.0  ;;  %v1391_v0 = vadd.f32 %v1390_v45, %v10138_v4  ;;  %v2039_v52 = vmax.f32 %v1387_v36, 0.0 }
 0x198   : > { %v2042_v55 = vmax.f32 %v1389_v54, 0.0  ;;  %v2256_v17 = vpack.c.bf16 %v2036_v41, %v2032_v43 }
 0x199   : > { %v1737_v34 = vpop.f32.mrb[36].mxu1  ;;  %v2257_v10 = vpack.c.bf16 %v2037_v30, %v2033_v11  ;;  %v2043_v31 = vmax.f32 %v1391_v0, 0.0 }
 0x19a   : > { %v1738_v26 = vadd.f32 %v1737_v34, %v10147_v7  ;;  %v1739_v23 = vpop.f32.mrb[37].mxu1  ;;  %v2258_v42 = vpack.c.bf16 %v2042_v55, %v2038_v58 }
 0x19b   : > { %v1740_v37 = vadd.f32 %v1739_v23, %v10147_v7  ;;  %v1741_v61 = vpop.f32.mrb[38].mxu1  ;;  %3328 = vmatprep.subr.bf16.mxu1 %v2257_v10  ;;  %v1394_v39 = vpop.f32.mrb[40].mxu0  ;;  %v2259_v8 = vpack.c.bf16 %v2043_v31, %v2039_v52 }
 0x19c   : > { %v1742_v47 = vadd.f32 %v1741_v61, %v10138_v4  ;;  %v1743_v27 = vpop.f32.mrb[39].mxu1  ;;  %3329 = vmatpush1.bf16.msra.mxu1 %v2256_v17  ;;  %v1395_v20 = vadd.f32 %v1394_v39, %v10163_v38  ;;  %v1396_v24 = vpop.f32.mrb[41].mxu0  ;;  %v2040_v35 = vmax.f32 %v1738_v26, 0.0 }
 0x19d   : > { %v1744_v19 = vadd.f32 %v1743_v27, %v10138_v4  ;;  %v1397_v32 = vadd.f32 %v1396_v24, %v10163_v38  ;;  %v1398_v63 = vpop.f32.mrb[42].mxu0  ;;  %2944 = vmatprep.subr.bf16.mxu0 %v2259_v8  ;;  %v2041_v36 = vmax.f32 %v1740_v37, 0.0 }
 0x19e   : > { %v2044_v2 = vmax.f32 %v1742_v47, 0.0  ;;  %v1399_v7 = vadd.f32 %v1398_v63, %v10161_v12  ;;  %v1400_v14 = vpop.f32.mrb[43].mxu0  ;;  %2945 = vmatpush1.bf16.msra.mxu0 %v2258_v42  ;;  %v2046_v41 = vmax.f32 %v1395_v20, 0.0 }
 0x19f   : > { %v2045_v1 = vmax.f32 %v1744_v19, 0.0  ;;  %v1401_v43 = vadd.f32 %v1400_v14, %v10161_v12  ;;  %v2047_v4 = vmax.f32 %v1397_v32, 0.0 }
 0x1a0   : > { %v2050_v54 = vmax.f32 %v1399_v7, 0.0  ;;  %v2260_v45 = vpack.c.bf16 %v2044_v2, %v2040_v35 }
 0x1a1   : > { %v1747_v11 = vpop.f32.mrb[40].mxu1  ;;  %v2261_v30 = vpack.c.bf16 %v2045_v1, %v2041_v36  ;;  %v2051_v0 = vmax.f32 %v1401_v43, 0.0 }
 0x1a2   : > { %v1748_v58 = vadd.f32 %v1747_v11, %v10163_v38  ;;  %v1749_v55 = vpop.f32.mrb[41].mxu1  ;;  %v2262_v17 = vpack.c.bf16 %v2050_v54, %v2046_v41 }
 0x1a3   : > { %v1750_v34 = vadd.f32 %v1749_v55, %v10163_v38  ;;  %v1751_v10 = vpop.f32.mrb[42].mxu1  ;;  %3330 = vmatprep.subr.bf16.mxu1 %v2261_v30  ;;  %v1404_v52 = vpop.f32.mrb[44].mxu0  ;;  %v2263_v31 = vpack.c.bf16 %v2051_v0, %v2047_v4 }
 0x1a4   : > { %v1752_v26 = vadd.f32 %v1751_v10, %v10161_v12  ;;  %v1753_v23 = vpop.f32.mrb[43].mxu1  ;;  %3331 = vmatpush1.bf16.msra.mxu1 %v2260_v45  ;;  %v1405_v42 = vadd.f32 %v1404_v52, %v10183_v22  ;;  %v1406_v37 = vpop.f32.mrb[45].mxu0  ;;  %v2048_v47 = vmax.f32 %v1748_v58, 0.0 }
 0x1a5   : > { %v1754_v61 = vadd.f32 %v1753_v23, %v10161_v12  ;;  %v1407_v39 = vadd.f32 %v1406_v37, %v10183_v22  ;;  %v1408_v8 = vpop.f32.mrb[46].mxu0  ;;  %2946 = vmatprep.subr.bf16.mxu0 %v2263_v31  ;;  %v2049_v24 = vmax.f32 %v1750_v34, 0.0 }
 0x1a6   : > { %v2052_v27 = vmax.f32 %v1752_v26, 0.0  ;;  %v1409_v38 = vadd.f32 %v1408_v8, %v10175_v16  ;;  %v1410_v20 = vpop.f32.mrb[47].mxu0  ;;  %2947 = vmatpush1.bf16.msra.mxu0 %v2262_v17  ;;  %v2054_v63 = vmax.f32 %v1405_v42, 0.0 }
 0x1a7   : > { %v2053_v19 = vmax.f32 %v1754_v61, 0.0  ;;  %v1411_v32 = vadd.f32 %v1410_v20, %v10175_v16  ;;  %v2055_v12 = vmax.f32 %v1407_v39, 0.0 }
 0x1a8   : > { %v2058_v35 = vmax.f32 %v1409_v38, 0.0  ;;  %v2264_v2 = vpack.c.bf16 %v2052_v27, %v2048_v47 }
 0x1a9   : > { %v1757_v7 = vpop.f32.mrb[44].mxu1  ;;  %v2265_v14 = vpack.c.bf16 %v2053_v19, %v2049_v24  ;;  %v2059_v36 = vmax.f32 %v1411_v32, 0.0 }
 0x1aa   : > { %v1758_v1 = vadd.f32 %v1757_v7, %v10183_v22  ;;  %v1759_v43 = vpop.f32.mrb[45].mxu1  ;;  %v2266_v41 = vpack.c.bf16 %v2058_v35, %v2054_v63 }
 0x1ab   : > { %v1760_v54 = vadd.f32 %v1759_v43, %v10183_v22  ;;  %v1761_v45 = vpop.f32.mrb[46].mxu1  ;;  %3332 = vmatprep.subr.bf16.mxu1 %v2265_v14  ;;  %v1414_v11 = vpop.f32.mrb[48].mxu0  ;;  %v2267_v30 = vpack.c.bf16 %v2059_v36, %v2055_v12 }
 0x1ac   : > { %v1762_v4 = vadd.f32 %v1761_v45, %v10175_v16  ;;  %v1763_v0 = vpop.f32.mrb[47].mxu1  ;;  %3333 = vmatpush1.bf16.msra.mxu1 %v2264_v2  ;;  %v1415_v58 = vadd.f32 %v1414_v11, %v10200_v29  ;;  %v1416_v55 = vpop.f32.mrb[49].mxu0  ;;  %v2056_v52 = vmax.f32 %v1758_v1, 0.0 }
 0x1ad   : > { %v1764_v17 = vadd.f32 %v1763_v0, %v10175_v16  ;;  %v1417_v34 = vadd.f32 %v1416_v55, %v10200_v29  ;;  %v1418_v10 = vpop.f32.mrb[50].mxu0  ;;  %2948 = vmatprep.subr.bf16.mxu0 %v2267_v30  ;;  %v2057_v23 = vmax.f32 %v1760_v54, 0.0 }
 0x1ae   : > { %v2060_v31 = vmax.f32 %v1762_v4, 0.0  ;;  %v1419_v22 = vadd.f32 %v1418_v10, %v10196_v28  ;;  %v1420_v26 = vpop.f32.mrb[51].mxu0  ;;  %2949 = vmatpush1.bf16.msra.mxu0 %v2266_v41  ;;  %v2062_v61 = vmax.f32 %v1415_v58, 0.0 }
 0x1af   : > { %v2061_v42 = vmax.f32 %v1764_v17, 0.0  ;;  %v1421_v37 = vadd.f32 %v1420_v26, %v10196_v28  ;;  %v2063_v16 = vmax.f32 %v1417_v34, 0.0 }
 0x1b0   : > { %v2066_v39 = vmax.f32 %v1419_v22, 0.0  ;;  %v2268_v8 = vpack.c.bf16 %v2060_v31, %v2056_v52 }
 0x1b1   : > { %v1767_v47 = vpop.f32.mrb[48].mxu1  ;;  %v2269_v27 = vpack.c.bf16 %v2061_v42, %v2057_v23  ;;  %v2067_v38 = vmax.f32 %v1421_v37, 0.0 }
 0x1b2   : > { %v1768_v20 = vadd.f32 %v1767_v47, %v10200_v29  ;;  %v1769_v24 = vpop.f32.mrb[49].mxu1  ;;  %v2270_v19 = vpack.c.bf16 %v2066_v39, %v2062_v61 }
 0x1b3   : > { %v1770_v32 = vadd.f32 %v1769_v24, %v10200_v29  ;;  %v1771_v63 = vpop.f32.mrb[50].mxu1  ;;  %3334 = vmatprep.subr.bf16.mxu1 %v2269_v27  ;;  %v1424_v35 = vpop.f32.mrb[52].mxu0  ;;  %v2271_v2 = vpack.c.bf16 %v2067_v38, %v2063_v16 }
 0x1b4   : > { %v1772_v7 = vadd.f32 %v1771_v63, %v10196_v28  ;;  %v1773_v14 = vpop.f32.mrb[51].mxu1  ;;  %3335 = vmatpush1.bf16.msra.mxu1 %v2268_v8  ;;  %v1425_v12 = vadd.f32 %v1424_v35, %v10219_v53  ;;  %v1426_v36 = vpop.f32.mrb[53].mxu0  ;;  %v2064_v54 = vmax.f32 %v1768_v20, 0.0 }
 0x1b5   : > { %v1774_v1 = vadd.f32 %v1773_v14, %v10196_v28  ;;  %v1427_v43 = vadd.f32 %v1426_v36, %v10219_v53  ;;  %v1428_v41 = vpop.f32.mrb[54].mxu0  ;;  %2950 = vmatprep.subr.bf16.mxu0 %v2271_v2  ;;  %v2065_v30 = vmax.f32 %v1770_v32, 0.0 }
 0x1b6   : > { %v2068_v45 = vmax.f32 %v1772_v7, 0.0  ;;  %v1429_v29 = vadd.f32 %v1428_v41, %v10211_v40  ;;  %v1430_v11 = vpop.f32.mrb[55].mxu0  ;;  %2951 = vmatpush1.bf16.msra.mxu0 %v2270_v19  ;;  %v2070_v58 = vmax.f32 %v1425_v12, 0.0 }
 0x1b7   : > { %v2069_v4 = vmax.f32 %v1774_v1, 0.0  ;;  %v1431_v0 = vadd.f32 %v1430_v11, %v10211_v40  ;;  %v2071_v28 = vmax.f32 %v1427_v43, 0.0 }
 0x1b8   : > { %v2074_v55 = vmax.f32 %v1429_v29, 0.0  ;;  %v2272_v17 = vpack.c.bf16 %v2068_v45, %v2064_v54 }
 0x1b9   : > { %v1777_v34 = vpop.f32.mrb[52].mxu1  ;;  %v2273_v10 = vpack.c.bf16 %v2069_v4, %v2065_v30  ;;  %v2075_v52 = vmax.f32 %v1431_v0, 0.0 }
 0x1ba   : > { %v1778_v31 = vadd.f32 %v1777_v34, %v10219_v53  ;;  %v1779_v22 = vpop.f32.mrb[53].mxu1  ;;  %v2274_v26 = vpack.c.bf16 %v2074_v55, %v2070_v58 }
 0x1bb   : > { %v1780_v23 = vadd.f32 %v1779_v22, %v10219_v53  ;;  %v1781_v42 = vpop.f32.mrb[54].mxu1  ;;  %3336 = vmatprep.subr.bf16.mxu1 %v2273_v10  ;;  %v1434_v37 = vpop.f32.mrb[56].mxu0  ;;  %v2275_v61 = vpack.c.bf16 %v2075_v52, %v2071_v28 }
 0x1bc   : > { %v1782_v39 = vadd.f32 %v1781_v42, %v10211_v40  ;;  %v1783_v8 = vpop.f32.mrb[55].mxu1  ;;  %3337 = vmatpush1.bf16.msra.mxu1 %v2272_v17  ;;  %v1435_v47 = vadd.f32 %v1434_v37, %v10236_v62  ;;  %v1436_v27 = vpop.f32.mrb[57].mxu0  ;;  %v2072_v24 = vmax.f32 %v1778_v31, 0.0 }
 0x1bd   : > { %v1784_v16 = vadd.f32 %v1783_v8, %v10211_v40  ;;  %v1437_v38 = vadd.f32 %v1436_v27, %v10236_v62  ;;  %v1438_v20 = vpop.f32.mrb[58].mxu0  ;;  %2952 = vmatprep.subr.bf16.mxu0 %v2275_v61  ;;  %v2073_v63 = vmax.f32 %v1780_v23, 0.0 }
 0x1be   : > { %v2076_v19 = vmax.f32 %v1782_v39, 0.0  ;;  %v1439_v53 = vadd.f32 %v1438_v20, %v10234_v60  ;;  %v1440_v32 = vpop.f32.mrb[59].mxu0  ;;  %2953 = vmatpush1.bf16.msra.mxu0 %v2274_v26  ;;  %v2078_v7 = vmax.f32 %v1435_v47, 0.0 }
 0x1bf   : > { %v2077_v35 = vmax.f32 %v1784_v16, 0.0  ;;  %v1441_v2 = vadd.f32 %v1440_v32, %v10234_v60  ;;  %v2079_v40 = vmax.f32 %v1437_v38, 0.0 }
 0x1c0   : > { %v2082_v14 = vmax.f32 %v1439_v53, 0.0  ;;  %v2276_v12 = vpack.c.bf16 %v2076_v19, %v2072_v24 }
 0x1c1   : > { %v1787_v36 = vpop.f32.mrb[56].mxu1  ;;  %v2277_v1 = vpack.c.bf16 %v2077_v35, %v2073_v63  ;;  %v2083_v43 = vmax.f32 %v1441_v2, 0.0 }
 0x1c2   : > { %v1788_v41 = vadd.f32 %v1787_v36, %v10236_v62  ;;  %v1789_v54 = vpop.f32.mrb[57].mxu1  ;;  %v2278_v45 = vpack.c.bf16 %v2082_v14, %v2078_v7 }
 0x1c3   : > { %v1790_v29 = vadd.f32 %v1789_v54, %v10236_v62  ;;  %v1791_v11 = vpop.f32.mrb[58].mxu1  ;;  %3338 = vmatprep.subr.bf16.mxu1 %v2277_v1  ;;  %v1444_v30 = vpop.f32.mrb[60].mxu0  ;;  %v2279_v4 = vpack.c.bf16 %v2083_v43, %v2079_v40  ;;  %v8969_v54 = vld [vmem:[%s12251_s3 + $0x24] ss:$16 sps:$4 sm:$0xff]  }
 0x1c4   : > { %v1792_v0 = vadd.f32 %v1791_v11, %v10234_v60  ;;  %v1793_v58 = vpop.f32.mrb[59].mxu1  ;;  %3339 = vmatpush1.bf16.msra.mxu1 %v2276_v12  ;;  %v1445_v55 = vadd.f32 %v1444_v30, %v10256_v46  ;;  %v1446_v17 = vpop.f32.mrb[61].mxu0  ;;  %v2080_v52 = vmax.f32 %v1788_v41, 0.0 }
 0x1c5   : > { %v1794_v34 = vadd.f32 %v1793_v58, %v10234_v60  ;;  %v1447_v10 = vadd.f32 %v1446_v17, %v10256_v46  ;;  %v1448_v28 = vpop.f32.mrb[62].mxu0  ;;  %2954 = vmatprep.subr.bf16.mxu0 %v2279_v4  ;;  %v2081_v26 = vmax.f32 %v1790_v29, 0.0 }
 0x1c6   : > { %v2084_v31 = vmax.f32 %v1792_v0, 0.0  ;;  %v1449_v62 = vadd.f32 %v1448_v28, %v10248_v48  ;;  %v1450_v22 = vpop.f32.mrb[63].mxu0  ;;  %2955 = vmatpush1.bf16.msra.mxu0 %v2278_v45  ;;  %v2086_v37 = vmax.f32 %v1445_v55, 0.0 }
 0x1c7   : > { %v2085_v23 = vmax.f32 %v1794_v34, 0.0  ;;  %v1451_v42 = vadd.f32 %v1450_v22, %v10248_v48  ;;  %v2087_v60 = vmax.f32 %v1447_v10, 0.0 }
 0x1c8   : > { %v2090_v61 = vmax.f32 %v1449_v62, 0.0  ;;  %v2280_v39 = vpack.c.bf16 %v2084_v31, %v2080_v52 }
 0x1c9   : > { %v1797_v8 = vpop.f32.mrb[60].mxu1  ;;  %v2281_v47 = vpack.c.bf16 %v2085_v23, %v2081_v26  ;;  %v2091_v27 = vmax.f32 %v1451_v42, 0.0 }
 0x1ca   : > { %v1798_v16 = vadd.f32 %v1797_v8, %v10256_v46  ;;  %v1799_v38 = vpop.f32.mrb[61].mxu1  ;;  %v2282_v20 = vpack.c.bf16 %v2090_v61, %v2086_v37 }
 0x1cb   : > { %v1800_v24 = vadd.f32 %v1799_v38, %v10256_v46  ;;  %v1801_v19 = vpop.f32.mrb[62].mxu1  ;;  %3340 = vmatprep.subr.bf16.mxu1 %v2281_v47  ;;  %v1454_v53 = vpop.f32.mrb[64].mxu0  ;;  %v2283_v32 = vpack.c.bf16 %v2091_v27, %v2087_v60  ;;  %v8966_v46 = vld [vmem:[%s12251_s3] ss:$16 sps:$4 sm:$0xff]   ;;  %v8972_v38 = vld [vmem:[%s12251_s3 + $0x44] ss:$16 sps:$4 sm:$0xff]  }
 0x1cc   : > { %v1802_v63 = vadd.f32 %v1801_v19, %v10248_v48  ;;  %v1803_v35 = vpop.f32.mrb[63].mxu1  ;;  %3341 = vmatpush1.bf16.msra.mxu1 %v2280_v39  ;;  %v1455_v2 = vadd.f32 %v1454_v53, %v10273_v9  ;;  %v1456_v7 = vpop.f32.mrb[65].mxu0  ;;  %v2088_v1 = vmax.f32 %v1798_v16, 0.0 }
 0x1cd   : > { %v1804_v14 = vadd.f32 %v1803_v35, %v10248_v48  ;;  %v1457_v12 = vadd.f32 %v1456_v7, %v10273_v9  ;;  %v1458_v36 = vpop.f32.mrb[66].mxu0  ;;  %2956 = vmatprep.subr.bf16.mxu0 %v2283_v32  ;;  %v2089_v45 = vmax.f32 %v1800_v24, 0.0 }
 0x1ce   : > { %v2092_v40 = vmax.f32 %v1802_v63, 0.0  ;;  %v1459_v43 = vadd.f32 %v1458_v36, %v10269_v6  ;;  %v1460_v41 = vpop.f32.mrb[67].mxu0  ;;  %2957 = vmatpush1.bf16.msra.mxu0 %v2282_v20  ;;  %v2094_v11 = vmax.f32 %v1455_v2, 0.0 }
 0x1cf   : > { %v2093_v48 = vmax.f32 %v1804_v14, 0.0  ;;  %v1461_v29 = vadd.f32 %v1460_v41, %v10269_v6  ;;  %v2095_v55 = vmax.f32 %v1457_v12, 0.0 }
 0x1d0   : > { %v2098_v30 = vmax.f32 %v1459_v43, 0.0  ;;  %v2284_v4 = vpack.c.bf16 %v2092_v40, %v2088_v1 }
 0x1d1   : > { %v1807_v0 = vpop.f32.mrb[64].mxu1  ;;  %v2285_v58 = vpack.c.bf16 %v2093_v48, %v2089_v45  ;;  %2959 = vmatmul.mubr.bf16.vlgmr.msra.gmra.mrb[128].mxu0 %v8966_v46  ;;  %v2099_v17 = vmax.f32 %v1461_v29, 0.0 }
 0x1d2   : > { %v1808_v34 = vadd.f32 %v1807_v0, %v10273_v9  ;;  %v1809_v10 = vpop.f32.mrb[65].mxu1  ;;  %v2286_v28 = vpack.c.bf16 %v2098_v30, %v2094_v11  ;;  %2968 = vmatprep.mubr.bf16.mxu0 %v8969_v54 }
 0x1d3   : > { %v1810_v52 = vadd.f32 %v1809_v10, %v10273_v9  ;;  %v1811_v31 = vpop.f32.mrb[66].mxu1  ;;  %3342 = vmatprep.subr.bf16.mxu1 %v2285_v58  ;;  %v1464_v62 = vpop.f32.mrb[68].mxu0  ;;  %v2287_v22 = vpack.c.bf16 %v2099_v17, %v2095_v55  ;;  %v8971_v9 = vld [vmem:[%s12251_s3 + $0x20] ss:$16 sps:$4 sm:$0xff]   ;;  %v8975_v17 = vld [vmem:[%s12251_s3 + $0x64] ss:$16 sps:$4 sm:$0xff]  }
 0x1d4   : > { %v1812_v26 = vadd.f32 %v1811_v31, %v10269_v6  ;;  %v1813_v23 = vpop.f32.mrb[67].mxu1  ;;  %3343 = vmatpush1.bf16.msra.mxu1 %v2284_v4  ;;  %v1465_v42 = vadd.f32 %v1464_v62, %v10292_v25  ;;  %v1466_v37 = vpop.f32.mrb[69].mxu0  ;;  %v2096_v47 = vmax.f32 %v1808_v34, 0.0 }
 0x1d5   : > { %v1814_v61 = vadd.f32 %v1813_v23, %v10269_v6  ;;  %v1467_v39 = vadd.f32 %v1466_v37, %v10292_v25  ;;  %v1468_v8 = vpop.f32.mrb[70].mxu0  ;;  %3119 = vmatprep.subr.bf16.mxu0 %v2287_v22  ;;  %v2097_v6 = vmax.f32 %v1810_v52, 0.0 }
 0x1d6   : > { %v2100_v60 = vmax.f32 %v1812_v26, 0.0  ;;  %v1469_v27 = vadd.f32 %v1468_v8, %v10284_v15  ;;  %v1470_v16 = vpop.f32.mrb[71].mxu0  ;;  %3120 = vmatpush1.bf16.msra.mxu0 %v2286_v28  ;;  %v2102_v19 = vmax.f32 %v1465_v42, 0.0 }
 0x1d7   : > { %3345 = vmatmul.mubr.bf16.vlgmr.msra.gmra.mrb[128].mxu1 %v8966_v46  ;;  %v2101_v20 = vmax.f32 %v1814_v61, 0.0  ;;  %v1471_v24 = vadd.f32 %v1470_v16, %v10284_v15  ;;  %v2103_v2 = vmax.f32 %v1467_v39, 0.0 }
 0x1d8   : > { %v2106_v53 = vmax.f32 %v1469_v27, 0.0  ;;  %v2288_v32 = vpack.c.bf16 %v2100_v60, %v2096_v47  ;;  %3354 = vmatprep.mubr.bf16.mxu1 %v8969_v54 }
 0x1d9   : > { %v1817_v63 = vpop.f32.mrb[68].mxu1  ;;  %v2289_v35 = vpack.c.bf16 %v2101_v20, %v2097_v6  ;;  %2969 = vmatmul.mubr.bf16.gmra.mrb[132].mxu0 %v8971_v9  ;;  %v2107_v7 = vmax.f32 %v1471_v24, 0.0 }
 0x1da   : > { %v1818_v14 = vadd.f32 %v1817_v63, %v10292_v25  ;;  %v1819_v12 = vpop.f32.mrb[69].mxu1  ;;  %v2290_v36 = vpack.c.bf16 %v2106_v53, %v2102_v19  ;;  %2978 = vmatprep.mubr.bf16.mxu0 %v8972_v38 }
 0x1db   : > { %v1820_v46 = vadd.f32 %v1819_v12, %v10292_v25  ;;  %v1821_v1 = vpop.f32.mrb[70].mxu1  ;;  %3505 = vmatprep.subr.bf16.mxu1 %v2289_v35  ;;  %v1474_v40 = vpop.f32.mrb[72].mxu0  ;;  %v2291_v43 = vpack.c.bf16 %v2107_v7, %v2103_v2  ;;  %v8974_v25 = vld [vmem:[%s12251_s3 + $0x40] ss:$16 sps:$4 sm:$0xff]   ;;  %v8978_v35 = vld [vmem:[%s12251_s3 + $0x84] ss:$16 sps:$4 sm:$0xff]  }
 0x1dc   : > { %v1822_v41 = vadd.f32 %v1821_v1, %v10284_v15  ;;  %v1823_v45 = vpop.f32.mrb[71].mxu1  ;;  %3506 = vmatpush1.bf16.msra.mxu1 %v2288_v32  ;;  %v1475_v54 = vadd.f32 %v1474_v40, %v10309_v57  ;;  %v1476_v48 = vpop.f32.mrb[73].mxu0  ;;  %v2104_v4 = vmax.f32 %v1818_v14, 0.0 }
 0x1dd   : > { %v1824_v29 = vadd.f32 %v1823_v45, %v10284_v15  ;;  %v1477_v11 = vadd.f32 %v1476_v48, %v10309_v57  ;;  %v1478_v30 = vpop.f32.mrb[74].mxu0  ;;  %3121 = vmatprep.subr.bf16.mxu0 %v2291_v43  ;;  %v2105_v15 = vmax.f32 %v1820_v46, 0.0 }
 0x1de   : > { %v2108_v0 = vmax.f32 %v1822_v41, 0.0  ;;  %v1479_v58 = vadd.f32 %v1478_v30, %v10307_v33  ;;  %v1480_v55 = vpop.f32.mrb[75].mxu0  ;;  %3122 = vmatpush1.bf16.msra.mxu0 %v2290_v36  ;;  %v2110_v28 = vmax.f32 %v1475_v54, 0.0 }
 0x1df   : > { %3355 = vmatmul.mubr.bf16.gmra.mrb[132].mxu1 %v8971_v9  ;;  %v2109_v34 = vmax.f32 %v1824_v29, 0.0  ;;  %v1481_v10 = vadd.f32 %v1480_v55, %v10307_v33  ;;  %v2111_v26 = vmax.f32 %v1477_v11, 0.0 }
 0x1e0   : > { %v2114_v52 = vmax.f32 %v1479_v58, 0.0  ;;  %v2292_v31 = vpack.c.bf16 %v2108_v0, %v2104_v4  ;;  %3364 = vmatprep.mubr.bf16.mxu1 %v8972_v38  ;;  %v12331_v0 = vld [vmem:[#allocation14_spill] sm:$0xff] }
 0x1e1   : > { %v1827_v62 = vpop.f32.mrb[72].mxu1  ;;  %v2293_v22 = vpack.c.bf16 %v2109_v34, %v2105_v15  ;;  %2979 = vmatmul.mubr.bf16.gmra.mrb[136].mxu0 %v8974_v25  ;;  %v2115_v23 = vmax.f32 %v1481_v10, 0.0 }
 0x1e2   : > { %v1828_v42 = vadd.f32 %v1827_v62, %v10309_v57  ;;  %v1829_v37 = vpop.f32.mrb[73].mxu1  ;;  %v2294_v61 = vpack.c.bf16 %v2114_v52, %v2110_v28  ;;  %2988 = vmatprep.mubr.bf16.mxu0 %v8975_v17  ;;  %v12332_v52 = vld [vmem:[#allocation13_spill] sm:$0xff] }
 0x1e3   : > { %v1830_v39 = vadd.f32 %v1829_v37, %v10309_v57  ;;  %v1831_v8 = vpop.f32.mrb[74].mxu1  ;;  %3507 = vmatprep.subr.bf16.mxu1 %v2293_v22  ;;  %v1484_v9 = vpop.f32.mrb[76].mxu0  ;;  %v2295_v47 = vpack.c.bf16 %v2115_v23, %v2111_v26  ;;  %v8977_v57 = vld [vmem:[%s12251_s3 + $0x60] ss:$16 sps:$4 sm:$0xff]   ;;  %v8981_v22 = vld [vmem:[%s12251_s3 + $0xa4] ss:$16 sps:$4 sm:$0xff]  }
 0x1e4   : > { %v1832_v60 = vadd.f32 %v1831_v8, %v10307_v33  ;;  %v1833_v27 = vpop.f32.mrb[75].mxu1  ;;  %3508 = vmatpush1.bf16.msra.mxu1 %v2292_v31  ;;  %v1485_v16 = vadd.f32 %v1484_v9, %v10329_v44  ;;  %v1486_v38 = vpop.f32.mrb[77].mxu0  ;;  %v2112_v19 = vmax.f32 %v1828_v42, 0.0 }
 0x1e5   : > { %v1834_v6 = vadd.f32 %v1833_v27, %v10307_v33  ;;  %v1487_v20 = vadd.f32 %v1486_v38, %v10329_v44  ;;  %v1488_v24 = vpop.f32.mrb[78].mxu0  ;;  %3123 = vmatprep.subr.bf16.mxu0 %v2295_v47  ;;  %v2113_v33 = vmax.f32 %v1830_v39, 0.0 }
 0x1e6   : > { %v2116_v53 = vmax.f32 %v1832_v60, 0.0  ;;  %v1489_v32 = vadd.f32 %v1488_v24, %v10321_v59  ;;  %v1490_v63 = vpop.f32.mrb[79].mxu0  ;;  %3124 = vmatpush1.bf16.msra.mxu0 %v2294_v61  ;;  %v2118_v14 = vmax.f32 %v1485_v16, 0.0 }
 0x1e7   : > { %3365 = vmatmul.mubr.bf16.gmra.mrb[136].mxu1 %v8974_v25  ;;  %v2117_v2 = vmax.f32 %v1834_v6, 0.0  ;;  %v1491_v7 = vadd.f32 %v1490_v63, %v10321_v59  ;;  %v2119_v1 = vmax.f32 %v1487_v20, 0.0 }
 0x1e8   : > { %v2122_v12 = vmax.f32 %v1489_v32, 0.0  ;;  %v2296_v36 = vpack.c.bf16 %v2116_v53, %v2112_v19  ;;  %3374 = vmatprep.mubr.bf16.mxu1 %v8975_v17  ;;  %v12333_v53 = vld [vmem:[#allocation16_spill] sm:$0xff] }
 0x1e9   : > { %v1837_v46 = vpop.f32.mrb[76].mxu1  ;;  %v2297_v40 = vpack.c.bf16 %v2117_v2, %v2113_v33  ;;  %v2123_v43 = vmax.f32 %v1491_v7, 0.0  ;;  %2989 = vmatmul.mubr.bf16.gmra.mrb[140].mxu0 %v8977_v57  ;;  %v8983_v7 = vld [vmem:[%s12251_s3 + $0xa0] ss:$16 sps:$4 sm:$0xff]  }
 0x1ea   : > { %v1838_v41 = vadd.f32 %v1837_v46, %v10329_v44  ;;  %v1839_v45 = vpop.f32.mrb[77].mxu1  ;;  %v2298_v54 = vpack.c.bf16 %v2122_v12, %v2118_v14  ;;  %2998 = vmatprep.mubr.bf16.mxu0 %v8978_v35 }
 0x1eb   : > { %v1840_v48 = vadd.f32 %v1839_v45, %v10329_v44  ;;  %v1841_v29 = vpop.f32.mrb[78].mxu1  ;;  %3509 = vmatprep.subr.bf16.mxu1 %v2297_v40  ;;  %v2299_v11 = vpack.c.bf16 %v2123_v43, %v2119_v1  ;;  %v1494_v30 = vpop.f32.mrb[80].mxu0  ;;  %v8980_v44 = vld [vmem:[%s12251_s3 + $0x80] ss:$16 sps:$4 sm:$0xff]   ;;  %v8984_v40 = vld [vmem:[%s12251_s3 + $0xc4] ss:$16 sps:$4 sm:$0xff]  }
 0x1ec   : > { %v1842_v25 = vadd.f32 %v1841_v29, %v10321_v59  ;;  %v1843_v4 = vpop.f32.mrb[79].mxu1  ;;  %3510 = vmatpush1.bf16.msra.mxu1 %v2296_v36  ;;  %v1495_v58 = vadd.f32 %v1494_v30, %v12331_v0  ;;  %v1496_v55 = vpop.f32.mrb[81].mxu0  ;;  %v2120_v10 = vmax.f32 %v1838_v41, 0.0  ;;  %v12334_v36 = vld [vmem:[#allocation15_spill] sm:$0xff] }
 0x1ed   : > { %v1844_v17 = vadd.f32 %v1843_v4, %v10321_v59  ;;  %v1497_v15 = vadd.f32 %v1496_v55, %v12331_v0  ;;  %v1498_v34 = vpop.f32.mrb[82].mxu0  ;;  %3125 = vmatprep.subr.bf16.mxu0 %v2299_v11  ;;  %v2121_v26 = vmax.f32 %v1840_v48, 0.0 }
 0x1ee   : > { %v2124_v28 = vmax.f32 %v1842_v25, 0.0  ;;  %v1499_v31 = vadd.f32 %v1498_v34, %v12332_v52  ;;  %v1500_v62 = vpop.f32.mrb[83].mxu0  ;;  %3126 = vmatpush1.bf16.msra.mxu0 %v2298_v54  ;;  %v2126_v37 = vmax.f32 %v1495_v58, 0.0 }
 0x1ef   : > { %v2125_v59 = vmax.f32 %v1844_v17, 0.0  ;;  %3375 = vmatmul.mubr.bf16.gmra.mrb[140].mxu1 %v8977_v57  ;;  %v1501_v23 = vadd.f32 %v1500_v62, %v12332_v52  ;;  %v2127_v9 = vmax.f32 %v1497_v15, 0.0 }
 0x1f0   : > { %v2300_v42 = vpack.c.bf16 %v2124_v28, %v2120_v10  ;;  %v2130_v61 = vmax.f32 %v1499_v31, 0.0  ;;  %3384 = vmatprep.mubr.bf16.mxu1 %v8978_v35 }
 0x1f1   : > { %v2301_v39 = vpack.c.bf16 %v2125_v59, %v2121_v26  ;;  %v1847_v8 = vpop.f32.mrb[80].mxu1  ;;  %v2131_v47 = vmax.f32 %v1501_v23, 0.0  ;;  %2999 = vmatmul.mubr.bf16.gmra.mrb[144].mxu0 %v8980_v44  ;;  %v8986_v23 = vld [vmem:[%s12251_s3 + $0xc0] ss:$16 sps:$4 sm:$0xff]  }
 0x1f2   : > { %v1848_v60 = vadd.f32 %v1847_v8, %v12331_v0  ;;  %v1849_v27 = vpop.f32.mrb[81].mxu1  ;;  %v2302_v16 = vpack.c.bf16 %v2130_v61, %v2126_v37  ;;  %3008 = vmatprep.mubr.bf16.mxu0 %v8981_v22  ;;  %v12336_v61 = vld [vmem:[#allocation17_spill] sm:$0xff] }
 0x1f3   : > { %v1850_v38 = vadd.f32 %v1849_v27, %v12331_v0  ;;  %v1851_v6 = vpop.f32.mrb[82].mxu1  ;;  %3511 = vmatprep.subr.bf16.mxu1 %v2301_v39  ;;  %v2303_v20 = vpack.c.bf16 %v2131_v47, %v2127_v9  ;;  %v1504_v24 = vpop.f32.mrb[84].mxu0  ;;  %v8987_v9 = vld [vmem:[%s12251_s3 + $0xe4] ss:$16 sps:$4 sm:$0xff]  }
 0x1f4   : > { %v1852_v57 = vadd.f32 %v1851_v6, %v12332_v52  ;;  %v1853_v19 = vpop.f32.mrb[83].mxu1  ;;  %3512 = vmatpush1.bf16.msra.mxu1 %v2300_v42  ;;  %v1505_v32 = vadd.f32 %v1504_v24, %v12333_v53  ;;  %v1506_v63 = vpop.f32.mrb[85].mxu0  ;;  %v2128_v14 = vmax.f32 %v1848_v60, 0.0 }
 0x1f5   : > { %v1854_v35 = vadd.f32 %v1853_v19, %v12332_v52  ;;  %v1507_v33 = vadd.f32 %v1506_v63, %v12333_v53  ;;  %v1508_v2 = vpop.f32.mrb[86].mxu0  ;;  %3127 = vmatprep.subr.bf16.mxu0 %v2303_v20  ;;  %v2129_v43 = vmax.f32 %v1850_v38, 0.0  ;;  %v12335_v52 = vld [vmem:[#allocation18_spill] sm:$0xff] }
 0x1f6   : > { %v2132_v12 = vmax.f32 %v1852_v57, 0.0  ;;  %v1509_v46 = vadd.f32 %v1508_v2, %v12334_v36  ;;  %v1510_v1 = vpop.f32.mrb[87].mxu0  ;;  %3128 = vmatpush1.bf16.msra.mxu0 %v2302_v16  ;;  %v2134_v48 = vmax.f32 %v1505_v32, 0.0 }
 0x1f7   : > { %v2133_v41 = vmax.f32 %v1854_v35, 0.0  ;;  %3385 = vmatmul.mubr.bf16.gmra.mrb[144].mxu1 %v8980_v44  ;;  %v1511_v45 = vadd.f32 %v1510_v1, %v12334_v36  ;;  %v2135_v25 = vmax.f32 %v1507_v33, 0.0  ;;  %v12337_v33 = vld [vmem:[#allocation20_spill] sm:$0xff] }
 0x1f8   : > { %v2304_v54 = vpack.c.bf16 %v2132_v12, %v2128_v14  ;;  %v2138_v29 = vmax.f32 %v1509_v46, 0.0  ;;  %3394 = vmatprep.mubr.bf16.mxu1 %v8981_v22 }
 0x1f9   : > { %v2305_v11 = vpack.c.bf16 %v2133_v41, %v2129_v43  ;;  %v1857_v30 = vpop.f32.mrb[84].mxu1  ;;  %v2139_v4 = vmax.f32 %v1511_v45, 0.0  ;;  %3009 = vmatmul.mubr.bf16.gmra.mrb[148].mxu0 %v8983_v7  ;;  %v12338_v41 = vld [vmem:[#allocation19_spill] sm:$0xff] }
 0x1fa   : > { %v1858_v0 = vadd.f32 %v1857_v30, %v12333_v53  ;;  %v1859_v58 = vpop.f32.mrb[85].mxu1  ;;  %v2306_v55 = vpack.c.bf16 %v2138_v29, %v2134_v48  ;;  %3018 = vmatprep.mubr.bf16.mxu0 %v8984_v40 }
 0x1fb   : > { %v1860_v17 = vadd.f32 %v1859_v58, %v12333_v53  ;;  %v1861_v15 = vpop.f32.mrb[86].mxu1  ;;  %3513 = vmatprep.subr.bf16.mxu1 %v2305_v11  ;;  %v2307_v34 = vpack.c.bf16 %v2139_v4, %v2135_v25  ;;  %v1514_v44 = vpop.f32.mrb[88].mxu0  ;;  %v8989_v11 = vld [vmem:[%s12251_s3 + $0xe0] ss:$16 sps:$4 sm:$0xff]   ;;  %v8990_v58 = vld [vmem:[%s12251_s3 + $0x104] ss:$16 sps:$4 sm:$0xff]  }
 0x1fc   : > { %v1862_v10 = vadd.f32 %v1861_v15, %v12334_v36  ;;  %v1863_v28 = vpop.f32.mrb[87].mxu1  ;;  %3514 = vmatpush1.bf16.msra.mxu1 %v2304_v54  ;;  %v1515_v31 = vadd.f32 %v1514_v44, %v12335_v52  ;;  %v1516_v62 = vpop.f32.mrb[89].mxu0  ;;  %v2136_v42 = vmax.f32 %v1858_v0, 0.0 }
 0x1fd   : > { %v1864_v22 = vadd.f32 %v1863_v28, %v12334_v36  ;;  %v1517_v26 = vadd.f32 %v1516_v62, %v12335_v52  ;;  %v1518_v59 = vpop.f32.mrb[90].mxu0  ;;  %3129 = vmatprep.subr.bf16.mxu0 %v2307_v34  ;;  %v2137_v47 = vmax.f32 %v1860_v17, 0.0 }
 0x1fe   : > { %v2140_v37 = vmax.f32 %v1862_v10, 0.0  ;;  %v1519_v39 = vadd.f32 %v1518_v59, %v12336_v61  ;;  %v1520_v8 = vpop.f32.mrb[91].mxu0  ;;  %3130 = vmatpush1.bf16.msra.mxu0 %v2306_v55  ;;  %v2142_v38 = vmax.f32 %v1515_v31, 0.0  ;;  %v12339_v59 = vld [vmem:[#allocation22_spill] sm:$0xff] }
 0x1ff   : > { %v2141_v60 = vmax.f32 %v1864_v22, 0.0  ;;  %3395 = vmatmul.mubr.bf16.gmra.mrb[148].mxu1 %v8983_v7  ;;  %v1521_v27 = vadd.f32 %v1520_v8, %v12336_v61  ;;  %v2143_v57 = vmax.f32 %v1517_v26, 0.0 }
 0x200   : > { %v2308_v16 = vpack.c.bf16 %v2140_v37, %v2136_v42  ;;  %v2146_v6 = vmax.f32 %v1519_v39, 0.0  ;;  %3404 = vmatprep.mubr.bf16.mxu1 %v8984_v40 }
 0x201   : > { %v2309_v20 = vpack.c.bf16 %v2141_v60, %v2137_v47  ;;  %v1867_v24 = vpop.f32.mrb[88].mxu1  ;;  %v2147_v19 = vmax.f32 %v1521_v27, 0.0  ;;  %3019 = vmatmul.mubr.bf16.gmra.mrb[152].mxu0 %v8986_v23  ;;  %v12340_v60 = vld [vmem:[#allocation21_spill] sm:$0xff] }
 0x202   : > { %v1868_v32 = vadd.f32 %v1867_v24, %v12335_v52  ;;  %v1869_v63 = vpop.f32.mrb[89].mxu1  ;;  %v2310_v35 = vpack.c.bf16 %v2146_v6, %v2142_v38  ;;  %3028 = vmatprep.mubr.bf16.mxu0 %v8987_v9 }
 0x203   : > { %v1524_v53 = vpop.f32.mrb[92].mxu0  ;;  %v1870_v7 = vadd.f32 %v1869_v63, %v12335_v52  ;;  %v1871_v12 = vpop.f32.mrb[90].mxu1  ;;  %3515 = vmatprep.subr.bf16.mxu1 %v2309_v20  ;;  %v2311_v36 = vpack.c.bf16 %v2147_v19, %v2143_v57  ;;  %v8992_v20 = vld [vmem:[%s12251_s3 + $0x100] ss:$16 sps:$4 sm:$0xff]  }
 0x204   : > { %v1525_v2 = vadd.f32 %v1524_v53, %v12337_v33  ;;  %v1526_v14 = vpop.f32.mrb[93].mxu0  ;;  %v1872_v40 = vadd.f32 %v1871_v12, %v12336_v61  ;;  %v1873_v43 = vpop.f32.mrb[91].mxu1  ;;  %3516 = vmatpush1.bf16.msra.mxu1 %v2308_v16  ;;  %v2144_v30 = vmax.f32 %v1868_v32, 0.0  ;;  %v8993_v32 = vld [vmem:[%s12251_s3 + $0x124] ss:$16 sps:$4 sm:$0xff]  }
 0x205   : > { %v1527_v46 = vadd.f32 %v1526_v14, %v12337_v33  ;;  %v1528_v1 = vpop.f32.mrb[94].mxu0  ;;  %v1874_v48 = vadd.f32 %v1873_v43, %v12336_v61  ;;  %3131 = vmatprep.subr.bf16.mxu0 %v2311_v36  ;;  %v2145_v55 = vmax.f32 %v1870_v7, 0.0 }
 0x206   : > { %v1529_v45 = vadd.f32 %v1528_v1, %v12338_v41  ;;  %v1530_v54 = vpop.f32.mrb[95].mxu0  ;;  %v2148_v25 = vmax.f32 %v1872_v40, 0.0  ;;  %v2150_v4 = vmax.f32 %v1525_v2, 0.0  ;;  %3132 = vmatpush1.bf16.msra.mxu0 %v2310_v35 }
 0x207   : > { %v1531_v29 = vadd.f32 %v1530_v54, %v12338_v41  ;;  %v2149_v17 = vmax.f32 %v1874_v48, 0.0  ;;  %3405 = vmatmul.mubr.bf16.gmra.mrb[152].mxu1 %v8986_v23  ;;  %v2151_v15 = vmax.f32 %v1527_v46, 0.0 }
 0x208   : > { %v2154_v0 = vmax.f32 %v1529_v45, 0.0  ;;  %v2312_v44 = vpack.c.bf16 %v2148_v25, %v2144_v30  ;;  %3414 = vmatprep.mubr.bf16.mxu1 %v8987_v9 }
 0x209   : > { %v2155_v34 = vmax.f32 %v1531_v29, 0.0  ;;  %v2313_v28 = vpack.c.bf16 %v2149_v17, %v2145_v55  ;;  %v1877_v52 = vpop.f32.mrb[92].mxu1  ;;  %3029 = vmatmul.mubr.bf16.gmra.mrb[156].mxu0 %v8989_v11 }
 0x20a   : > { %v2314_v10 = vpack.c.bf16 %v2154_v0, %v2150_v4  ;;  %v1878_v22 = vadd.f32 %v1877_v52, %v12337_v33  ;;  %v1879_v26 = vpop.f32.mrb[93].mxu1  ;;  %3038 = vmatprep.mubr.bf16.mxu0 %v8990_v58  ;;  %v12342_v0 = vld [vmem:[#allocation23_spill] sm:$0xff] }
 0x20b   : > { %v2315_v31 = vpack.c.bf16 %v2155_v34, %v2151_v15  ;;  %v1534_v62 = vpop.f32.mrb[96].mxu0  ;;  %v1880_v61 = vadd.f32 %v1879_v26, %v12337_v33  ;;  %v1881_v23 = vpop.f32.mrb[94].mxu1  ;;  %3517 = vmatprep.subr.bf16.mxu1 %v2313_v28  ;;  %v8995_v34 = vld [vmem:[%s12251_s3 + $0x120] ss:$16 sps:$4 sm:$0xff]  }
 0x20c   : > { %v1535_v42 = vadd.f32 %v1534_v62, %v12339_v59  ;;  %v1536_v37 = vpop.f32.mrb[97].mxu0  ;;  %v1882_v9 = vadd.f32 %v1881_v23, %v12338_v41  ;;  %v1883_v47 = vpop.f32.mrb[95].mxu1  ;;  %3518 = vmatpush1.bf16.msra.mxu1 %v2312_v44  ;;  %v2152_v24 = vmax.f32 %v1878_v22, 0.0 }
 0x20d   : > { %v1537_v39 = vadd.f32 %v1536_v37, %v12339_v59  ;;  %v1538_v8 = vpop.f32.mrb[98].mxu0  ;;  %3133 = vmatprep.subr.bf16.mxu0 %v2315_v31  ;;  %v1884_v38 = vadd.f32 %v1883_v47, %v12338_v41  ;;  %v2153_v63 = vmax.f32 %v1880_v61, 0.0  ;;  %v12341_v41 = vld [vmem:[#allocation24_spill] sm:$0xff]  ;;  %v8996_v31 = vld [vmem:[%s12251_s3 + $0x144] ss:$16 sps:$4 sm:$0xff]  }
 0x20e   : > { %v1539_v27 = vadd.f32 %v1538_v8, %v12340_v60  ;;  %v1540_v16 = vpop.f32.mrb[99].mxu0  ;;  %3134 = vmatpush1.bf16.msra.mxu0 %v2314_v10  ;;  %v2156_v57 = vmax.f32 %v1882_v9, 0.0  ;;  %v2158_v19 = vmax.f32 %v1535_v42, 0.0 }
 0x20f   : > { %v1541_v6 = vadd.f32 %v1540_v16, %v12340_v60  ;;  %v2157_v35 = vmax.f32 %v1884_v38, 0.0  ;;  %3415 = vmatmul.mubr.bf16.gmra.mrb[156].mxu1 %v8989_v11  ;;  %v2159_v33 = vmax.f32 %v1537_v39, 0.0 }
 0x210   : > { %v2162_v53 = vmax.f32 %v1539_v27, 0.0  ;;  %v2316_v14 = vpack.c.bf16 %v2156_v57, %v2152_v24  ;;  %3424 = vmatprep.mubr.bf16.mxu1 %v8990_v58 }
 0x211   : > { %v2163_v2 = vmax.f32 %v1541_v6, 0.0  ;;  %v2317_v12 = vpack.c.bf16 %v2157_v35, %v2153_v63  ;;  %v1887_v36 = vpop.f32.mrb[96].mxu1  ;;  %3039 = vmatmul.mubr.bf16.gmra.mrb[160].mxu0 %v8992_v20 }
 0x212   : > { %v2318_v7 = vpack.c.bf16 %v2162_v53, %v2158_v19  ;;  %v1888_v40 = vadd.f32 %v1887_v36, %v12339_v59  ;;  %v1889_v43 = vpop.f32.mrb[97].mxu1  ;;  %3048 = vmatprep.mubr.bf16.mxu0 %v8993_v32  ;;  %v12344_v53 = vld [vmem:[#allocation25_spill] sm:$0xff] }
 0x213   : > { %v2319_v46 = vpack.c.bf16 %v2163_v2, %v2159_v33  ;;  %v1544_v1 = vpop.f32.mrb[100].mxu0  ;;  %v1890_v48 = vadd.f32 %v1889_v43, %v12339_v59  ;;  %v1891_v29 = vpop.f32.mrb[98].mxu1  ;;  %3519 = vmatprep.subr.bf16.mxu1 %v2317_v12  ;;  %v8998_v2 = vld [vmem:[%s12251_s3 + $0x140] ss:$16 sps:$4 sm:$0xff]  }
 0x214   : > { %v1545_v45 = vadd.f32 %v1544_v1, %v12341_v41  ;;  %v1546_v54 = vpop.f32.mrb[101].mxu0  ;;  %v1892_v25 = vadd.f32 %v1891_v29, %v12340_v60  ;;  %v1893_v4 = vpop.f32.mrb[99].mxu1  ;;  %3520 = vmatpush1.bf16.msra.mxu1 %v2316_v14  ;;  %v2160_v44 = vmax.f32 %v1888_v40, 0.0 }
 0x215   : > { %v1547_v11 = vadd.f32 %v1546_v54, %v12341_v41  ;;  %v1548_v30 = vpop.f32.mrb[102].mxu0  ;;  %3135 = vmatprep.subr.bf16.mxu0 %v2319_v46  ;;  %v1894_v17 = vadd.f32 %v1893_v4, %v12340_v60  ;;  %v2161_v62 = vmax.f32 %v1890_v48, 0.0  ;;  %v12343_v60 = vld [vmem:[#allocation26_spill] sm:$0xff]  ;;  %v8999_v46 = vld [vmem:[%s12251_s3 + $0x164] ss:$16 sps:$4 sm:$0xff]  }
 0x216   : > { %v1549_v58 = vadd.f32 %v1548_v30, %v12342_v0  ;;  %v1550_v55 = vpop.f32.mrb[103].mxu0  ;;  %3136 = vmatpush1.bf16.msra.mxu0 %v2318_v7  ;;  %v2164_v10 = vmax.f32 %v1892_v25, 0.0  ;;  %v2166_v28 = vmax.f32 %v1545_v45, 0.0 }
 0x217   : > { %v1551_v15 = vadd.f32 %v1550_v55, %v12342_v0  ;;  %v2165_v22 = vmax.f32 %v1894_v17, 0.0  ;;  %3425 = vmatmul.mubr.bf16.gmra.mrb[160].mxu1 %v8992_v20  ;;  %v2167_v26 = vmax.f32 %v1547_v11, 0.0 }
 0x218   : > { %v2170_v52 = vmax.f32 %v1549_v58, 0.0  ;;  %v2320_v42 = vpack.c.bf16 %v2164_v10, %v2160_v44  ;;  %3434 = vmatprep.mubr.bf16.mxu1 %v8993_v32 }
 0x219   : > { %v2171_v59 = vmax.f32 %v1551_v15, 0.0  ;;  %v2321_v61 = vpack.c.bf16 %v2165_v22, %v2161_v62  ;;  %v1897_v23 = vpop.f32.mrb[100].mxu1  ;;  %3049 = vmatmul.mubr.bf16.gmra.mrb[164].mxu0 %v8995_v34 }
 0x21a   : > { %v2322_v37 = vpack.c.bf16 %v2170_v52, %v2166_v28  ;;  %v1898_v9 = vadd.f32 %v1897_v23, %v12341_v41  ;;  %v1899_v47 = vpop.f32.mrb[101].mxu1  ;;  %3058 = vmatprep.mubr.bf16.mxu0 %v8996_v31  ;;  %v12346_v52 = vld [vmem:[#allocation27_spill] sm:$0xff] }
 0x21b   : > { %v2323_v39 = vpack.c.bf16 %v2171_v59, %v2167_v26  ;;  %v1554_v8 = vpop.f32.mrb[104].mxu0  ;;  %v1900_v38 = vadd.f32 %v1899_v47, %v12341_v41  ;;  %v1901_v6 = vpop.f32.mrb[102].mxu1  ;;  %3521 = vmatprep.subr.bf16.mxu1 %v2321_v61  ;;  %v9001_v59 = vld [vmem:[%s12251_s3 + $0x160] ss:$16 sps:$4 sm:$0xff]  }
 0x21c   : > { %v1555_v27 = vadd.f32 %v1554_v8, %v12343_v60  ;;  %v1556_v16 = vpop.f32.mrb[105].mxu0  ;;  %v1902_v57 = vadd.f32 %v1901_v6, %v12342_v0  ;;  %v1903_v19 = vpop.f32.mrb[103].mxu1  ;;  %3522 = vmatpush1.bf16.msra.mxu1 %v2320_v42  ;;  %v2168_v14 = vmax.f32 %v1898_v9, 0.0 }
 0x21d   : > { %v1557_v20 = vadd.f32 %v1556_v16, %v12343_v60  ;;  %v1558_v24 = vpop.f32.mrb[106].mxu0  ;;  %3137 = vmatprep.subr.bf16.mxu0 %v2323_v39  ;;  %v1904_v35 = vadd.f32 %v1903_v19, %v12342_v0  ;;  %v2169_v1 = vmax.f32 %v1900_v38, 0.0  ;;  %v12345_v0 = vld [vmem:[#allocation28_spill] sm:$0xff]  ;;  %v9002_v39 = vld [vmem:[%s12251_s3 + $0x184] ss:$16 sps:$4 sm:$0xff]  }
 0x21e   : > { %v1559_v32 = vadd.f32 %v1558_v24, %v12344_v53  ;;  %v1560_v63 = vpop.f32.mrb[107].mxu0  ;;  %3138 = vmatpush1.bf16.msra.mxu0 %v2322_v37  ;;  %v2172_v7 = vmax.f32 %v1902_v57, 0.0  ;;  %v2174_v12 = vmax.f32 %v1555_v27, 0.0 }
 0x21f   : > { %v1561_v33 = vadd.f32 %v1560_v63, %v12344_v53  ;;  %v2173_v40 = vmax.f32 %v1904_v35, 0.0  ;;  %3435 = vmatmul.mubr.bf16.gmra.mrb[164].mxu1 %v8995_v34  ;;  %v2175_v43 = vmax.f32 %v1557_v20, 0.0 }
 0x220   : > { %v2178_v36 = vmax.f32 %v1559_v32, 0.0  ;;  %v2324_v45 = vpack.c.bf16 %v2172_v7, %v2168_v14  ;;  %3444 = vmatprep.mubr.bf16.mxu1 %v8996_v31 }
 0x221   : > { %v2179_v41 = vmax.f32 %v1561_v33, 0.0  ;;  %v2325_v48 = vpack.c.bf16 %v2173_v40, %v2169_v1  ;;  %v1907_v29 = vpop.f32.mrb[104].mxu1  ;;  %3059 = vmatmul.mubr.bf16.gmra.mrb[168].mxu0 %v8998_v2 }
 0x222   : > { %v2326_v54 = vpack.c.bf16 %v2178_v36, %v2174_v12  ;;  %v1908_v25 = vadd.f32 %v1907_v29, %v12343_v60  ;;  %v1909_v4 = vpop.f32.mrb[105].mxu1  ;;  %3068 = vmatprep.mubr.bf16.mxu0 %v8999_v46  ;;  %v12348_v36 = vld [vmem:[#allocation29_spill] sm:$0xff] }
 0x223   : > { %v2327_v11 = vpack.c.bf16 %v2179_v41, %v2175_v43  ;;  %v1564_v30 = vpop.f32.mrb[108].mxu0  ;;  %v1910_v17 = vadd.f32 %v1909_v4, %v12343_v60  ;;  %v1911_v15 = vpop.f32.mrb[106].mxu1  ;;  %3523 = vmatprep.subr.bf16.mxu1 %v2325_v48  ;;  %v9004_v41 = vld [vmem:[%s12251_s3 + $0x180] ss:$16 sps:$4 sm:$0xff]  }
 0x224   : > { %v1565_v58 = vadd.f32 %v1564_v30, %v12345_v0  ;;  %v1566_v55 = vpop.f32.mrb[109].mxu0  ;;  %v1912_v10 = vadd.f32 %v1911_v15, %v12344_v53  ;;  %v1913_v28 = vpop.f32.mrb[107].mxu1  ;;  %3524 = vmatpush1.bf16.msra.mxu1 %v2324_v45  ;;  %v2176_v42 = vmax.f32 %v1908_v25, 0.0 }
 0x225   : > { %v1567_v34 = vadd.f32 %v1566_v55, %v12345_v0  ;;  %v1568_v44 = vpop.f32.mrb[110].mxu0  ;;  %3139 = vmatprep.subr.bf16.mxu0 %v2327_v11  ;;  %v1914_v22 = vadd.f32 %v1913_v28, %v12344_v53  ;;  %v2177_v8 = vmax.f32 %v1910_v17, 0.0  ;;  %v12347_v53 = vld [vmem:[#allocation30_spill] sm:$0xff]  ;;  %v9005_v11 = vld [vmem:[%s12251_s3 + $0x1a4] ss:$16 sps:$4 sm:$0xff]  }
 0x226   : > { %v1569_v31 = vadd.f32 %v1568_v44, %v12346_v52  ;;  %v1570_v62 = vpop.f32.mrb[111].mxu0  ;;  %3140 = vmatpush1.bf16.msra.mxu0 %v2326_v54  ;;  %v2180_v37 = vmax.f32 %v1912_v10, 0.0  ;;  %v2182_v61 = vmax.f32 %v1565_v58, 0.0 }
 0x227   : > { %v1571_v26 = vadd.f32 %v1570_v62, %v12346_v52  ;;  %v2181_v9 = vmax.f32 %v1914_v22, 0.0  ;;  %3445 = vmatmul.mubr.bf16.gmra.mrb[168].mxu1 %v8998_v2  ;;  %v2183_v47 = vmax.f32 %v1567_v34, 0.0 }
 0x228   : > { %v2186_v23 = vmax.f32 %v1569_v31, 0.0  ;;  %v2328_v27 = vpack.c.bf16 %v2180_v37, %v2176_v42  ;;  %3454 = vmatprep.mubr.bf16.mxu1 %v8999_v46 }
 0x229   : > { %v2187_v60 = vmax.f32 %v1571_v26, 0.0  ;;  %v2329_v38 = vpack.c.bf16 %v2181_v9, %v2177_v8  ;;  %v1917_v6 = vpop.f32.mrb[108].mxu1  ;;  %3069 = vmatmul.mubr.bf16.gmra.mrb[172].mxu0 %v9001_v59  ;;  %v9007_v9 = vld [vmem:[%s12251_s3 + $0x1a0] ss:$16 sps:$4 sm:$0xff]  }
 0x22a   : > { %v2330_v16 = vpack.c.bf16 %v2186_v23, %v2182_v61  ;;  %v1918_v57 = vadd.f32 %v1917_v6, %v12345_v0  ;;  %v1919_v19 = vpop.f32.mrb[109].mxu1  ;;  %3078 = vmatprep.mubr.bf16.mxu0 %v9002_v39 }
 0x22b   : > { %v2331_v20 = vpack.c.bf16 %v2187_v60, %v2183_v47  ;;  %v1574_v24 = vpop.f32.mrb[112].mxu0  ;;  %v1920_v35 = vadd.f32 %v1919_v19, %v12345_v0  ;;  %v1921_v33 = vpop.f32.mrb[110].mxu1  ;;  %3525 = vmatprep.subr.bf16.mxu1 %v2329_v38  ;;  %v9008_v38 = vld [vmem:[%s12251_s3 + $0x1c4] ss:$16 sps:$4 sm:$0xff]  }
 0x22c   : > { %v1575_v32 = vadd.f32 %v1574_v24, %v12347_v53  ;;  %v1576_v63 = vpop.f32.mrb[113].mxu0  ;;  %v1922_v7 = vadd.f32 %v1921_v33, %v12346_v52  ;;  %v1923_v12 = vpop.f32.mrb[111].mxu1  ;;  %3526 = vmatpush1.bf16.msra.mxu1 %v2328_v27  ;;  %v2184_v45 = vmax.f32 %v1918_v57, 0.0 }
 0x22d   : > { %v1577_v2 = vadd.f32 %v1576_v63, %v12347_v53  ;;  %v1578_v14 = vpop.f32.mrb[114].mxu0  ;;  %3141 = vmatprep.subr.bf16.mxu0 %v2331_v20  ;;  %v1924_v40 = vadd.f32 %v1923_v12, %v12346_v52  ;;  %v2185_v30 = vmax.f32 %v1920_v35, 0.0 }
 0x22e   : > { %v1579_v46 = vadd.f32 %v1578_v14, %v12348_v36  ;;  %v1580_v1 = vpop.f32.mrb[115].mxu0  ;;  %3142 = vmatpush1.bf16.msra.mxu0 %v2330_v16  ;;  %v2188_v54 = vmax.f32 %v1922_v7, 0.0  ;;  %v2190_v48 = vmax.f32 %v1575_v32, 0.0 }
 0x22f   : > { %v1581_v43 = vadd.f32 %v1580_v1, %v12348_v36  ;;  %v2189_v25 = vmax.f32 %v1924_v40, 0.0  ;;  %3455 = vmatmul.mubr.bf16.gmra.mrb[172].mxu1 %v9001_v59  ;;  %v2191_v4 = vmax.f32 %v1577_v2, 0.0 }
 0x230   : > { %v2194_v29 = vmax.f32 %v1579_v46, 0.0  ;;  %v2332_v58 = vpack.c.bf16 %v2188_v54, %v2184_v45  ;;  %3464 = vmatprep.mubr.bf16.mxu1 %v9002_v39 }
 0x231   : > { %v2195_v0 = vmax.f32 %v1581_v43, 0.0  ;;  %v2333_v17 = vpack.c.bf16 %v2189_v25, %v2185_v30  ;;  %v1927_v15 = vpop.f32.mrb[112].mxu1  ;;  %3079 = vmatmul.mubr.bf16.gmra.mrb[176].mxu0 %v9004_v41 }
 0x232   : > { %v2334_v55 = vpack.c.bf16 %v2194_v29, %v2190_v48  ;;  %v1928_v10 = vadd.f32 %v1927_v15, %v12347_v53  ;;  %v1929_v28 = vpop.f32.mrb[113].mxu1  ;;  %3088 = vmatprep.mubr.bf16.mxu0 %v9005_v11 }
 0x233   : > { %v2335_v34 = vpack.c.bf16 %v2195_v0, %v2191_v4  ;;  %v1584_v44 = vpop.f32.mrb[116].mxu0  ;;  %v1930_v62 = vadd.f32 %v1929_v28, %v12347_v53  ;;  %v1931_v22 = vpop.f32.mrb[114].mxu1  ;;  %3527 = vmatprep.subr.bf16.mxu1 %v2333_v17  ;;  %v9011_v0 = vld [vmem:[%s12251_s3 + $0x1e4] ss:$16 sps:$4 sm:$0xff]  }
 0x234   : > { %v1585_v52 = vadd.f32 %v1584_v44, %v10530_v5  ;;  %v1586_v31 = vpop.f32.mrb[117].mxu0  ;;  %v1932_v42 = vadd.f32 %v1931_v22, %v12348_v36  ;;  %v1933_v37 = vpop.f32.mrb[115].mxu1  ;;  %3528 = vmatpush1.bf16.msra.mxu1 %v2332_v58  ;;  %v2192_v47 = vmax.f32 %v1928_v10, 0.0 }
 0x235   : > { %v1587_v26 = vadd.f32 %v1586_v31, %v10530_v5  ;;  %v1588_v59 = vpop.f32.mrb[118].mxu0  ;;  %3143 = vmatprep.subr.bf16.mxu0 %v2335_v34  ;;  %v1934_v39 = vadd.f32 %v1933_v37, %v12348_v36  ;;  %v2193_v6 = vmax.f32 %v1930_v62, 0.0 }
 0x236   : > { %v1589_v61 = vadd.f32 %v1588_v59, %v10528_v21  ;;  %v1590_v23 = vpop.f32.mrb[119].mxu0  ;;  %3144 = vmatpush1.bf16.msra.mxu0 %v2334_v55  ;;  %v2196_v60 = vmax.f32 %v1932_v42, 0.0  ;;  %v2198_v27 = vmax.f32 %v1585_v52, 0.0 }
 0x237   : > { %v1591_v8 = vadd.f32 %v1590_v23, %v10528_v21  ;;  %v2197_v20 = vmax.f32 %v1934_v39, 0.0  ;;  %3465 = vmatmul.mubr.bf16.gmra.mrb[176].mxu1 %v9004_v41  ;;  %v2199_v24 = vmax.f32 %v1587_v26, 0.0 }
 0x238   : > { %v2202_v16 = vmax.f32 %v1589_v61, 0.0  ;;  %v2336_v19 = vpack.c.bf16 %v2196_v60, %v2192_v47  ;;  %3474 = vmatprep.mubr.bf16.mxu1 %v9005_v11 }
 0x239   : > { %v2203_v57 = vmax.f32 %v1591_v8, 0.0  ;;  %v2337_v32 = vpack.c.bf16 %v2197_v20, %v2193_v6  ;;  %v1937_v63 = vpop.f32.mrb[116].mxu1  ;;  %3089 = vmatmul.mubr.bf16.gmra.mrb[180].mxu0 %v9007_v9  ;;  %v9016_v20 = vld [vmem:[%s12251_s3 + $0xc] ss:$16 sps:$4 sm:$0xff]  }
 0x23a   : > { %v2338_v53 = vpack.c.bf16 %v2202_v16, %v2198_v27  ;;  %v1938_v2 = vadd.f32 %v1937_v63, %v10530_v5  ;;  %v1939_v14 = vpop.f32.mrb[117].mxu1  ;;  %3098 = vmatprep.mubr.bf16.mxu0 %v9008_v38 }
 0x23b   : > { %v2339_v35 = vpack.c.bf16 %v2203_v57, %v2199_v24  ;;  %v1594_v33 = vpop.f32.mrb[120].mxu0  ;;  %v1940_v36 = vadd.f32 %v1939_v14, %v10530_v5  ;;  %v1941_v46 = vpop.f32.mrb[118].mxu1  ;;  %3529 = vmatprep.subr.bf16.mxu1 %v2337_v32  ;;  %v9010_v5 = vld [vmem:[%s12251_s3 + $0x1c0] ss:$16 sps:$4 sm:$0xff]  }
 0x23c   : > { %v1595_v7 = vadd.f32 %v1594_v33, %v10565_v56  ;;  %v1596_v12 = vpop.f32.mrb[121].mxu0  ;;  %v1942_v43 = vadd.f32 %v1941_v46, %v10528_v21  ;;  %v1943_v41 = vpop.f32.mrb[119].mxu1  ;;  %3530 = vmatpush1.bf16.msra.mxu1 %v2336_v19  ;;  %v2200_v11 = vmax.f32 %v1938_v2, 0.0 }
 0x23d   : > { %v1597_v1 = vadd.f32 %v1596_v12, %v10565_v56  ;;  %v1598_v40 = vpop.f32.mrb[122].mxu0  ;;  %3145 = vmatprep.subr.bf16.mxu0 %v2339_v35  ;;  %v1944_v48 = vadd.f32 %v1943_v41, %v10528_v21  ;;  %v2201_v58 = vmax.f32 %v1940_v36, 0.0 }
 0x23e   : > { %v1599_v45 = vadd.f32 %v1598_v40, %v10563_v49  ;;  %v1600_v54 = vpop.f32.mrb[123].mxu0  ;;  %3146 = vmatpush1.bf16.msra.mxu0 %v2338_v53  ;;  %v2204_v30 = vmax.f32 %v1942_v43, 0.0  ;;  %v2206_v25 = vmax.f32 %v1595_v7, 0.0  ;;  %v9014_v40 = vld [vmem:[%s12251_s3 + $0x8] ss:$16 sps:$4 sm:$0xff]   ;;  %v12349_v43 = vld [vmem:[#allocation9_spill] sm:$0xff] }
 0x23f   : > { %v1601_v29 = vadd.f32 %v1600_v54, %v10563_v49  ;;  %v2205_v55 = vmax.f32 %v1944_v48, 0.0  ;;  %3475 = vmatmul.mubr.bf16.gmra.mrb[180].mxu1 %v9007_v9  ;;  %v2207_v17 = vmax.f32 %v1597_v1, 0.0 }
 0x240   : > { %v2210_v4 = vmax.f32 %v1599_v45, 0.0  ;;  %v2340_v21 = vpack.c.bf16 %v2204_v30, %v2200_v11  ;;  %3484 = vmatprep.mubr.bf16.mxu1 %v9008_v38  ;;  %v9019_v11 = vld [vmem:[%s12251_s3 + $0x28] ss:$16 sps:$4 sm:$0xff]  }
 0x241   : > { %v2211_v15 = vmax.f32 %v1601_v29, 0.0  ;;  %v2341_v44 = vpack.c.bf16 %v2205_v55, %v2201_v58  ;;  %v1947_v10 = vpop.f32.mrb[120].mxu1  ;;  %3099 = vmatmul.mubr.bf16.gmra.mrb[184].mxu0 %v9010_v5  ;;  %v12351_v30 = vld [vmem:[#allocation10_spill] sm:$0xff] }
 0x242   : > { %v2342_v34 = vpack.c.bf16 %v2210_v4, %v2206_v25  ;;  %v1948_v31 = vadd.f32 %v1947_v10, %v10565_v56  ;;  %v1949_v62 = vpop.f32.mrb[121].mxu1  ;;  %3108 = vmatprep.mubr.bf16.mxu0 %v9011_v0  ;;  %v9020_v25 = vld [vmem:[%s12251_s3 + $0x4c] ss:$16 sps:$4 sm:$0xff]   ;;  %v9025_v55 = vld [vmem:[%s12251_s3 + $0x68] ss:$16 sps:$4 sm:$0xff]  }
 0x243   : > { %v2343_v28 = vpack.c.bf16 %v2211_v15, %v2207_v17  ;;  %v1604_v52 = vpop.f32.mrb[124].mxu0  ;;  %v1950_v59 = vadd.f32 %v1949_v62, %v10565_v56  ;;  %v1951_v42 = vpop.f32.mrb[122].mxu1  ;;  %3531 = vmatprep.subr.bf16.mxu1 %v2341_v44  ;;  %v9013_v56 = vld [vmem:[%s12251_s3 + $0x1e0] ss:$16 sps:$4 sm:$0xff]   ;;  %v12352_v4 = vld [vmem:[#allocation12_spill] sm:$0xff] }
 0x244   : > { %v1605_v22 = vadd.f32 %v1604_v52, %v10600_v13  ;;  %v1606_v26 = vpop.f32.mrb[125].mxu0  ;;  %v1952_v23 = vadd.f32 %v1951_v42, %v10563_v49  ;;  %v1953_v39 = vpop.f32.mrb[123].mxu1  ;;  %3532 = vmatpush1.bf16.msra.mxu1 %v2340_v21  ;;  %v2208_v27 = vmax.f32 %v1948_v31, 0.0  ;;  %v9023_v58 = vld [vmem:[%s12251_s3 + $0x6c] ss:$16 sps:$4 sm:$0xff]  }
 0x245   : > { %v1607_v37 = vadd.f32 %v1606_v26, %v10600_v13  ;;  %v1608_v61 = vpop.f32.mrb[126].mxu0  ;;  %3147 = vmatprep.subr.bf16.mxu0 %v2343_v28  ;;  %v1954_v47 = vadd.f32 %v1953_v39, %v10563_v49  ;;  %v2209_v24 = vmax.f32 %v1950_v59, 0.0  ;;  %v9026_v17 = vld [vmem:[%s12251_s3 + $0x8c] ss:$16 sps:$4 sm:$0xff]   ;;  %v9028_v15 = vld [vmem:[%s12251_s3 + $0x88] ss:$16 sps:$4 sm:$0xff]  }
 0x246   : > { %v1609_v8 = vadd.f32 %v1608_v61, %v10598_v51  ;;  %v1610_v9 = vpop.f32.mrb[127].mxu0  ;;  %3148 = vmatpush1.bf16.msra.mxu0 %v2342_v34  ;;  %v2212_v16 = vmax.f32 %v1952_v23, 0.0  ;;  %v2214_v38 = vmax.f32 %v1605_v22, 0.0  ;;  %v9029_v21 = vld [vmem:[%s12251_s3 + $0xac] ss:$16 sps:$4 sm:$0xff]  }
 0x247   : > { %v1611_v60 = vadd.f32 %v1610_v9, %v10598_v51  ;;  %v2213_v57 = vmax.f32 %v1954_v47, 0.0  ;;  %3485 = vmatmul.mubr.bf16.gmra.mrb[184].mxu1 %v9010_v5  ;;  %v2215_v19 = vmax.f32 %v1607_v37, 0.0  ;;  %v9031_v34 = vld [vmem:[%s12251_s3 + $0xa8] ss:$16 sps:$4 sm:$0xff]   ;;  %v9032_v44 = vld [vmem:[%s12251_s3 + $0xcc] ss:$16 sps:$4 sm:$0xff]  }
 0x248   : > { %v2218_v6 = vmax.f32 %v1609_v8, 0.0  ;;  %v2344_v49 = vpack.c.bf16 %v2212_v16, %v2208_v27  ;;  %3494 = vmatprep.mubr.bf16.mxu1 %v9011_v0  ;;  %v9022_v0 = vld [vmem:[%s12251_s3 + $0x48] ss:$16 sps:$4 sm:$0xff]   ;;  %v9035_v28 = vld [vmem:[%s12251_s3 + $0xec] ss:$16 sps:$4 sm:$0xff]   ;;  %v9062_v16 = vld [vmem:[%s12254_s6] sm:$0xff]  }
 0x249   : > { %v2219_v53 = vmax.f32 %v1611_v60, 0.0  ;;  %v2345_v63 = vpack.c.bf16 %v2213_v57, %v2209_v24  ;;  %v1957_v35 = vpop.f32.mrb[124].mxu1  ;;  %3109 = vmatmul.mubr.bf16.gmra.mrb[188].mxu0 %v9013_v56  ;;  %v9034_v10 = vld [vmem:[%s12251_s3 + $0xc8] ss:$16 sps:$4 sm:$0xff]   ;;  %v9038_v31 = vld [vmem:[%s12251_s3 + $0x10c] ss:$16 sps:$4 sm:$0xff]  }
 0x24a   : > { %v2346_v32 = vpack.c.bf16 %v2218_v6, %v2214_v38  ;;  %v1958_v2 = vadd.f32 %v1957_v35, %v10600_v13  ;;  %v1959_v14 = vpop.f32.mrb[125].mxu1  ;;  %3151 = vmatprep.mubr.bf16.mxu0 %v9016_v20  ;;  %v9037_v52 = vld [vmem:[%s12251_s3 + $0xe8] ss:$16 sps:$4 sm:$0xff]   ;;  %v9041_v22 = vld [vmem:[%s12251_s3 + $0x12c] ss:$16 sps:$4 sm:$0xff]   ;;  %v9064_v6 = vld [vmem:[%s12254_s6 + $0x10] sm:$0xff]  }
 0x24b   : > { %v2347_v33 = vpack.c.bf16 %v2219_v53, %v2215_v19  ;;  %v1960_v7 = vadd.f32 %v1959_v14, %v10600_v13  ;;  %v1961_v12 = vpop.f32.mrb[126].mxu1  ;;  %3533 = vmatprep.subr.bf16.mxu1 %v2345_v63  ;;  %v9017_v13 = vld [vmem:[%s12251_s3 + $0x2c] ss:$16 sps:$4 sm:$0xff]   ;;  %v9040_v62 = vld [vmem:[%s12251_s3 + $0x108] ss:$16 sps:$4 sm:$0xff]   ;;  %v9066_v24 = vld [vmem:[%s12254_s6 + $0x20] sm:$0xff]  }
 0x24c   : > { %v1962_v36 = vadd.f32 %v1961_v12, %v10598_v51  ;;  %v1963_v46 = vpop.f32.mrb[127].mxu1  ;;  %3534 = vmatpush1.bf16.msra.mxu1 %v2344_v49  ;;  %v2216_v41 = vmax.f32 %v1958_v2, 0.0  ;;  %v9043_v26 = vld [vmem:[%s12251_s3 + $0x128] ss:$16 sps:$4 sm:$0xff]   ;;  %v9044_v59 = vld [vmem:[%s12251_s3 + $0x14c] ss:$16 sps:$4 sm:$0xff]  }
 0x24d   : > { %3149 = vmatprep.subr.bf16.mxu0 %v2347_v33  ;;  %v1964_v1 = vadd.f32 %v1963_v46, %v10598_v51  ;;  %v2217_v54 = vmax.f32 %v1960_v7, 0.0  ;;  %v12350_v51 = vld [vmem:[#allocation11_spill] sm:$0xff]  ;;  %v9046_v42 = vld [vmem:[%s12251_s3 + $0x148] ss:$16 sps:$4 sm:$0xff]   ;;  %v9047_v37 = vld [vmem:[%s12251_s3 + $0x16c] ss:$16 sps:$4 sm:$0xff]  }
 0x24e   : > { %3150 = vmatpush1.bf16.msra.mxu0 %v2346_v32  ;;  %v2220_v45 = vmax.f32 %v1962_v36, 0.0  ;;  %v9049_v61 = vld [vmem:[%s12251_s3 + $0x168] ss:$16 sps:$4 sm:$0xff]   ;;  %v9050_v23 = vld [vmem:[%s12251_s3 + $0x18c] ss:$16 sps:$4 sm:$0xff]   ;;  %v9068_v19 = vld [vmem:[%s12254_s6 + $0x30] sm:$0xff]  }
 0x24f   : > { %4146 = vmatprep.subr.bf16.mxu0 %v12349_v43  ;;  %v2221_v48 = vmax.f32 %v1964_v1, 0.0  ;;  %3495 = vmatmul.mubr.bf16.gmra.mrb[188].mxu1 %v9013_v56  ;;  %v9052_v39 = vld [vmem:[%s12251_s3 + $0x188] ss:$16 sps:$4 sm:$0xff]   ;;  %v9053_v8 = vld [vmem:[%s12251_s3 + $0x1ac] ss:$16 sps:$4 sm:$0xff]   ;;  %v9070_v49 = vld [vmem:[%s12254_s6 + $0x40] sm:$0xff]  }
 0x250   : > { %v2348_v29 = vpack.c.bf16 %v2220_v45, %v2216_v41  ;;  %3537 = vmatprep.mubr.bf16.mxu1 %v9016_v20  ;;  %v9055_v9 = vld [vmem:[%s12251_s3 + $0x1a8] ss:$16 sps:$4 sm:$0xff]   ;;  %v9056_v47 = vld [vmem:[%s12251_s3 + $0x1cc] ss:$16 sps:$4 sm:$0xff]   ;;  %v9072_v63 = vld [vmem:[%s12254_s6 + $0x50] sm:$0xff]  }
 0x251   : > { %v2349_v5 = vpack.c.bf16 %v2221_v48, %v2217_v54  ;;  %3152 = vmatmul.mubr.bf16.vlgmr.msra.gmra.mrb[128].mxu0 %v9014_v40  ;;  %v9058_v60 = vld [vmem:[%s12251_s3 + $0x1c8] ss:$16 sps:$4 sm:$0xff]   ;;  %v9059_v56 = vld [vmem:[%s12251_s3 + $0x1ec] ss:$16 sps:$4 sm:$0xff]  }
 0x252   : > { %3161 = vmatprep.mubr.bf16.mxu0 %v9017_v13  ;;  %4147 = vmatpush1.bf16.msra.mxu0 %v12350_v51  ;;  %v9061_v27 = vld [vmem:[%s12251_s3 + $0x1e8] ss:$16 sps:$4 sm:$0xff]  }
 0x253   : > { %3535 = vmatprep.subr.bf16.mxu1 %v2349_v5  ;;  %v9063_v38 = vld [vmem:[%s12254_s6 + $0x8] sm:$0xff]   ;;  %v9065_v20 = vld [vmem:[%s12254_s6 + $0x18] sm:$0xff]  }
 0x254   : > { %3536 = vmatpush1.bf16.msra.mxu1 %v2348_v29  ;;  %v9067_v57 = vld [vmem:[%s12254_s6 + $0x28] sm:$0xff]   ;;  %v9069_v53 = vld [vmem:[%s12254_s6 + $0x38] sm:$0xff]  }
 0x255   : > { %4499 = vmatprep.subr.bf16.mxu1 %v12351_v30  ;;  %v9071_v32 = vld [vmem:[%s12254_s6 + $0x48] sm:$0xff]   ;;  %v9073_v14 = vld [vmem:[%s12254_s6 + $0x58] sm:$0xff]  }
 0x257   : > { %3538 = vmatmul.mubr.bf16.vlgmr.msra.gmra.mrb[128].mxu1 %v9014_v40 }
 0x258   : > { %3547 = vmatprep.mubr.bf16.mxu1 %v9017_v13  ;;  %4500 = vmatpush1.bf16.msra.mxu1 %v12352_v4 }
 0x259   : > { %3162 = vmatmul.mubr.bf16.gmra.mrb[132].mxu0 %v9019_v11 }
 0x25a   : > { %3171 = vmatprep.mubr.bf16.mxu0 %v9020_v25 }
 0x25f   : > { %3548 = vmatmul.mubr.bf16.gmra.mrb[132].mxu1 %v9019_v11 }
 0x260   : > { %3557 = vmatprep.mubr.bf16.mxu1 %v9020_v25 }
 0x261   : > { %3172 = vmatmul.mubr.bf16.gmra.mrb[136].mxu0 %v9022_v0 }
 0x262   : > { %3181 = vmatprep.mubr.bf16.mxu0 %v9023_v58 }
 0x267   : > { %3558 = vmatmul.mubr.bf16.gmra.mrb[136].mxu1 %v9022_v0 }
 0x268   : > { %3567 = vmatprep.mubr.bf16.mxu1 %v9023_v58 }
 0x269   : > { %3182 = vmatmul.mubr.bf16.gmra.mrb[140].mxu0 %v9025_v55 }
 0x26a   : > { %3191 = vmatprep.mubr.bf16.mxu0 %v9026_v17 }
 0x26f   : > { %3568 = vmatmul.mubr.bf16.gmra.mrb[140].mxu1 %v9025_v55  ;;  %v12353_v55 = vlaneseq }
 0x270   : > { %3577 = vmatprep.mubr.bf16.mxu1 %v9026_v17 }
 0x271   : > { %3192 = vmatmul.mubr.bf16.gmra.mrb[144].mxu0 %v9028_v15  ;;  %v7668_v17 = vshrl.u32 %v12353_v55, 7 }
 0x272   : > { %3201 = vmatprep.mubr.bf16.mxu0 %v9029_v21 }
 0x277   : > { %3578 = vmatmul.mubr.bf16.gmra.mrb[144].mxu1 %v9028_v15 }
 0x278   : > { %3587 = vmatprep.mubr.bf16.mxu1 %v9029_v21 }
 0x279   : > { %3202 = vmatmul.mubr.bf16.gmra.mrb[148].mxu0 %v9031_v34 }
 0x27a   : > { %3211 = vmatprep.mubr.bf16.mxu0 %v9032_v44 }
 0x27f   : > { %3588 = vmatmul.mubr.bf16.gmra.mrb[148].mxu1 %v9031_v34 }
 0x280   : > { %3597 = vmatprep.mubr.bf16.mxu1 %v9032_v44 }
 0x281   : > { %3212 = vmatmul.mubr.bf16.gmra.mrb[152].mxu0 %v9034_v10 }
 0x282   : > { %3221 = vmatprep.mubr.bf16.mxu0 %v9035_v28 }
 0x287   : > { %3598 = vmatmul.mubr.bf16.gmra.mrb[152].mxu1 %v9034_v10  ;;  %v9074_v10 = vld [vmem:[%s12254_s6 + $0x60] sm:$0xff]  }
 0x288   : > { %3607 = vmatprep.mubr.bf16.mxu1 %v9035_v28 }
 0x289   : > { %3222 = vmatmul.mubr.bf16.gmra.mrb[156].mxu0 %v9037_v52 }
 0x28a   : > { %3231 = vmatprep.mubr.bf16.mxu0 %v9038_v31 }
 0x28f   : > { %3608 = vmatmul.mubr.bf16.gmra.mrb[156].mxu1 %v9037_v52  ;;  %v12354_v52 = vld [vmem:[#allocation32_spill] sm:$0xff] }
 0x290   : > { %3617 = vmatprep.mubr.bf16.mxu1 %v9038_v31 }
 0x291   : > { %3232 = vmatmul.mubr.bf16.gmra.mrb[160].mxu0 %v9040_v62 }
 0x292   : > { %3241 = vmatprep.mubr.bf16.mxu0 %v9041_v22 }
 0x297   : > { %3618 = vmatmul.mubr.bf16.gmra.mrb[160].mxu1 %v9040_v62 }
 0x298   : > { %3627 = vmatprep.mubr.bf16.mxu1 %v9041_v22 }
 0x299   : > { %3242 = vmatmul.mubr.bf16.gmra.mrb[164].mxu0 %v9043_v26 }
 0x29a   : > { %3251 = vmatprep.mubr.bf16.mxu0 %v9044_v59 }
 0x29f   : > { %3628 = vmatmul.mubr.bf16.gmra.mrb[164].mxu1 %v9043_v26 }
 0x2a0   : > { %3637 = vmatprep.mubr.bf16.mxu1 %v9044_v59 }
 0x2a1   : > { %3252 = vmatmul.mubr.bf16.gmra.mrb[168].mxu0 %v9046_v42 }
 0x2a2   : > { %3261 = vmatprep.mubr.bf16.mxu0 %v9047_v37 }
 0x2a7   : > { %3638 = vmatmul.mubr.bf16.gmra.mrb[168].mxu1 %v9046_v42  ;;  %v12355_v42 = vld [vmem:[#allocation31_spill] sm:$0xff] }
 0x2a8   : > { %3647 = vmatprep.mubr.bf16.mxu1 %v9047_v37 }
 0x2a9   : > { %3262 = vmatmul.mubr.bf16.gmra.mrb[172].mxu0 %v9049_v61 }
 0x2aa   : > { %3271 = vmatprep.mubr.bf16.mxu0 %v9050_v23 }
 0x2af   : > { %3648 = vmatmul.mubr.bf16.gmra.mrb[172].mxu1 %v9049_v61 }
 0x2b0   : > { %3657 = vmatprep.mubr.bf16.mxu1 %v9050_v23 }
 0x2b1   : > { %3272 = vmatmul.mubr.bf16.gmra.mrb[176].mxu0 %v9052_v39 }
 0x2b2   : > { %3281 = vmatprep.mubr.bf16.mxu0 %v9053_v8 }
 0x2b7   : > { %3658 = vmatmul.mubr.bf16.gmra.mrb[176].mxu1 %v9052_v39 }
 0x2b8   : > { %3667 = vmatprep.mubr.bf16.mxu1 %v9053_v8 }
 0x2b9   : > { %3282 = vmatmul.mubr.bf16.gmra.mrb[180].mxu0 %v9055_v9 }
 0x2ba   : > { %3291 = vmatprep.mubr.bf16.mxu0 %v9056_v47 }
 0x2bf   : > { %3668 = vmatmul.mubr.bf16.gmra.mrb[180].mxu1 %v9055_v9 }
 0x2c0   : > { %3677 = vmatprep.mubr.bf16.mxu1 %v9056_v47 }
 0x2c1   : > { %3292 = vmatmul.mubr.bf16.gmra.mrb[184].mxu0 %v9058_v60 }
 0x2c2   : > { %3301 = vmatprep.mubr.bf16.mxu0 %v9059_v56 }
 0x2c7   : > { %3678 = vmatmul.mubr.bf16.gmra.mrb[184].mxu1 %v9058_v60  ;;  %v7670_v60 = vcvt.s32.f32 %v7668_v17 }
 0x2c8   : > { %3687 = vmatprep.mubr.bf16.mxu1 %v9059_v56  ;;  %v11167_v56 = vpop.permute.xlu1 %2473 }
 0x2c9   : > { %3302 = vmatmul.mubr.bf16.gmra.mrb[188].mxu0 %v9061_v27 }
 0x2ca   : > { %4178 = vmatprep.mubr.bf16.mxu0 %v12326_v3 }
 0x2cf   : > { %3688 = vmatmul.mubr.bf16.gmra.mrb[188].mxu1 %v9061_v27 }
 0x2d0   : > { %4531 = vmatprep.mubr.bf16.mxu1 %v12326_v3 }
 0x2d1   : > { %8150 = vmatmul.mubr.msk.bf16.vlgmr.msra.gmra.mrb[192].mxu0 %vm1149_vm10, %v9062_v16 }
 0x2d2   : > { %4188 = vmatprep.mubr.bf16.mxu0 %v12326_v3 }
 0x2d7   : > { %8182 = vmatmul.mubr.msk.bf16.vlgmr.msra.gmra.mrb[192].mxu1 %vm1149_vm10, %v9062_v16 }
 0x2d8   : > { %4541 = vmatprep.mubr.bf16.mxu1 %v12326_v3 }
 0x2d9   : > { %8151 = vmatmul.mubr.msk.bf16.gmra.mrb[196].mxu0 %vm1149_vm10, %v9063_v38 }
 0x2da   : > { %4198 = vmatprep.mubr.bf16.mxu0 %v12326_v3 }
 0x2df   : > { %8183 = vmatmul.mubr.msk.bf16.gmra.mrb[196].mxu1 %vm1149_vm10, %v9063_v38 }
 0x2e0   : > { %4551 = vmatprep.mubr.bf16.mxu1 %v12326_v3 }
 0x2e1   : > { %8152 = vmatmul.mubr.msk.bf16.gmra.mrb[200].mxu0 %vm1149_vm10, %v9064_v6 }
 0x2e2   : > { %4208 = vmatprep.mubr.bf16.mxu0 %v12326_v3 }
 0x2e7   : > { %8184 = vmatmul.mubr.msk.bf16.gmra.mrb[200].mxu1 %vm1149_vm10, %v9064_v6  ;;  %v11170_v6 = vpop.permute.xlu0 %2468 }
 0x2e8   : > { %4561 = vmatprep.mubr.bf16.mxu1 %v12326_v3 }
 0x2e9   : > { %8153 = vmatmul.mubr.msk.bf16.gmra.mrb[204].mxu0 %vm1149_vm10, %v9065_v20 }
 0x2ea   : > { %4218 = vmatprep.mubr.bf16.mxu0 %v12326_v3 }
 0x2ef   : > { %8185 = vmatmul.mubr.msk.bf16.gmra.mrb[204].mxu1 %vm1149_vm10, %v9065_v20 }
 0x2f0   : > { %4571 = vmatprep.mubr.bf16.mxu1 %v12326_v3 }
 0x2f1   : > { %8154 = vmatmul.mubr.msk.bf16.gmra.mrb[208].mxu0 %vm1149_vm10, %v9066_v24 }
 0x2f2   : > { %4228 = vmatprep.mubr.bf16.mxu0 %v12326_v3 }
 0x2f7   : > { %8186 = vmatmul.mubr.msk.bf16.gmra.mrb[208].mxu1 %vm1149_vm10, %v9066_v24 }
 0x2f8   : > { %4581 = vmatprep.mubr.bf16.mxu1 %v12326_v3 }
 0x2f9   : > { %8155 = vmatmul.mubr.msk.bf16.gmra.mrb[212].mxu0 %vm1149_vm10, %v9067_v57 }
 0x2fa   : > { %4238 = vmatprep.mubr.bf16.mxu0 %v12326_v3 }
 0x2ff   : > { %8187 = vmatmul.mubr.msk.bf16.gmra.mrb[212].mxu1 %vm1149_vm10, %v9067_v57 }
 0x300   : > { %4591 = vmatprep.mubr.bf16.mxu1 %v12326_v3 }
 0x301   : > { %8156 = vmatmul.mubr.msk.bf16.gmra.mrb[216].mxu0 %vm1149_vm10, %v9068_v19 }
 0x302   : > { %4248 = vmatprep.mubr.bf16.mxu0 %v12326_v3 }
 0x307   : > { %8188 = vmatmul.mubr.msk.bf16.gmra.mrb[216].mxu1 %vm1149_vm10, %v9068_v19  ;;  %v11172_v19 = vadd.s32 8, %v7668_v17 }
 0x308   : > { %4601 = vmatprep.mubr.bf16.mxu1 %v12326_v3 }
 0x309   : > { %8157 = vmatmul.mubr.msk.bf16.gmra.mrb[220].mxu0 %vm1149_vm10, %v9069_v53  ;;  %12356 = vst [vmem:[#allocation14_spill] sm:$0xff] %v11172_v19 }
 0x30a   : > { %4258 = vmatprep.mubr.bf16.mxu0 %v12326_v3 }
 0x30f   : > { %8189 = vmatmul.mubr.msk.bf16.gmra.mrb[220].mxu1 %vm1149_vm10, %v9069_v53 }
 0x310   : > { %4611 = vmatprep.mubr.bf16.mxu1 %v12326_v3 }
 0x311   : > { %8158 = vmatmul.mubr.msk.bf16.gmra.mrb[224].mxu0 %vm1149_vm10, %v9070_v49 }
 0x312   : > { %4268 = vmatprep.mubr.bf16.mxu0 %v12326_v3 }
 0x317   : > { %8190 = vmatmul.mubr.msk.bf16.gmra.mrb[224].mxu1 %vm1149_vm10, %v9070_v49 }
 0x318   : > { %4621 = vmatprep.mubr.bf16.mxu1 %v12326_v3 }
 0x319   : > { %8159 = vmatmul.mubr.msk.bf16.gmra.mrb[228].mxu0 %vm1149_vm10, %v9071_v32 }
 0x31a   : > { %4278 = vmatprep.mubr.bf16.mxu0 %v12326_v3 }
 0x31f   : > { %8191 = vmatmul.mubr.msk.bf16.gmra.mrb[228].mxu1 %vm1149_vm10, %v9071_v32 }
 0x320   : > { %4631 = vmatprep.mubr.bf16.mxu1 %v12326_v3 }
 0x321   : > { %8160 = vmatmul.mubr.msk.bf16.gmra.mrb[232].mxu0 %vm1149_vm10, %v9072_v63 }
 0x322   : > { %4288 = vmatprep.mubr.bf16.mxu0 %v12326_v3 }
 0x324   : > { %v3153_v35 = vpop.f32.mrb[128].mxu0 }
 0x325   : > { %v8320_v33 = vadd.f32 %v3153_v35, %v10637_v50  ;;  %v3155_v2 = vpop.f32.mrb[129].mxu0 }
 0x326   : > { %v8321_v7 = vadd.f32 %v3155_v2, %v10637_v50  ;;  %v3157_v12 = vpop.f32.mrb[130].mxu0  ;;  %v11181_v2 = vld [vmem:[%s12254_s6 + $0x68] sm:$0xff]  }
 0x327   : > { %8192 = vmatmul.mubr.msk.bf16.gmra.mrb[232].mxu1 %vm1149_vm10, %v9072_v63  ;;  %v7406_v36 = vmin.f32 %v8320_v33, 80.0  ;;  %v8322_v46 = vadd.f32 %v3157_v12, %v10630_v18  ;;  %v3159_v1 = vpop.f32.mrb[131].mxu0 }
 0x328   : > { %v7407_v40 = vmin.f32 %v8321_v7, 80.0  ;;  %v8323_v43 = vadd.f32 %v3159_v1, %v10630_v18  ;;  %4641 = vmatprep.mubr.bf16.mxu1 %v12326_v3 }
 0x329   : > { %v7414_v41 = vmul.f32 1.442695, %v7406_v36  ;;  %v3698_v45 = vpack.c.bf16 %v8322_v46, %v8320_v33  ;;  %v7410_v13 = vmin.f32 %v8322_v46, 80.0  ;;  %8161 = vmatmul.mubr.msk.bf16.gmra.mrb[236].mxu0 %vm1149_vm10, %v9073_v14 }
 0x32a   : > { %v3539_v54 = vpop.f32.mrb[128].mxu1  ;;  %v7416_v48 = vmul.f32 1.442695, %v7407_v40  ;;  %v3699_v29 = vpack.c.bf16 %v8323_v43, %v8321_v7  ;;  %v7411_v5 = vmin.f32 %v8323_v43, 80.0  ;;  %4298 = vmatprep.mubr.bf16.mxu0 %v12326_v3 }
 0x32b   : > { %9218 = vpow2.f32 %v7414_v41  ;;  %v8384_v51 = vadd.f32 %v3539_v54, %v10637_v50  ;;  %v3541_v11 = vpop.f32.mrb[129].mxu1  ;;  %v7422_v30 = vmul.f32 1.442695, %v7410_v13 }
 0x32c   : > { %9220 = vpow2.f32 %v7416_v48  ;;  %v8385_v25 = vadd.f32 %v3541_v11, %v10637_v50  ;;  %v3543_v4 = vpop.f32.mrb[130].mxu1  ;;  %v7424_v0 = vmul.f32 1.442695, %v7411_v5  ;;  %v3163_v58 = vpop.f32.mrb[132].mxu0  ;;  %5172 = vmatprep.subr.bf16.mxu0 %v3699_v29 }
 0x32d   : > { %v7408_v15 = vmin.f32 %v8384_v51, 80.0  ;;  %9222 = vpow2.f32 %v7422_v30  ;;  %v8386_v21 = vadd.f32 %v3543_v4, %v10630_v18  ;;  %v3545_v34 = vpop.f32.mrb[131].mxu1  ;;  %v3165_v44 = vpop.f32.mrb[133].mxu0  ;;  %5173 = vmatpush1.bf16.msra.mxu0 %v3698_v45  ;;  %v8324_v31 = vadd.f32 %v3163_v58, %v12354_v52 }
 0x32e   : > { %v7409_v28 = vmin.f32 %v8385_v25, 80.0  ;;  %9224 = vpow2.f32 %v7424_v0  ;;  %v8387_v50 = vadd.f32 %v3545_v34, %v10630_v18  ;;  %v3167_v62 = vpop.f32.mrb[134].mxu0  ;;  %v8325_v8 = vadd.f32 %v3165_v44, %v12354_v52  ;;  %v11212_v58 = vpop.permute.xlu1 %2483 }
 0x32f   : > { %v7418_v22 = vmul.f32 1.442695, %v7408_v15  ;;  %v3700_v26 = vpack.c.bf16 %v8386_v21, %v8384_v51  ;;  %v7412_v59 = vmin.f32 %v8386_v21, 80.0  ;;  %8193 = vmatmul.mubr.msk.bf16.gmra.mrb[236].mxu1 %vm1149_vm10, %v9073_v14  ;;  %v8326_v37 = vadd.f32 %v3167_v62, %v12355_v42  ;;  %v3169_v61 = vpop.f32.mrb[135].mxu0  ;;  %v11219_v44 = vpop.permute.xlu0 %2478 }
 0x330   : > { %v7420_v23 = vmul.f32 1.442695, %v7409_v28  ;;  %v3701_v39 = vpack.c.bf16 %v8387_v50, %v8385_v25  ;;  %v8327_v9 = vadd.f32 %v3169_v61, %v12355_v42  ;;  %4651 = vmatprep.mubr.bf16.mxu1 %v12326_v3  ;;  %v7413_v18 = vmin.f32 %v8387_v50, 80.0 }
 0x331   : > { %9226 = vpow2.f32 %v7418_v22  ;;  %v3702_v47 = vpack.c.bf16 %v8326_v37, %v8324_v31  ;;  %8162 = vmatmul.mubr.msk.bf16.gmra.mrb[240].mxu0 %vm1149_vm10, %v9074_v10  ;;  %v7426_v27 = vmul.f32 1.442695, %v7412_v59  ;;  %v11183_v14 = vadd.f32 0.5, %v7670_v60 }
 0x332   : > { %9228 = vpow2.f32 %v7420_v23  ;;  %v3549_v16 = vpop.f32.mrb[132].mxu1  ;;  %5525 = vmatprep.subr.bf16.mxu1 %v3701_v39  ;;  %v3703_v38 = vpack.c.bf16 %v8327_v9, %v8325_v8  ;;  %4308 = vmatprep.mubr.bf16.mxu0 %v12326_v3  ;;  %v7428_v49 = vmul.f32 1.442695, %v7413_v18 }
 0x333   : > { %v3551_v20 = vpop.f32.mrb[133].mxu1  ;;  %5526 = vmatpush1.bf16.msra.mxu1 %v3700_v26  ;;  %v8388_v32 = vadd.f32 %v3549_v16, %v12354_v52  ;;  %12357 = vst [vmem:[#allocation13_spill] sm:$0xff] %v11183_v14  ;;  %9230 = vpow2.f32 %v7426_v27 }
 0x334   : > { %v3553_v24 = vpop.f32.mrb[134].mxu1  ;;  %v3173_v57 = vpop.f32.mrb[136].mxu0  ;;  %5174 = vmatprep.subr.bf16.mxu0 %v3703_v38  ;;  %v8389_v36 = vadd.f32 %v3551_v20, %v12354_v52  ;;  %9232 = vpow2.f32 %v7428_v49 }
 0x335   : > { %v9219_v53 = vpop.eup %9218  ;;  %v8390_v63 = vadd.f32 %v3553_v24, %v12355_v42  ;;  %v3555_v35 = vpop.f32.mrb[135].mxu1  ;;  %5175 = vmatpush1.bf16.msra.mxu0 %v3702_v47  ;;  %v11193_v45 = vadd.f32 %v3173_v57, %v11170_v6  ;;  %v9076_v47 = vld [vmem:[%s12254_s6 + $0x70] sm:$0xff]  }
 0x336   : > { %v11176_v33 = vpop.f32.mrb[137].mxu0  ;;  %v9221_v7 = vpop.eup %9220  ;;  %v11185_v12 = vmul.f32 0.121875, %v9219_v53  ;;  %v8391_v46 = vadd.f32 %v3555_v35, %v12355_v42 }
 0x337   : > { %v3177_v1 = vpop.f32.mrb[138].mxu0  ;;  %v9223_v40 = vpop.eup %9222  ;;  %v11189_v43 = vmul.f32 0.121875, %v9221_v7  ;;  %v3704_v41 = vpack.c.bf16 %v8390_v63, %v8388_v32  ;;  %8194 = vmatmul.mubr.msk.bf16.gmra.mrb[240].mxu1 %vm1149_vm10, %v9074_v10 }
 0x338   : > { %v11196_v13 = vadd.f32 %v3177_v1, %v11167_v56  ;;  %v11198_v54 = vpop.f32.mrb[139].mxu0  ;;  %v9225_v48 = vpop.eup %9224  ;;  %v7446_v29 = vrot.slane %v11185_v12, 7  ;;  %v7599_v5 = vsub.f32 0.0, %v11185_v12  ;;  %v11202_v51 = vmul.f32 0.121875, %v9223_v40  ;;  %4661 = vmatprep.mubr.bf16.mxu1 %v12326_v3 }
 0x339   : > { %v3705_v11 = vpack.c.bf16 %v8391_v46, %v8389_v36  ;;  %v12292_v30 = vrot.slane %v11189_v43, 7  ;;  %v7600_v25 = vsub.f32 0.0, %v11189_v43  ;;  %8163 = vmatmul.mubr.msk.bf16.gmra.mrb[244].mxu0 %vm1149_vm10, %v11181_v2  ;;  %v11225_v52 = vmul.f32 0.121875, %v9225_v48 }
 0x33a   : > { %v7466_v55 = vsel %vm523_vm6, 0.0, %v7446_v29  ;;  %v7607_v17 = vmul.f32 1.442695, %v7599_v5  ;;  %v7450_v15 = vrot.slane %v11202_v51, 7  ;;  %v11216_v21 = vpop.f32.mrb[136].mxu1  ;;  %4318 = vmatprep.mubr.bf16.mxu0 %v12326_v3  ;;  %v7603_v42 = vsub.f32 0.0, %v11202_v51 }
 0x33b   : > { %5527 = vmatprep.subr.bf16.mxu1 %v3705_v11  ;;  %v9227_v34 = vpop.eup %9226  ;;  %v7470_v10 = vadd.f32 %v7466_v55, %v11185_v12  ;;  %v7467_v28 = vsel %vm523_vm6, 0.0, %v12292_v30  ;;  %v7609_v50 = vmul.f32 1.442695, %v7600_v25  ;;  %v11227_v31 = vpop.f32.mrb[137].mxu1 }
 0x33c   : > { %5528 = vmatpush1.bf16.msra.mxu1 %v3704_v41  ;;  %v9229_v62 = vpop.eup %9228  ;;  %v11229_v22 = vmul.f32 0.121875, %v9227_v34  ;;  %v11232_v26 = vadd.f32 %v7467_v28, %v11189_v43  ;;  %v7451_v59 = vsel %vm523_vm6, %v7446_v29, %v7450_v15  ;;  %v11236_v37 = vpop.f32.mrb[138].mxu1  ;;  %9234 = vpow2.f32 %v7607_v17 }
 0x33d   : > { %v11238_v61 = vpop.f32.mrb[140].mxu0  ;;  %v7486_v23 = vrot.slane %v7470_v10, 6  ;;  %v11240_v39 = vmul.f32 0.121875, %v9229_v62  ;;  %v7474_v8 = vadd.f32 %v7451_v59, %v11202_v51  ;;  %v11243_v9 = vpop.f32.mrb[139].mxu1  ;;  %9236 = vpow2.f32 %v7609_v50 }
 0x33e   : > { %v11245_v18 = vpop.f32.mrb[141].mxu0  ;;  %v7448_v60 = vrot.slane %v11229_v22, 7  ;;  %v7601_v27 = vsub.f32 0.0, %v11229_v22  ;;  %v12290_v16 = vrot.slane %v11232_v26, 6  ;;  %v9231_v32 = vpop.eup %9230  ;;  %v7615_v11 = vmul.f32 1.442695, %v7603_v42 }
 0x33f   : > { %v11253_v38 = vpop.f32.mrb[142].mxu0  ;;  %v7506_v20 = vsel %vm528_vm8, 0.0, %v7486_v23  ;;  %v12289_v24 = vrot.slane %v11240_v39, 7  ;;  %v7602_v57 = vsub.f32 0.0, %v11240_v39  ;;  %v7490_v53 = vrot.slane %v7474_v8, 6  ;;  %8195 = vmatmul.mubr.msk.bf16.gmra.mrb[244].mxu1 %vm1149_vm10, %v11181_v2  ;;  %v11279_v41 = vpop.permute.xlu1 %2493 }
 0x340   : > { %v11260_v49 = vpop.f32.mrb[143].mxu0  ;;  %v7510_v63 = vadd.f32 %v7506_v20, %v7470_v10  ;;  %v7468_v35 = vsel %vm523_vm6, 0.0, %v7448_v60  ;;  %v7611_v7 = vmul.f32 1.442695, %v7601_v27  ;;  %v7507_v36 = vsel %vm528_vm8, 0.0, %v12290_v16  ;;  %4671 = vmatprep.mubr.bf16.mxu1 %v12326_v3  ;;  %v11288_v55 = vpop.permute.xlu0 %2488 }
 0x341   : > { %v11270_v46 = vadd.f32 %v7468_v35, %v11229_v22  ;;  %v11273_v2 = vadd.f32 %v7507_v36, %v11232_v26  ;;  %v7469_v1 = vsel %vm523_vm6, 0.0, %v12289_v24  ;;  %v7613_v40 = vmul.f32 1.442695, %v7602_v57  ;;  %8164 = vmatmul.mubr.msk.bf16.gmra.mrb[248].mxu0 %vm1149_vm10, %v9076_v47  ;;  %v11294_v28 = vpop.eup %9232 }
 0x342   : > { %v7527_v48 = vrot.slane %v7510_v63, 4  ;;  %v11282_v29 = vadd.f32 %v7469_v1, %v11240_v39  ;;  %v7491_v5 = vsel %vm528_vm8, %v7486_v23, %v7490_v53  ;;  %v11285_v25 = vpop.f32.mrb[140].mxu1  ;;  %4328 = vmatprep.mubr.bf16.mxu0 %v12326_v3  ;;  %9238 = vpow2.f32 %v7611_v7 }
 0x343   : > { %v12291_v17 = vrot.slane %v11270_v46, 6  ;;  %v12288_v15 = vrot.slane %v11273_v2, 4  ;;  %v7514_v34 = vadd.f32 %v7491_v5, %v7474_v8  ;;  %v11292_v10 = vpop.f32.mrb[141].mxu1  ;;  %9240 = vpow2.f32 %v7613_v40 }
 0x344   : > { %v7547_v50 = vsel %vm7526_vm11, 0.0, %v7527_v48  ;;  %v12287_v62 = vrot.slane %v11282_v29, 6  ;;  %v11298_v59 = vmul.f32 0.121875, %v9231_v32  ;;  %v11300_v42 = vpop.f32.mrb[142].mxu1  ;;  %v11302_v23 = vpop.f32.mrb[144].mxu0  ;;  %9242 = vpow2.f32 %v7615_v11 }
 0x345   : > { %v7551_v27 = vadd.f32 %v7547_v50, %v7510_v63  ;;  %v7508_v8 = vsel %vm528_vm8, 0.0, %v12291_v17  ;;  %v7548_v20 = vsel %vm7526_vm11, 0.0, %v12288_v15  ;;  %v7531_v57 = vrot.slane %v7514_v34, 4  ;;  %v11310_v53 = vpop.f32.mrb[143].mxu1  ;;  %v11312_v35 = vpop.f32.mrb[145].mxu0  ;;  %v9077_v32 = vld [vmem:[%s12254_s6 + $0x78] sm:$0xff]  }
 0x346   : > { %v11318_v7 = vadd.f32 %v7508_v8, %v11270_v46  ;;  %v11321_v63 = vadd.f32 %v7548_v20, %v11273_v2  ;;  %v7509_v36 = vsel %vm528_vm8, 0.0, %v12287_v62  ;;  %v7454_v1 = vrot.slane %v11298_v59, 7  ;;  %v11327_v40 = vpop.f32.mrb[146].mxu0  ;;  %v11329_v5 = vpop.eup %9234 }
 0x347   : > { %v7567_v50 = vsub.f32 %v7551_v27, %v11185_v12  ;;  %v11333_v0 = vadd.f32 %v7509_v36, %v11282_v29  ;;  %v7532_v8 = vsel %vm7526_vm11, %v7527_v48, %v7531_v57  ;;  %v7452_v20 = vrot.slane %v11225_v52, 7  ;;  %8196 = vmatmul.mubr.msk.bf16.gmra.mrb[248].mxu1 %vm1149_vm10, %v9076_v47  ;;  %v11338_v4 = vpop.f32.mrb[147].mxu0  ;;  %v11340_v62 = vpop.eup %9236 }
 0x348   : > { %12358 = vst [vmem:[#allocation16_spill] sm:$0xff] %v11338_v4  ;;  %v12294_v15 = vrot.slane %v11318_v7, 4  ;;  %v7568_v24 = vsub.f32 %v11321_v63, %v11189_v43  ;;  %v7555_v16 = vadd.f32 %v7532_v8, %v7514_v34  ;;  %4681 = vmatprep.mubr.bf16.mxu1 %v12326_v3  ;;  %v7455_v47 = vsel %vm523_vm6, %v7448_v60, %v7454_v1  ;;  %v11352_v36 = vpop.permute.xlu1 %2503  ;;  %v11361_v30 = vpop.permute.xlu0 %2498 }
 0x349   : > { %v7575_v12 = vsub.f32 0.0, %v7567_v50  ;;  %v12296_v48 = vrot.slane %v11333_v0, 4  ;;  %v7605_v57 = vsub.f32 0.0, %v11298_v59  ;;  %8165 = vmatmul.mubr.msk.bf16.gmra.mrb[252].mxu0 %vm1149_vm10, %v9077_v32  ;;  %12359 = vst [vmem:[#allocation15_spill] sm:$0xff] %v11352_v36  ;;  %v7476_v50 = vadd.f32 %v7455_v47, %v11298_v59  ;;  %12360 = vst [vmem:[#allocation18_spill] sm:$0xff] %v11361_v30 }
 0x34a   : > { %v7549_v34 = vsel %vm7526_vm11, 0.0, %v12294_v15  ;;  %v7576_v11 = vsub.f32 0.0, %v7568_v24  ;;  %v7563_v8 = vadd.f32 %v7555_v16, %v7551_v27  ;;  %v11358_v17 = vpop.f32.mrb[144].mxu1  ;;  %4338 = vmatprep.mubr.bf16.mxu0 %v12326_v3  ;;  %v7604_v30 = vsub.f32 0.0, %v11225_v52 }
 0x34b   : > { %v7583_v60 = vmul.f32 1.442695, %v7575_v12  ;;  %v11364_v1 = vadd.f32 %v7549_v34, %v11318_v7  ;;  %v7550_v19 = vsel %vm7526_vm11, 0.0, %v12296_v48  ;;  %v7619_v14 = vmul.f32 1.442695, %v7605_v57  ;;  %v11369_v15 = vpop.f32.mrb[145].mxu1 }
 0x34c   : > { %12361 = vst [vmem:[#allocation17_spill] sm:$0xff] %v11369_v15  ;;  %v7585_v16 = vmul.f32 1.442695, %v7576_v11  ;;  %v11372_v24 = vadd.f32 %v7550_v19, %v11333_v0  ;;  %v7571_v27 = vsub.f32 %v7563_v8, %v11202_v51  ;;  %v7494_v47 = vrot.slane %v7476_v50, 6  ;;  %v11375_v36 = vpop.f32.mrb[146].mxu1  ;;  %v11377_v12 = vpop.f32.mrb[148].mxu0 }
 0x34d   : > { %12362 = vst [vmem:[#allocation20_spill] sm:$0xff] %v11375_v36  ;;  %12363 = vst [vmem:[#allocation19_spill] sm:$0xff] %v11377_v12  ;;  %v11379_v34 = vpop.eup %9238  ;;  %9244 = vpow2.f32 %v7583_v60  ;;  %v7569_v48 = vsub.f32 %v11364_v1, %v11229_v22  ;;  %v12364_v57 = vrot.slane %v11189_v43, 7  ;;  %v11388_v19 = vadd.f32 %v11176_v33, %v11170_v6  ;;  %v11390_v51 = vpop.f32.mrb[147].mxu1  ;;  %v9078_v12 = vld [vmem:[%s12254_s6 + $0x80] sm:$0xff]  }
 0x34e   : > { %12365 = vst [vmem:[#allocation22_spill] sm:$0xff] %v11390_v51  ;;  %v11392_v8 = vpop.f32.mrb[149].mxu0  ;;  %v11397_v60 = vpop.eup %9240  ;;  %9246 = vpow2.f32 %v7585_v16  ;;  %v7570_v43 = vsub.f32 %v11372_v24, %v11240_v39 }
 0x34f   : > { %v7453_v11 = vsel %vm523_vm6, %v12364_v57, %v7452_v20  ;;  %12366 = vst [vmem:[#allocation21_spill] sm:$0xff] %v11392_v8  ;;  %v7579_v20 = vsub.f32 0.0, %v7571_v27  ;;  %v11402_v57 = vpop.f32.mrb[150].mxu0  ;;  %v7577_v33 = vsub.f32 0.0, %v7569_v48  ;;  %v12368_v8 = vrot.slane %v11270_v46, 6  ;;  %8197 = vmatmul.mubr.msk.bf16.gmra.mrb[252].mxu1 %vm1149_vm10, %v9077_v32  ;;  %v11421_v32 = vpop.permute.xlu1 %2513 }
 0x350   : > { %12367 = vst [vmem:[#allocation24_spill] sm:$0xff] %v11402_v57  ;;  %9248 = vpow2.f32 %v7619_v14  ;;  %v11409_v4 = vpop.f32.mrb[151].mxu0  ;;  %v7578_v22 = vsub.f32 0.0, %v7570_v43  ;;  %v7475_v15 = vadd.f32 %v7453_v11, %v11225_v52  ;;  %4691 = vmatprep.mubr.bf16.mxu1 %v12326_v3  ;;  %v11416_v46 = vmul.f32 0.121875, %v11294_v28  ;;  %v11419_v14 = vpop.eup %9242  ;;  %12370 = vst [vmem:[#allocation26_spill] sm:$0xff] %v11421_v32 }
 0x351   : > { %v7495_v51 = vsel %vm528_vm8, %v12368_v8, %v7494_v47  ;;  %12369 = vst [vmem:[#allocation23_spill] sm:$0xff] %v11409_v4  ;;  %v7591_v16 = vmul.f32 1.442695, %v7579_v20  ;;  %v7587_v27 = vmul.f32 1.442695, %v7577_v33  ;;  %8166 = vmatmul.mubr.msk.bf16.gmra.mrb[0].mxu0 %vm1149_vm10, %v9078_v12  ;;  %v11426_v8 = vpop.permute.xlu0 %2508  ;;  %v12375_v48 = vrot.slane %v11232_v26, 6 }
 0x352   : > { %v7516_v36 = vadd.f32 %v7495_v51, %v7476_v50  ;;  %v7589_v47 = vmul.f32 1.442695, %v7578_v22  ;;  %v7492_v11 = vrot.slane %v7475_v15, 6  ;;  %v11423_v51 = vpop.f32.mrb[148].mxu1  ;;  %4348 = vmatprep.mubr.bf16.mxu0 %v12326_v3  ;;  %12372 = vst [vmem:[#allocation28_spill] sm:$0xff] %v11426_v8  ;;  %v7456_v43 = vrot.slane %v11416_v46, 7 }
 0x353   : > { %9250 = vpow2.f32 %v7591_v16  ;;  %12371 = vst [vmem:[#allocation25_spill] sm:$0xff] %v11423_v51  ;;  %v7606_v20 = vsub.f32 0.0, %v11416_v46  ;;  %v11431_v33 = vpop.f32.mrb[149].mxu1  ;;  %v12374_v22 = vrot.slane %v11318_v7, 4  ;;  %v7617_v4 = vmul.f32 1.442695, %v7604_v30 }
 0x354   : > { %v7535_v50 = vrot.slane %v7516_v36, 4  ;;  %9252 = vpow2.f32 %v7587_v27  ;;  %12373 = vst [vmem:[#allocation27_spill] sm:$0xff] %v11431_v33  ;;  %v7493_v32 = vsel %vm528_vm8, %v12375_v48, %v7492_v11  ;;  %v11439_v8 = vpop.f32.mrb[150].mxu1  ;;  %v11441_v27 = vpop.f32.mrb[152].mxu0  ;;  %v7627_v28 = vsub.f32 1.0, %v11419_v14  ;;  %v11454_v30 = vld [vmem:[%s12254_s6 + $0x88] sm:$0xff]  }
 0x355   : > { %9254 = vpow2.f32 %v7589_v47  ;;  %v7515_v51 = vadd.f32 %v7493_v32, %v7475_v15  ;;  %v12376_v33 = vrot.slane %v11240_v39, 7  ;;  %v11447_v7 = vpop.f32.mrb[151].mxu1  ;;  %v8392_v48 = vadd.f32 %v11216_v21, %v11170_v6 }
 0x356   : > { %v7536_v16 = vsel %vm7526_vm11, %v12374_v22, %v7535_v50  ;;  %v11449_v50 = vpop.f32.mrb[153].mxu0  ;;  %v8394_v15 = vadd.f32 %v11236_v37, %v11167_v56  ;;  %v8331_v39 = vadd.f32 %v11198_v54, %v11167_v56  ;;  %9256 = vpow2.f32 %v7617_v4 }
 0x357   : > { %v7557_v57 = vadd.f32 %v7536_v16, %v7516_v36  ;;  %v7457_v47 = vsel %vm523_vm6, %v12376_v33, %v7456_v43  ;;  %v11463_v36 = vpop.f32.mrb[154].mxu0  ;;  %v9245_v14 = vpop.eup %9244  ;;  %v7533_v11 = vrot.slane %v7515_v51, 4  ;;  %v7621_v43 = vmul.f32 1.442695, %v7606_v20  ;;  %8198 = vmatmul.mubr.msk.bf16.gmra.mrb[0].mxu1 %vm1149_vm10, %v9078_v12 }
 0x358   : > { %v7477_v26 = vadd.f32 %v7457_v47, %v11416_v46  ;;  %v8395_v33 = vadd.f32 %v11243_v9, %v11167_v56  ;;  %v11469_v22 = vpop.f32.mrb[155].mxu0  ;;  %v9247_v21 = vpop.eup %9246  ;;  %v8393_v54 = vadd.f32 %v11227_v31, %v11170_v6  ;;  %v3708_v16 = vpack.c.bf16 %v8394_v15, %v8392_v48  ;;  %4701 = vmatprep.mubr.bf16.mxu1 %v12326_v3 }
 0x359   : > { %v7565_v32 = vadd.f32 %v7557_v57, %v11364_v1  ;;  %v12377_v57 = vrot.slane %v11273_v2, 4  ;;  %v3707_v9 = vpack.c.bf16 %v8331_v39, %v11388_v19  ;;  %v11483_v4 = vadd.f32 %v11238_v61, %v11219_v44  ;;  %8167 = vmatmul.mubr.msk.bf16.gmra.mrb[4].mxu0 %vm1149_vm10, %v11454_v30  ;;  %v11487_v6 = vpop.permute.xlu1 %2523  ;;  %v11499_v61 = vpop.permute.xlu0 %2518 }
 0x35a   : > { %v7496_v37 = vrot.slane %v7477_v26, 6  ;;  %v11474_v47 = vpop.eup %9248  ;;  %v12378_v31 = vsub.f32 1.0, %v11329_v5  ;;  %v12379_v2 = vrot.slane %v11282_v29, 6  ;;  %v3709_v48 = vpack.c.bf16 %v8395_v33, %v8393_v54  ;;  %v11496_v19 = vpop.f32.mrb[152].mxu1  ;;  %4358 = vmatprep.mubr.bf16.mxu0 %v12326_v3 }
 0x35b   : > { %v7573_v1 = vsub.f32 %v7565_v32, %v11298_v59  ;;  %v7534_v56 = vsel %vm7526_vm11, %v12377_v57, %v7533_v11  ;;  %v12380_v15 = vsub.f32 1.0, %v11340_v62  ;;  %9258 = vpow2.f32 %v7621_v43  ;;  %5176 = vmatprep.subr.bf16.mxu0 %v3707_v9 }
 0x35c   : > { %v11491_v12 = vmul.f32 %v9245_v14, %v12378_v31  ;;  %v7556_v59 = vadd.f32 %v7534_v56, %v7515_v51  ;;  %v7497_v20 = vsel %vm528_vm8, %v12379_v2, %v7496_v37  ;;  %v11505_v51 = vpop.f32.mrb[153].mxu1  ;;  %v7629_v14 = vsub.f32 1.0, %v11474_v47  ;;  %5529 = vmatprep.subr.bf16.mxu1 %v3709_v48 }
 0x35d   : > { %v11503_v39 = vmul.f32 %v9247_v21, %v12380_v15  ;;  %v7581_v32 = vsub.f32 0.0, %v7573_v1  ;;  %v7517_v5 = vadd.f32 %v7497_v20, %v7477_v26  ;;  %v9251_v29 = vpop.eup %9250  ;;  %v11511_v33 = vadd.f32 %v11285_v25, %v11219_v44  ;;  %v11518_v43 = vpop.f32.mrb[154].mxu1  ;;  %5530 = vmatpush1.bf16.msra.mxu1 %v3708_v16 }
 0x35e   : > { %v7564_v11 = vadd.f32 %v7556_v59, %v11321_v63  ;;  %v12381_v62 = vpack.c.bf16 %v11196_v13, %v11193_v45  ;;  %v8334_v26 = vadd.f32 %v11253_v38, %v11212_v58  ;;  %v11520_v21 = vpop.f32.mrb[156].mxu0  ;;  %v9253_v37 = vpop.eup %9252  ;;  %v11522_v54 = vmul.f32 %v9251_v29, %v7627_v28  ;;  %v11533_v13 = vld [vmem:[%s12254_s6 + $0x90] sm:$0xff]  }
 0x35f   : > { %v7595_v63 = vmul.f32 1.442695, %v7581_v32  ;;  %v7537_v1 = vrot.slane %v7517_v5, 4  ;;  %v8398_v25 = vadd.f32 %v11300_v42, %v11212_v58  ;;  %v11526_v57 = vpop.f32.mrb[155].mxu1  ;;  %v11528_v45 = vpop.f32.mrb[157].mxu0  ;;  %v8333_v28 = vadd.f32 %v11245_v18, %v11219_v44  ;;  %8199 = vmatmul.mubr.msk.bf16.gmra.mrb[4].mxu1 %vm1149_vm10, %v11454_v30 }
 0x360   : > { %5177 = vmatpush1.bf16.msra.mxu0 %v12381_v62  ;;  %v9255_v38 = vpop.eup %9254  ;;  %v7572_v56 = vsub.f32 %v7564_v11, %v11225_v52  ;;  %v3710_v16 = vpack.c.bf16 %v8334_v26, %v11483_v4  ;;  %v8335_v42 = vadd.f32 %v11260_v49, %v11212_v58  ;;  %v11541_v9 = vpop.f32.mrb[158].mxu0  ;;  %v12382_v31 = vrot.slane %v11333_v0, 4  ;;  %4711 = vmatprep.mubr.bf16.mxu1 %v12326_v3 }
 0x361   : > { %9260 = vpow2.f32 %v7595_v63  ;;  %v8397_v2 = vadd.f32 %v11292_v10, %v11219_v44  ;;  %v3712_v52 = vpack.c.bf16 %v8398_v25, %v11511_v33  ;;  %v11551_v18 = vpop.f32.mrb[159].mxu0  ;;  %v12383_v4 = vsub.f32 1.0, %v11379_v34  ;;  %8168 = vmatmul.mubr.msk.bf16.gmra.mrb[8].mxu0 %vm1149_vm10, %v11533_v13  ;;  %v11570_v30 = vpop.eup %9256  ;;  %v12385_v33 = vld [vmem:[#allocation17_spill] sm:$0xff]  ;;  %v12388_v25 = vld [vmem:[#allocation22_spill] sm:$0xff] }
 0x362   : > { %v7538_v59 = vsel %vm7526_vm11, %v12382_v31, %v7537_v1  ;;  %v7580_v20 = vsub.f32 0.0, %v7572_v56  ;;  %v3711_v15 = vpack.c.bf16 %v8335_v42, %v8333_v28  ;;  %v12384_v0 = vsub.f32 1.0, %v11397_v60  ;;  %4368 = vmatprep.mubr.bf16.mxu0 %v12326_v3  ;;  %v12389_v31 = vld [vmem:[#allocation18_spill] sm:$0xff] }
 0x363   : > { %v11555_v49 = vmul.f32 %v9253_v37, %v12383_v4  ;;  %v7558_v48 = vadd.f32 %v7538_v59, %v7517_v5  ;;  %v8399_v44 = vadd.f32 %v11310_v53, %v11212_v58  ;;  %v8336_v10 = vadd.f32 %v11302_v23, %v11288_v55  ;;  %v11572_v5 = vpop.permute.xlu1 %2533  ;;  %v11579_v53 = vpop.f32.mrb[156].mxu1  ;;  %v12387_v37 = vld [vmem:[#allocation16_spill] sm:$0xff]  ;;  %v12390_v59 = vld [vmem:[#allocation19_spill] sm:$0xff]  ;;  %v12391_v4 = vld [vmem:[#allocation25_spill] sm:$0xff] }
 0x364   : > { %v11560_v32 = vmul.f32 %v9255_v38, %v12384_v0  ;;  %v8400_v34 = vadd.f32 %v11358_v17, %v11288_v55  ;;  %v7593_v29 = vmul.f32 1.442695, %v7580_v20  ;;  %5178 = vmatprep.subr.bf16.mxu0 %v3711_v15  ;;  %v8337_v58 = vadd.f32 %v11312_v35, %v11288_v55  ;;  %v11582_v17 = vpop.permute.xlu0 %2528  ;;  %v11590_v63 = vpop.f32.mrb[157].mxu1  ;;  %v12392_v0 = vld [vmem:[#allocation21_spill] sm:$0xff] }
 0x365   : > { %v7566_v60 = vadd.f32 %v7558_v48, %v11372_v24  ;;  %v8338_v23 = vadd.f32 %v11327_v40, %v11279_v41  ;;  %v3713_v11 = vpack.c.bf16 %v8399_v44, %v8397_v2  ;;  %v8401_v62 = vadd.f32 %v12385_v33, %v11288_v55  ;;  %5179 = vmatpush1.bf16.msra.mxu0 %v3710_v16  ;;  %v12386_v24 = vld [vmem:[#allocation20_spill] sm:$0xff]  ;;  %v11595_v56 = vpop.f32.mrb[158].mxu1  ;;  %v11597_v28 = vpop.f32.mrb[160].mxu0  ;;  %v12396_v33 = vld [vmem:[#allocation23_spill] sm:$0xff] }
 0x366   : > { %v8402_v26 = vadd.f32 %v12386_v24, %v11279_v41  ;;  %v8339_v35 = vadd.f32 %v12387_v37, %v11279_v41  ;;  %9262 = vpow2.f32 %v7593_v29  ;;  %v8403_v38 = vadd.f32 %v12388_v25, %v11279_v41  ;;  %v11599_v55 = vpop.eup %9258  ;;  %v11605_v48 = vpop.f32.mrb[161].mxu0  ;;  %v12397_v37 = vld [vmem:[#allocation28_spill] sm:$0xff] }
 0x367   : > { %v7574_v40 = vsub.f32 %v7566_v60, %v11416_v46  ;;  %v3714_v1 = vpack.c.bf16 %v8338_v23, %v8336_v10  ;;  %5531 = vmatprep.subr.bf16.mxu1 %v3713_v11  ;;  %v8340_v2 = vadd.f32 %v12390_v59, %v12389_v31  ;;  %v8404_v20 = vadd.f32 %v12391_v4, %v12389_v31  ;;  %v3615_v46 = vpop.f32.mrb[159].mxu1  ;;  %v12393_v10 = vld [vmem:[#allocation27_spill] sm:$0xff]  ;;  %v12398_v59 = vld [vmem:[#allocation26_spill] sm:$0xff] }
 0x368   : > { %v3716_v16 = vpack.c.bf16 %v8402_v26, %v8400_v34  ;;  %v3715_v42 = vpack.c.bf16 %v8339_v35, %v8337_v58  ;;  %5532 = vmatpush1.bf16.msra.mxu1 %v3712_v52  ;;  %v3717_v41 = vpack.c.bf16 %v8403_v38, %v8401_v62  ;;  %v8341_v44 = vadd.f32 %v12392_v0, %v12389_v31  ;;  %v11611_v34 = vpop.f32.mrb[162].mxu0  ;;  %v12394_v60 = vld [vmem:[#allocation15_spill] sm:$0xff]  ;;  %v12395_v58 = vld [vmem:[#allocation24_spill] sm:$0xff] }
 0x369   : > { %v7582_v15 = vsub.f32 0.0, %v7574_v40  ;;  %v8405_v29 = vadd.f32 %v12393_v10, %v12389_v31  ;;  %v8342_v23 = vadd.f32 %v12395_v58, %v12394_v60  ;;  %v8406_v11 = vadd.f32 %v11439_v8, %v12394_v60  ;;  %v11621_v62 = vpop.f32.mrb[163].mxu0  ;;  %8200 = vmatmul.mubr.msk.bf16.gmra.mrb[8].mxu1 %vm1149_vm10, %v11533_v13  ;;  %v11647_v13 = vpop.permute.xlu0 %2538 }
 0x36a   : > { %5180 = vmatprep.subr.bf16.mxu0 %v3715_v42  ;;  %v8343_v24 = vadd.f32 %v12396_v33, %v12394_v60  ;;  %v8407_v52 = vadd.f32 %v11447_v7, %v12394_v60  ;;  %5533 = vmatprep.subr.bf16.mxu1 %v3717_v41  ;;  %v8344_v35 = vadd.f32 %v11441_v27, %v12397_v37  ;;  %v11636_v27 = vpop.permute.xlu1 %2543  ;;  %v3619_v4 = vpop.f32.mrb[160].mxu1 }
 0x36b   : > { %v7597_v26 = vmul.f32 1.442695, %v7582_v15  ;;  %5181 = vmatpush1.bf16.msra.mxu0 %v3714_v1  ;;  %v11627_v40 = vadd.f32 %v11496_v19, %v12397_v37  ;;  %v8345_v8 = vadd.f32 %v11449_v50, %v12397_v37  ;;  %v9261_v25 = vpop.eup %9260  ;;  %v3718_v38 = vpack.c.bf16 %v8342_v23, %v8340_v2  ;;  %v9081_v1 = vld [vmem:[%s12254_s6 + $0x98] sm:$0xff]   ;;  %4721 = vmatprep.mubr.bf16.mxu1 %v12326_v3 }
 0x36c   : > { %v3720_v42 = vpack.c.bf16 %v8406_v11, %v8404_v20  ;;  %v3719_v31 = vpack.c.bf16 %v8343_v24, %v8341_v44  ;;  %v3721_v7 = vpack.c.bf16 %v8407_v52, %v8405_v29  ;;  %v11640_v19 = vmul.f32 %v9261_v25, %v7629_v14  ;;  %5534 = vmatpush1.bf16.msra.mxu1 %v3716_v16  ;;  %v3621_v16 = vpop.f32.mrb[161].mxu1  ;;  %v3243_v0 = vpop.f32.mrb[164].mxu0  ;;  %v12399_v24 = vld [vmem:[#allocation13_spill] sm:$0xff] }
 0x36d   : > { %9264 = vpow2.f32 %v7597_v26  ;;  %v8409_v50 = vadd.f32 %v11505_v51, %v12397_v37  ;;  %v8346_v2 = vadd.f32 %v11463_v36, %v12398_v59  ;;  %v7628_v20 = vsub.f32 1.0, %v11570_v30  ;;  %8169 = vmatmul.mubr.msk.bf16.gmra.mrb[12].mxu0 %vm1149_vm10, %v9081_v1 }
 0x36e   : > { %5182 = vmatprep.subr.bf16.mxu0 %v3719_v31  ;;  %5535 = vmatprep.subr.bf16.mxu1 %v3721_v7  ;;  %v8410_v47 = vadd.f32 %v11518_v43, %v12398_v59  ;;  %v8347_v14 = vadd.f32 %v11469_v22, %v12398_v59  ;;  %v8411_v51 = vadd.f32 %v11526_v57, %v12398_v59  ;;  %v3623_v43 = vpop.f32.mrb[162].mxu1  ;;  %v7674_v52 = vmul.f32 0.121875, %v12399_v24 }
 0x36f   : > { %5183 = vmatpush1.bf16.msra.mxu0 %v3718_v38  ;;  %v3722_v36 = vpack.c.bf16 %v8346_v2, %v8344_v35  ;;  %v8348_v15 = vadd.f32 %v11520_v21, %v11499_v61  ;;  %v11660_v30 = vadd.f32 %v11579_v53, %v11499_v61  ;;  %v8349_v41 = vadd.f32 %v11528_v45, %v11499_v61  ;;  %v3625_v29 = vpop.f32.mrb[163].mxu1  ;;  %v3245_v21 = vpop.f32.mrb[165].mxu0 }
 0x370   : > { %v3724_v22 = vpack.c.bf16 %v8410_v47, %v11627_v40  ;;  %v3723_v44 = vpack.c.bf16 %v8347_v14, %v8345_v8  ;;  %v3725_v10 = vpack.c.bf16 %v8411_v51, %v8409_v50  ;;  %v8413_v57 = vadd.f32 %v11590_v63, %v11499_v61  ;;  %v9263_v60 = vpop.eup %9262  ;;  %5536 = vmatpush1.bf16.msra.mxu1 %v3720_v42  ;;  %v3247_v11 = vpop.f32.mrb[166].mxu0 }
 0x371   : > { %v8350_v53 = vadd.f32 %v11541_v9, %v11487_v6  ;;  %v8414_v45 = vadd.f32 %v11595_v56, %v11487_v6  ;;  %v8351_v58 = vadd.f32 %v11551_v18, %v11487_v6  ;;  %v8415_v23 = vadd.f32 %v3615_v46, %v11487_v6  ;;  %v3249_v9 = vpop.f32.mrb[167].mxu0  ;;  %8201 = vmatmul.mubr.msk.bf16.gmra.mrb[12].mxu1 %vm1149_vm10, %v9081_v1  ;;  %v11691_v40 = vpop.permute.xlu1 %2553 }
 0x372   : > { %v11675_v33 = vmul.f32 %v9263_v60, %v7628_v20  ;;  %5184 = vmatprep.subr.bf16.mxu0 %v3723_v44  ;;  %5537 = vmatprep.subr.bf16.mxu1 %v3725_v10  ;;  %v8352_v61 = vadd.f32 %v11597_v28, %v11582_v17  ;;  %v11680_v63 = vadd.f32 %v3619_v4, %v11582_v17  ;;  %v7630_v8 = vsub.f32 1.0, %v11599_v55  ;;  %v3629_v38 = vpop.f32.mrb[164].mxu1  ;;  %v11698_v42 = vpop.permute.xlu0 %2548 }
 0x373   : > { %5185 = vmatpush1.bf16.msra.mxu0 %v3722_v36  ;;  %v3726_v56 = vpack.c.bf16 %v8350_v53, %v8348_v15  ;;  %v3728_v18 = vpack.c.bf16 %v8414_v45, %v11660_v30  ;;  %v3727_v26 = vpack.c.bf16 %v8351_v58, %v8349_v41  ;;  %v3729_v6 = vpack.c.bf16 %v8415_v23, %v8413_v57  ;;  %v3631_v1 = vpop.f32.mrb[165].mxu1  ;;  %v12400_v57 = vld [vmem:[#allocation14_spill] sm:$0xff] }
 0x374   : > { %v8353_v46 = vadd.f32 %v11605_v48, %v11582_v17  ;;  %v8417_v37 = vadd.f32 %v3621_v16, %v11582_v17  ;;  %v8354_v28 = vadd.f32 %v11611_v34, %v11572_v5  ;;  %v8418_v35 = vadd.f32 %v3623_v43, %v11572_v5  ;;  %5538 = vmatpush1.bf16.msra.mxu1 %v3724_v22  ;;  %v3633_v20 = vpop.f32.mrb[166].mxu1  ;;  %v3253_v47 = vpop.f32.mrb[168].mxu0 }
 0x375   : > { %5186 = vmatprep.subr.bf16.mxu0 %v3727_v26  ;;  %v8355_v25 = vadd.f32 %v11621_v62, %v11572_v5  ;;  %v8419_v48 = vadd.f32 %v3625_v29, %v11572_v5  ;;  %v8356_v17 = vadd.f32 %v3243_v0, %v11647_v13  ;;  %5539 = vmatprep.subr.bf16.mxu1 %v3729_v6  ;;  %v9082_v62 = vld [vmem:[%s12254_s6 + $0xa0] sm:$0xff]   ;;  %v3635_v36 = vpop.f32.mrb[167].mxu1  ;;  %v3255_v15 = vpop.f32.mrb[169].mxu0  ;;  %v12401_v29 = vcvt.s32.f32 %v12400_v57  ;;  %v9083_v26 = vld [vmem:[%s12254_s6 + $0xa8] sm:$0xff]  }
 0x376   : > { %v3730_v34 = vpack.c.bf16 %v8354_v28, %v8352_v61  ;;  %v3732_v31 = vpack.c.bf16 %v8418_v35, %v11680_v63  ;;  %v11702_v7 = vadd.f32 %v3629_v38, %v11647_v13  ;;  %v8357_v55 = vadd.f32 %v3245_v21, %v11647_v13  ;;  %4378 = vmatprep.mubr.bf16.mxu0 %v12326_v3  ;;  %v3257_v43 = vpop.f32.mrb[170].mxu0  ;;  %v2564_v61 = vpop.permute.xlu1 %2563 }
 0x377   : > { %v9265_v5 = vpop.eup %9264  ;;  %5187 = vmatpush1.bf16.msra.mxu0 %v3726_v56  ;;  %v3731_v50 = vpack.c.bf16 %v8355_v25, %v8353_v46  ;;  %v3733_v59 = vpack.c.bf16 %v8419_v48, %v8417_v37  ;;  %v8421_v2 = vadd.f32 %v3631_v1, %v11647_v13  ;;  %v8358_v4 = vadd.f32 %v3247_v11, %v11636_v27  ;;  %v3259_v10 = vpop.f32.mrb[171].mxu0 }
 0x378   : > { %v11710_v14 = vmul.f32 %v9265_v5, %v7630_v8  ;;  %v8422_v51 = vadd.f32 %v3633_v20, %v11636_v27  ;;  %v8359_v16 = vadd.f32 %v3249_v9, %v11636_v27  ;;  %4731 = vmatprep.mubr.bf16.mxu1 %v12326_v3  ;;  %5540 = vmatpush1.bf16.msra.mxu1 %v3728_v18  ;;  %v7673_v21 = vadd.f32 0.5, %v12401_v29  ;;  %v2559_v56 = vpop.permute.xlu0 %2558 }
 0x379   : > { %5188 = vmatprep.subr.bf16.mxu0 %v3731_v50  ;;  %v3734_v30 = vpack.c.bf16 %v8358_v4, %v8356_v17  ;;  %v8423_v13 = vadd.f32 %v3635_v36, %v11636_v27  ;;  %v8360_v41 = vadd.f32 %v3253_v47, %v11698_v42  ;;  %5541 = vmatprep.subr.bf16.mxu1 %v3733_v59  ;;  %v7676_v45 = vadd.f32 0.05, %v7674_v52  ;;  %v9084_v36 = vld [vmem:[%s12254_s6 + $0xb0] sm:$0xff]  }
 0x37a   : > { %v3736_v0 = vpack.c.bf16 %v8422_v51, %v11702_v7  ;;  %v3735_v22 = vpack.c.bf16 %v8359_v16, %v8357_v55  ;;  %8170 = vmatmul.mubr.msk.bf16.gmra.mrb[16].mxu0 %vm1149_vm10, %v9082_v62  ;;  %v8361_v44 = vadd.f32 %v3255_v15, %v11698_v42  ;;  %v8362_v53 = vadd.f32 %v3257_v43, %v11691_v40  ;;  %v3639_v63 = vpop.f32.mrb[168].mxu1 }
 0x37b   : > { %5189 = vmatpush1.bf16.msra.mxu0 %v3730_v34  ;;  %v3737_v60 = vpack.c.bf16 %v8423_v13, %v8421_v2  ;;  %v8363_v27 = vadd.f32 %v3259_v10, %v11691_v40  ;;  %4388 = vmatprep.mubr.bf16.mxu0 %v12326_v3  ;;  %v11729_v58 = vadd.f32 %v11522_v54, %v11491_v12  ;;  %v3641_v18 = vpop.f32.mrb[169].mxu1  ;;  %v7675_v37 = vmul.f32 0.121875, %v7673_v21 }
 0x37c   : > { %8202 = vmatmul.mubr.msk.bf16.gmra.mrb[16].mxu1 %vm1149_vm10, %v9082_v62  ;;  %5190 = vmatprep.subr.bf16.mxu0 %v3735_v22  ;;  %v11733_v23 = vadd.f32 %v11675_v33, %v11503_v39  ;;  %v11737_v11 = vadd.f32 %v11640_v19, %v11555_v49  ;;  %v3738_v9 = vpack.c.bf16 %v8362_v53, %v8360_v41  ;;  %v3643_v6 = vpop.f32.mrb[170].mxu1  ;;  %v3263_v46 = vpop.f32.mrb[172].mxu0 }
 0x37d   : > { %5542 = vmatpush1.bf16.msra.mxu1 %v3732_v31  ;;  %v3739_v24 = vpack.c.bf16 %v8363_v27, %v8361_v44  ;;  %4741 = vmatprep.mubr.bf16.mxu1 %v12326_v3  ;;  %v11742_v52 = vadd.f32 %v11710_v14, %v11560_v32  ;;  %v7678_v28 = vmul.f32 %v7676_v45, %v11491_v12  ;;  %v3645_v48 = vpop.f32.mrb[171].mxu1  ;;  %v3265_v17 = vpop.f32.mrb[173].mxu0  ;;  %v7677_v2 = vadd.f32 0.05, %v7675_v37 }
 0x37e   : > { %5543 = vmatprep.subr.bf16.mxu1 %v3737_v60  ;;  %v7679_v35 = vmul.f32 %v7676_v45, %v11503_v39  ;;  %v8424_v8 = vadd.f32 %v3639_v63, %v11698_v42  ;;  %v8426_v25 = vadd.f32 %v3643_v6, %v11691_v40  ;;  %v8425_v38 = vadd.f32 %v3641_v18, %v11698_v42  ;;  %v3267_v31 = vpop.f32.mrb[174].mxu0  ;;  %v2569_v51 = vpop.permute.xlu0 %2568 }
 0x37f   : > { %5191 = vmatpush1.bf16.msra.mxu0 %v3734_v30  ;;  %v8427_v34 = vadd.f32 %v3645_v48, %v11691_v40  ;;  %v8364_v55 = vadd.f32 %v3263_v46, %v2559_v56  ;;  %v8366_v1 = vadd.f32 %v3267_v31, %v2564_v61  ;;  %v3269_v62 = vpop.f32.mrb[175].mxu0  ;;  %v8365_v50 = vadd.f32 %v3265_v17, %v2559_v56  ;;  %v2574_v40 = vpop.permute.xlu1 %2573 }
 0x380   : > { %5192 = vmatprep.subr.bf16.mxu0 %v3739_v24  ;;  %v3740_v7 = vpack.c.bf16 %v8426_v25, %v8424_v8  ;;  %v8367_v59 = vadd.f32 %v3269_v62, %v2564_v61  ;;  %v7680_v4 = vmul.f32 %v7676_v45, %v11555_v49  ;;  %v7681_v15 = vmul.f32 %v7676_v45, %v11560_v32 }
 0x381   : > { %5544 = vmatpush1.bf16.msra.mxu1 %v3736_v0  ;;  %v3741_v5 = vpack.c.bf16 %v8427_v34, %v8425_v38  ;;  %v3742_v42 = vpack.c.bf16 %v8366_v1, %v8364_v55  ;;  %v7682_v41 = vmul.f32 %v7677_v2, %v11522_v54  ;;  %v7683_v63 = vmul.f32 %v7677_v2, %v11675_v33 }
 0x382   : > { %8171 = vmatmul.mubr.msk.bf16.gmra.mrb[20].mxu0 %vm1149_vm10, %v9083_v26  ;;  %v3649_v20 = vpop.f32.mrb[172].mxu1  ;;  %v3743_v47 = vpack.c.bf16 %v8367_v59, %v8365_v50  ;;  %v2579_v1 = vpop.permute.xlu0 %2578 }
 0x383   : > { %5193 = vmatpush1.bf16.msra.mxu0 %v3738_v9  ;;  %4398 = vmatprep.mubr.bf16.mxu0 %v12326_v3  ;;  %v3651_v16 = vpop.f32.mrb[173].mxu1  ;;  %v8428_v43 = vadd.f32 %v3649_v20, %v2559_v56  ;;  %v7684_v9 = vmul.f32 %v7677_v2, %v11640_v19  ;;  %v11771_v6 = vadd.f32 %v7683_v63, %v7679_v35  ;;  %v2584_v48 = vpop.permute.xlu1 %2583 }
 0x384   : > { %8203 = vmatmul.mubr.msk.bf16.gmra.mrb[20].mxu1 %vm1149_vm10, %v9083_v26  ;;  %5545 = vmatprep.subr.bf16.mxu1 %v3741_v5  ;;  %v3653_v30 = vpop.f32.mrb[174].mxu1  ;;  %v3273_v13 = vpop.f32.mrb[176].mxu0  ;;  %v8429_v10 = vadd.f32 %v3651_v16, %v2559_v56  ;;  %v7685_v26 = vmul.f32 %v7677_v2, %v11710_v14  ;;  %v11768_v56 = vadd.f32 %v7682_v41, %v7678_v28  ;;  %v9085_v28 = vld [vmem:[%s12254_s6 + $0xb8] sm:$0xff]  }
 0x385   : > { %4751 = vmatprep.mubr.bf16.mxu1 %v12326_v3  ;;  %5546 = vmatpush1.bf16.msra.mxu1 %v3740_v7  ;;  %v8430_v0 = vadd.f32 %v3653_v30, %v2564_v61  ;;  %v3655_v22 = vpop.f32.mrb[175].mxu1  ;;  %v3275_v44 = vpop.f32.mrb[177].mxu0  ;;  %v8368_v29 = vadd.f32 %v3273_v13, %v2569_v51  ;;  %v11773_v46 = vadd.f32 %v7684_v9, %v7680_v4  ;;  %v9086_v13 = vld [vmem:[%s12254_s6 + $0xc0] sm:$0xff]  }
 0x386   : > { %5194 = vmatprep.subr.bf16.mxu0 %v3743_v47  ;;  %v8431_v57 = vadd.f32 %v3655_v22, %v2564_v61  ;;  %v8369_v21 = vadd.f32 %v3275_v44, %v2569_v51  ;;  %v3277_v60 = vpop.f32.mrb[178].mxu0  ;;  %v11776_v25 = vadd.f32 %v7685_v26, %v7681_v15 }
 0x387   : > { %5195 = vmatpush1.bf16.msra.mxu0 %v3742_v42  ;;  %v3744_v53 = vpack.c.bf16 %v8430_v0, %v8428_v43  ;;  %v8370_v27 = vadd.f32 %v3277_v60, %v2574_v40  ;;  %v3279_v45 = vpop.f32.mrb[179].mxu0 }
 0x388   : > { %v3745_v24 = vpack.c.bf16 %v8431_v57, %v8429_v10  ;;  %v8371_v18 = vadd.f32 %v3279_v45, %v2574_v40  ;;  %v2589_v57 = vpop.permute.xlu0 %2588 }
 0x389   : > { %v3746_v61 = vpack.c.bf16 %v8370_v27, %v8368_v29 }
 0x38a   : > { %8172 = vmatmul.mubr.msk.bf16.gmra.mrb[24].mxu0 %vm1149_vm10, %v9084_v36  ;;  %v3659_v37 = vpop.f32.mrb[176].mxu1  ;;  %5547 = vmatprep.subr.bf16.mxu1 %v3745_v24  ;;  %v3747_v8 = vpack.c.bf16 %v8371_v18, %v8369_v21 }
 0x38b   : > { %4408 = vmatprep.mubr.bf16.mxu0 %v12326_v3  ;;  %v3661_v17 = vpop.f32.mrb[177].mxu1  ;;  %5548 = vmatpush1.bf16.msra.mxu1 %v3744_v53  ;;  %v8432_v35 = vadd.f32 %v3659_v37, %v2569_v51 }
 0x38c   : > { %8204 = vmatmul.mubr.msk.bf16.gmra.mrb[24].mxu1 %vm1149_vm10, %v9084_v36  ;;  %v3663_v38 = vpop.f32.mrb[178].mxu1  ;;  %v3283_v34 = vpop.f32.mrb[180].mxu0  ;;  %5196 = vmatprep.subr.bf16.mxu0 %v3747_v8  ;;  %v8433_v62 = vadd.f32 %v3661_v17, %v2569_v51  ;;  %v9087_v17 = vld [vmem:[%s12254_s6 + $0xc8] sm:$0xff]  }
 0x38d   : > { %4761 = vmatprep.mubr.bf16.mxu1 %v12326_v3  ;;  %v8434_v31 = vadd.f32 %v3663_v38, %v2574_v40  ;;  %v3665_v7 = vpop.f32.mrb[179].mxu1  ;;  %v3285_v55 = vpop.f32.mrb[181].mxu0  ;;  %5197 = vmatpush1.bf16.msra.mxu0 %v3746_v61  ;;  %v8372_v2 = vadd.f32 %v3283_v34, %v2579_v1 }
 0x38e   : > { %v8435_v5 = vadd.f32 %v3665_v7, %v2574_v40  ;;  %v3287_v50 = vpop.f32.mrb[182].mxu0  ;;  %v8373_v47 = vadd.f32 %v3285_v55, %v2579_v1  ;;  %v2594_v40 = vpop.permute.xlu1 %2593 }
 0x38f   : > { %v3748_v59 = vpack.c.bf16 %v8434_v31, %v8432_v35  ;;  %v8374_v42 = vadd.f32 %v3287_v50, %v2584_v48  ;;  %v3289_v4 = vpop.f32.mrb[183].mxu0  ;;  %v2599_v55 = vpop.permute.xlu0 %2598 }
 0x390   : > { %v3749_v20 = vpack.c.bf16 %v8435_v5, %v8433_v62  ;;  %v8375_v16 = vadd.f32 %v3289_v4, %v2584_v48 }
 0x391   : > { %v3750_v36 = vpack.c.bf16 %v8374_v42, %v8372_v2 }
 0x392   : > { %8173 = vmatmul.mubr.msk.bf16.gmra.mrb[28].mxu0 %vm1149_vm10, %v9085_v28  ;;  %v3669_v15 = vpop.f32.mrb[180].mxu1  ;;  %5549 = vmatprep.subr.bf16.mxu1 %v3749_v20  ;;  %v3751_v30 = vpack.c.bf16 %v8375_v16, %v8373_v47  ;;  %v2604_v8 = vpop.permute.xlu1 %2603 }
 0x393   : > { %4418 = vmatprep.mubr.bf16.mxu0 %v12326_v3  ;;  %v3671_v51 = vpop.f32.mrb[181].mxu1  ;;  %5550 = vmatpush1.bf16.msra.mxu1 %v3748_v59  ;;  %v8436_v0 = vadd.f32 %v3669_v15, %v2579_v1 }
 0x394   : > { %8205 = vmatmul.mubr.msk.bf16.gmra.mrb[28].mxu1 %vm1149_vm10, %v9085_v28  ;;  %v3673_v41 = vpop.f32.mrb[182].mxu1  ;;  %v3293_v43 = vpop.f32.mrb[184].mxu0  ;;  %5198 = vmatprep.subr.bf16.mxu0 %v3751_v30  ;;  %v8437_v29 = vadd.f32 %v3671_v51, %v2579_v1 }
 0x395   : > { %4771 = vmatprep.mubr.bf16.mxu1 %v12326_v3  ;;  %v8438_v22 = vadd.f32 %v3673_v41, %v2584_v48  ;;  %v3675_v44 = vpop.f32.mrb[183].mxu1  ;;  %v3295_v10 = vpop.f32.mrb[185].mxu0  ;;  %5199 = vmatpush1.bf16.msra.mxu0 %v3750_v36  ;;  %v8376_v27 = vadd.f32 %v3293_v43, %v2589_v57 }
 0x396   : > { %v8439_v21 = vadd.f32 %v3675_v44, %v2584_v48  ;;  %v3297_v60 = vpop.f32.mrb[186].mxu0  ;;  %v8377_v24 = vadd.f32 %v3295_v10, %v2589_v57 }
 0x397   : > { %v3752_v53 = vpack.c.bf16 %v8438_v22, %v8436_v0  ;;  %v8378_v45 = vadd.f32 %v3297_v60, %v2594_v40  ;;  %v3299_v63 = vpop.f32.mrb[187].mxu0  ;;  %v9092_v60 = vld [vmem:[%s12254_s6 + $0xf0] sm:$0xff]  }
 0x398   : > { %v3753_v9 = vpack.c.bf16 %v8439_v21, %v8437_v29  ;;  %v8379_v18 = vadd.f32 %v3299_v63, %v2594_v40  ;;  %v9090_v29 = vld [vmem:[%s12254_s6 + $0xe0] sm:$0xff]   ;;  %v9091_v21 = vld [vmem:[%s12254_s6 + $0xe8] sm:$0xff]   ;;  %v9099_v63 = vld [vmem:[%s12253_s5 + $0x10] ss:$8 sps:$4 sm:$0xff]  }
 0x399   : > { %v3754_v26 = vpack.c.bf16 %v8378_v45, %v8376_v27  ;;  %v9096_v27 = vld [vmem:[%s12253_s5 + $0x4] ss:$8 sps:$4 sm:$0xff]   ;;  %v9094_v45 = vld [vmem:[%s12253_s5] ss:$8 sps:$4 sm:$0xff]  }
 0x39a   : > { %8174 = vmatmul.mubr.msk.bf16.gmra.mrb[32].mxu0 %vm1149_vm10, %v9086_v13  ;;  %v3679_v61 = vpop.f32.mrb[184].mxu1  ;;  %5551 = vmatprep.subr.bf16.mxu1 %v3753_v9  ;;  %v3755_v37 = vpack.c.bf16 %v8379_v18, %v8377_v24  ;;  %v9100_v9 = vld [vmem:[%s12253_s5 + $0x24] ss:$8 sps:$4 sm:$0xff]   ;;  %v9102_v24 = vld [vmem:[%s12253_s5 + $0x20] ss:$8 sps:$4 sm:$0xff]  }
 0x39b   : > { %4428 = vmatprep.mubr.bf16.mxu0 %v12326_v3  ;;  %v3681_v48 = vpop.f32.mrb[185].mxu1  ;;  %5552 = vmatpush1.bf16.msra.mxu1 %v3752_v53  ;;  %v8440_v34 = vadd.f32 %v3679_v61, %v2589_v57  ;;  %v9093_v53 = vld [vmem:[%s12254_s6 + $0xf8] sm:$0xff]   ;;  %v9106_v61 = vld [vmem:[%s12253_s5 + $0x44] ss:$8 sps:$4 sm:$0xff]  }
 0x39c   : > { %8206 = vmatmul.mubr.msk.bf16.gmra.mrb[32].mxu1 %vm1149_vm10, %v9086_v13  ;;  %v3683_v28 = vpop.f32.mrb[186].mxu1  ;;  %v3303_v38 = vpop.f32.mrb[188].mxu0  ;;  %5200 = vmatprep.subr.bf16.mxu0 %v3755_v37  ;;  %v8441_v1 = vadd.f32 %v3681_v48, %v2589_v57  ;;  %v9089_v57 = vld [vmem:[%s12254_s6 + $0xd8] sm:$0xff]   ;;  %v9108_v37 = vld [vmem:[%s12253_s5 + $0x40] ss:$8 sps:$4 sm:$0xff]  }
 0x39d   : > { %4781 = vmatprep.mubr.bf16.mxu1 %v12326_v3  ;;  %v8442_v35 = vadd.f32 %v3683_v28, %v2594_v40  ;;  %v3685_v31 = vpop.f32.mrb[187].mxu1  ;;  %v3305_v7 = vpop.f32.mrb[189].mxu0  ;;  %5201 = vmatpush1.bf16.msra.mxu0 %v3754_v26  ;;  %v8380_v59 = vadd.f32 %v3303_v38, %v2599_v55  ;;  %v9103_v18 = vld [vmem:[%s12253_s5 + $0x34] ss:$8 sps:$4 sm:$0xff]   ;;  %v9105_v26 = vld [vmem:[%s12253_s5 + $0x30] ss:$8 sps:$4 sm:$0xff]  }
 0x39e   : > { %v8443_v62 = vadd.f32 %v3685_v31, %v2594_v40  ;;  %v3307_v5 = vpop.f32.mrb[190].mxu0  ;;  %v8381_v20 = vadd.f32 %v3305_v7, %v2599_v55  ;;  %v9088_v40 = vld [vmem:[%s12254_s6 + $0xd0] sm:$0xff]   ;;  %v9114_v28 = vld [vmem:[%s12253_s5 + $0x60] ss:$8 sps:$4 sm:$0xff]  }
 0x39f   : > { %v3756_v50 = vpack.c.bf16 %v8442_v35, %v8440_v34  ;;  %v8382_v2 = vadd.f32 %v3307_v5, %v2604_v8  ;;  %v3309_v42 = vpop.f32.mrb[191].mxu0  ;;  %v9111_v48 = vld [vmem:[%s12253_s5 + $0x50] ss:$8 sps:$4 sm:$0xff]   ;;  %v9115_v38 = vld [vmem:[%s12253_s5 + $0x74] ss:$8 sps:$4 sm:$0xff]  }
 0x3a0   : > { %v3757_v4 = vpack.c.bf16 %v8443_v62, %v8441_v1  ;;  %v8383_v47 = vadd.f32 %v3309_v42, %v2604_v8  ;;  %v9117_v34 = vld [vmem:[%s12253_s5 + $0x70] ss:$8 sps:$4 sm:$0xff]   ;;  %v9118_v35 = vld [vmem:[%s12253_s5 + $0x84] ss:$8 sps:$4 sm:$0xff]   ;;  %v9120_v31 = vld [vmem:[%s12253_s5 + $0x80] ss:$8 sps:$4 sm:$0xff]  }
 0x3a1   : > { %v3758_v16 = vpack.c.bf16 %v8382_v2, %v8380_v59  ;;  %v9121_v7 = vld [vmem:[%s12253_s5 + $0x94] ss:$8 sps:$4 sm:$0xff]   ;;  %v9124_v1 = vld [vmem:[%s12253_s5 + $0xa4] ss:$8 sps:$4 sm:$0xff]   ;;  %v9126_v62 = vld [vmem:[%s12253_s5 + $0xa0] ss:$8 sps:$4 sm:$0xff]  }
 0x3a2   : > { %8175 = vmatmul.mubr.msk.bf16.gmra.mrb[36].mxu0 %vm1149_vm10, %v9087_v17  ;;  %v3689_v36 = vpop.f32.mrb[188].mxu1  ;;  %5553 = vmatprep.subr.bf16.mxu1 %v3757_v4  ;;  %v3759_v15 = vpack.c.bf16 %v8383_v47, %v8381_v20  ;;  %v9127_v5 = vld [vmem:[%s12253_s5 + $0xb4] ss:$8 sps:$4 sm:$0xff]   ;;  %v9130_v59 = vld [vmem:[%s12253_s5 + $0xc4] ss:$8 sps:$4 sm:$0xff]  }
 0x3a3   : > { %4438 = vmatprep.mubr.bf16.mxu0 %v12326_v3  ;;  %v3691_v30 = vpop.f32.mrb[189].mxu1  ;;  %5554 = vmatpush1.bf16.msra.mxu1 %v3756_v50  ;;  %v8444_v13 = vadd.f32 %v3689_v36, %v2599_v55  ;;  %v9129_v50 = vld [vmem:[%s12253_s5 + $0xb0] ss:$8 sps:$4 sm:$0xff]   ;;  %v9132_v2 = vld [vmem:[%s12253_s5 + $0xc0] ss:$8 sps:$4 sm:$0xff]  }
 0x3a4   : > { %8207 = vmatmul.mubr.msk.bf16.gmra.mrb[36].mxu1 %vm1149_vm10, %v9087_v17  ;;  %v3693_v51 = vpop.f32.mrb[190].mxu1  ;;  %5202 = vmatprep.subr.bf16.mxu0 %v3759_v15  ;;  %v8445_v0 = vadd.f32 %v3691_v30, %v2599_v55  ;;  %v9112_v17 = vld [vmem:[%s12253_s5 + $0x64] ss:$8 sps:$4 sm:$0xff]   ;;  %v9123_v55 = vld [vmem:[%s12253_s5 + $0x90] ss:$8 sps:$4 sm:$0xff]  }
 0x3a5   : > { %4791 = vmatprep.mubr.bf16.mxu1 %v12326_v3  ;;  %v8446_v41 = vadd.f32 %v3693_v51, %v2604_v8  ;;  %v3695_v43 = vpop.f32.mrb[191].mxu1  ;;  %5203 = vmatpush1.bf16.msra.mxu0 %v3758_v16  ;;  %v9133_v42 = vld [vmem:[%s12253_s5 + $0xd4] ss:$8 sps:$4 sm:$0xff]   ;;  %v9135_v4 = vld [vmem:[%s12253_s5 + $0xd0] ss:$8 sps:$4 sm:$0xff]  }
 0x3a6   : > { %v8447_v22 = vadd.f32 %v3695_v43, %v2604_v8  ;;  %v9109_v8 = vld [vmem:[%s12253_s5 + $0x54] ss:$8 sps:$4 sm:$0xff]   ;;  %v9136_v20 = vld [vmem:[%s12253_s5 + $0xe4] ss:$8 sps:$4 sm:$0xff]   ;;  %v9138_v47 = vld [vmem:[%s12253_s5 + $0xe0] ss:$8 sps:$4 sm:$0xff]  }
 0x3a7   : > { %v3760_v44 = vpack.c.bf16 %v8446_v41, %v8444_v13  ;;  %v9139_v16 = vld [vmem:[%s12253_s5 + $0xf4] ss:$8 sps:$4 sm:$0xff]   ;;  %v9141_v36 = vld [vmem:[%s12253_s5 + $0xf0] ss:$8 sps:$4 sm:$0xff]   ;;  %v9144_v15 = vld [vmem:[%s12253_s5 + $0x104] ss:$8 sps:$4 sm:$0xff]  }
 0x3a8   : > { %v3761_v10 = vpack.c.bf16 %v8447_v22, %v8445_v0  ;;  %v9142_v30 = vld [vmem:[%s12253_s5 + $0x100] ss:$8 sps:$4 sm:$0xff]   ;;  %v9145_v51 = vld [vmem:[%s12253_s5 + $0x110] ss:$8 sps:$4 sm:$0xff]   ;;  %v9150_v13 = vld [vmem:[%s12253_s5 + $0x124] ss:$8 sps:$4 sm:$0xff]  }
 0x3a9   : > { %v9148_v41 = vld [vmem:[%s12253_s5 + $0x120] ss:$8 sps:$4 sm:$0xff]   ;;  %v9153_v43 = vld [vmem:[%s12253_s5 + $0x134] ss:$8 sps:$4 sm:$0xff]   ;;  %v9151_v0 = vld [vmem:[%s12253_s5 + $0x130] ss:$8 sps:$4 sm:$0xff]  }
 0x3aa   : > { %8176 = vmatmul.mubr.msk.bf16.gmra.mrb[40].mxu0 %vm1149_vm10, %v9088_v40  ;;  %5555 = vmatprep.subr.bf16.mxu1 %v3761_v10  ;;  %v9156_v22 = vld [vmem:[%s12253_s5 + $0x144] ss:$8 sps:$4 sm:$0xff]   ;;  %v9159_v10 = vld [vmem:[%s12253_s5 + $0x154] ss:$8 sps:$4 sm:$0xff]  }
 0x3ab   : > { %4448 = vmatprep.mubr.bf16.mxu0 %v12326_v3  ;;  %5556 = vmatpush1.bf16.msra.mxu1 %v3760_v44  ;;  %v9154_v44 = vld [vmem:[%s12253_s5 + $0x140] ss:$8 sps:$4 sm:$0xff]  }
 0x3ac   : > { %8208 = vmatmul.mubr.msk.bf16.gmra.mrb[40].mxu1 %vm1149_vm10, %v9088_v40  ;;  %v9147_v40 = vld [vmem:[%s12253_s5 + $0x114] ss:$8 sps:$4 sm:$0xff]  }
 0x3ad   : > { %4801 = vmatprep.mubr.bf16.mxu1 %v12326_v3 }
 0x3b2   : > { %8177 = vmatmul.mubr.msk.bf16.gmra.mrb[44].mxu0 %vm1149_vm10, %v9089_v57 }
 0x3b3   : > { %4458 = vmatprep.mubr.bf16.mxu0 %v12326_v3 }
 0x3b4   : > { %8209 = vmatmul.mubr.msk.bf16.gmra.mrb[44].mxu1 %vm1149_vm10, %v9089_v57  ;;  %v9157_v57 = vld [vmem:[%s12253_s5 + $0x150] ss:$8 sps:$4 sm:$0xff]  }
 0x3b5   : > { %4811 = vmatprep.mubr.bf16.mxu1 %v12326_v3 }
 0x3ba   : > { %8178 = vmatmul.mubr.msk.bf16.gmra.mrb[48].mxu0 %vm1149_vm10, %v9090_v29 }
 0x3bb   : > { %4468 = vmatprep.mubr.bf16.mxu0 %v12326_v3 }
 0x3bc   : > { %8210 = vmatmul.mubr.msk.bf16.gmra.mrb[48].mxu1 %vm1149_vm10, %v9090_v29  ;;  %v9162_v29 = vld [vmem:[%s12253_s5 + $0x164] ss:$8 sps:$4 sm:$0xff]  }
 0x3bd   : > { %4821 = vmatprep.mubr.bf16.mxu1 %v12326_v3 }
 0x3c2   : > { %8179 = vmatmul.mubr.msk.bf16.gmra.mrb[52].mxu0 %vm1149_vm10, %v9091_v21 }
 0x3c3   : > { %4478 = vmatprep.mubr.bf16.mxu0 %v12326_v3 }
 0x3c4   : > { %8211 = vmatmul.mubr.msk.bf16.gmra.mrb[52].mxu1 %vm1149_vm10, %v9091_v21  ;;  %v9160_v21 = vld [vmem:[%s12253_s5 + $0x160] ss:$8 sps:$4 sm:$0xff]  }
 0x3c5   : > { %4831 = vmatprep.mubr.bf16.mxu1 %v12326_v3 }
 0x3ca   : > { %8180 = vmatmul.mubr.msk.bf16.gmra.mrb[56].mxu0 %vm1149_vm10, %v9092_v60 }
 0x3cb   : > { %4488 = vmatprep.mubr.bf16.mxu0 %v12326_v3 }
 0x3cc   : > { %8212 = vmatmul.mubr.msk.bf16.gmra.mrb[56].mxu1 %vm1149_vm10, %v9092_v60  ;;  %v9165_v60 = vld [vmem:[%s12253_s5 + $0x174] ss:$8 sps:$4 sm:$0xff]  }
 0x3cd   : > { %4841 = vmatprep.mubr.bf16.mxu1 %v12326_v3  ;;  %v9097_v3 = vld [vmem:[%s12253_s5 + $0x14] ss:$8 sps:$4 sm:$0xff]  }
 0x3d2   : > { %8181 = vmatmul.mubr.msk.bf16.gmra.mrb[60].mxu0 %vm1149_vm10, %v9093_v53 }
 0x3d3   : > { %5204 = vmatprep.mubr.bf16.mxu0 %v9096_v27 }
 0x3d4   : > { %8213 = vmatmul.mubr.msk.bf16.gmra.mrb[60].mxu1 %vm1149_vm10, %v9093_v53  ;;  %v9163_v53 = vld [vmem:[%s12253_s5 + $0x170] ss:$8 sps:$4 sm:$0xff]  }
 0x3d5   : > { %5557 = vmatprep.mubr.bf16.mxu1 %v9096_v27  ;;  %v9168_v27 = vld [vmem:[%s12253_s5 + $0x184] ss:$8 sps:$4 sm:$0xff]  }
 0x3da   : > { %5205 = vmatmul.mubr.bf16.vlgmr.msra.gmra.mrb[192].mxu0 %v9094_v45 }
 0x3db   : > { %5214 = vmatprep.mubr.bf16.mxu0 %v9097_v3 }
 0x3dc   : > { %5558 = vmatmul.mubr.bf16.vlgmr.msra.gmra.mrb[192].mxu1 %v9094_v45  ;;  %v9166_v45 = vld [vmem:[%s12253_s5 + $0x180] ss:$8 sps:$4 sm:$0xff]  }
 0x3dd   : > { %5567 = vmatprep.mubr.bf16.mxu1 %v9097_v3  ;;  %v9171_v3 = vld [vmem:[%s12253_s5 + $0x194] ss:$8 sps:$4 sm:$0xff]  }
 0x3e2   : > { %5215 = vmatmul.mubr.bf16.gmra.mrb[196].mxu0 %v9099_v63 }
 0x3e3   : > { %5224 = vmatprep.mubr.bf16.mxu0 %v9100_v9 }
 0x3e4   : > { %5568 = vmatmul.mubr.bf16.gmra.mrb[196].mxu1 %v9099_v63  ;;  %v9169_v63 = vld [vmem:[%s12253_s5 + $0x190] ss:$8 sps:$4 sm:$0xff]  }
 0x3e5   : > { %5577 = vmatprep.mubr.bf16.mxu1 %v9100_v9  ;;  %v9174_v9 = vld [vmem:[%s12253_s5 + $0x1a4] ss:$8 sps:$4 sm:$0xff]  }
 0x3ea   : > { %5225 = vmatmul.mubr.bf16.gmra.mrb[200].mxu0 %v9102_v24 }
 0x3eb   : > { %5234 = vmatprep.mubr.bf16.mxu0 %v9103_v18 }
 0x3ec   : > { %5578 = vmatmul.mubr.bf16.gmra.mrb[200].mxu1 %v9102_v24  ;;  %v9172_v24 = vld [vmem:[%s12253_s5 + $0x1a0] ss:$8 sps:$4 sm:$0xff]  }
 0x3ed   : > { %5587 = vmatprep.mubr.bf16.mxu1 %v9103_v18  ;;  %v9177_v18 = vld [vmem:[%s12253_s5 + $0x1b4] ss:$8 sps:$4 sm:$0xff]  }
 0x3f2   : > { %5235 = vmatmul.mubr.bf16.gmra.mrb[204].mxu0 %v9105_v26 }
 0x3f3   : > { %5244 = vmatprep.mubr.bf16.mxu0 %v9106_v61 }
 0x3f4   : > { %5588 = vmatmul.mubr.bf16.gmra.mrb[204].mxu1 %v9105_v26  ;;  %v5945_v26 = vpop.permute.xlu0 %5944 }
 0x3f5   : > { %5597 = vmatprep.mubr.bf16.mxu1 %v9106_v61 }
 0x3fa   : > { %5245 = vmatmul.mubr.bf16.gmra.mrb[208].mxu0 %v9108_v37 }
 0x3fb   : > { %5254 = vmatprep.mubr.bf16.mxu0 %v9109_v8 }
 0x3fc   : > { %5598 = vmatmul.mubr.bf16.gmra.mrb[208].mxu1 %v9108_v37  ;;  %v5950_v37 = vpop.permute.xlu1 %5949 }
 0x3fd   : > { %5607 = vmatprep.mubr.bf16.mxu1 %v9109_v8 }
 0x402   : > { %5255 = vmatmul.mubr.bf16.gmra.mrb[212].mxu0 %v9111_v48 }
 0x403   : > { %5264 = vmatprep.mubr.bf16.mxu0 %v9112_v17 }
 0x404   : > { %5608 = vmatmul.mubr.bf16.gmra.mrb[212].mxu1 %v9111_v48 }
 0x405   : > { %5617 = vmatprep.mubr.bf16.mxu1 %v9112_v17  ;;  %v9175_v17 = vld [vmem:[%s12253_s5 + $0x1b0] ss:$8 sps:$4 sm:$0xff]  }
 0x40a   : > { %5265 = vmatmul.mubr.bf16.gmra.mrb[216].mxu0 %v9114_v28 }
 0x40b   : > { %5274 = vmatprep.mubr.bf16.mxu0 %v9115_v38 }
 0x40c   : > { %5618 = vmatmul.mubr.bf16.gmra.mrb[216].mxu1 %v9114_v28 }
 0x40d   : > { %5627 = vmatprep.mubr.bf16.mxu1 %v9115_v38 }
 0x412   : > { %5275 = vmatmul.mubr.bf16.gmra.mrb[220].mxu0 %v9117_v34 }
 0x413   : > { %5284 = vmatprep.mubr.bf16.mxu0 %v9118_v35 }
 0x414   : > { %5628 = vmatmul.mubr.bf16.gmra.mrb[220].mxu1 %v9117_v34 }
 0x415   : > { %5637 = vmatprep.mubr.bf16.mxu1 %v9118_v35  ;;  %v9180_v35 = vld [vmem:[%s12253_s5 + $0x1c4] ss:$8 sps:$4 sm:$0xff]  }
 0x41a   : > { %5285 = vmatmul.mubr.bf16.gmra.mrb[224].mxu0 %v9120_v31 }
 0x41b   : > { %5294 = vmatprep.mubr.bf16.mxu0 %v9121_v7 }
 0x41c   : > { %5638 = vmatmul.mubr.bf16.gmra.mrb[224].mxu1 %v9120_v31 }
 0x41d   : > { %5647 = vmatprep.mubr.bf16.mxu1 %v9121_v7 }
 0x422   : > { %5295 = vmatmul.mubr.bf16.gmra.mrb[228].mxu0 %v9123_v55 }
 0x423   : > { %5304 = vmatprep.mubr.bf16.mxu0 %v9124_v1 }
 0x424   : > { %5648 = vmatmul.mubr.bf16.gmra.mrb[228].mxu1 %v9123_v55 }
 0x425   : > { %5657 = vmatprep.mubr.bf16.mxu1 %v9124_v1 }
 0x42a   : > { %5305 = vmatmul.mubr.bf16.gmra.mrb[232].mxu0 %v9126_v62 }
 0x42b   : > { %5314 = vmatprep.mubr.bf16.mxu0 %v9127_v5 }
 0x42c   : > { %5658 = vmatmul.mubr.bf16.gmra.mrb[232].mxu1 %v9126_v62 }
 0x42d   : > { %5667 = vmatprep.mubr.bf16.mxu1 %v9127_v5 }
 0x432   : > { %5315 = vmatmul.mubr.bf16.gmra.mrb[236].mxu0 %v9129_v50 }
 0x433   : > { %5324 = vmatprep.mubr.bf16.mxu0 %v9130_v59 }
 0x434   : > { %5668 = vmatmul.mubr.bf16.gmra.mrb[236].mxu1 %v9129_v50 }
 0x435   : > { %5677 = vmatprep.mubr.bf16.mxu1 %v9130_v59 }
 0x43a   : > { %5325 = vmatmul.mubr.bf16.gmra.mrb[240].mxu0 %v9132_v2 }
 0x43b   : > { %5334 = vmatprep.mubr.bf16.mxu0 %v9133_v42 }
 0x43c   : > { %5678 = vmatmul.mubr.bf16.gmra.mrb[240].mxu1 %v9132_v2 }
 0x43d   : > { %5687 = vmatprep.mubr.bf16.mxu1 %v9133_v42 }
 0x442   : > { %5335 = vmatmul.mubr.bf16.gmra.mrb[244].mxu0 %v9135_v4 }
 0x443   : > { %5344 = vmatprep.mubr.bf16.mxu0 %v9136_v20 }
 0x444   : > { %5688 = vmatmul.mubr.bf16.gmra.mrb[244].mxu1 %v9135_v4 }
 0x445   : > { %5697 = vmatprep.mubr.bf16.mxu1 %v9136_v20 }
 0x44a   : > { %5345 = vmatmul.mubr.bf16.gmra.mrb[248].mxu0 %v9138_v47 }
 0x44b   : > { %5354 = vmatprep.mubr.bf16.mxu0 %v9139_v16 }
 0x44c   : > { %5698 = vmatmul.mubr.bf16.gmra.mrb[248].mxu1 %v9138_v47 }
 0x44d   : > { %5707 = vmatprep.mubr.bf16.mxu1 %v9139_v16 }
 0x452   : > { %5355 = vmatmul.mubr.bf16.gmra.mrb[252].mxu0 %v9141_v36 }
 0x453   : > { %5364 = vmatprep.mubr.bf16.mxu0 %v9144_v15 }
 0x454   : > { %5708 = vmatmul.mubr.bf16.gmra.mrb[252].mxu1 %v9141_v36 }
 0x455   : > { %5717 = vmatprep.mubr.bf16.mxu1 %v9144_v15 }
 0x45a   : > { %5365 = vmatmul.mubr.bf16.gmra.mrb[0].mxu0 %v9142_v30 }
 0x45b   : > { %5374 = vmatprep.mubr.bf16.mxu0 %v9147_v40 }
 0x45c   : > { %5718 = vmatmul.mubr.bf16.gmra.mrb[0].mxu1 %v9142_v30 }
 0x45d   : > { %5727 = vmatprep.mubr.bf16.mxu1 %v9147_v40  ;;  %v5955_v40 = vpop.permute.xlu0 %5954 }
 0x462   : > { %5375 = vmatmul.mubr.bf16.gmra.mrb[4].mxu0 %v9145_v51 }
 0x463   : > { %5384 = vmatprep.mubr.bf16.mxu0 %v9150_v13 }
 0x464   : > { %5728 = vmatmul.mubr.bf16.gmra.mrb[4].mxu1 %v9145_v51 }
 0x465   : > { %5737 = vmatprep.mubr.bf16.mxu1 %v9150_v13 }
 0x46a   : > { %5385 = vmatmul.mubr.bf16.gmra.mrb[8].mxu0 %v9148_v41 }
 0x46b   : > { %5394 = vmatprep.mubr.bf16.mxu0 %v9153_v43 }
 0x46c   : > { %5738 = vmatmul.mubr.bf16.gmra.mrb[8].mxu1 %v9148_v41 }
 0x46d   : > { %5747 = vmatprep.mubr.bf16.mxu1 %v9153_v43 }
 0x472   : > { %5395 = vmatmul.mubr.bf16.gmra.mrb[12].mxu0 %v9151_v0 }
 0x473   : > { %5404 = vmatprep.mubr.bf16.mxu0 %v9156_v22 }
 0x474   : > { %5748 = vmatmul.mubr.bf16.gmra.mrb[12].mxu1 %v9151_v0  ;;  %v5960_v0 = vpop.permute.xlu1 %5959 }
 0x475   : > { %5757 = vmatprep.mubr.bf16.mxu1 %v9156_v22 }
 0x47a   : > { %5405 = vmatmul.mubr.bf16.gmra.mrb[16].mxu0 %v9154_v44 }
 0x47b   : > { %5414 = vmatprep.mubr.bf16.mxu0 %v9159_v10 }
 0x47c   : > { %5758 = vmatmul.mubr.bf16.gmra.mrb[16].mxu1 %v9154_v44 }
 0x47d   : > { %5767 = vmatprep.mubr.bf16.mxu1 %v9159_v10 }
 0x482   : > { %5415 = vmatmul.mubr.bf16.gmra.mrb[20].mxu0 %v9157_v57 }
 0x483   : > { %5424 = vmatprep.mubr.bf16.mxu0 %v9162_v29 }
 0x484   : > { %5768 = vmatmul.mubr.bf16.gmra.mrb[20].mxu1 %v9157_v57  ;;  %v9178_v57 = vld [vmem:[%s12253_s5 + $0x1c0] ss:$8 sps:$4 sm:$0xff]  }
 0x485   : > { %5777 = vmatprep.mubr.bf16.mxu1 %v9162_v29 }
 0x48a   : > { %5425 = vmatmul.mubr.bf16.gmra.mrb[24].mxu0 %v9160_v21 }
 0x48b   : > { %5434 = vmatprep.mubr.bf16.mxu0 %v9165_v60 }
 0x48c   : > { %5778 = vmatmul.mubr.bf16.gmra.mrb[24].mxu1 %v9160_v21 }
 0x48d   : > { %5787 = vmatprep.mubr.bf16.mxu1 %v9165_v60 }
 0x492   : > { %5435 = vmatmul.mubr.bf16.gmra.mrb[28].mxu0 %v9163_v53 }
 0x493   : > { %5444 = vmatprep.mubr.bf16.mxu0 %v9168_v27 }
 0x494   : > { %5788 = vmatmul.mubr.bf16.gmra.mrb[28].mxu1 %v9163_v53 }
 0x495   : > { %5797 = vmatprep.mubr.bf16.mxu1 %v9168_v27  ;;  %v9183_v27 = vld [vmem:[%s12253_s5 + $0x1d4] ss:$8 sps:$4 sm:$0xff]  }
 0x49a   : > { %5445 = vmatmul.mubr.bf16.gmra.mrb[32].mxu0 %v9166_v45 }
 0x49b   : > { %5454 = vmatprep.mubr.bf16.mxu0 %v9171_v3 }
 0x49c   : > { %5798 = vmatmul.mubr.bf16.gmra.mrb[32].mxu1 %v9166_v45 }
 0x49d   : > { %5807 = vmatprep.mubr.bf16.mxu1 %v9171_v3 }
 0x4a2   : > { %5455 = vmatmul.mubr.bf16.gmra.mrb[36].mxu0 %v9169_v63 }
 0x4a3   : > { %5464 = vmatprep.mubr.bf16.mxu0 %v9174_v9 }
 0x4a4   : > { %5808 = vmatmul.mubr.bf16.gmra.mrb[36].mxu1 %v9169_v63 }
 0x4a5   : > { %5817 = vmatprep.mubr.bf16.mxu1 %v9174_v9 }
 0x4aa   : > { %5465 = vmatmul.mubr.bf16.gmra.mrb[40].mxu0 %v9172_v24 }
 0x4ab   : > { %5474 = vmatprep.mubr.bf16.mxu0 %v9177_v18 }
 0x4ac   : > { %5818 = vmatmul.mubr.bf16.gmra.mrb[40].mxu1 %v9172_v24 }
 0x4ad   : > { %v5206_v61 = vpop.f32.mrb[192].mxu0  ;;  %5827 = vmatprep.mubr.bf16.mxu1 %v9177_v18 }
 0x4ae   : > { %v6262_v8 = vadd.f32 %v5945_v26, %v5206_v61  ;;  %v5208_v48 = vpop.f32.mrb[193].mxu0 }
 0x4af   : > { %v5559_v28 = vpop.f32.mrb[192].mxu1  ;;  %v6263_v38 = vadd.f32 %v5945_v26, %v5208_v48  ;;  %v5210_v34 = vpop.f32.mrb[194].mxu0 }
 0x4b0   : > { %v6264_v31 = vadd.f32 %v5945_v26, %v5559_v28  ;;  %v5561_v7 = vpop.f32.mrb[193].mxu1  ;;  %v6266_v55 = vadd.f32 %v5950_v37, %v5210_v34  ;;  %v5212_v1 = vpop.f32.mrb[195].mxu0  ;;  %v6518_v59 = vmax.f32 %v6262_v8, 0.0 }
 0x4b1   : > { %v6265_v62 = vadd.f32 %v5945_v26, %v5561_v7  ;;  %v5563_v5 = vpop.f32.mrb[194].mxu1  ;;  %v6267_v50 = vadd.f32 %v5950_v37, %v5212_v1  ;;  %v6519_v20 = vmax.f32 %v6263_v38, 0.0  ;;  %v5965_v7 = vpop.permute.xlu0 %5964 }
 0x4b2   : > { %v6522_v2 = vmax.f32 %v6266_v55, 0.0  ;;  %v6268_v42 = vadd.f32 %v5950_v37, %v5563_v5  ;;  %v5565_v4 = vpop.f32.mrb[195].mxu1  ;;  %5475 = vmatmul.mubr.bf16.gmra.mrb[44].mxu0 %v9175_v17  ;;  %v6520_v36 = vmax.f32 %v6264_v31, 0.0 }
 0x4b3   : > { %v6523_v47 = vmax.f32 %v6267_v50, 0.0  ;;  %v6269_v16 = vadd.f32 %v5950_v37, %v5565_v4  ;;  %5484 = vmatprep.mubr.bf16.mxu0 %v9180_v35  ;;  %v6521_v51 = vmax.f32 %v6265_v62, 0.0  ;;  %v5970_v50 = vpop.permute.xlu1 %5969  ;;  %v9181_v4 = vld [vmem:[%s12253_s5 + $0x1d0] ss:$8 sps:$4 sm:$0xff]  }
 0x4b4   : > { %v6774_v15 = vpack.c.bf16 %v6522_v2, %v6518_v59  ;;  %v6524_v30 = vmax.f32 %v6268_v42, 0.0  ;;  %5828 = vmatmul.mubr.bf16.gmra.mrb[44].mxu1 %v9175_v17 }
 0x4b5   : > { %v6775_v13 = vpack.c.bf16 %v6523_v47, %v6519_v20  ;;  %v6525_v41 = vmax.f32 %v6269_v16, 0.0  ;;  %v5216_v43 = vpop.f32.mrb[196].mxu0  ;;  %5837 = vmatprep.mubr.bf16.mxu1 %v9180_v35 }
 0x4b6   : > { %v6776_v22 = vpack.c.bf16 %v6524_v30, %v6520_v36  ;;  %v6270_v44 = vadd.f32 %v5955_v40, %v5216_v43  ;;  %v5218_v10 = vpop.f32.mrb[197].mxu0 }
 0x4b7   : > { %v6777_v29 = vpack.c.bf16 %v6525_v41, %v6521_v51  ;;  %v5569_v21 = vpop.f32.mrb[196].mxu1  ;;  %v6271_v60 = vadd.f32 %v5955_v40, %v5218_v10  ;;  %v5220_v53 = vpop.f32.mrb[198].mxu0  ;;  %7010 = vmatprep.subr.bf16.mxu0 %v6775_v13 }
 0x4b8   : > { %v6272_v45 = vadd.f32 %v5955_v40, %v5569_v21  ;;  %v5571_v3 = vpop.f32.mrb[197].mxu1  ;;  %v6274_v63 = vadd.f32 %v5960_v0, %v5220_v53  ;;  %v5222_v9 = vpop.f32.mrb[199].mxu0  ;;  %7011 = vmatpush1.bf16.msra.mxu0 %v6774_v15  ;;  %v6526_v61 = vmax.f32 %v6270_v44, 0.0  ;;  %v9186_v15 = vld [vmem:[%s12253_s5 + $0x1e4] ss:$8 sps:$4 sm:$0xff]  }
 0x4b9   : > { %v6273_v24 = vadd.f32 %v5955_v40, %v5571_v3  ;;  %v5573_v18 = vpop.f32.mrb[198].mxu1  ;;  %7136 = vmatprep.subr.bf16.mxu1 %v6777_v29  ;;  %v6275_v26 = vadd.f32 %v5960_v0, %v5222_v9  ;;  %v6527_v17 = vmax.f32 %v6271_v60, 0.0  ;;  %v5975_v3 = vpop.permute.xlu0 %5974 }
 0x4ba   : > { %v6530_v37 = vmax.f32 %v6274_v63, 0.0  ;;  %v6276_v8 = vadd.f32 %v5960_v0, %v5573_v18  ;;  %v5575_v48 = vpop.f32.mrb[199].mxu1  ;;  %7137 = vmatpush1.bf16.msra.mxu1 %v6776_v22  ;;  %5485 = vmatmul.mubr.bf16.gmra.mrb[48].mxu0 %v9178_v57  ;;  %v6528_v34 = vmax.f32 %v6272_v45, 0.0 }
 0x4bb   : > { %v6531_v28 = vmax.f32 %v6275_v26, 0.0  ;;  %v6277_v38 = vadd.f32 %v5960_v0, %v5575_v48  ;;  %5494 = vmatprep.mubr.bf16.mxu0 %v9183_v27  ;;  %v6529_v55 = vmax.f32 %v6273_v24, 0.0  ;;  %v5980_v26 = vpop.permute.xlu1 %5979  ;;  %v9184_v48 = vld [vmem:[%s12253_s5 + $0x1e0] ss:$8 sps:$4 sm:$0xff]  }
 0x4bc   : > { %v6778_v35 = vpack.c.bf16 %v6530_v37, %v6526_v61  ;;  %v6532_v31 = vmax.f32 %v6276_v8, 0.0  ;;  %5838 = vmatmul.mubr.bf16.gmra.mrb[48].mxu1 %v9178_v57 }
 0x4bd   : > { %v6779_v1 = vpack.c.bf16 %v6531_v28, %v6527_v17  ;;  %v6533_v62 = vmax.f32 %v6277_v38, 0.0  ;;  %v5226_v5 = vpop.f32.mrb[200].mxu0  ;;  %5847 = vmatprep.mubr.bf16.mxu1 %v9183_v27 }
 0x4be   : > { %v6780_v59 = vpack.c.bf16 %v6532_v31, %v6528_v34  ;;  %v6278_v2 = vadd.f32 %v5965_v7, %v5226_v5  ;;  %v5228_v42 = vpop.f32.mrb[201].mxu0 }
 0x4bf   : > { %v6781_v20 = vpack.c.bf16 %v6533_v62, %v6529_v55  ;;  %v5579_v47 = vpop.f32.mrb[200].mxu1  ;;  %v6279_v16 = vadd.f32 %v5965_v7, %v5228_v42  ;;  %v5230_v36 = vpop.f32.mrb[202].mxu0  ;;  %7012 = vmatprep.subr.bf16.mxu0 %v6779_v1 }
 0x4c0   : > { %v6280_v30 = vadd.f32 %v5965_v7, %v5579_v47  ;;  %v5581_v40 = vpop.f32.mrb[201].mxu1  ;;  %v6282_v51 = vadd.f32 %v5970_v50, %v5230_v36  ;;  %v5232_v13 = vpop.f32.mrb[203].mxu0  ;;  %7013 = vmatpush1.bf16.msra.mxu0 %v6778_v35  ;;  %v6534_v22 = vmax.f32 %v6278_v2, 0.0  ;;  %v9189_v35 = vld [vmem:[%s12253_s5 + $0x1f4] ss:$8 sps:$4 sm:$0xff]  }
 0x4c1   : > { %v6281_v41 = vadd.f32 %v5965_v7, %v5581_v40  ;;  %v5583_v43 = vpop.f32.mrb[202].mxu1  ;;  %7138 = vmatprep.subr.bf16.mxu1 %v6781_v20  ;;  %v6283_v0 = vadd.f32 %v5970_v50, %v5232_v13  ;;  %v6535_v29 = vmax.f32 %v6279_v16, 0.0  ;;  %v5985_v40 = vpop.permute.xlu0 %5984 }
 0x4c2   : > { %v6538_v44 = vmax.f32 %v6282_v51, 0.0  ;;  %v6284_v10 = vadd.f32 %v5970_v50, %v5583_v43  ;;  %v5585_v57 = vpop.f32.mrb[203].mxu1  ;;  %7139 = vmatpush1.bf16.msra.mxu1 %v6780_v59  ;;  %5495 = vmatmul.mubr.bf16.gmra.mrb[52].mxu0 %v9181_v4  ;;  %v6536_v53 = vmax.f32 %v6280_v30, 0.0 }
 0x4c3   : > { %v6539_v21 = vmax.f32 %v6283_v0, 0.0  ;;  %v6285_v60 = vadd.f32 %v5970_v50, %v5585_v57  ;;  %5504 = vmatprep.mubr.bf16.mxu0 %v9186_v15  ;;  %v6537_v63 = vmax.f32 %v6281_v41, 0.0  ;;  %v5990_v0 = vpop.permute.xlu1 %5989  ;;  %v9187_v57 = vld [vmem:[%s12253_s5 + $0x1f0] ss:$8 sps:$4 sm:$0xff]  }
 0x4c4   : > { %v6782_v27 = vpack.c.bf16 %v6538_v44, %v6534_v22  ;;  %v6540_v45 = vmax.f32 %v6284_v10, 0.0  ;;  %5848 = vmatmul.mubr.bf16.gmra.mrb[52].mxu1 %v9181_v4 }
 0x4c5   : > { %v6783_v9 = vpack.c.bf16 %v6539_v21, %v6535_v29  ;;  %v6541_v24 = vmax.f32 %v6285_v60, 0.0  ;;  %v5236_v18 = vpop.f32.mrb[204].mxu0  ;;  %5857 = vmatprep.mubr.bf16.mxu1 %v9186_v15 }
 0x4c6   : > { %v6784_v61 = vpack.c.bf16 %v6540_v45, %v6536_v53  ;;  %v6286_v37 = vadd.f32 %v5975_v3, %v5236_v18  ;;  %v5238_v8 = vpop.f32.mrb[205].mxu0 }
 0x4c7   : > { %v6785_v17 = vpack.c.bf16 %v6541_v24, %v6537_v63  ;;  %v5589_v28 = vpop.f32.mrb[204].mxu1  ;;  %v6287_v38 = vadd.f32 %v5975_v3, %v5238_v8  ;;  %v5240_v34 = vpop.f32.mrb[206].mxu0  ;;  %7014 = vmatprep.subr.bf16.mxu0 %v6783_v9 }
 0x4c8   : > { %v6288_v31 = vadd.f32 %v5975_v3, %v5589_v28  ;;  %v5591_v7 = vpop.f32.mrb[205].mxu1  ;;  %v6290_v55 = vadd.f32 %v5980_v26, %v5240_v34  ;;  %v5242_v1 = vpop.f32.mrb[207].mxu0  ;;  %7015 = vmatpush1.bf16.msra.mxu0 %v6782_v27  ;;  %v6542_v59 = vmax.f32 %v6286_v37, 0.0  ;;  %v9192_v27 = vld [vmem:[%s12256_s8 + $0x4] ss:$16 sps:$4 sm:$0xff]  }
 0x4c9   : > { %v6289_v62 = vadd.f32 %v5975_v3, %v5591_v7  ;;  %v5593_v5 = vpop.f32.mrb[206].mxu1  ;;  %7140 = vmatprep.subr.bf16.mxu1 %v6785_v17  ;;  %v6291_v50 = vadd.f32 %v5980_v26, %v5242_v1  ;;  %v6543_v20 = vmax.f32 %v6287_v38, 0.0  ;;  %v5995_v7 = vpop.permute.xlu0 %5994 }
 0x4ca   : > { %v6546_v2 = vmax.f32 %v6290_v55, 0.0  ;;  %v6292_v42 = vadd.f32 %v5980_v26, %v5593_v5  ;;  %v5595_v4 = vpop.f32.mrb[207].mxu1  ;;  %7141 = vmatpush1.bf16.msra.mxu1 %v6784_v61  ;;  %5505 = vmatmul.mubr.bf16.gmra.mrb[56].mxu0 %v9184_v48  ;;  %v6544_v36 = vmax.f32 %v6288_v31, 0.0 }
 0x4cb   : > { %v6547_v47 = vmax.f32 %v6291_v50, 0.0  ;;  %v6293_v16 = vadd.f32 %v5980_v26, %v5595_v4  ;;  %5514 = vmatprep.mubr.bf16.mxu0 %v9189_v35  ;;  %v6545_v51 = vmax.f32 %v6289_v62, 0.0  ;;  %v6000_v50 = vpop.permute.xlu1 %5999 }
 0x4cc   : > { %v6786_v15 = vpack.c.bf16 %v6546_v2, %v6542_v59  ;;  %v6548_v30 = vmax.f32 %v6292_v42, 0.0  ;;  %5858 = vmatmul.mubr.bf16.gmra.mrb[56].mxu1 %v9184_v48 }
 0x4cd   : > { %v6787_v13 = vpack.c.bf16 %v6547_v47, %v6543_v20  ;;  %v6549_v41 = vmax.f32 %v6293_v16, 0.0  ;;  %v5246_v43 = vpop.f32.mrb[208].mxu0  ;;  %5867 = vmatprep.mubr.bf16.mxu1 %v9189_v35 }
 0x4ce   : > { %v6788_v22 = vpack.c.bf16 %v6548_v30, %v6544_v36  ;;  %v6294_v44 = vadd.f32 %v5985_v40, %v5246_v43  ;;  %v5248_v10 = vpop.f32.mrb[209].mxu0 }
 0x4cf   : > { %v6789_v29 = vpack.c.bf16 %v6549_v41, %v6545_v51  ;;  %v5599_v21 = vpop.f32.mrb[208].mxu1  ;;  %v6295_v60 = vadd.f32 %v5985_v40, %v5248_v10  ;;  %v5250_v53 = vpop.f32.mrb[210].mxu0  ;;  %7016 = vmatprep.subr.bf16.mxu0 %v6787_v13 }
 0x4d0   : > { %v6296_v45 = vadd.f32 %v5985_v40, %v5599_v21  ;;  %v5601_v3 = vpop.f32.mrb[209].mxu1  ;;  %v6298_v63 = vadd.f32 %v5990_v0, %v5250_v53  ;;  %v5252_v9 = vpop.f32.mrb[211].mxu0  ;;  %7017 = vmatpush1.bf16.msra.mxu0 %v6786_v15  ;;  %v6550_v61 = vmax.f32 %v6294_v44, 0.0 }
 0x4d1   : > { %v6297_v24 = vadd.f32 %v5985_v40, %v5601_v3  ;;  %v5603_v18 = vpop.f32.mrb[210].mxu1  ;;  %7142 = vmatprep.subr.bf16.mxu1 %v6789_v29  ;;  %v6299_v26 = vadd.f32 %v5990_v0, %v5252_v9  ;;  %v6551_v17 = vmax.f32 %v6295_v60, 0.0 }
 0x4d2   : > { %v6554_v37 = vmax.f32 %v6298_v63, 0.0  ;;  %v6300_v8 = vadd.f32 %v5990_v0, %v5603_v18  ;;  %v5605_v48 = vpop.f32.mrb[211].mxu1  ;;  %7143 = vmatpush1.bf16.msra.mxu1 %v6788_v22  ;;  %5515 = vmatmul.mubr.bf16.gmra.mrb[60].mxu0 %v9187_v57  ;;  %v6552_v34 = vmax.f32 %v6296_v45, 0.0 }
 0x4d3   : > { %v6555_v28 = vmax.f32 %v6299_v26, 0.0  ;;  %v6301_v38 = vadd.f32 %v5990_v0, %v5605_v48  ;;  %7042 = vmatprep.mubr.bf16.mxu0 %v9192_v27  ;;  %v6553_v55 = vmax.f32 %v6297_v24, 0.0  ;;  %v6010_v24 = vpop.permute.xlu1 %6009 }
 0x4d4   : > { %v6790_v35 = vpack.c.bf16 %v6554_v37, %v6550_v61  ;;  %v6556_v31 = vmax.f32 %v6300_v8, 0.0  ;;  %5868 = vmatmul.mubr.bf16.gmra.mrb[60].mxu1 %v9187_v57 }
 0x4d5   : > { %v6791_v1 = vpack.c.bf16 %v6555_v28, %v6551_v17  ;;  %v6557_v62 = vmax.f32 %v6301_v38, 0.0  ;;  %v5256_v5 = vpop.f32.mrb[212].mxu0  ;;  %7168 = vmatprep.mubr.bf16.mxu1 %v9192_v27  ;;  %v6005_v27 = vpop.permute.xlu0 %6004 }
 0x4d6   : > { %v6792_v59 = vpack.c.bf16 %v6556_v31, %v6552_v34  ;;  %v6302_v2 = vadd.f32 %v5995_v7, %v5256_v5  ;;  %v5258_v42 = vpop.f32.mrb[213].mxu0 }
 0x4d7   : > { %v6793_v4 = vpack.c.bf16 %v6557_v62, %v6553_v55  ;;  %v5609_v20 = vpop.f32.mrb[212].mxu1  ;;  %v6303_v47 = vadd.f32 %v5995_v7, %v5258_v42  ;;  %v5260_v16 = vpop.f32.mrb[214].mxu0  ;;  %7018 = vmatprep.subr.bf16.mxu0 %v6791_v1 }
 0x4d8   : > { %v6304_v36 = vadd.f32 %v5995_v7, %v5609_v20  ;;  %v5611_v15 = vpop.f32.mrb[213].mxu1  ;;  %v6306_v30 = vadd.f32 %v6000_v50, %v5260_v16  ;;  %v5262_v40 = vpop.f32.mrb[215].mxu0  ;;  %7019 = vmatpush1.bf16.msra.mxu0 %v6790_v35  ;;  %v6558_v43 = vmax.f32 %v6302_v2, 0.0 }
 0x4d9   : > { %v6305_v51 = vadd.f32 %v5995_v7, %v5611_v15  ;;  %v5613_v13 = vpop.f32.mrb[214].mxu1  ;;  %7144 = vmatprep.subr.bf16.mxu1 %v6793_v4  ;;  %v6307_v41 = vadd.f32 %v6000_v50, %v5262_v40  ;;  %v6559_v10 = vmax.f32 %v6303_v47, 0.0  ;;  %v6015_v16 = vpop.permute.xlu0 %6014 }
 0x4da   : > { %v6562_v0 = vmax.f32 %v6306_v30, 0.0  ;;  %v6308_v22 = vadd.f32 %v6000_v50, %v5613_v13  ;;  %v5615_v44 = vpop.f32.mrb[215].mxu1  ;;  %7145 = vmatpush1.bf16.msra.mxu1 %v6792_v59  ;;  %v6560_v21 = vmax.f32 %v6304_v36, 0.0 }
 0x4db   : > { %v6563_v57 = vmax.f32 %v6307_v41, 0.0  ;;  %v6309_v29 = vadd.f32 %v6000_v50, %v5615_v44  ;;  %v6561_v45 = vmax.f32 %v6305_v51, 0.0  ;;  %v6020_v51 = vpop.permute.xlu1 %6019 }
 0x4dc   : > { %v6794_v60 = vpack.c.bf16 %v6562_v0, %v6558_v43  ;;  %v6564_v53 = vmax.f32 %v6308_v22, 0.0 }
 0x4dd   : > { %v6795_v3 = vpack.c.bf16 %v6563_v57, %v6559_v10  ;;  %v6565_v63 = vmax.f32 %v6309_v29, 0.0  ;;  %v5266_v9 = vpop.f32.mrb[216].mxu0 }
 0x4de   : > { %v6796_v18 = vpack.c.bf16 %v6564_v53, %v6560_v21  ;;  %v6310_v26 = vadd.f32 %v6005_v27, %v5266_v9  ;;  %v5268_v61 = vpop.f32.mrb[217].mxu0 }
 0x4df   : > { %v6797_v37 = vpack.c.bf16 %v6565_v63, %v6561_v45  ;;  %v5619_v8 = vpop.f32.mrb[216].mxu1  ;;  %v6311_v48 = vadd.f32 %v6005_v27, %v5268_v61  ;;  %v5270_v17 = vpop.f32.mrb[218].mxu0  ;;  %7020 = vmatprep.subr.bf16.mxu0 %v6795_v3 }
 0x4e0   : > { %v6312_v28 = vadd.f32 %v6005_v27, %v5619_v8  ;;  %v5621_v38 = vpop.f32.mrb[217].mxu1  ;;  %v6314_v34 = vadd.f32 %v6010_v24, %v5270_v17  ;;  %v5272_v35 = vpop.f32.mrb[219].mxu0  ;;  %7021 = vmatpush1.bf16.msra.mxu0 %v6794_v60  ;;  %v6566_v1 = vmax.f32 %v6310_v26, 0.0 }
 0x4e1   : > { %v6313_v31 = vadd.f32 %v6005_v27, %v5621_v38  ;;  %v5623_v7 = vpop.f32.mrb[218].mxu1  ;;  %7146 = vmatprep.subr.bf16.mxu1 %v6797_v37  ;;  %v6315_v55 = vadd.f32 %v6010_v24, %v5272_v35  ;;  %v6567_v59 = vmax.f32 %v6311_v48, 0.0  ;;  %v6025_v17 = vpop.permute.xlu0 %6024 }
 0x4e2   : > { %v6570_v62 = vmax.f32 %v6314_v34, 0.0  ;;  %v6316_v5 = vadd.f32 %v6010_v24, %v5623_v7  ;;  %v5625_v50 = vpop.f32.mrb[219].mxu1  ;;  %7147 = vmatpush1.bf16.msra.mxu1 %v6796_v18  ;;  %v6568_v4 = vmax.f32 %v6312_v28, 0.0 }
 0x4e3   : > { %v6571_v2 = vmax.f32 %v6315_v55, 0.0  ;;  %v6317_v42 = vadd.f32 %v6010_v24, %v5625_v50  ;;  %v6569_v36 = vmax.f32 %v6313_v31, 0.0  ;;  %v6030_v31 = vpop.permute.xlu1 %6029 }
 0x4e4   : > { %v6798_v20 = vpack.c.bf16 %v6570_v62, %v6566_v1  ;;  %v6572_v47 = vmax.f32 %v6316_v5, 0.0 }
 0x4e5   : > { %v6799_v15 = vpack.c.bf16 %v6571_v2, %v6567_v59  ;;  %v6573_v30 = vmax.f32 %v6317_v42, 0.0  ;;  %v5276_v40 = vpop.f32.mrb[220].mxu0 }
 0x4e6   : > { %v6800_v13 = vpack.c.bf16 %v6572_v47, %v6568_v4  ;;  %v6318_v41 = vadd.f32 %v6015_v16, %v5276_v40  ;;  %v5278_v43 = vpop.f32.mrb[221].mxu0 }
 0x4e7   : > { %v6801_v0 = vpack.c.bf16 %v6573_v30, %v6569_v36  ;;  %v5629_v22 = vpop.f32.mrb[220].mxu1  ;;  %v6319_v44 = vadd.f32 %v6015_v16, %v5278_v43  ;;  %v5280_v10 = vpop.f32.mrb[222].mxu0  ;;  %7022 = vmatprep.subr.bf16.mxu0 %v6799_v15 }
 0x4e8   : > { %v6320_v57 = vadd.f32 %v6015_v16, %v5629_v22  ;;  %v5631_v29 = vpop.f32.mrb[221].mxu1  ;;  %v6322_v21 = vadd.f32 %v6020_v51, %v5280_v10  ;;  %v5282_v60 = vpop.f32.mrb[223].mxu0  ;;  %7023 = vmatpush1.bf16.msra.mxu0 %v6798_v20  ;;  %v6574_v3 = vmax.f32 %v6318_v41, 0.0 }
 0x4e9   : > { %v6321_v53 = vadd.f32 %v6015_v16, %v5631_v29  ;;  %v5633_v27 = vpop.f32.mrb[222].mxu1  ;;  %7148 = vmatprep.subr.bf16.mxu1 %v6801_v0  ;;  %v6323_v45 = vadd.f32 %v6020_v51, %v5282_v60  ;;  %v6575_v18 = vmax.f32 %v6319_v44, 0.0  ;;  %v6035_v10 = vpop.permute.xlu0 %6034 }
 0x4ea   : > { %v6578_v63 = vmax.f32 %v6322_v21, 0.0  ;;  %v6324_v9 = vadd.f32 %v6020_v51, %v5633_v27  ;;  %v5635_v24 = vpop.f32.mrb[223].mxu1  ;;  %7149 = vmatpush1.bf16.msra.mxu1 %v6800_v13  ;;  %v6576_v37 = vmax.f32 %v6320_v57, 0.0 }
 0x4eb   : > { %v6579_v26 = vmax.f32 %v6323_v45, 0.0  ;;  %v6325_v61 = vadd.f32 %v6020_v51, %v5635_v24  ;;  %v6577_v28 = vmax.f32 %v6321_v53, 0.0  ;;  %v6040_v53 = vpop.permute.xlu1 %6039 }
 0x4ec   : > { %v6802_v8 = vpack.c.bf16 %v6578_v63, %v6574_v3  ;;  %v6580_v48 = vmax.f32 %v6324_v9, 0.0 }
 0x4ed   : > { %v6803_v38 = vpack.c.bf16 %v6579_v26, %v6575_v18  ;;  %v6581_v34 = vmax.f32 %v6325_v61, 0.0  ;;  %v5286_v35 = vpop.f32.mrb[224].mxu0 }
 0x4ee   : > { %v6804_v7 = vpack.c.bf16 %v6580_v48, %v6576_v37  ;;  %v6326_v55 = vadd.f32 %v6025_v17, %v5286_v35  ;;  %v5288_v1 = vpop.f32.mrb[225].mxu0 }
 0x4ef   : > { %v6805_v62 = vpack.c.bf16 %v6581_v34, %v6577_v28  ;;  %v5639_v5 = vpop.f32.mrb[224].mxu1  ;;  %v6327_v50 = vadd.f32 %v6025_v17, %v5288_v1  ;;  %v5290_v59 = vpop.f32.mrb[226].mxu0  ;;  %7024 = vmatprep.subr.bf16.mxu0 %v6803_v38 }
 0x4f0   : > { %v6328_v2 = vadd.f32 %v6025_v17, %v5639_v5  ;;  %v5641_v42 = vpop.f32.mrb[225].mxu1  ;;  %v6330_v4 = vadd.f32 %v6030_v31, %v5290_v59  ;;  %v5292_v20 = vpop.f32.mrb[227].mxu0  ;;  %7025 = vmatpush1.bf16.msra.mxu0 %v6802_v8  ;;  %v6582_v15 = vmax.f32 %v6326_v55, 0.0 }
 0x4f1   : > { %v6329_v47 = vadd.f32 %v6025_v17, %v5641_v42  ;;  %v5643_v16 = vpop.f32.mrb[226].mxu1  ;;  %7150 = vmatprep.subr.bf16.mxu1 %v6805_v62  ;;  %v6331_v36 = vadd.f32 %v6030_v31, %v5292_v20  ;;  %v6583_v13 = vmax.f32 %v6327_v50, 0.0  ;;  %v6045_v59 = vpop.permute.xlu0 %6044 }
 0x4f2   : > { %v6586_v30 = vmax.f32 %v6330_v4, 0.0  ;;  %v6332_v40 = vadd.f32 %v6030_v31, %v5643_v16  ;;  %v5645_v51 = vpop.f32.mrb[227].mxu1  ;;  %7151 = vmatpush1.bf16.msra.mxu1 %v6804_v7  ;;  %v6584_v0 = vmax.f32 %v6328_v2, 0.0 }
 0x4f3   : > { %v6587_v41 = vmax.f32 %v6331_v36, 0.0  ;;  %v6333_v43 = vadd.f32 %v6030_v31, %v5645_v51  ;;  %v6585_v57 = vmax.f32 %v6329_v47, 0.0  ;;  %v6050_v47 = vpop.permute.xlu1 %6049 }
 0x4f4   : > { %v6806_v22 = vpack.c.bf16 %v6586_v30, %v6582_v15  ;;  %v6588_v44 = vmax.f32 %v6332_v40, 0.0 }
 0x4f5   : > { %v6807_v29 = vpack.c.bf16 %v6587_v41, %v6583_v13  ;;  %v6589_v21 = vmax.f32 %v6333_v43, 0.0  ;;  %v5296_v60 = vpop.f32.mrb[228].mxu0 }
 0x4f6   : > { %v6808_v27 = vpack.c.bf16 %v6588_v44, %v6584_v0  ;;  %v6334_v45 = vadd.f32 %v6035_v10, %v5296_v60  ;;  %v5298_v3 = vpop.f32.mrb[229].mxu0 }
 0x4f7   : > { %v6809_v63 = vpack.c.bf16 %v6589_v21, %v6585_v57  ;;  %v5649_v9 = vpop.f32.mrb[228].mxu1  ;;  %v6335_v24 = vadd.f32 %v6035_v10, %v5298_v3  ;;  %v5300_v18 = vpop.f32.mrb[230].mxu0  ;;  %7026 = vmatprep.subr.bf16.mxu0 %v6807_v29 }
 0x4f8   : > { %v6336_v26 = vadd.f32 %v6035_v10, %v5649_v9  ;;  %v5651_v61 = vpop.f32.mrb[229].mxu1  ;;  %v6338_v37 = vadd.f32 %v6040_v53, %v5300_v18  ;;  %v5302_v8 = vpop.f32.mrb[231].mxu0  ;;  %7027 = vmatpush1.bf16.msra.mxu0 %v6806_v22  ;;  %v6590_v38 = vmax.f32 %v6334_v45, 0.0 }
 0x4f9   : > { %v6337_v48 = vadd.f32 %v6035_v10, %v5651_v61  ;;  %v5653_v17 = vpop.f32.mrb[230].mxu1  ;;  %7152 = vmatprep.subr.bf16.mxu1 %v6809_v63  ;;  %v6339_v28 = vadd.f32 %v6040_v53, %v5302_v8  ;;  %v6591_v7 = vmax.f32 %v6335_v24, 0.0  ;;  %v6055_v18 = vpop.permute.xlu0 %6054 }
 0x4fa   : > { %v6594_v34 = vmax.f32 %v6338_v37, 0.0  ;;  %v6340_v35 = vadd.f32 %v6040_v53, %v5653_v17  ;;  %v5655_v31 = vpop.f32.mrb[231].mxu1  ;;  %7153 = vmatpush1.bf16.msra.mxu1 %v6808_v27  ;;  %v6592_v62 = vmax.f32 %v6336_v26, 0.0 }
 0x4fb   : > { %v6595_v55 = vmax.f32 %v6339_v28, 0.0  ;;  %v6341_v1 = vadd.f32 %v6040_v53, %v5655_v31  ;;  %v6593_v2 = vmax.f32 %v6337_v48, 0.0  ;;  %v6060_v48 = vpop.permute.xlu1 %6059 }
 0x4fc   : > { %v6810_v5 = vpack.c.bf16 %v6594_v34, %v6590_v38  ;;  %v6596_v50 = vmax.f32 %v6340_v35, 0.0 }
 0x4fd   : > { %v6811_v42 = vpack.c.bf16 %v6595_v55, %v6591_v7  ;;  %v6597_v4 = vmax.f32 %v6341_v1, 0.0  ;;  %v5306_v20 = vpop.f32.mrb[232].mxu0 }
 0x4fe   : > { %v6812_v16 = vpack.c.bf16 %v6596_v50, %v6592_v62  ;;  %v6342_v36 = vadd.f32 %v6045_v59, %v5306_v20  ;;  %v5308_v15 = vpop.f32.mrb[233].mxu0 }
 0x4ff   : > { %v6813_v30 = vpack.c.bf16 %v6597_v4, %v6593_v2  ;;  %v5659_v40 = vpop.f32.mrb[232].mxu1  ;;  %v6343_v51 = vadd.f32 %v6045_v59, %v5308_v15  ;;  %v5310_v13 = vpop.f32.mrb[234].mxu0  ;;  %7028 = vmatprep.subr.bf16.mxu0 %v6811_v42 }
 0x500   : > { %v6344_v41 = vadd.f32 %v6045_v59, %v5659_v40  ;;  %v5661_v43 = vpop.f32.mrb[233].mxu1  ;;  %v6346_v0 = vadd.f32 %v6050_v47, %v5310_v13  ;;  %v5312_v22 = vpop.f32.mrb[235].mxu0  ;;  %7029 = vmatpush1.bf16.msra.mxu0 %v6810_v5  ;;  %v6598_v29 = vmax.f32 %v6342_v36, 0.0 }
 0x501   : > { %v6345_v44 = vadd.f32 %v6045_v59, %v5661_v43  ;;  %v5663_v10 = vpop.f32.mrb[234].mxu1  ;;  %7154 = vmatprep.subr.bf16.mxu1 %v6813_v30  ;;  %v6347_v57 = vadd.f32 %v6050_v47, %v5312_v22  ;;  %v6599_v27 = vmax.f32 %v6343_v51, 0.0  ;;  %v6065_v13 = vpop.permute.xlu0 %6064 }
 0x502   : > { %v6602_v21 = vmax.f32 %v6346_v0, 0.0  ;;  %v6348_v60 = vadd.f32 %v6050_v47, %v5663_v10  ;;  %v5665_v53 = vpop.f32.mrb[235].mxu1  ;;  %7155 = vmatpush1.bf16.msra.mxu1 %v6812_v16  ;;  %v6600_v63 = vmax.f32 %v6344_v41, 0.0 }
 0x503   : > { %v6603_v45 = vmax.f32 %v6347_v57, 0.0  ;;  %v6349_v3 = vadd.f32 %v6050_v47, %v5665_v53  ;;  %v6601_v26 = vmax.f32 %v6345_v44, 0.0  ;;  %v6070_v44 = vpop.permute.xlu1 %6069 }
 0x504   : > { %v6814_v9 = vpack.c.bf16 %v6602_v21, %v6598_v29  ;;  %v6604_v24 = vmax.f32 %v6348_v60, 0.0 }
 0x505   : > { %v6815_v61 = vpack.c.bf16 %v6603_v45, %v6599_v27  ;;  %v6605_v37 = vmax.f32 %v6349_v3, 0.0  ;;  %v5316_v8 = vpop.f32.mrb[236].mxu0 }
 0x506   : > { %v6816_v17 = vpack.c.bf16 %v6604_v24, %v6600_v63  ;;  %v6350_v28 = vadd.f32 %v6055_v18, %v5316_v8  ;;  %v5318_v38 = vpop.f32.mrb[237].mxu0 }
 0x507   : > { %v6817_v34 = vpack.c.bf16 %v6605_v37, %v6601_v26  ;;  %v5669_v35 = vpop.f32.mrb[236].mxu1  ;;  %v6351_v31 = vadd.f32 %v6055_v18, %v5318_v38  ;;  %v5320_v7 = vpop.f32.mrb[238].mxu0  ;;  %7030 = vmatprep.subr.bf16.mxu0 %v6815_v61 }
 0x508   : > { %v6352_v55 = vadd.f32 %v6055_v18, %v5669_v35  ;;  %v5671_v1 = vpop.f32.mrb[237].mxu1  ;;  %v6354_v62 = vadd.f32 %v6060_v48, %v5320_v7  ;;  %v5322_v5 = vpop.f32.mrb[239].mxu0  ;;  %7031 = vmatpush1.bf16.msra.mxu0 %v6814_v9  ;;  %v6606_v42 = vmax.f32 %v6350_v28, 0.0 }
 0x509   : > { %v6353_v50 = vadd.f32 %v6055_v18, %v5671_v1  ;;  %v5673_v59 = vpop.f32.mrb[238].mxu1  ;;  %7156 = vmatprep.subr.bf16.mxu1 %v6817_v34  ;;  %v6355_v2 = vadd.f32 %v6060_v48, %v5322_v5  ;;  %v6607_v16 = vmax.f32 %v6351_v31, 0.0  ;;  %v6075_v7 = vpop.permute.xlu0 %6074 }
 0x50a   : > { %v6610_v4 = vmax.f32 %v6354_v62, 0.0  ;;  %v6356_v20 = vadd.f32 %v6060_v48, %v5673_v59  ;;  %v5675_v47 = vpop.f32.mrb[239].mxu1  ;;  %7157 = vmatpush1.bf16.msra.mxu1 %v6816_v17  ;;  %v6608_v30 = vmax.f32 %v6352_v55, 0.0 }
 0x50b   : > { %v6611_v36 = vmax.f32 %v6355_v2, 0.0  ;;  %v6357_v15 = vadd.f32 %v6060_v48, %v5675_v47  ;;  %v6609_v41 = vmax.f32 %v6353_v50, 0.0  ;;  %v6080_v50 = vpop.permute.xlu1 %6079 }
 0x50c   : > { %v6818_v40 = vpack.c.bf16 %v6610_v4, %v6606_v42  ;;  %v6612_v51 = vmax.f32 %v6356_v20, 0.0 }
 0x50d   : > { %v6819_v43 = vpack.c.bf16 %v6611_v36, %v6607_v16  ;;  %v6613_v0 = vmax.f32 %v6357_v15, 0.0  ;;  %v5326_v22 = vpop.f32.mrb[240].mxu0 }
 0x50e   : > { %v6820_v10 = vpack.c.bf16 %v6612_v51, %v6608_v30  ;;  %v6358_v57 = vadd.f32 %v6065_v13, %v5326_v22  ;;  %v5328_v29 = vpop.f32.mrb[241].mxu0 }
 0x50f   : > { %v6821_v21 = vpack.c.bf16 %v6613_v0, %v6609_v41  ;;  %v5679_v60 = vpop.f32.mrb[240].mxu1  ;;  %v6359_v53 = vadd.f32 %v6065_v13, %v5328_v29  ;;  %v5330_v27 = vpop.f32.mrb[242].mxu0  ;;  %7032 = vmatprep.subr.bf16.mxu0 %v6819_v43 }
 0x510   : > { %v6360_v45 = vadd.f32 %v6065_v13, %v5679_v60  ;;  %v5681_v3 = vpop.f32.mrb[241].mxu1  ;;  %v6362_v63 = vadd.f32 %v6070_v44, %v5330_v27  ;;  %v5332_v9 = vpop.f32.mrb[243].mxu0  ;;  %7033 = vmatpush1.bf16.msra.mxu0 %v6818_v40  ;;  %v6614_v61 = vmax.f32 %v6358_v57, 0.0 }
 0x511   : > { %v6361_v24 = vadd.f32 %v6065_v13, %v5681_v3  ;;  %v5683_v18 = vpop.f32.mrb[242].mxu1  ;;  %7158 = vmatprep.subr.bf16.mxu1 %v6821_v21  ;;  %v6363_v26 = vadd.f32 %v6070_v44, %v5332_v9  ;;  %v6615_v17 = vmax.f32 %v6359_v53, 0.0  ;;  %v6085_v27 = vpop.permute.xlu0 %6084 }
 0x512   : > { %v6618_v37 = vmax.f32 %v6362_v63, 0.0  ;;  %v6364_v8 = vadd.f32 %v6070_v44, %v5683_v18  ;;  %v5685_v48 = vpop.f32.mrb[243].mxu1  ;;  %7159 = vmatpush1.bf16.msra.mxu1 %v6820_v10  ;;  %v6616_v34 = vmax.f32 %v6360_v45, 0.0 }
 0x513   : > { %v6619_v28 = vmax.f32 %v6363_v26, 0.0  ;;  %v6365_v38 = vadd.f32 %v6070_v44, %v5685_v48  ;;  %v6617_v55 = vmax.f32 %v6361_v24, 0.0  ;;  %v6090_v24 = vpop.permute.xlu1 %6089 }
 0x514   : > { %v6822_v35 = vpack.c.bf16 %v6618_v37, %v6614_v61  ;;  %v6620_v31 = vmax.f32 %v6364_v8, 0.0 }
 0x515   : > { %v6823_v1 = vpack.c.bf16 %v6619_v28, %v6615_v17  ;;  %v6621_v62 = vmax.f32 %v6365_v38, 0.0  ;;  %v5336_v5 = vpop.f32.mrb[244].mxu0 }
 0x516   : > { %v6824_v59 = vpack.c.bf16 %v6620_v31, %v6616_v34  ;;  %v6366_v2 = vadd.f32 %v6075_v7, %v5336_v5  ;;  %v5338_v42 = vpop.f32.mrb[245].mxu0 }
 0x517   : > { %v6825_v4 = vpack.c.bf16 %v6621_v62, %v6617_v55  ;;  %v5689_v20 = vpop.f32.mrb[244].mxu1  ;;  %v6367_v47 = vadd.f32 %v6075_v7, %v5338_v42  ;;  %v5340_v16 = vpop.f32.mrb[246].mxu0  ;;  %7034 = vmatprep.subr.bf16.mxu0 %v6823_v1 }
 0x518   : > { %v6368_v36 = vadd.f32 %v6075_v7, %v5689_v20  ;;  %v5691_v15 = vpop.f32.mrb[245].mxu1  ;;  %v6370_v30 = vadd.f32 %v6080_v50, %v5340_v16  ;;  %v5342_v40 = vpop.f32.mrb[247].mxu0  ;;  %7035 = vmatpush1.bf16.msra.mxu0 %v6822_v35  ;;  %v6622_v43 = vmax.f32 %v6366_v2, 0.0 }
 0x519   : > { %v6369_v51 = vadd.f32 %v6075_v7, %v5691_v15  ;;  %v5693_v13 = vpop.f32.mrb[246].mxu1  ;;  %7160 = vmatprep.subr.bf16.mxu1 %v6825_v4  ;;  %v6371_v41 = vadd.f32 %v6080_v50, %v5342_v40  ;;  %v6623_v10 = vmax.f32 %v6367_v47, 0.0  ;;  %v6095_v16 = vpop.permute.xlu0 %6094 }
 0x51a   : > { %v6626_v0 = vmax.f32 %v6370_v30, 0.0  ;;  %v6372_v22 = vadd.f32 %v6080_v50, %v5693_v13  ;;  %v5695_v44 = vpop.f32.mrb[247].mxu1  ;;  %7161 = vmatpush1.bf16.msra.mxu1 %v6824_v59  ;;  %v6624_v21 = vmax.f32 %v6368_v36, 0.0 }
 0x51b   : > { %v6627_v57 = vmax.f32 %v6371_v41, 0.0  ;;  %v6373_v29 = vadd.f32 %v6080_v50, %v5695_v44  ;;  %v6625_v45 = vmax.f32 %v6369_v51, 0.0  ;;  %v6100_v51 = vpop.permute.xlu1 %6099 }
 0x51c   : > { %v6826_v60 = vpack.c.bf16 %v6626_v0, %v6622_v43  ;;  %v6628_v53 = vmax.f32 %v6372_v22, 0.0 }
 0x51d   : > { %v6827_v3 = vpack.c.bf16 %v6627_v57, %v6623_v10  ;;  %v6629_v63 = vmax.f32 %v6373_v29, 0.0  ;;  %v5346_v9 = vpop.f32.mrb[248].mxu0 }
 0x51e   : > { %v6828_v18 = vpack.c.bf16 %v6628_v53, %v6624_v21  ;;  %v6374_v26 = vadd.f32 %v6085_v27, %v5346_v9  ;;  %v5348_v61 = vpop.f32.mrb[249].mxu0 }
 0x51f   : > { %v6829_v37 = vpack.c.bf16 %v6629_v63, %v6625_v45  ;;  %v5699_v8 = vpop.f32.mrb[248].mxu1  ;;  %v6375_v48 = vadd.f32 %v6085_v27, %v5348_v61  ;;  %v5350_v17 = vpop.f32.mrb[250].mxu0  ;;  %7036 = vmatprep.subr.bf16.mxu0 %v6827_v3 }
 0x520   : > { %v6376_v28 = vadd.f32 %v6085_v27, %v5699_v8  ;;  %v5701_v38 = vpop.f32.mrb[249].mxu1  ;;  %v6378_v34 = vadd.f32 %v6090_v24, %v5350_v17  ;;  %v5352_v35 = vpop.f32.mrb[251].mxu0  ;;  %7037 = vmatpush1.bf16.msra.mxu0 %v6826_v60  ;;  %v6630_v1 = vmax.f32 %v6374_v26, 0.0 }
 0x521   : > { %v6377_v31 = vadd.f32 %v6085_v27, %v5701_v38  ;;  %v5703_v7 = vpop.f32.mrb[250].mxu1  ;;  %7162 = vmatprep.subr.bf16.mxu1 %v6829_v37  ;;  %v6379_v55 = vadd.f32 %v6090_v24, %v5352_v35  ;;  %v6631_v59 = vmax.f32 %v6375_v48, 0.0  ;;  %v6105_v17 = vpop.permute.xlu0 %6104 }
 0x522   : > { %v6634_v62 = vmax.f32 %v6378_v34, 0.0  ;;  %v6380_v5 = vadd.f32 %v6090_v24, %v5703_v7  ;;  %v5705_v50 = vpop.f32.mrb[251].mxu1  ;;  %7163 = vmatpush1.bf16.msra.mxu1 %v6828_v18  ;;  %v6632_v4 = vmax.f32 %v6376_v28, 0.0 }
 0x523   : > { %v6635_v2 = vmax.f32 %v6379_v55, 0.0  ;;  %v6381_v42 = vadd.f32 %v6090_v24, %v5705_v50  ;;  %v6633_v36 = vmax.f32 %v6377_v31, 0.0  ;;  %v6110_v31 = vpop.permute.xlu1 %6109 }
 0x524   : > { %v6830_v20 = vpack.c.bf16 %v6634_v62, %v6630_v1  ;;  %v6636_v47 = vmax.f32 %v6380_v5, 0.0 }
 0x525   : > { %v6831_v15 = vpack.c.bf16 %v6635_v2, %v6631_v59  ;;  %v6637_v30 = vmax.f32 %v6381_v42, 0.0  ;;  %v5356_v40 = vpop.f32.mrb[252].mxu0  ;;  %v9190_v2 = vld [vmem:[%s12256_s8] ss:$16 sps:$4 sm:$0xff]  }
 0x526   : > { %v6832_v13 = vpack.c.bf16 %v6636_v47, %v6632_v4  ;;  %v6382_v41 = vadd.f32 %v6095_v16, %v5356_v40  ;;  %v5358_v43 = vpop.f32.mrb[253].mxu0 }
 0x527   : > { %v6833_v0 = vpack.c.bf16 %v6637_v30, %v6633_v36  ;;  %v5709_v22 = vpop.f32.mrb[252].mxu1  ;;  %v6383_v44 = vadd.f32 %v6095_v16, %v5358_v43  ;;  %v5360_v10 = vpop.f32.mrb[254].mxu0  ;;  %7038 = vmatprep.subr.bf16.mxu0 %v6831_v15 }
 0x528   : > { %v6384_v57 = vadd.f32 %v6095_v16, %v5709_v22  ;;  %v5711_v29 = vpop.f32.mrb[253].mxu1  ;;  %v6386_v21 = vadd.f32 %v6100_v51, %v5360_v10  ;;  %v5362_v60 = vpop.f32.mrb[255].mxu0  ;;  %7039 = vmatpush1.bf16.msra.mxu0 %v6830_v20  ;;  %v6638_v3 = vmax.f32 %v6382_v41, 0.0 }
 0x529   : > { %v6385_v53 = vadd.f32 %v6095_v16, %v5711_v29  ;;  %v5713_v27 = vpop.f32.mrb[254].mxu1  ;;  %7164 = vmatprep.subr.bf16.mxu1 %v6833_v0  ;;  %v6387_v45 = vadd.f32 %v6100_v51, %v5362_v60  ;;  %v6639_v18 = vmax.f32 %v6383_v44, 0.0  ;;  %v9195_v16 = vld [vmem:[%s12256_s8 + $0x24] ss:$16 sps:$4 sm:$0xff]   ;;  %v6115_v29 = vpop.permute.xlu0 %6114 }
 0x52a   : > { %v6642_v63 = vmax.f32 %v6386_v21, 0.0  ;;  %v6388_v9 = vadd.f32 %v6100_v51, %v5713_v27  ;;  %v5715_v24 = vpop.f32.mrb[255].mxu1  ;;  %7165 = vmatpush1.bf16.msra.mxu1 %v6832_v13  ;;  %v6640_v37 = vmax.f32 %v6384_v57, 0.0 }
 0x52b   : > { %v6643_v26 = vmax.f32 %v6387_v45, 0.0  ;;  %v6389_v61 = vadd.f32 %v6100_v51, %v5715_v24  ;;  %v6641_v28 = vmax.f32 %v6385_v53, 0.0  ;;  %v6120_v45 = vpop.permute.xlu1 %6119 }
 0x52c   : > { %v6834_v8 = vpack.c.bf16 %v6642_v63, %v6638_v3  ;;  %v6644_v48 = vmax.f32 %v6388_v9, 0.0 }
 0x52d   : > { %v6835_v38 = vpack.c.bf16 %v6643_v26, %v6639_v18  ;;  %v6645_v34 = vmax.f32 %v6389_v61, 0.0  ;;  %v5366_v35 = vpop.f32.mrb[0].mxu0 }
 0x52e   : > { %v6836_v7 = vpack.c.bf16 %v6644_v48, %v6640_v37  ;;  %v6390_v55 = vadd.f32 %v6105_v17, %v5366_v35  ;;  %v5368_v1 = vpop.f32.mrb[1].mxu0  ;;  %v9193_v37 = vld [vmem:[%s12256_s8 + $0x20] ss:$16 sps:$4 sm:$0xff]  }
 0x52f   : > { %v6837_v62 = vpack.c.bf16 %v6645_v34, %v6641_v28  ;;  %v5719_v5 = vpop.f32.mrb[0].mxu1  ;;  %v6391_v50 = vadd.f32 %v6105_v17, %v5368_v1  ;;  %v5370_v59 = vpop.f32.mrb[2].mxu0  ;;  %7040 = vmatprep.subr.bf16.mxu0 %v6835_v38  ;;  %v9198_v38 = vld [vmem:[%s12256_s8 + $0x44] ss:$16 sps:$4 sm:$0xff]  }
 0x530   : > { %v6392_v42 = vadd.f32 %v6105_v17, %v5719_v5  ;;  %v5721_v4 = vpop.f32.mrb[1].mxu1  ;;  %v6394_v20 = vadd.f32 %v6110_v31, %v5370_v59  ;;  %v5372_v47 = vpop.f32.mrb[3].mxu0  ;;  %7041 = vmatpush1.bf16.msra.mxu0 %v6834_v8  ;;  %v6646_v40 = vmax.f32 %v6390_v55, 0.0 }
 0x531   : > { %v6393_v36 = vadd.f32 %v6105_v17, %v5721_v4  ;;  %v5723_v15 = vpop.f32.mrb[2].mxu1  ;;  %7166 = vmatprep.subr.bf16.mxu1 %v6837_v62  ;;  %v6395_v30 = vadd.f32 %v6110_v31, %v5372_v47  ;;  %v6647_v43 = vmax.f32 %v6391_v50, 0.0 }
 0x532   : > { %v6650_v51 = vmax.f32 %v6394_v20, 0.0  ;;  %v6396_v13 = vadd.f32 %v6110_v31, %v5723_v15  ;;  %v5725_v41 = vpop.f32.mrb[3].mxu1  ;;  %7167 = vmatpush1.bf16.msra.mxu1 %v6836_v7  ;;  %v6648_v44 = vmax.f32 %v6392_v42, 0.0  ;;  %v6125_v20 = vpop.permute.xlu0 %6124 }
 0x533   : > { %v6651_v0 = vmax.f32 %v6395_v30, 0.0  ;;  %v6397_v22 = vadd.f32 %v6110_v31, %v5725_v41  ;;  %7043 = vmatmul.mubr.bf16.vlgmr.msra.gmra.mrb[64].mxu0 %v9190_v2  ;;  %v6649_v21 = vmax.f32 %v6393_v36, 0.0  ;;  %v6130_v30 = vpop.permute.xlu1 %6129 }
 0x534   : > { %v6838_v10 = vpack.c.bf16 %v6650_v51, %v6646_v40  ;;  %v6652_v57 = vmax.f32 %v6396_v13, 0.0  ;;  %7052 = vmatprep.mubr.bf16.mxu0 %v9195_v16 }
 0x535   : > { %v6839_v60 = vpack.c.bf16 %v6651_v0, %v6647_v43  ;;  %v6653_v53 = vmax.f32 %v6397_v22, 0.0  ;;  %v5376_v27 = vpop.f32.mrb[4].mxu0  ;;  %7169 = vmatmul.mubr.bf16.vlgmr.msra.gmra.mrb[64].mxu1 %v9190_v2 }
 0x536   : > { %v6840_v3 = vpack.c.bf16 %v6652_v57, %v6648_v44  ;;  %v6398_v63 = vadd.f32 %v6115_v29, %v5376_v27  ;;  %v5378_v9 = vpop.f32.mrb[5].mxu0  ;;  %7178 = vmatprep.mubr.bf16.mxu1 %v9195_v16  ;;  %v9196_v44 = vld [vmem:[%s12256_s8 + $0x40] ss:$16 sps:$4 sm:$0xff]  }
 0x537   : > { %v6841_v24 = vpack.c.bf16 %v6653_v53, %v6649_v21  ;;  %v5729_v18 = vpop.f32.mrb[4].mxu1  ;;  %v6399_v26 = vadd.f32 %v6115_v29, %v5378_v9  ;;  %v5380_v61 = vpop.f32.mrb[6].mxu0  ;;  %7073 = vmatprep.subr.bf16.mxu0 %v6839_v60  ;;  %v9201_v60 = vld [vmem:[%s12256_s8 + $0xc] ss:$16 sps:$4 sm:$0xff]  }
 0x538   : > { %v6400_v8 = vadd.f32 %v6115_v29, %v5729_v18  ;;  %v5731_v48 = vpop.f32.mrb[5].mxu1  ;;  %v6402_v17 = vadd.f32 %v6120_v45, %v5380_v61  ;;  %v5382_v28 = vpop.f32.mrb[7].mxu0  ;;  %7074 = vmatpush1.bf16.msra.mxu0 %v6838_v10  ;;  %v6654_v7 = vmax.f32 %v6398_v63, 0.0 }
 0x539   : > { %v6401_v34 = vadd.f32 %v6115_v29, %v5731_v48  ;;  %v5733_v35 = vpop.f32.mrb[6].mxu1  ;;  %7199 = vmatprep.subr.bf16.mxu1 %v6841_v24  ;;  %v6403_v31 = vadd.f32 %v6120_v45, %v5382_v28  ;;  %v6655_v5 = vmax.f32 %v6399_v26, 0.0 }
 0x53a   : > { %v6658_v55 = vmax.f32 %v6402_v17, 0.0  ;;  %v6404_v1 = vadd.f32 %v6120_v45, %v5733_v35  ;;  %v5735_v62 = vpop.f32.mrb[7].mxu1  ;;  %7200 = vmatpush1.bf16.msra.mxu1 %v6840_v3  ;;  %v6656_v2 = vmax.f32 %v6400_v8, 0.0  ;;  %v6135_v17 = vpop.permute.xlu0 %6134 }
 0x53b   : > { %v6659_v50 = vmax.f32 %v6403_v31, 0.0  ;;  %v6405_v59 = vadd.f32 %v6120_v45, %v5735_v62  ;;  %7053 = vmatmul.mubr.bf16.gmra.mrb[68].mxu0 %v9193_v37  ;;  %v6657_v47 = vmax.f32 %v6401_v34, 0.0  ;;  %v6140_v31 = vpop.permute.xlu1 %6139 }
 0x53c   : > { %v6842_v42 = vpack.c.bf16 %v6658_v55, %v6654_v7  ;;  %v6660_v4 = vmax.f32 %v6404_v1, 0.0  ;;  %7062 = vmatprep.mubr.bf16.mxu0 %v9198_v38 }
 0x53d   : > { %v6843_v16 = vpack.c.bf16 %v6659_v50, %v6655_v5  ;;  %v6661_v36 = vmax.f32 %v6405_v59, 0.0  ;;  %v5386_v15 = vpop.f32.mrb[8].mxu0  ;;  %7179 = vmatmul.mubr.bf16.gmra.mrb[68].mxu1 %v9193_v37 }
 0x53e   : > { %v6844_v40 = vpack.c.bf16 %v6660_v4, %v6656_v2  ;;  %v6406_v51 = vadd.f32 %v6125_v20, %v5386_v15  ;;  %v5388_v13 = vpop.f32.mrb[9].mxu0  ;;  %7188 = vmatprep.mubr.bf16.mxu1 %v9198_v38 }
 0x53f   : > { %v6845_v41 = vpack.c.bf16 %v6661_v36, %v6657_v47  ;;  %v5739_v43 = vpop.f32.mrb[8].mxu1  ;;  %v6407_v0 = vadd.f32 %v6125_v20, %v5388_v13  ;;  %v5390_v22 = vpop.f32.mrb[10].mxu0  ;;  %7075 = vmatprep.subr.bf16.mxu0 %v6843_v16 }
 0x540   : > { %v6408_v10 = vadd.f32 %v6125_v20, %v5739_v43  ;;  %v5741_v57 = vpop.f32.mrb[9].mxu1  ;;  %v6410_v29 = vadd.f32 %v6130_v30, %v5390_v22  ;;  %v5392_v21 = vpop.f32.mrb[11].mxu0  ;;  %7076 = vmatpush1.bf16.msra.mxu0 %v6842_v42  ;;  %v6662_v3 = vmax.f32 %v6406_v51, 0.0 }
 0x541   : > { %v6409_v53 = vadd.f32 %v6125_v20, %v5741_v57  ;;  %v5743_v27 = vpop.f32.mrb[10].mxu1  ;;  %7201 = vmatprep.subr.bf16.mxu1 %v6845_v41  ;;  %v6411_v45 = vadd.f32 %v6130_v30, %v5392_v21  ;;  %v6663_v18 = vmax.f32 %v6407_v0, 0.0 }
 0x542   : > { %v6666_v63 = vmax.f32 %v6410_v29, 0.0  ;;  %v6412_v9 = vadd.f32 %v6130_v30, %v5743_v27  ;;  %v5745_v24 = vpop.f32.mrb[11].mxu1  ;;  %7202 = vmatpush1.bf16.msra.mxu1 %v6844_v40  ;;  %v6664_v37 = vmax.f32 %v6408_v10, 0.0  ;;  %v6145_v10 = vpop.permute.xlu0 %6144 }
 0x543   : > { %v6667_v26 = vmax.f32 %v6411_v45, 0.0  ;;  %v6413_v61 = vadd.f32 %v6130_v30, %v5745_v24  ;;  %7063 = vmatmul.mubr.bf16.gmra.mrb[72].mxu0 %v9196_v44  ;;  %v6665_v28 = vmax.f32 %v6409_v53, 0.0  ;;  %v6150_v53 = vpop.permute.xlu1 %6149 }
 0x544   : > { %v6846_v8 = vpack.c.bf16 %v6666_v63, %v6662_v3  ;;  %v6668_v48 = vmax.f32 %v6412_v9, 0.0  ;;  %7105 = vmatprep.mubr.bf16.mxu0 %v9201_v60 }
 0x545   : > { %v6847_v38 = vpack.c.bf16 %v6667_v26, %v6663_v18  ;;  %v6669_v34 = vmax.f32 %v6413_v61, 0.0  ;;  %v5396_v35 = vpop.f32.mrb[12].mxu0  ;;  %7189 = vmatmul.mubr.bf16.gmra.mrb[72].mxu1 %v9196_v44 }
 0x546   : > { %v6848_v7 = vpack.c.bf16 %v6668_v48, %v6664_v37  ;;  %v6414_v55 = vadd.f32 %v6135_v17, %v5396_v35  ;;  %v5398_v1 = vpop.f32.mrb[13].mxu0  ;;  %7231 = vmatprep.mubr.bf16.mxu1 %v9201_v60 }
 0x547   : > { %v6849_v62 = vpack.c.bf16 %v6669_v34, %v6665_v28  ;;  %v5749_v5 = vpop.f32.mrb[12].mxu1  ;;  %v6415_v50 = vadd.f32 %v6135_v17, %v5398_v1  ;;  %v5400_v59 = vpop.f32.mrb[14].mxu0  ;;  %7077 = vmatprep.subr.bf16.mxu0 %v6847_v38 }
 0x548   : > { %v6416_v2 = vadd.f32 %v6135_v17, %v5749_v5  ;;  %v5751_v42 = vpop.f32.mrb[13].mxu1  ;;  %v6418_v4 = vadd.f32 %v6140_v31, %v5400_v59  ;;  %v5402_v20 = vpop.f32.mrb[15].mxu0  ;;  %7078 = vmatpush1.bf16.msra.mxu0 %v6846_v8  ;;  %v6670_v15 = vmax.f32 %v6414_v55, 0.0 }
 0x549   : > { %v6417_v47 = vadd.f32 %v6135_v17, %v5751_v42  ;;  %v5753_v16 = vpop.f32.mrb[14].mxu1  ;;  %7203 = vmatprep.subr.bf16.mxu1 %v6849_v62  ;;  %v6419_v36 = vadd.f32 %v6140_v31, %v5402_v20  ;;  %v6671_v13 = vmax.f32 %v6415_v50, 0.0  ;;  %v6155_v59 = vpop.permute.xlu0 %6154 }
 0x54a   : > { %v6674_v30 = vmax.f32 %v6418_v4, 0.0  ;;  %v6420_v40 = vadd.f32 %v6140_v31, %v5753_v16  ;;  %v5755_v51 = vpop.f32.mrb[15].mxu1  ;;  %7204 = vmatpush1.bf16.msra.mxu1 %v6848_v7  ;;  %v6672_v0 = vmax.f32 %v6416_v2, 0.0 }
 0x54b   : > { %v6675_v41 = vmax.f32 %v6419_v36, 0.0  ;;  %v6421_v43 = vadd.f32 %v6140_v31, %v5755_v51  ;;  %v6673_v57 = vmax.f32 %v6417_v47, 0.0  ;;  %v6160_v47 = vpop.permute.xlu1 %6159 }
 0x54c   : > { %v6850_v22 = vpack.c.bf16 %v6674_v30, %v6670_v15  ;;  %v6676_v44 = vmax.f32 %v6420_v40, 0.0 }
 0x54d   : > { %v6851_v29 = vpack.c.bf16 %v6675_v41, %v6671_v13  ;;  %v6677_v21 = vmax.f32 %v6421_v43, 0.0  ;;  %v5406_v60 = vpop.f32.mrb[16].mxu0 }
 0x54e   : > { %v6852_v27 = vpack.c.bf16 %v6676_v44, %v6672_v0  ;;  %v6422_v45 = vadd.f32 %v6145_v10, %v5406_v60  ;;  %v5408_v3 = vpop.f32.mrb[17].mxu0 }
 0x54f   : > { %v6853_v63 = vpack.c.bf16 %v6677_v21, %v6673_v57  ;;  %v5759_v9 = vpop.f32.mrb[16].mxu1  ;;  %v6423_v24 = vadd.f32 %v6145_v10, %v5408_v3  ;;  %v5410_v18 = vpop.f32.mrb[18].mxu0  ;;  %7079 = vmatprep.subr.bf16.mxu0 %v6851_v29 }
 0x550   : > { %v6424_v26 = vadd.f32 %v6145_v10, %v5759_v9  ;;  %v5761_v61 = vpop.f32.mrb[17].mxu1  ;;  %v6426_v37 = vadd.f32 %v6150_v53, %v5410_v18  ;;  %v5412_v8 = vpop.f32.mrb[19].mxu0  ;;  %7080 = vmatpush1.bf16.msra.mxu0 %v6850_v22  ;;  %v6678_v38 = vmax.f32 %v6422_v45, 0.0 }
 0x551   : > { %v6425_v48 = vadd.f32 %v6145_v10, %v5761_v61  ;;  %v5763_v17 = vpop.f32.mrb[18].mxu1  ;;  %7205 = vmatprep.subr.bf16.mxu1 %v6853_v63  ;;  %v6427_v28 = vadd.f32 %v6150_v53, %v5412_v8  ;;  %v6679_v7 = vmax.f32 %v6423_v24, 0.0  ;;  %v6165_v18 = vpop.permute.xlu0 %6164 }
 0x552   : > { %v6682_v34 = vmax.f32 %v6426_v37, 0.0  ;;  %v6428_v35 = vadd.f32 %v6150_v53, %v5763_v17  ;;  %v5765_v31 = vpop.f32.mrb[19].mxu1  ;;  %7206 = vmatpush1.bf16.msra.mxu1 %v6852_v27  ;;  %v6680_v62 = vmax.f32 %v6424_v26, 0.0 }
 0x553   : > { %v6683_v55 = vmax.f32 %v6427_v28, 0.0  ;;  %v6429_v1 = vadd.f32 %v6150_v53, %v5765_v31  ;;  %v6681_v2 = vmax.f32 %v6425_v48, 0.0  ;;  %v6170_v48 = vpop.permute.xlu1 %6169 }
 0x554   : > { %v6854_v5 = vpack.c.bf16 %v6682_v34, %v6678_v38  ;;  %v6684_v50 = vmax.f32 %v6428_v35, 0.0 }
 0x555   : > { %v6855_v42 = vpack.c.bf16 %v6683_v55, %v6679_v7  ;;  %v6685_v4 = vmax.f32 %v6429_v1, 0.0  ;;  %v5416_v20 = vpop.f32.mrb[20].mxu0 }
 0x556   : > { %v6856_v16 = vpack.c.bf16 %v6684_v50, %v6680_v62  ;;  %v6430_v36 = vadd.f32 %v6155_v59, %v5416_v20  ;;  %v5418_v15 = vpop.f32.mrb[21].mxu0 }
 0x557   : > { %v6857_v30 = vpack.c.bf16 %v6685_v4, %v6681_v2  ;;  %v5769_v40 = vpop.f32.mrb[20].mxu1  ;;  %v6431_v51 = vadd.f32 %v6155_v59, %v5418_v15  ;;  %v5420_v13 = vpop.f32.mrb[22].mxu0  ;;  %7081 = vmatprep.subr.bf16.mxu0 %v6855_v42 }
 0x558   : > { %v6432_v41 = vadd.f32 %v6155_v59, %v5769_v40  ;;  %v5771_v43 = vpop.f32.mrb[21].mxu1  ;;  %v6434_v0 = vadd.f32 %v6160_v47, %v5420_v13  ;;  %v5422_v22 = vpop.f32.mrb[23].mxu0  ;;  %7082 = vmatpush1.bf16.msra.mxu0 %v6854_v5  ;;  %v6686_v29 = vmax.f32 %v6430_v36, 0.0 }
 0x559   : > { %v6433_v44 = vadd.f32 %v6155_v59, %v5771_v43  ;;  %v5773_v10 = vpop.f32.mrb[22].mxu1  ;;  %7207 = vmatprep.subr.bf16.mxu1 %v6857_v30  ;;  %v6435_v57 = vadd.f32 %v6160_v47, %v5422_v22  ;;  %v6687_v27 = vmax.f32 %v6431_v51, 0.0  ;;  %v6175_v13 = vpop.permute.xlu0 %6174 }
 0x55a   : > { %v6690_v21 = vmax.f32 %v6434_v0, 0.0  ;;  %v6436_v60 = vadd.f32 %v6160_v47, %v5773_v10  ;;  %v5775_v53 = vpop.f32.mrb[23].mxu1  ;;  %7208 = vmatpush1.bf16.msra.mxu1 %v6856_v16  ;;  %v6688_v63 = vmax.f32 %v6432_v41, 0.0 }
 0x55b   : > { %v6691_v45 = vmax.f32 %v6435_v57, 0.0  ;;  %v6437_v3 = vadd.f32 %v6160_v47, %v5775_v53  ;;  %v6689_v26 = vmax.f32 %v6433_v44, 0.0  ;;  %v6180_v44 = vpop.permute.xlu1 %6179 }
 0x55c   : > { %v6858_v9 = vpack.c.bf16 %v6690_v21, %v6686_v29  ;;  %v6692_v24 = vmax.f32 %v6436_v60, 0.0 }
 0x55d   : > { %v6859_v61 = vpack.c.bf16 %v6691_v45, %v6687_v27  ;;  %v6693_v37 = vmax.f32 %v6437_v3, 0.0  ;;  %v5426_v8 = vpop.f32.mrb[24].mxu0 }
 0x55e   : > { %v6860_v17 = vpack.c.bf16 %v6692_v24, %v6688_v63  ;;  %v6438_v28 = vadd.f32 %v6165_v18, %v5426_v8  ;;  %v5428_v38 = vpop.f32.mrb[25].mxu0 }
 0x55f   : > { %v6861_v34 = vpack.c.bf16 %v6693_v37, %v6689_v26  ;;  %v5779_v35 = vpop.f32.mrb[24].mxu1  ;;  %v6439_v31 = vadd.f32 %v6165_v18, %v5428_v38  ;;  %v5430_v7 = vpop.f32.mrb[26].mxu0  ;;  %7083 = vmatprep.subr.bf16.mxu0 %v6859_v61 }
 0x560   : > { %v6440_v55 = vadd.f32 %v6165_v18, %v5779_v35  ;;  %v5781_v1 = vpop.f32.mrb[25].mxu1  ;;  %v6442_v62 = vadd.f32 %v6170_v48, %v5430_v7  ;;  %v5432_v5 = vpop.f32.mrb[27].mxu0  ;;  %7084 = vmatpush1.bf16.msra.mxu0 %v6858_v9  ;;  %v6694_v42 = vmax.f32 %v6438_v28, 0.0 }
 0x561   : > { %v6441_v50 = vadd.f32 %v6165_v18, %v5781_v1  ;;  %v5783_v59 = vpop.f32.mrb[26].mxu1  ;;  %7209 = vmatprep.subr.bf16.mxu1 %v6861_v34  ;;  %v6443_v2 = vadd.f32 %v6170_v48, %v5432_v5  ;;  %v6695_v16 = vmax.f32 %v6439_v31, 0.0  ;;  %v6185_v7 = vpop.permute.xlu0 %6184 }
 0x562   : > { %v6698_v4 = vmax.f32 %v6442_v62, 0.0  ;;  %v6444_v20 = vadd.f32 %v6170_v48, %v5783_v59  ;;  %v5785_v47 = vpop.f32.mrb[27].mxu1  ;;  %7210 = vmatpush1.bf16.msra.mxu1 %v6860_v17  ;;  %v6696_v30 = vmax.f32 %v6440_v55, 0.0 }
 0x563   : > { %v6699_v36 = vmax.f32 %v6443_v2, 0.0  ;;  %v6445_v15 = vadd.f32 %v6170_v48, %v5785_v47  ;;  %v6697_v41 = vmax.f32 %v6441_v50, 0.0  ;;  %v6190_v50 = vpop.permute.xlu1 %6189 }
 0x564   : > { %v6862_v40 = vpack.c.bf16 %v6698_v4, %v6694_v42  ;;  %v6700_v51 = vmax.f32 %v6444_v20, 0.0 }
 0x565   : > { %v6863_v43 = vpack.c.bf16 %v6699_v36, %v6695_v16  ;;  %v6701_v0 = vmax.f32 %v6445_v15, 0.0  ;;  %v5436_v22 = vpop.f32.mrb[28].mxu0 }
 0x566   : > { %v6864_v10 = vpack.c.bf16 %v6700_v51, %v6696_v30  ;;  %v6446_v57 = vadd.f32 %v6175_v13, %v5436_v22  ;;  %v5438_v29 = vpop.f32.mrb[29].mxu0 }
 0x567   : > { %v6865_v21 = vpack.c.bf16 %v6701_v0, %v6697_v41  ;;  %v5789_v60 = vpop.f32.mrb[28].mxu1  ;;  %v6447_v53 = vadd.f32 %v6175_v13, %v5438_v29  ;;  %v5440_v27 = vpop.f32.mrb[30].mxu0  ;;  %7085 = vmatprep.subr.bf16.mxu0 %v6863_v43 }
 0x568   : > { %v6448_v45 = vadd.f32 %v6175_v13, %v5789_v60  ;;  %v5791_v3 = vpop.f32.mrb[29].mxu1  ;;  %v6450_v63 = vadd.f32 %v6180_v44, %v5440_v27  ;;  %v5442_v9 = vpop.f32.mrb[31].mxu0  ;;  %7086 = vmatpush1.bf16.msra.mxu0 %v6862_v40  ;;  %v6702_v61 = vmax.f32 %v6446_v57, 0.0 }
 0x569   : > { %v6449_v24 = vadd.f32 %v6175_v13, %v5791_v3  ;;  %v5793_v18 = vpop.f32.mrb[30].mxu1  ;;  %7211 = vmatprep.subr.bf16.mxu1 %v6865_v21  ;;  %v6451_v26 = vadd.f32 %v6180_v44, %v5442_v9  ;;  %v6703_v17 = vmax.f32 %v6447_v53, 0.0  ;;  %v6195_v27 = vpop.permute.xlu0 %6194 }
 0x56a   : > { %v6706_v37 = vmax.f32 %v6450_v63, 0.0  ;;  %v6452_v8 = vadd.f32 %v6180_v44, %v5793_v18  ;;  %v5795_v48 = vpop.f32.mrb[31].mxu1  ;;  %7212 = vmatpush1.bf16.msra.mxu1 %v6864_v10  ;;  %v6704_v34 = vmax.f32 %v6448_v45, 0.0 }
 0x56b   : > { %v6707_v28 = vmax.f32 %v6451_v26, 0.0  ;;  %v6453_v38 = vadd.f32 %v6180_v44, %v5795_v48  ;;  %v6705_v55 = vmax.f32 %v6449_v24, 0.0  ;;  %v6200_v24 = vpop.permute.xlu1 %6199 }
 0x56c   : > { %v6866_v35 = vpack.c.bf16 %v6706_v37, %v6702_v61  ;;  %v6708_v31 = vmax.f32 %v6452_v8, 0.0 }
 0x56d   : > { %v6867_v1 = vpack.c.bf16 %v6707_v28, %v6703_v17  ;;  %v6709_v62 = vmax.f32 %v6453_v38, 0.0  ;;  %v5446_v5 = vpop.f32.mrb[32].mxu0 }
 0x56e   : > { %v6868_v59 = vpack.c.bf16 %v6708_v31, %v6704_v34  ;;  %v6454_v2 = vadd.f32 %v6185_v7, %v5446_v5  ;;  %v5448_v42 = vpop.f32.mrb[33].mxu0 }
 0x56f   : > { %v6869_v4 = vpack.c.bf16 %v6709_v62, %v6705_v55  ;;  %v5799_v20 = vpop.f32.mrb[32].mxu1  ;;  %v6455_v47 = vadd.f32 %v6185_v7, %v5448_v42  ;;  %v5450_v16 = vpop.f32.mrb[34].mxu0  ;;  %7087 = vmatprep.subr.bf16.mxu0 %v6867_v1 }
 0x570   : > { %v6456_v36 = vadd.f32 %v6185_v7, %v5799_v20  ;;  %v5801_v15 = vpop.f32.mrb[33].mxu1  ;;  %v6458_v30 = vadd.f32 %v6190_v50, %v5450_v16  ;;  %v5452_v40 = vpop.f32.mrb[35].mxu0  ;;  %7088 = vmatpush1.bf16.msra.mxu0 %v6866_v35  ;;  %v6710_v43 = vmax.f32 %v6454_v2, 0.0 }
 0x571   : > { %v6457_v51 = vadd.f32 %v6185_v7, %v5801_v15  ;;  %v5803_v13 = vpop.f32.mrb[34].mxu1  ;;  %7213 = vmatprep.subr.bf16.mxu1 %v6869_v4  ;;  %v6459_v41 = vadd.f32 %v6190_v50, %v5452_v40  ;;  %v6711_v10 = vmax.f32 %v6455_v47, 0.0  ;;  %v6205_v16 = vpop.permute.xlu0 %6204 }
 0x572   : > { %v6714_v0 = vmax.f32 %v6458_v30, 0.0  ;;  %v6460_v22 = vadd.f32 %v6190_v50, %v5803_v13  ;;  %v5805_v44 = vpop.f32.mrb[35].mxu1  ;;  %7214 = vmatpush1.bf16.msra.mxu1 %v6868_v59  ;;  %v6712_v21 = vmax.f32 %v6456_v36, 0.0 }
 0x573   : > { %v6715_v57 = vmax.f32 %v6459_v41, 0.0  ;;  %v6461_v29 = vadd.f32 %v6190_v50, %v5805_v44  ;;  %v6713_v45 = vmax.f32 %v6457_v51, 0.0  ;;  %v6210_v51 = vpop.permute.xlu1 %6209 }
 0x574   : > { %v6870_v60 = vpack.c.bf16 %v6714_v0, %v6710_v43  ;;  %v6716_v53 = vmax.f32 %v6460_v22, 0.0 }
 0x575   : > { %v6871_v3 = vpack.c.bf16 %v6715_v57, %v6711_v10  ;;  %v6717_v63 = vmax.f32 %v6461_v29, 0.0  ;;  %v5456_v9 = vpop.f32.mrb[36].mxu0 }
 0x576   : > { %v6872_v18 = vpack.c.bf16 %v6716_v53, %v6712_v21  ;;  %v6462_v26 = vadd.f32 %v6195_v27, %v5456_v9  ;;  %v5458_v61 = vpop.f32.mrb[37].mxu0 }
 0x577   : > { %v6873_v37 = vpack.c.bf16 %v6717_v63, %v6713_v45  ;;  %v5809_v8 = vpop.f32.mrb[36].mxu1  ;;  %v6463_v48 = vadd.f32 %v6195_v27, %v5458_v61  ;;  %v5460_v17 = vpop.f32.mrb[38].mxu0  ;;  %7089 = vmatprep.subr.bf16.mxu0 %v6871_v3 }
 0x578   : > { %v6464_v28 = vadd.f32 %v6195_v27, %v5809_v8  ;;  %v5811_v38 = vpop.f32.mrb[37].mxu1  ;;  %v6466_v34 = vadd.f32 %v6200_v24, %v5460_v17  ;;  %v5462_v35 = vpop.f32.mrb[39].mxu0  ;;  %7090 = vmatpush1.bf16.msra.mxu0 %v6870_v60  ;;  %v6718_v1 = vmax.f32 %v6462_v26, 0.0 }
 0x579   : > { %v6465_v31 = vadd.f32 %v6195_v27, %v5811_v38  ;;  %v5813_v7 = vpop.f32.mrb[38].mxu1  ;;  %7215 = vmatprep.subr.bf16.mxu1 %v6873_v37  ;;  %v6467_v55 = vadd.f32 %v6200_v24, %v5462_v35  ;;  %v6719_v59 = vmax.f32 %v6463_v48, 0.0  ;;  %v6215_v17 = vpop.permute.xlu0 %6214 }
 0x57a   : > { %v6722_v62 = vmax.f32 %v6466_v34, 0.0  ;;  %v6468_v5 = vadd.f32 %v6200_v24, %v5813_v7  ;;  %v5815_v50 = vpop.f32.mrb[39].mxu1  ;;  %7216 = vmatpush1.bf16.msra.mxu1 %v6872_v18  ;;  %v6720_v4 = vmax.f32 %v6464_v28, 0.0 }
 0x57b   : > { %v6723_v2 = vmax.f32 %v6467_v55, 0.0  ;;  %v6469_v42 = vadd.f32 %v6200_v24, %v5815_v50  ;;  %v6721_v36 = vmax.f32 %v6465_v31, 0.0  ;;  %v6220_v31 = vpop.permute.xlu1 %6219 }
 0x57c   : > { %v6874_v20 = vpack.c.bf16 %v6722_v62, %v6718_v1  ;;  %v6724_v47 = vmax.f32 %v6468_v5, 0.0 }
 0x57d   : > { %v6875_v15 = vpack.c.bf16 %v6723_v2, %v6719_v59  ;;  %v6725_v30 = vmax.f32 %v6469_v42, 0.0  ;;  %v5466_v40 = vpop.f32.mrb[40].mxu0 }
 0x57e   : > { %v6876_v13 = vpack.c.bf16 %v6724_v47, %v6720_v4  ;;  %v6470_v41 = vadd.f32 %v6205_v16, %v5466_v40  ;;  %v5468_v43 = vpop.f32.mrb[41].mxu0 }
 0x57f   : > { %v6877_v0 = vpack.c.bf16 %v6725_v30, %v6721_v36  ;;  %v5819_v22 = vpop.f32.mrb[40].mxu1  ;;  %v6471_v44 = vadd.f32 %v6205_v16, %v5468_v43  ;;  %v5470_v10 = vpop.f32.mrb[42].mxu0  ;;  %7091 = vmatprep.subr.bf16.mxu0 %v6875_v15 }
 0x580   : > { %v6472_v57 = vadd.f32 %v6205_v16, %v5819_v22  ;;  %v5821_v29 = vpop.f32.mrb[41].mxu1  ;;  %v6474_v21 = vadd.f32 %v6210_v51, %v5470_v10  ;;  %v5472_v60 = vpop.f32.mrb[43].mxu0  ;;  %7092 = vmatpush1.bf16.msra.mxu0 %v6874_v20  ;;  %v6726_v3 = vmax.f32 %v6470_v41, 0.0 }
 0x581   : > { %v6473_v53 = vadd.f32 %v6205_v16, %v5821_v29  ;;  %v5823_v27 = vpop.f32.mrb[42].mxu1  ;;  %7217 = vmatprep.subr.bf16.mxu1 %v6877_v0  ;;  %v6475_v45 = vadd.f32 %v6210_v51, %v5472_v60  ;;  %v6727_v18 = vmax.f32 %v6471_v44, 0.0  ;;  %v6225_v10 = vpop.permute.xlu0 %6224 }
 0x582   : > { %v6730_v63 = vmax.f32 %v6474_v21, 0.0  ;;  %v6476_v9 = vadd.f32 %v6210_v51, %v5823_v27  ;;  %v5825_v24 = vpop.f32.mrb[43].mxu1  ;;  %7218 = vmatpush1.bf16.msra.mxu1 %v6876_v13  ;;  %v6728_v37 = vmax.f32 %v6472_v57, 0.0 }
 0x583   : > { %v6731_v26 = vmax.f32 %v6475_v45, 0.0  ;;  %v6477_v61 = vadd.f32 %v6210_v51, %v5825_v24  ;;  %v6729_v28 = vmax.f32 %v6473_v53, 0.0  ;;  %v6230_v53 = vpop.permute.xlu1 %6229 }
 0x584   : > { %v6878_v8 = vpack.c.bf16 %v6730_v63, %v6726_v3  ;;  %v6732_v48 = vmax.f32 %v6476_v9, 0.0 }
 0x585   : > { %v6879_v38 = vpack.c.bf16 %v6731_v26, %v6727_v18  ;;  %v6733_v34 = vmax.f32 %v6477_v61, 0.0  ;;  %v5476_v35 = vpop.f32.mrb[44].mxu0 }
 0x586   : > { %v6880_v7 = vpack.c.bf16 %v6732_v48, %v6728_v37  ;;  %v6478_v55 = vadd.f32 %v6215_v17, %v5476_v35  ;;  %v5478_v1 = vpop.f32.mrb[45].mxu0 }
 0x587   : > { %v6881_v62 = vpack.c.bf16 %v6733_v34, %v6729_v28  ;;  %v5829_v5 = vpop.f32.mrb[44].mxu1  ;;  %v6479_v50 = vadd.f32 %v6215_v17, %v5478_v1  ;;  %v5480_v59 = vpop.f32.mrb[46].mxu0  ;;  %7093 = vmatprep.subr.bf16.mxu0 %v6879_v38 }
 0x588   : > { %v6480_v2 = vadd.f32 %v6215_v17, %v5829_v5  ;;  %v5831_v42 = vpop.f32.mrb[45].mxu1  ;;  %v6482_v4 = vadd.f32 %v6220_v31, %v5480_v59  ;;  %v5482_v20 = vpop.f32.mrb[47].mxu0  ;;  %7094 = vmatpush1.bf16.msra.mxu0 %v6878_v8  ;;  %v6734_v15 = vmax.f32 %v6478_v55, 0.0 }
 0x589   : > { %v6481_v47 = vadd.f32 %v6215_v17, %v5831_v42  ;;  %v5833_v16 = vpop.f32.mrb[46].mxu1  ;;  %7219 = vmatprep.subr.bf16.mxu1 %v6881_v62  ;;  %v6483_v36 = vadd.f32 %v6220_v31, %v5482_v20  ;;  %v6735_v13 = vmax.f32 %v6479_v50, 0.0  ;;  %v6235_v59 = vpop.permute.xlu0 %6234 }
 0x58a   : > { %v6738_v30 = vmax.f32 %v6482_v4, 0.0  ;;  %v6484_v40 = vadd.f32 %v6220_v31, %v5833_v16  ;;  %v5835_v51 = vpop.f32.mrb[47].mxu1  ;;  %7220 = vmatpush1.bf16.msra.mxu1 %v6880_v7  ;;  %v6736_v0 = vmax.f32 %v6480_v2, 0.0 }
 0x58b   : > { %v6739_v41 = vmax.f32 %v6483_v36, 0.0  ;;  %v6485_v43 = vadd.f32 %v6220_v31, %v5835_v51  ;;  %v6737_v57 = vmax.f32 %v6481_v47, 0.0  ;;  %v6240_v47 = vpop.permute.xlu1 %6239 }
 0x58c   : > { %v6882_v22 = vpack.c.bf16 %v6738_v30, %v6734_v15  ;;  %v6740_v44 = vmax.f32 %v6484_v40, 0.0 }
 0x58d   : > { %v6883_v29 = vpack.c.bf16 %v6739_v41, %v6735_v13  ;;  %v6741_v21 = vmax.f32 %v6485_v43, 0.0  ;;  %v5486_v60 = vpop.f32.mrb[48].mxu0 }
 0x58e   : > { %v6884_v27 = vpack.c.bf16 %v6740_v44, %v6736_v0  ;;  %v6486_v45 = vadd.f32 %v6225_v10, %v5486_v60  ;;  %v5488_v3 = vpop.f32.mrb[49].mxu0 }
 0x58f   : > { %v6885_v63 = vpack.c.bf16 %v6741_v21, %v6737_v57  ;;  %v5839_v9 = vpop.f32.mrb[48].mxu1  ;;  %v6487_v24 = vadd.f32 %v6225_v10, %v5488_v3  ;;  %v5490_v18 = vpop.f32.mrb[50].mxu0  ;;  %7095 = vmatprep.subr.bf16.mxu0 %v6883_v29 }
 0x590   : > { %v6488_v26 = vadd.f32 %v6225_v10, %v5839_v9  ;;  %v5841_v61 = vpop.f32.mrb[49].mxu1  ;;  %v6490_v37 = vadd.f32 %v6230_v53, %v5490_v18  ;;  %v5492_v8 = vpop.f32.mrb[51].mxu0  ;;  %7096 = vmatpush1.bf16.msra.mxu0 %v6882_v22  ;;  %v6742_v38 = vmax.f32 %v6486_v45, 0.0 }
 0x591   : > { %v6489_v48 = vadd.f32 %v6225_v10, %v5841_v61  ;;  %v5843_v17 = vpop.f32.mrb[50].mxu1  ;;  %7221 = vmatprep.subr.bf16.mxu1 %v6885_v63  ;;  %v6491_v28 = vadd.f32 %v6230_v53, %v5492_v8  ;;  %v6743_v7 = vmax.f32 %v6487_v24, 0.0  ;;  %v6245_v18 = vpop.permute.xlu0 %6244 }
 0x592   : > { %v6746_v34 = vmax.f32 %v6490_v37, 0.0  ;;  %v6492_v35 = vadd.f32 %v6230_v53, %v5843_v17  ;;  %v5845_v31 = vpop.f32.mrb[51].mxu1  ;;  %7222 = vmatpush1.bf16.msra.mxu1 %v6884_v27  ;;  %v6744_v62 = vmax.f32 %v6488_v26, 0.0 }
 0x593   : > { %v6747_v55 = vmax.f32 %v6491_v28, 0.0  ;;  %v6493_v1 = vadd.f32 %v6230_v53, %v5845_v31  ;;  %v6745_v2 = vmax.f32 %v6489_v48, 0.0  ;;  %v6250_v48 = vpop.permute.xlu1 %6249 }
 0x594   : > { %v6886_v5 = vpack.c.bf16 %v6746_v34, %v6742_v38  ;;  %v6748_v50 = vmax.f32 %v6492_v35, 0.0 }
 0x595   : > { %v6887_v42 = vpack.c.bf16 %v6747_v55, %v6743_v7  ;;  %v6749_v4 = vmax.f32 %v6493_v1, 0.0  ;;  %v5496_v20 = vpop.f32.mrb[52].mxu0 }
 0x596   : > { %v6888_v16 = vpack.c.bf16 %v6748_v50, %v6744_v62  ;;  %v6494_v36 = vadd.f32 %v6235_v59, %v5496_v20  ;;  %v5498_v15 = vpop.f32.mrb[53].mxu0 }
 0x597   : > { %v6889_v30 = vpack.c.bf16 %v6749_v4, %v6745_v2  ;;  %v5849_v40 = vpop.f32.mrb[52].mxu1  ;;  %v6495_v51 = vadd.f32 %v6235_v59, %v5498_v15  ;;  %v5500_v13 = vpop.f32.mrb[54].mxu0  ;;  %7097 = vmatprep.subr.bf16.mxu0 %v6887_v42 }
 0x598   : > { %v6496_v41 = vadd.f32 %v6235_v59, %v5849_v40  ;;  %v5851_v43 = vpop.f32.mrb[53].mxu1  ;;  %v6498_v0 = vadd.f32 %v6240_v47, %v5500_v13  ;;  %v5502_v22 = vpop.f32.mrb[55].mxu0  ;;  %7098 = vmatpush1.bf16.msra.mxu0 %v6886_v5  ;;  %v6750_v29 = vmax.f32 %v6494_v36, 0.0 }
 0x599   : > { %v6497_v44 = vadd.f32 %v6235_v59, %v5851_v43  ;;  %v5853_v10 = vpop.f32.mrb[54].mxu1  ;;  %7223 = vmatprep.subr.bf16.mxu1 %v6889_v30  ;;  %v6499_v57 = vadd.f32 %v6240_v47, %v5502_v22  ;;  %v6751_v27 = vmax.f32 %v6495_v51, 0.0  ;;  %v6255_v13 = vpop.permute.xlu0 %6254 }
 0x59a   : > { %v6754_v21 = vmax.f32 %v6498_v0, 0.0  ;;  %v6500_v60 = vadd.f32 %v6240_v47, %v5853_v10  ;;  %v5855_v53 = vpop.f32.mrb[55].mxu1  ;;  %7224 = vmatpush1.bf16.msra.mxu1 %v6888_v16  ;;  %v6752_v63 = vmax.f32 %v6496_v41, 0.0 }
 0x59b   : > { %v6755_v45 = vmax.f32 %v6499_v57, 0.0  ;;  %v6501_v3 = vadd.f32 %v6240_v47, %v5855_v53  ;;  %v6753_v26 = vmax.f32 %v6497_v44, 0.0  ;;  %v6260_v44 = vpop.permute.xlu1 %6259 }
 0x59c   : > { %v6890_v9 = vpack.c.bf16 %v6754_v21, %v6750_v29  ;;  %v6756_v24 = vmax.f32 %v6500_v60, 0.0 }
 0x59d   : > { %v6891_v61 = vpack.c.bf16 %v6755_v45, %v6751_v27  ;;  %v6757_v37 = vmax.f32 %v6501_v3, 0.0  ;;  %v5506_v8 = vpop.f32.mrb[56].mxu0 }
 0x59e   : > { %v6892_v17 = vpack.c.bf16 %v6756_v24, %v6752_v63  ;;  %v6502_v28 = vadd.f32 %v6245_v18, %v5506_v8  ;;  %v5508_v38 = vpop.f32.mrb[57].mxu0 }
 0x59f   : > { %v6893_v34 = vpack.c.bf16 %v6757_v37, %v6753_v26  ;;  %v5859_v35 = vpop.f32.mrb[56].mxu1  ;;  %v6503_v31 = vadd.f32 %v6245_v18, %v5508_v38  ;;  %v5510_v7 = vpop.f32.mrb[58].mxu0  ;;  %7099 = vmatprep.subr.bf16.mxu0 %v6891_v61 }
 0x5a0   : > { %v6504_v55 = vadd.f32 %v6245_v18, %v5859_v35  ;;  %v5861_v1 = vpop.f32.mrb[57].mxu1  ;;  %v6506_v62 = vadd.f32 %v6250_v48, %v5510_v7  ;;  %v5512_v5 = vpop.f32.mrb[59].mxu0  ;;  %7100 = vmatpush1.bf16.msra.mxu0 %v6890_v9  ;;  %v6758_v42 = vmax.f32 %v6502_v28, 0.0 }
 0x5a1   : > { %v6505_v50 = vadd.f32 %v6245_v18, %v5861_v1  ;;  %v5863_v59 = vpop.f32.mrb[58].mxu1  ;;  %7225 = vmatprep.subr.bf16.mxu1 %v6893_v34  ;;  %v6507_v2 = vadd.f32 %v6250_v48, %v5512_v5  ;;  %v6759_v16 = vmax.f32 %v6503_v31, 0.0 }
 0x5a2   : > { %v6762_v4 = vmax.f32 %v6506_v62, 0.0  ;;  %v6508_v20 = vadd.f32 %v6250_v48, %v5863_v59  ;;  %v5865_v47 = vpop.f32.mrb[59].mxu1  ;;  %7226 = vmatpush1.bf16.msra.mxu1 %v6892_v17  ;;  %v6760_v30 = vmax.f32 %v6504_v55, 0.0  ;;  %v9204_v59 = vld [vmem:[%s12256_s8 + $0x2c] ss:$16 sps:$4 sm:$0xff]  }
 0x5a3   : > { %v6763_v36 = vmax.f32 %v6507_v2, 0.0  ;;  %v6509_v15 = vadd.f32 %v6250_v48, %v5865_v47  ;;  %v6761_v41 = vmax.f32 %v6505_v50, 0.0  ;;  %v9199_v50 = vld [vmem:[%s12256_s8 + $0x8] ss:$16 sps:$4 sm:$0xff]   ;;  %v6923_v47 = vpop.permute.xlu0 %6922 }
 0x5a4   : > { %v6894_v40 = vpack.c.bf16 %v6762_v4, %v6758_v42  ;;  %v6764_v51 = vmax.f32 %v6508_v20, 0.0  ;;  %v9202_v2 = vld [vmem:[%s12256_s8 + $0x28] ss:$16 sps:$4 sm:$0xff]   ;;  %v9207_v42 = vld [vmem:[%s12256_s8 + $0x4c] ss:$16 sps:$4 sm:$0xff]   ;;  %v7640_v20 = vrot.slane %v11729_v58, 4 }
 0x5a5   : > { %v6895_v43 = vpack.c.bf16 %v6763_v36, %v6759_v16  ;;  %v6765_v0 = vmax.f32 %v6509_v15, 0.0  ;;  %v5516_v22 = vpop.f32.mrb[60].mxu0  ;;  %v9205_v4 = vld [vmem:[%s12256_s8 + $0x48] ss:$16 sps:$4 sm:$0xff]   ;;  %v7647_v36 = vrot.slane %v11733_v23, 4  ;;  %v6928_v15 = vpop.permute.xlu1 %6927 }
 0x5a6   : > { %v6896_v10 = vpack.c.bf16 %v6764_v51, %v6760_v30  ;;  %v6510_v57 = vadd.f32 %v6255_v13, %v5516_v22  ;;  %v5518_v29 = vpop.f32.mrb[61].mxu0 }
 0x5a7   : > { %v6897_v21 = vpack.c.bf16 %v6765_v0, %v6761_v41  ;;  %v5869_v60 = vpop.f32.mrb[60].mxu1  ;;  %v6511_v53 = vadd.f32 %v6255_v13, %v5518_v29  ;;  %v5520_v27 = vpop.f32.mrb[62].mxu0  ;;  %7101 = vmatprep.subr.bf16.mxu0 %v6895_v43  ;;  %v7654_v43 = vrot.slane %v11737_v11, 4  ;;  %v7661_v0 = vrot.slane %v11742_v52, 4 }
 0x5a8   : > { %v6512_v45 = vadd.f32 %v6255_v13, %v5869_v60  ;;  %v5871_v3 = vpop.f32.mrb[61].mxu1  ;;  %v6514_v63 = vadd.f32 %v6260_v44, %v5520_v27  ;;  %v5522_v9 = vpop.f32.mrb[63].mxu0  ;;  %7102 = vmatpush1.bf16.msra.mxu0 %v6894_v40  ;;  %v6766_v61 = vmax.f32 %v6510_v57, 0.0 }
 0x5a9   : > { %v6513_v24 = vadd.f32 %v6255_v13, %v5871_v3  ;;  %v5873_v18 = vpop.f32.mrb[62].mxu1  ;;  %7227 = vmatprep.subr.bf16.mxu1 %v6897_v21  ;;  %v6515_v26 = vadd.f32 %v6260_v44, %v5522_v9  ;;  %v6767_v17 = vmax.f32 %v6511_v53, 0.0  ;;  %v7641_v21 = vadd.f32 %v7640_v20, %v11729_v58  ;;  %v6933_v58 = vpop.permute.xlu0 %6932 }
 0x5aa   : > { %v6770_v37 = vmax.f32 %v6514_v63, 0.0  ;;  %v6516_v8 = vadd.f32 %v6260_v44, %v5873_v18  ;;  %v5875_v48 = vpop.f32.mrb[63].mxu1  ;;  %7228 = vmatpush1.bf16.msra.mxu1 %v6896_v10  ;;  %v6768_v34 = vmax.f32 %v6512_v45, 0.0  ;;  %v7648_v3 = vadd.f32 %v7647_v36, %v11733_v23  ;;  %v12075_v23 = vpop.permute.xlu1 %6937 }
 0x5ab   : > { %v6771_v28 = vmax.f32 %v6515_v26, 0.0  ;;  %v6517_v38 = vadd.f32 %v6260_v44, %v5875_v48  ;;  %v6769_v7 = vmax.f32 %v6513_v24, 0.0 }
 0x5ac   : > { %v6898_v35 = vpack.c.bf16 %v6770_v37, %v6766_v61  ;;  %v6772_v31 = vmax.f32 %v6516_v8, 0.0  ;;  %v7655_v37 = vadd.f32 %v7654_v43, %v11737_v11  ;;  %v7649_v11 = vrot.slane %v7648_v3, 2 }
 0x5ad   : > { %v6899_v55 = vpack.c.bf16 %v6771_v28, %v6767_v17  ;;  %v6773_v1 = vmax.f32 %v6517_v38, 0.0  ;;  %v7662_v38 = vadd.f32 %v7661_v0, %v11742_v52 }
 0x5ae   : > { %v6900_v62 = vpack.c.bf16 %v6772_v31, %v6768_v34  ;;  %v7642_v31 = vrot.slane %v7641_v21, 2 }
 0x5af   : > { %v6901_v5 = vpack.c.bf16 %v6773_v1, %v6769_v7  ;;  %7103 = vmatprep.subr.bf16.mxu0 %v6899_v55 }
 0x5b0   : > { %7104 = vmatpush1.bf16.msra.mxu0 %v6898_v35 }
 0x5b1   : > { %7229 = vmatprep.subr.bf16.mxu1 %v6901_v5 }
 0x5b2   : > { %7230 = vmatpush1.bf16.msra.mxu1 %v6900_v62  ;;  %v7656_v62 = vrot.slane %v7655_v37, 2 }
 0x5b3   : > { %7106 = vmatmul.mubr.bf16.vlgmr.msra.gmra.mrb[64].mxu0 %v9199_v50 }
 0x5b4   : > { %7115 = vmatprep.mubr.bf16.mxu0 %v9204_v59 }
 0x5b5   : > { %7232 = vmatmul.mubr.bf16.vlgmr.msra.gmra.mrb[64].mxu1 %v9199_v50 }
 0x5b6   : > { %7241 = vmatprep.mubr.bf16.mxu1 %v9204_v59 }
 0x5bb   : > { %7116 = vmatmul.mubr.bf16.gmra.mrb[68].mxu0 %v9202_v2 }
 0x5bc   : > { %7125 = vmatprep.mubr.bf16.mxu0 %v9207_v42 }
 0x5bd   : > { %7242 = vmatmul.mubr.bf16.gmra.mrb[68].mxu1 %v9202_v2 }
 0x5be   : > { %7251 = vmatprep.mubr.bf16.mxu1 %v9207_v42 }
 0x5c3   : > { %7126 = vmatmul.mubr.bf16.gmra.mrb[72].mxu0 %v9205_v4 }
 0x5c5   : > { %7252 = vmatmul.mubr.bf16.gmra.mrb[72].mxu1 %v9205_v4 }
 0x686   : > { %v7107_v16 = vpop.f32.mrb[64].mxu0 }
 0x687   : > { %v8448_v30 = vadd.f32 %v7107_v16, %v6923_v47  ;;  %v7109_v40 = vpop.f32.mrb[65].mxu0 }
 0x688   : > { %v7233_v51 = vpop.f32.mrb[64].mxu1  ;;  %v8449_v13 = vadd.f32 %v7109_v40, %v6923_v47  ;;  %v7111_v41 = vpop.f32.mrb[66].mxu0 }
 0x689   : > { %v8290_v22 = vmul.f32 -1.442695, %v8448_v30  ;;  %v8460_v44 = vadd.f32 %v7233_v51, %v6923_v47  ;;  %v7235_v10 = vpop.f32.mrb[65].mxu1  ;;  %v8450_v57 = vadd.f32 %v7111_v41, %v6928_v15  ;;  %v7113_v29 = vpop.f32.mrb[67].mxu0  ;;  %v7643_v30 = vadd.f32 %v7642_v31, %v7641_v21 }
 0x68a   : > { %v8291_v60 = vmul.f32 -1.442695, %v8449_v13  ;;  %v8461_v53 = vadd.f32 %v7235_v10, %v6923_v47  ;;  %v7237_v27 = vpop.f32.mrb[66].mxu1  ;;  %v8451_v45 = vadd.f32 %v7113_v29, %v6928_v15  ;;  %v7663_v47 = vrot.slane %v7662_v38, 2 }
 0x68b   : > { %9266 = vpow2.f32 %v8290_v22  ;;  %v8292_v63 = vmul.f32 -1.442695, %v8460_v44  ;;  %v8294_v9 = vmul.f32 -1.442695, %v8450_v57  ;;  %v8462_v24 = vadd.f32 %v7237_v27, %v6928_v15  ;;  %v7239_v18 = vpop.f32.mrb[67].mxu1 }
 0x68c   : > { %9268 = vpow2.f32 %v8291_v60  ;;  %v8293_v26 = vmul.f32 -1.442695, %v8461_v53  ;;  %v8463_v61 = vadd.f32 %v7239_v18, %v6928_v15  ;;  %v8295_v48 = vmul.f32 -1.442695, %v8451_v45 }
 0x68d   : > { %9270 = vpow2.f32 %v8292_v63  ;;  %v8296_v8 = vmul.f32 -1.442695, %v8462_v24  ;;  %v7650_v51 = vadd.f32 %v7649_v11, %v7648_v3  ;;  %v7657_v41 = vadd.f32 %v7656_v62, %v7655_v37 }
 0x68e   : > { %9272 = vpow2.f32 %v8293_v26  ;;  %v8297_v17 = vmul.f32 -1.442695, %v8463_v61  ;;  %v7117_v28 = vpop.f32.mrb[68].mxu0  ;;  %v7664_v44 = vadd.f32 %v7663_v47, %v7662_v38  ;;  %v7644_v60 = vrot.slane %v7643_v30, 1 }
 0x68f   : > { %9274 = vpow2.f32 %v8294_v9  ;;  %v8452_v34 = vadd.f32 %v7117_v28, %v6933_v58  ;;  %v7119_v35 = vpop.f32.mrb[69].mxu0  ;;  %v7651_v3 = vrot.slane %v7650_v51, 1  ;;  %v7658_v26 = vrot.slane %v7657_v41, 1 }
 0x690   : > { %9276 = vpow2.f32 %v8296_v8  ;;  %v7243_v7 = vpop.f32.mrb[68].mxu1  ;;  %v8453_v55 = vadd.f32 %v7119_v35, %v6933_v58  ;;  %v7121_v1 = vpop.f32.mrb[70].mxu0  ;;  %v12082_v38 = vadd.f32 %v7644_v60, %v7643_v30 }
 0x691   : > { %9278 = vpow2.f32 %v8295_v48  ;;  %v8298_v5 = vmul.f32 -1.442695, %v8452_v34  ;;  %v8464_v50 = vadd.f32 %v7243_v7, %v6933_v58  ;;  %v7245_v59 = vpop.f32.mrb[69].mxu1  ;;  %v8454_v2 = vadd.f32 %v7121_v1, %v12075_v23  ;;  %v7123_v42 = vpop.f32.mrb[71].mxu0 }
 0x692   : > { %9280 = vpow2.f32 %v8297_v17  ;;  %v8299_v52 = vmul.f32 -1.442695, %v8453_v55  ;;  %v8465_v4 = vadd.f32 %v7245_v59, %v6933_v58  ;;  %v7247_v20 = vpop.f32.mrb[70].mxu1  ;;  %v7665_v48 = vrot.slane %v7664_v44, 1 }
 0x693   : > { %9282 = vpow2.f32 %v8298_v5  ;;  %v8300_v16 = vmul.f32 -1.442695, %v8464_v50  ;;  %v8302_v36 = vmul.f32 -1.442695, %v8454_v2  ;;  %v7249_v15 = vpop.f32.mrb[71].mxu1  ;;  %v8455_v31 = vadd.f32 %v7123_v42, %v12075_v23  ;;  %v6943_v50 = vpop.permute.xlu0 %6942 }
 0x694   : > { %9284 = vpow2.f32 %v8299_v52  ;;  %v8301_v40 = vmul.f32 -1.442695, %v8465_v4  ;;  %v12085_v7 = vadd.f32 %v7651_v3, %v7650_v51  ;;  %v8466_v11 = vadd.f32 %v7247_v20, %v12075_v23 }
 0x695   : > { %v9267_v13 = vpop.eup %9266  ;;  %9286 = vpow2.f32 %v8300_v16  ;;  %v12088_v62 = vadd.f32 %v7658_v26, %v7657_v41  ;;  %v8467_v2 = vadd.f32 %v7249_v15, %v12075_v23  ;;  %v12091_v52 = vadd.f32 %v7665_v48, %v7664_v44 }
 0x696   : > { %v9269_v43 = vpop.eup %9268  ;;  %v7334_v0 = vadd.f32 1.0, %v9267_v13  ;;  %9288 = vpow2.f32 %v8301_v40  ;;  %v7127_v22 = vpop.f32.mrb[72].mxu0  ;;  %v12094_v16 = vsub.f32 1.0, %v12082_v38  ;;  %v8303_v30 = vmul.f32 -1.442695, %v8455_v31 }
 0x697   : > { %v9271_v10 = vpop.eup %9270  ;;  %v7335_v57 = vadd.f32 1.0, %v9269_v43  ;;  %9290 = vpow2.f32 %v8302_v36  ;;  %v7129_v29 = vpop.f32.mrb[73].mxu0  ;;  %v8456_v47 = vadd.f32 %v7127_v22, %v6943_v50  ;;  %v12097_v40 = vsub.f32 1.0, %v12085_v7 }
 0x698   : > { %v9273_v53 = vpop.eup %9272  ;;  %9292 = vrcp.f32 %v7334_v0  ;;  %v7336_v27 = vadd.f32 1.0, %v9271_v10  ;;  %v7253_v21 = vpop.f32.mrb[72].mxu1  ;;  %v8304_v23 = vmul.f32 -1.442695, %v8466_v11  ;;  %v8305_v0 = vmul.f32 -1.442695, %v8467_v2 }
 0x699   : > { %v12078_v45 = vpop.f32.mrb[74].mxu0  ;;  %v9275_v63 = vpop.eup %9274  ;;  %9294 = vrcp.f32 %v7335_v57  ;;  %v7337_v9 = vadd.f32 1.0, %v9273_v53  ;;  %v8468_v15 = vadd.f32 %v7253_v21, %v6943_v50  ;;  %v8457_v22 = vadd.f32 %v7129_v29, %v6943_v50 }
 0x69a   : > { %v7255_v24 = vpop.f32.mrb[73].mxu1  ;;  %v12080_v18 = vpop.f32.mrb[75].mxu0  ;;  %9296 = vrcp.f32 %v7336_v27  ;;  %v7338_v37 = vadd.f32 1.0, %v9275_v63  ;;  %v8306_v60 = vmul.f32 -1.442695, %v8456_v47 }
 0x69b   : > { %v9277_v61 = vpop.eup %9276  ;;  %v7257_v8 = vpop.f32.mrb[74].mxu1  ;;  %9298 = vrcp.f32 %v7337_v9  ;;  %v8469_v53 = vadd.f32 %v7255_v24, %v6943_v50 }
 0x69c   : > { %v9279_v58 = vpop.eup %9278  ;;  %v7340_v17 = vadd.f32 1.0, %v9277_v61  ;;  %v7259_v28 = vpop.f32.mrb[75].mxu1  ;;  %9300 = vrcp.f32 %v7338_v37  ;;  %v8308_v61 = vmul.f32 -1.442695, %v8468_v15 }
 0x69d   : > { %v9281_v34 = vpop.eup %9280  ;;  %v7339_v35 = vadd.f32 1.0, %v9279_v58  ;;  %v6948_v10 = vpop.permute.xlu1 %6947  ;;  %v8307_v58 = vmul.f32 -1.442695, %v8457_v22 }
 0x69e   : > { %v9283_v55 = vpop.eup %9282  ;;  %9302 = vrcp.f32 %v7340_v17  ;;  %v7341_v1 = vadd.f32 1.0, %v9281_v34  ;;  %v8458_v63 = vadd.f32 %v12078_v45, %v6948_v10  ;;  %v8470_v9 = vadd.f32 %v7257_v8, %v6948_v10 }
 0x69f   : > { %v9285_v5 = vpop.eup %9284  ;;  %9304 = vrcp.f32 %v7339_v35  ;;  %v7342_v59 = vadd.f32 1.0, %v9283_v55  ;;  %v8459_v29 = vadd.f32 %v12080_v18, %v6948_v10  ;;  %v8471_v24 = vadd.f32 %v7259_v28, %v6948_v10 }
 0x6a0   : > { %v9287_v4 = vpop.eup %9286  ;;  %9306 = vrcp.f32 %v7341_v1  ;;  %v7343_v42 = vadd.f32 1.0, %v9285_v5  ;;  %v8309_v35 = vmul.f32 -1.442695, %v8469_v53  ;;  %v12107_v45 = vsub.f32 1.0, %v12088_v62 }
 0x6a1   : > { %v9289_v36 = vpop.eup %9288  ;;  %9308 = vrcp.f32 %v7342_v59  ;;  %v7344_v20 = vadd.f32 1.0, %v9287_v4  ;;  %v8310_v55 = vmul.f32 -1.442695, %v8458_v63  ;;  %v8312_v18 = vmul.f32 -1.442695, %v8470_v9 }
 0x6a2   : > { %v9291_v51 = vpop.eup %9290  ;;  %9310 = vrcp.f32 %v7343_v42  ;;  %v7345_v13 = vadd.f32 1.0, %v9289_v36  ;;  %v8311_v28 = vmul.f32 -1.442695, %v8459_v29  ;;  %v8313_v4 = vmul.f32 -1.442695, %v8471_v24 }
 0x6a3   : > { %v9293_v41 = vpop.eup %9292  ;;  %9312 = vrcp.f32 %v7344_v20  ;;  %v7346_v43 = vadd.f32 1.0, %v9291_v51 }
 0x6a4   : > { %v9295_v44 = vpop.eup %9294  ;;  %v7718_v57 = vmul.f32 %v9293_v41, %v11491_v12  ;;  %9314 = vrcp.f32 %v7345_v13 }
 0x6a5   : > { %v9297_v27 = vpop.eup %9296  ;;  %v7719_v3 = vmul.f32 %v9295_v44, %v11503_v39  ;;  %9316 = vrcp.f32 %v7346_v43 }
 0x6a6   : > { %v9299_v21 = vpop.eup %9298  ;;  %v7720_v26 = vmul.f32 %v9297_v27, %v11555_v49  ;;  %9318 = vpow2.f32 %v8304_v23 }
 0x6a7   : > { %v9301_v37 = vpop.eup %9300  ;;  %v7721_v48 = vmul.f32 %v9299_v21, %v11560_v32  ;;  %9320 = vpow2.f32 %v8303_v30 }
 0x6a8   : > { %v9303_v17 = vpop.eup %9302  ;;  %v7722_v34 = vmul.f32 %v9301_v37, %v11522_v54  ;;  %9322 = vpow2.f32 %v8305_v0 }
 0x6a9   : > { %v9305_v8 = vpop.eup %9304  ;;  %v7724_v31 = vmul.f32 %v9303_v17, %v11640_v19  ;;  %9324 = vpow2.f32 %v8306_v60 }
 0x6aa   : > { %v9307_v1 = vpop.eup %9306  ;;  %v7726_v11 = vadd.f32 %v7722_v34, %v7718_v57  ;;  %v7723_v5 = vmul.f32 %v9305_v8, %v11675_v33  ;;  %9326 = vpow2.f32 %v8308_v61  ;;  %v12124_v61 = vsub.f32 1.0, %v12091_v52 }
 0x6ab   : > { %v9309_v50 = vpop.eup %9308  ;;  %v7740_v59 = vadd.f32 %v7724_v31, %v7720_v26  ;;  %v7725_v2 = vmul.f32 %v9307_v1, %v11710_v14  ;;  %9328 = vpow2.f32 %v8307_v58 }
 0x6ac   : > { %v9311_v42 = vpop.eup %9310  ;;  %v7727_v47 = vrot.slane %v7726_v11, 4  ;;  %v7733_v36 = vadd.f32 %v7723_v5, %v7719_v3  ;;  %v7758_v20 = vmul.f32 %v9309_v50, %v11491_v12  ;;  %9330 = vpow2.f32 %v8309_v35 }
 0x6ad   : > { %v9313_v30 = vpop.eup %9312  ;;  %v7741_v51 = vrot.slane %v7740_v59, 4  ;;  %v7747_v13 = vadd.f32 %v7725_v2, %v7721_v48  ;;  %v12114_v23 = vmul.f32 %v9311_v42, %v11503_v39  ;;  %9332 = vpow2.f32 %v8310_v55 }
 0x6ae   : > { %v9315_v15 = vpop.eup %9314  ;;  %v7728_v41 = vadd.f32 %v7727_v47, %v7726_v11  ;;  %v7734_v43 = vrot.slane %v7733_v36, 4  ;;  %v12117_v0 = vmul.f32 %v9313_v30, %v11555_v49  ;;  %9334 = vpow2.f32 %v8312_v18 }
 0x6af   : > { %v9317_v22 = vpop.eup %9316  ;;  %v7742_v44 = vadd.f32 %v7741_v51, %v7740_v59  ;;  %v7748_v10 = vrot.slane %v7747_v13, 4  ;;  %v12120_v57 = vmul.f32 %v9315_v15, %v11560_v32  ;;  %9336 = vpow2.f32 %v8311_v28 }
 0x6b0   : > { %v9319_v60 = vpop.eup %9318  ;;  %v7729_v53 = vrot.slane %v7728_v41, 2  ;;  %v7735_v27 = vadd.f32 %v7734_v43, %v7733_v36  ;;  %v7762_v3 = vmul.f32 %v9317_v22, %v11522_v54  ;;  %9338 = vpow2.f32 %v8313_v4 }
 0x6b1   : > { %v9321_v63 = vpop.eup %9320  ;;  %v7743_v9 = vrot.slane %v7742_v44, 2  ;;  %v7749_v21 = vadd.f32 %v7748_v10, %v7747_v13  ;;  %v7348_v26 = vadd.f32 1.0, %v9319_v60 }
 0x6b2   : > { %v9323_v29 = vpop.eup %9322  ;;  %v7730_v37 = vadd.f32 %v7729_v53, %v7728_v41  ;;  %v7736_v48 = vrot.slane %v7735_v27, 2  ;;  %v7766_v58 = vadd.f32 %v7762_v3, %v7758_v20  ;;  %v7347_v24 = vadd.f32 1.0, %v9321_v63 }
 0x6b3   : > { %v9325_v17 = vpop.eup %9324  ;;  %v7744_v34 = vadd.f32 %v7743_v9, %v7742_v44  ;;  %v7750_v35 = vrot.slane %v7749_v21, 2  ;;  %9340 = vrcp.f32 %v7348_v26  ;;  %v7349_v8 = vadd.f32 1.0, %v9323_v29 }
 0x6b4   : > { %v9327_v31 = vpop.eup %9326  ;;  %v7731_v55 = vrot.slane %v7730_v37, 1  ;;  %v7737_v18 = vadd.f32 %v7736_v48, %v7735_v27  ;;  %v7767_v1 = vrot.slane %v7766_v58, 4  ;;  %9342 = vrcp.f32 %v7347_v24 }
 0x6b5   : > { %v9329_v11 = vpop.eup %9328  ;;  %v7745_v5 = vrot.slane %v7744_v34, 1  ;;  %v7751_v28 = vadd.f32 %v7750_v35, %v7749_v21  ;;  %9344 = vrcp.f32 %v7349_v8  ;;  %v7350_v50 = vadd.f32 1.0, %v9325_v17 }
 0x6b6   : > { %v9331_v59 = vpop.eup %9330  ;;  %v7732_v2 = vadd.f32 %v7731_v55, %v7730_v37  ;;  %v7738_v4 = vrot.slane %v7737_v18, 1  ;;  %v7768_v42 = vadd.f32 %v7767_v1, %v7766_v58  ;;  %v7352_v47 = vadd.f32 1.0, %v9327_v31 }
 0x6b7   : > { %v9333_v36 = vpop.eup %9332  ;;  %v7746_v20 = vadd.f32 %v7745_v5, %v7744_v34  ;;  %v7752_v30 = vrot.slane %v7751_v28, 1  ;;  %9346 = vrcp.f32 %v7350_v50  ;;  %v7351_v51 = vadd.f32 1.0, %v9329_v11 }
 0x6b8   : > { %v9335_v13 = vpop.eup %9334  ;;  %v7739_v15 = vadd.f32 %v7738_v4, %v7737_v18  ;;  %v7769_v41 = vrot.slane %v7768_v42, 2  ;;  %9348 = vrcp.f32 %v7352_v47  ;;  %v7353_v43 = vadd.f32 1.0, %v9331_v59 }
 0x6b9   : > { %v9337_v22 = vpop.eup %9336  ;;  %v7753_v44 = vadd.f32 %v7752_v30, %v7751_v28  ;;  %9350 = vrcp.f32 %v7351_v51  ;;  %v7354_v10 = vadd.f32 1.0, %v9333_v36  ;;  %v7356_v60 = vadd.f32 1.0, %v9335_v13 }
 0x6ba   : > { %v9339_v53 = vpop.eup %9338  ;;  %v7770_v27 = vadd.f32 %v7769_v41, %v7768_v42  ;;  %9352 = vrcp.f32 %v7353_v43  ;;  %v7355_v3 = vadd.f32 1.0, %v9337_v22  ;;  %v7754_v63 = vadd.f32 %v7732_v2, %v12094_v16 }
 0x6bb   : > { %9354 = vrcp.f32 %v7354_v10  ;;  %v7357_v9 = vadd.f32 1.0, %v9339_v53  ;;  %v12128_v21 = vadd.f32 %v7739_v15, %v12097_v40  ;;  %v12131_v26 = vadd.f32 %v7746_v20, %v12107_v45 }
 0x6bc   : > { %v7771_v29 = vrot.slane %v7770_v27, 1  ;;  %9356 = vrcp.f32 %v7356_v60  ;;  %v12134_v37 = vadd.f32 %v7753_v44, %v12124_v61  ;;  %v7687_v58 = vrot.slane %v11768_v56, 4 }
 0x6bd   : > { %v9341_v48 = vpop.eup %9340  ;;  %9358 = vrcp.f32 %v7355_v3  ;;  %v7694_v31 = vrot.slane %v11771_v6, 4  ;;  %v7701_v50 = vrot.slane %v11773_v46, 4 }
 0x6be   : > { %v9343_v24 = vpop.eup %9342  ;;  %v7772_v17 = vadd.f32 %v7771_v29, %v7770_v27  ;;  %v7764_v34 = vmul.f32 %v9341_v48, %v11640_v19  ;;  %9360 = vrcp.f32 %v7357_v9  ;;  %v7688_v28 = vadd.f32 %v7687_v58, %v11768_v56 }
 0x6bf   : > { %v9345_v35 = vpop.eup %9344  ;;  %v7763_v8 = vmul.f32 %v9343_v24, %v11675_v33  ;;  %v7695_v30 = vadd.f32 %v7694_v31, %v11771_v6  ;;  %v7702_v43 = vadd.f32 %v7701_v50, %v11773_v46 }
 0x6c0   : > { %v7780_v55 = vadd.f32 %v7764_v34, %v12117_v0  ;;  %v7765_v18 = vmul.f32 %v9345_v35, %v11710_v14  ;;  %v7794_v1 = vadd.f32 %v7772_v17, %v12094_v16  ;;  %v7689_v60 = vrot.slane %v7688_v28, 2 }
 0x6c1   : > { %v9347_v11 = vpop.eup %9346  ;;  %v7773_v5 = vadd.f32 %v7763_v8, %v12114_v23  ;;  %v7708_v23 = vrot.slane %v11776_v25, 4  ;;  %v7696_v3 = vrot.slane %v7695_v30, 2  ;;  %v7703_v17 = vrot.slane %v7702_v43, 2 }
 0x6c2   : > { %v9349_v59 = vpop.eup %9348  ;;  %v7781_v2 = vrot.slane %v7780_v55, 4  ;;  %v7787_v4 = vadd.f32 %v7765_v18, %v12120_v57  ;;  %v7798_v42 = vmul.f32 %v9347_v11, %v11491_v12  ;;  %v12149_v47 = vsel %vm523_vm6, %v7754_v63, %v7794_v1 }
 0x6c3   : > { %v9351_v0 = vpop.eup %9350  ;;  %v7774_v36 = vrot.slane %v7773_v5, 4  ;;  %v7800_v20 = vmul.f32 %v9349_v59, %v11555_v49  ;;  %v7709_v63 = vadd.f32 %v7708_v23, %v11776_v25  ;;  %v7690_v18 = vadd.f32 %v7689_v60, %v7688_v28 }
 0x6c4   : > { %v9353_v56 = vpop.eup %9352  ;;  %v7782_v51 = vadd.f32 %v7781_v2, %v7780_v55  ;;  %v7788_v13 = vrot.slane %v7787_v4, 4  ;;  %v7799_v15 = vmul.f32 %v9351_v0, %v11503_v39  ;;  %v7704_v23 = vadd.f32 %v7703_v17, %v7702_v43 }
 0x6c5   : > { %v9355_v41 = vpop.eup %9354  ;;  %v7775_v57 = vadd.f32 %v7774_v36, %v7773_v5  ;;  %v7801_v12 = vmul.f32 %v9353_v56, %v11560_v32  ;;  %v7710_v2 = vrot.slane %v7709_v63, 2 }
 0x6c6   : > { %v9357_v22 = vpop.eup %9356  ;;  %v7783_v44 = vrot.slane %v7782_v51, 2  ;;  %v7789_v10 = vadd.f32 %v7788_v13, %v7787_v4  ;;  %v7802_v49 = vmul.f32 %v9355_v41, %v11522_v54 }
 0x6c7   : > { %v9359_v6 = vpop.eup %9358  ;;  %v7776_v53 = vrot.slane %v7775_v57, 2  ;;  %v7804_v27 = vmul.f32 %v9357_v22, %v11640_v19  ;;  %v7711_v43 = vadd.f32 %v7710_v2, %v7709_v63 }
 0x6c8   : > { %v9361_v39 = vpop.eup %9360  ;;  %v7784_v9 = vadd.f32 %v7783_v44, %v7782_v51  ;;  %v7790_v29 = vrot.slane %v7789_v10, 2  ;;  %v7806_v48 = vadd.f32 %v7802_v49, %v7798_v42  ;;  %v7803_v32 = vmul.f32 %v9359_v6, %v11675_v33 }
 0x6c9   : > { %v7777_v46 = vadd.f32 %v7776_v53, %v7775_v57  ;;  %v7820_v58 = vadd.f32 %v7804_v27, %v7800_v20  ;;  %v7805_v24 = vmul.f32 %v9361_v39, %v11710_v14  ;;  %v7691_v53 = vrot.slane %v7690_v18, 1 }
 0x6ca   : > { %v7785_v54 = vrot.slane %v7784_v9, 1  ;;  %v7791_v34 = vadd.f32 %v7790_v29, %v7789_v10  ;;  %v7807_v35 = vrot.slane %v7806_v48, 4  ;;  %v7813_v8 = vadd.f32 %v7803_v32, %v7799_v15 }
 0x6cb   : > { %v7778_v31 = vrot.slane %v7777_v46, 1  ;;  %v7821_v19 = vrot.slane %v7820_v58, 4  ;;  %v7827_v55 = vadd.f32 %v7805_v24, %v7801_v12  ;;  %v7697_v12 = vadd.f32 %v7696_v3, %v7695_v30 }
 0x6cc   : > { %v7786_v25 = vadd.f32 %v7785_v54, %v7784_v9  ;;  %v7792_v1 = vrot.slane %v7791_v34, 1  ;;  %v7808_v11 = vadd.f32 %v7807_v35, %v7806_v48  ;;  %v7814_v5 = vrot.slane %v7813_v8, 4 }
 0x6cd   : > { %v7779_v50 = vadd.f32 %v7778_v31, %v7777_v46  ;;  %v7822_v59 = vadd.f32 %v7821_v19, %v7820_v58  ;;  %v7828_v33 = vrot.slane %v7827_v55, 4  ;;  %v7698_v30 = vrot.slane %v7697_v12, 1 }
 0x6ce   : > { %v7793_v4 = vadd.f32 %v7792_v1, %v7791_v34  ;;  %v7809_v14 = vrot.slane %v7808_v11, 2  ;;  %v7815_v42 = vadd.f32 %v7814_v5, %v7813_v8  ;;  %v7796_v0 = vadd.f32 %v7786_v25, %v12107_v45 }
 0x6cf   : > { %v7823_v36 = vrot.slane %v7822_v59, 2  ;;  %v7829_v20 = vadd.f32 %v7828_v33, %v7827_v55  ;;  %v7795_v56 = vadd.f32 %v7779_v50, %v12097_v40  ;;  %v7712_v48 = vrot.slane %v7711_v43, 1 }
 0x6d0   : > { %v7810_v28 = vadd.f32 %v7809_v14, %v7808_v11  ;;  %v7816_v51 = vrot.slane %v7815_v42, 2  ;;  %v7797_v13 = vadd.f32 %v7793_v4, %v12124_v61  ;;  %v7840_v15 = vsel %vm523_vm6, %v12131_v26, %v7796_v0 }
 0x6d1   : > { %v7824_v41 = vadd.f32 %v7823_v36, %v7822_v59  ;;  %v7830_v57 = vrot.slane %v7829_v20, 2  ;;  %v7839_v22 = vsel %vm523_vm6, %v12128_v21, %v7795_v56  ;;  %v7705_v26 = vrot.slane %v7704_v23, 1 }
 0x6d2   : > { %v7811_v44 = vrot.slane %v7810_v28, 1  ;;  %v7817_v10 = vadd.f32 %v7816_v51, %v7815_v42  ;;  %v7841_v49 = vsel %vm523_vm6, %v12134_v37, %v7797_v13  ;;  %v7692_v32 = vadd.f32 %v7691_v53, %v7690_v18 }
 0x6d3   : > { %v7825_v60 = vrot.slane %v7824_v41, 1  ;;  %v7831_v6 = vadd.f32 %v7830_v57, %v7829_v20  ;;  %v7706_v46 = vadd.f32 %v7705_v26, %v7704_v23  ;;  %v7699_v17 = vadd.f32 %v7698_v30, %v7697_v12 }
 0x6d4   : > { %v7812_v27 = vadd.f32 %v7811_v44, %v7810_v28  ;;  %v7818_v39 = vrot.slane %v7817_v10, 1 }
 0x6d5   : > { %v7826_v9 = vadd.f32 %v7825_v60, %v7824_v41  ;;  %v7832_v29 = vrot.slane %v7831_v6, 1 }
 0x6d6   : > { %v7819_v3 = vadd.f32 %v7818_v39, %v7817_v10  ;;  %v7834_v21 = vadd.f32 %v7812_v27, %v12094_v16  ;;  %v7713_v16 = vadd.f32 %v7712_v48, %v7711_v43 }
 0x6d7   : > { %v7833_v63 = vadd.f32 %v7832_v29, %v7831_v6  ;;  %v7836_v37 = vadd.f32 %v7826_v9, %v12107_v45 }
 0x6d8   : > { %v7835_v58 = vadd.f32 %v7819_v3, %v12097_v40  ;;  %v7842_v24 = vsel %vm528_vm8, %v12149_v47, %v7834_v21 }
 0x6d9   : > { %v7837_v54 = vadd.f32 %v7833_v63, %v12124_v61  ;;  %v7844_v34 = vsel %vm528_vm8, %v7840_v15, %v7836_v37  ;;  %v7847_v35 = vsel %vm7846_vm12, %v7842_v24, %v7692_v32 }
 0x6da   : > { %v7843_v8 = vsel %vm528_vm8, %v7839_v22, %v7835_v58  ;;  %v7849_v45 = vsel %vm7846_vm12, %v7844_v34, %v7706_v46  ;;  %v7851_v40 = vsel %vm7526_vm11, %v7847_v35, %v12082_v38 }
 0x6db   : > { %v7845_v47 = vsel %vm528_vm8, %v7841_v49, %v7837_v54  ;;  %v7848_v61 = vsel %vm7846_vm12, %v7843_v8, %v7699_v17  ;;  %v7853_v31 = vsel %vm7526_vm11, %v7849_v45, %v12088_v62  ;;  %v7856_v19 = vsel %vm7855_vm13, %v7851_v40, 0.0 }
 0x6dc   : > { %v7850_v55 = vsel %vm7846_vm12, %v7845_v47, %v7713_v16  ;;  %v7852_v18 = vsel %vm7526_vm11, %v7848_v61, %v12085_v7  ;;  %v7858_v38 = vsel %vm7855_vm13, %v7853_v31, 0.0  ;;  %7860 = vst [vmem:[%s351_s28] sm:$0xff] %v7856_v19 }
 0x6dd   : > { %v7854_v25 = vsel %vm7526_vm11, %v7850_v55, %v12091_v52  ;;  %v7857_v1 = vsel %vm7855_vm13, %v7852_v18, 0.0  ;;  %7862 = vst [vmem:[%s351_s28 + $0x10] sm:$0xff] %v7858_v38 }
 0x6de   : > { %v7859_v7 = vsel %vm7855_vm13, %v7854_v25, 0.0  ;;  %7861 = vst [vmem:[%s351_s28 + $0x8] sm:$0xff] %v7857_v1 }
 0x6df   : > { %7863 = vst [vmem:[%s351_s28 + $0x18] sm:$0xff] %v7859_v7 }
 0x6e0   : > { %9390 = shalt.err (!%p9387_p1)
}
 0x6e1   : > { %s9391_s20 = scalar_lea.hbm %s12203_s0, 512  ;;  %s9395_s28 = scalar_lea.hbm %s12258_s10, 1024 }
 0x6e2   : > { %p9392_p2 = scmp.ne.s32.totalorder %s12203_s0, %s9391_s20  ;;  %p9396_p7 = scmp.lt.u32.totalorder %s12203_s0, %s12258_s10 }
 0x6e3   : > { %p9397_p8 = scmp.lt.u32.totalorder %s9395_s28, %s9391_s20  ;;  %p9399_p10 = scmp.lt.u32.totalorder %s9391_s20, %s12203_s0 }
 0x6e4   : > { %p9393_p3 = pnand %p9392_p2, %p9542_p5 }
 0x6e5   : > { %p9398_p9 = por %p9397_p8, %p9396_p7 }
 0x6e6   : > { %p9394_p4 = pneg %p9393_p3 }
 0x6e7   : > { %p9400_p11 = por %p9399_p10, %p9398_p9 }
 0x6e9   : > { %p9401_p12 = pnand %p9400_p11, %p9394_p4 }
 0x6eb   : > { %9404 = shalt.err (!%p9401_p12)
}
 0x6ec   : > { %8884 = dma.vmem_to_hbm [thread:$0]  (%p9542_p5), %s12205_s30, 512, %s12203_s0, %s7865_s18  }
 0x6ed PF: > { %p8896_p13 = scmp.ge.s32.totalorder %s9443_s16, 2  ;;  %s7891_s12 = sand.u32 1, %s9431_s13  }
 0x6ee   : > { %s7892_s27 = scalar_lea.sflag [#allocation3], %s7891_s12 }
 0x6ef   : > { %p8891_p0 = pnand %p8896_p13, %p9546_p6 }
 0x6f1   : > { %9426 = dma.done.wait (!%p8891_p0), %s7892_s27, 512  }
 0x6f2   : > { %9428 = vsyncadd (!%p8891_p0), %s7892_s27, 4294966784  ;;  %s12403_s17 = sld [smem:[#allocation8_spill]]  ;;  %p21_p1 = scmp.ge.s32.totalorder %s9529_s19, 4  }
 0x6f3   : > { %s12404_s13 = smov %s9435_s14  ;;  %s12405_s14 = smov %s9439_s15 }
 0x6f4   : > { %s12407_s16 = smov %s9529_s19  ;;  %23 = sbr.rel (!%p21_p1) target bundleno = 6 (0x6), region = 97 }
 0x6f8   : > { %s12406_s15 = smov %s12403_s17 }
 0x6fb   :  { %7897 = vsyncpa [#allocation3], 1 }
 0x6fc   :  { %7899 = vsyncpa [#allocation3 + $0x1], 1 }
 0x6fd   :  { %7900 = vsyncpa [#allocation4], 1 }
 0x6fe   :  { %7902 = vsyncpa [#allocation4 + $0x1], 1 }

</bundles_post_ra>
